<compile_context>
chip_gen: v7x
topology: tpu7x:2x2x1
jax: 0.10.0
libtpu: 0.0.40
codegen_flags: <defaults>
</compile_context>

<pallas_src>
import functools

import jax
import jax.numpy as jnp
from jax.experimental import pallas as pl
from jax.experimental.pallas import tpu as pltpu

_BN_EPS = 1e-5


def _round_up(x, m):
    return ((x + m - 1) // m) * m


def _pick_tile(size, unit, max_tile):
    """Pick (tile, padded_size) with tile % unit == 0, tile <= max_tile and
    minimal padding (padded_size % tile == 0, padded_size >= size)."""
    size_u = -(-size // unit)          # size in units (ceil)
    max_u = max_tile // unit
    if size_u <= max_u:
        t = size_u * unit
        return t, t
    best = None
    s0 = -(-size_u // max_u)           # minimum number of tiles
    for s in range(s0, size_u + 1):
        per = -(-size_u // s)
        if per > max_u:
            continue
        pad = s * per - size_u
        if best is None or pad < best[1]:
            best = (per, pad, s)
        if pad == 0:
            break
    per, _, s = best
    return per * unit, s * per * unit


# -----------------------------------------------------------------------------
# Pallas kernels
# -----------------------------------------------------------------------------
def _mm_bn_kernel(a_ref, b_ref, s_ref, c_ref, o_ref, acc_ref, *, relu):
    """Tiled GEMM with fused BN epilogue: o = act((a @ b) * scale + bias)."""
    @pl.when(pl.program_id(2) == 0)
    def _():
        acc_ref[...] = jnp.zeros_like(acc_ref)

    acc_ref[...] += jnp.dot(a_ref[...], b_ref[...],
                            preferred_element_type=jnp.float32)

    @pl.when(pl.program_id(2) == pl.num_programs(2) - 1)
    def _():
        out = acc_ref[...] * s_ref[...] + c_ref[...]
        if relu:
            out = jnp.maximum(out, 0.0)
        o_ref[...] = out.astype(o_ref.dtype)


def _mm_bn_res_kernel(a_ref, b_ref, s_ref, c_ref, r_ref, o_ref, acc_ref, *,
                      relu):
    """o = act((a @ b) * scale + bias + residual)."""
    @pl.when(pl.program_id(2) == 0)
    def _():
        acc_ref[...] = jnp.zeros_like(acc_ref)

    acc_ref[...] += jnp.dot(a_ref[...], b_ref[...],
                            preferred_element_type=jnp.float32)

    @pl.when(pl.program_id(2) == pl.num_programs(2) - 1)
    def _():
        out = acc_ref[...] * s_ref[...] + c_ref[...] \
            + r_ref[...].astype(jnp.float32)
        if relu:
            out = jnp.maximum(out, 0.0)
        o_ref[...] = out.astype(o_ref.dtype)


def _max9_kernel(*refs):
    """Elementwise max of 9 equally-shaped tiles (3x3 max-pool windows)."""
    o_ref = refs[-1]
    m = refs[0][...]
    for r in refs[1:-1]:
        m = jnp.maximum(m, r[...])
    o_ref[...] = m


# -----------------------------------------------------------------------------
# pallas_call wrappers
# -----------------------------------------------------------------------------
def _matmul_bn(a, b, scale, bias, residual=None, relu=True,
               out_dtype=jnp.bfloat16):
    """Tiled, bf16-operand GEMM with fused BN/residual/ReLU epilogue."""
    m, k = a.shape
    _, n = b.shape

    # Divisor-aware tiles: sublane-aligned M, lane-aligned N/K, zero or minimal
    # padding of the K reduction (no wasted MXU work / HBM traffic).
    tm, mp = _pick_tile(m, 8, 512)
    tn, np_ = _pick_tile(n, 128, 512)
    tk, kp = _pick_tile(k, 128, 1024)

    a_p = jnp.pad(a.astype(jnp.bfloat16), ((0, mp - m), (0, kp - k)))
    b_p = jnp.pad(b.astype(jnp.bfloat16), ((0, kp - k), (0, np_ - n)))
    s_p = jnp.pad(scale.astype(jnp.float32).reshape(1, n),
                  ((0, 0), (0, np_ - n)))
    c_p = jnp.pad(bias.astype(jnp.float32).reshape(1, n),
                  ((0, 0), (0, np_ - n)))

    in_specs = [
        pl.BlockSpec((tm, tk), lambda i, j, kk: (i, kk)),   # A
        pl.BlockSpec((tk, tn), lambda i, j, kk: (kk, j)),   # B
        pl.BlockSpec((1, tn), lambda i, j, kk: (0, j)),     # scale (k-invariant)
        pl.BlockSpec((1, tn), lambda i, j, kk: (0, j)),     # bias  (k-invariant)
    ]
    args = [a_p, b_p, s_p, c_p]

    if residual is None:
        kern = functools.partial(_mm_bn_kernel, relu=relu)
    else:
        r_p = jnp.pad(residual.astype(jnp.bfloat16),
                      ((0, mp - m), (0, np_ - n)))
        in_specs.append(pl.BlockSpec((tm, tn), lambda i, j, kk: (i, j)))
        args.append(r_p)
        kern = functools.partial(_mm_bn_res_kernel, relu=relu)

    out = pl.pallas_call(
        kern,
        out_shape=jax.ShapeDtypeStruct((mp, np_), out_dtype),
        grid=(mp // tm, np_ // tn, kp // tk),
        in_specs=in_specs,
        out_specs=pl.BlockSpec((tm, tn), lambda i, j, kk: (i, j)),
        scratch_shapes=[pltpu.VMEM((tm, tn), jnp.float32)],
        compiler_params=pltpu.CompilerParams(
            dimension_semantics=("parallel", "parallel", "arbitrary"),
            vmem_limit_bytes=32 * 1024 * 1024,
        ),
    )(*args)
    return out[:m, :n]


def _im2col(x, kh, kw, stride, pad):
    """x: (N,H,W,C) -> patches (N,Ho,Wo,kh*kw,C). All indices static ints."""
    n, h, w, c = x.shape
    xp = jnp.pad(x, ((0, 0), (pad, pad), (pad, pad), (0, 0)))
    ho = (h + 2 * pad - kh) // stride + 1
    wo = (w + 2 * pad - kw) // stride + 1
    cols = []
    for i in range(kh):
        for j in range(kw):
            cols.append(jax.lax.slice(
                xp,
                (0, i, j, 0),
                (n, i + (ho - 1) * stride + 1, j + (wo - 1) * stride + 1, c),
                (1, stride, stride, 1)))
    patches = jnp.stack(cols, axis=3)  # (n, ho, wo, kh*kw, c)
    return patches, ho, wo


def conv_bn(x, w, scale, bias, stride, pad, relu=True, residual=None):
    """x: (N,H,W,Cin), w: (KH,KW,Cin,Cout) -> (N,Ho,Wo,Cout) (bf16)."""
    kh, kw, cin, cout = w.shape
    n = x.shape[0]
    if kh == 1 and kw == 1 and pad == 0:
        # 1x1 conv: no im2col, just (strided) spatial subsample + GEMM.
        xs = x[:, ::stride, ::stride, :] if stride > 1 else x
        ho, wo = xs.shape[1], xs.shape[2]
        a = xs.reshape(n * ho * wo, cin)
        b = w.reshape(cin, cout)
    else:
        patches, ho, wo = _im2col(x, kh, kw, stride, pad)
        a = patches.reshape(n * ho * wo, kh * kw * cin)
        b = w.reshape(kh * kw * cin, cout)
    res = None if residual is None else residual.reshape(n * ho * wo, cout)
    out = _matmul_bn(a, b, scale, bias, residual=res, relu=relu)
    return out.reshape(n, ho, wo, cout)


def maxpool_3x3_s2_p1(x):
    """3x3 stride-2 pad-1 max pool on NHWC, via a 9-way elementwise-max kernel."""
    n, h, w, c = x.shape
    ho = (h + 2 - 3) // 2 + 1
    wo = (w + 2 - 3) // 2 + 1
    xp = jnp.pad(x, ((0, 0), (1, 1), (1, 1), (0, 0)),
                 constant_values=-jnp.inf)
    slices = []
    for di in range(3):
        for dj in range(3):
            s = jax.lax.slice(
                xp,
                (0, di, dj, 0),
                (n, di + 2 * (ho - 1) + 1, dj + 2 * (wo - 1) + 1, c),
                (1, 2, 2, 1))
            slices.append(s.reshape(n * ho, wo * c))

    rows, cols = n * ho, wo * c
    itemsize = jnp.dtype(x.dtype).itemsize
    # Row tile: as large as possible while keeping 9 double-buffered input
    # tiles + output tile comfortably inside scoped VMEM (~10 MiB budget).
    rt = min(256, _round_up(rows, 8))
    while rt > 8 and (9 * 2 + 2) * rt * cols * itemsize > 10 * 1024 * 1024:
        rt //= 2
    rt = max(8, _round_up(rt, 8))
    rp = _round_up(rows, rt)
    slices = [jnp.pad(s, ((0, rp - rows), (0, 0))) for s in slices]

    out = pl.pallas_call(
        _max9_kernel,
        out_shape=jax.ShapeDtypeStruct((rp, cols), x.dtype),
        grid=(rp // rt,),
        in_specs=[pl.BlockSpec((rt, cols), lambda i: (i, 0))] * 9,
        out_specs=pl.BlockSpec((rt, cols), lambda i: (i, 0)),
        compiler_params=pltpu.CompilerParams(
            dimension_semantics=("parallel",)),
    )(*slices)
    return out[:rows].reshape(n, ho, wo, c)


# -----------------------------------------------------------------------------
# Deterministic synthetic parameters (shapes follow torchvision resnet18)
# -----------------------------------------------------------------------------
# Static architecture config: (cin, cout, stride of first block). Kept OUTSIDE
# the traced params pytree so strides stay Python ints under jit.
_LAYER_CFG = ((64, 64, 1), (64, 128, 2), (128, 256, 2), (256, 512, 2))


def _conv_w(key, kh, kw, cin, cout):
    fan_in = kh * kw * cin
    return jax.random.normal(key, (kh, kw, cin, cout), jnp.float32) \
        * (2.0 / fan_in) ** 0.5


def _bn_fold(key, c):
    k1, k2, k3, k4 = jax.random.split(key, 4)
    gamma = 1.0 + 0.1 * jax.random.normal(k1, (c,), jnp.float32)
    beta = 0.1 * jax.random.normal(k2, (c,), jnp.float32)
    mean = 0.1 * jax.random.normal(k3, (c,), jnp.float32)
    var = 0.5 + jax.random.uniform(k4, (c,), jnp.float32)
    scale = gamma * jax.lax.rsqrt(var + _BN_EPS)
    bias = beta - mean * scale
    return scale, bias


def init_resnet18_backbone_params(key):
    keys = iter(jax.random.split(key, 128))
    params = {}
    params["stem_w"] = _conv_w(next(keys), 7, 7, 3, 64)
    params["stem_s"], params["stem_b"] = _bn_fold(next(keys), 64)

    layers = []
    for cin, cout, stride in _LAYER_CFG:
        blocks = []
        for bi in range(2):
            b_in = cin if bi == 0 else cout
            b_stride = stride if bi == 0 else 1
            blk = {}
            blk["w1"] = _conv_w(next(keys), 3, 3, b_in, cout)
            blk["s1"], blk["b1"] = _bn_fold(next(keys), cout)
            blk["w2"] = _conv_w(next(keys), 3, 3, cout, cout)
            blk["s2"], blk["b2"] = _bn_fold(next(keys), cout)
            if b_stride != 1 or b_in != cout:
                blk["ds_w"] = _conv_w(next(keys), 1, 1, b_in, cout)
                blk["ds_s"], blk["ds_b"] = _bn_fold(next(keys), cout)
            blocks.append(blk)
        layers.append(blocks)
    params["layers"] = layers
    return params


# -----------------------------------------------------------------------------
# Forward pass (matches nn.Sequential(*list(resnet18.children())[:-2]))
# -----------------------------------------------------------------------------
def _basic_block(x, p, stride):
    if "ds_w" in p:
        identity = conv_bn(x, p["ds_w"], p["ds_s"], p["ds_b"],
                           stride=stride, pad=0, relu=False)
    else:
        identity = x
    out = conv_bn(x, p["w1"], p["s1"], p["b1"], stride=stride, pad=1,
                  relu=True)
    out = conv_bn(out, p["w2"], p["s2"], p["b2"], stride=1, pad=1,
                  relu=True, residual=identity)  # relu(bn2(conv2) + identity)
    return out


def resnet18_backbone(x_nchw, params):
    # NCHW -> NHWC, bf16 activations (MXU-friendly, halves HBM traffic).
    x = jnp.transpose(x_nchw, (0, 2, 3, 1)).astype(jnp.bfloat16)
    # stem: conv1 (7x7, s2, p3) + bn1 + relu + maxpool (3x3, s2, p1)
    x = conv_bn(x, params["stem_w"], params["stem_s"], params["stem_b"],
                stride=2, pad=3, relu=True)
    x = maxpool_3x3_s2_p1(x)
    # layer1..layer4
    for layer_params, (_, _, stride) in zip(params["layers"], _LAYER_CFG):
        for bi, blk in enumerate(layer_params):
            x = _basic_block(x, blk, stride if bi == 0 else 1)
    # NHWC -> NCHW, back to f32
    return jnp.transpose(x, (0, 3, 1, 2)).astype(jnp.float32)


if __name__ == "__main__":
    key = jax.random.PRNGKey(0)
    k_param, k_x = jax.random.split(key)
    params = init_resnet18_backbone_params(k_param)

    # Small input consistent with the module: NCHW, 3 channels.
    x = jax.random.normal(k_x, (2, 3, 32, 32), jnp.float32)

    out = jax.jit(resnet18_backbone)(x, params)
    out = jax.block_until_ready(out)

    assert out.shape == (2, 512, 1, 1), out.shape
    assert bool(jnp.all(jnp.isfinite(out)))
    print("KERNEL_OK")
</pallas_src>

<mosaic_0001>
module attributes {stable_mosaic.version = 11 : i64} {
  func.func @_mm_bn_kernel(%arg0: i32, %arg1: i32, %arg2: i32, %arg3: memref<512x256xbf16, #tpu.memory_space<vmem>>, %arg4: memref<256x128xbf16, #tpu.memory_space<vmem>>, %arg5: memref<1x128xf32, #tpu.memory_space<vmem>>, %arg6: memref<1x128xf32, #tpu.memory_space<vmem>>, %arg7: memref<512x128xbf16, #tpu.memory_space<vmem>>, %arg8: memref<512x128xf32, #tpu.memory_space<vmem>>) attributes {dimension_semantics = [#tpu.dimension_semantics<parallel>, #tpu.dimension_semantics<parallel>, #tpu.dimension_semantics<arbitrary>], iteration_bounds = array<i64: 1, 1, 1>, scalar_prefetch = 0 : i64, scratch_operands = 1 : i64, tpu.core_type = #tpu.core_type<tc>, window_params = [{transform_indices = @transform_0, window_bounds = array<i64: 512, 256>}, {transform_indices = @transform_1, window_bounds = array<i64: 256, 128>}, {transform_indices = @transform_2, window_bounds = array<i64: 1, 128>}, {transform_indices = @transform_3, window_bounds = array<i64: 1, 128>}, {transform_indices = @transform_4, window_bounds = array<i64: 512, 128>}]} {
    %c0_i32 = arith.constant 0 : i32
    %0 = arith.cmpi eq, %arg2, %c0_i32 : i32
    %1 = arith.extui %0 : i1 to i32
    %c0_i32_0 = arith.constant 0 : i32
    %2 = arith.cmpi ne, %1, %c0_i32_0 : i32
    scf.if %2 {
      %cst_10 = arith.constant 0.000000e+00 : f32
      %12 = vector.broadcast %cst_10 : f32 to vector<512x128xf32>
      %c0_11 = arith.constant 0 : index
      %c0_12 = arith.constant 0 : index
      %13 = vector.load %arg8[%c0_11, %c0_12] : memref<512x128xf32, #tpu.memory_space<vmem>>, vector<512x128xf32>
      tpu.vector_store %arg8[%c0_11, %c0_12], %12 {strides = array<i32>} : memref<512x128xf32, #tpu.memory_space<vmem>>, vector<512x128xf32>,
    } else {
    }
    %c0 = arith.constant 0 : index
    %c0_1 = arith.constant 0 : index
    %3 = vector.load %arg8[%c0, %c0_1] : memref<512x128xf32, #tpu.memory_space<vmem>>, vector<512x128xf32>
    %c0_2 = arith.constant 0 : index
    %c0_3 = arith.constant 0 : index
    %4 = vector.load %arg3[%c0_2, %c0_3] : memref<512x256xbf16, #tpu.memory_space<vmem>>, vector<512x256xbf16>
    %c0_4 = arith.constant 0 : index
    %c0_5 = arith.constant 0 : index
    %5 = vector.load %arg4[%c0_4, %c0_5] : memref<256x128xbf16, #tpu.memory_space<vmem>>, vector<256x128xbf16>
    %cst = arith.constant dense<0.000000e+00> : vector<512x128xf32>
    %6 = tpu.matmul %4, %5, %cst {dimension_numbers = #tpu.dot_dimension_numbers<[1], [0], [0], [1], [0, 0, 1, 1], [], []>} : vector<512x256xbf16>, vector<256x128xbf16>, vector<512x128xf32> -> vector<512x128xf32>
    %7 = arith.addf %3, %6 : vector<512x128xf32>
    %c0_6 = arith.constant 0 : index
    %c0_7 = arith.constant 0 : index
    %8 = vector.load %arg8[%c0_6, %c0_7] : memref<512x128xf32, #tpu.memory_space<vmem>>, vector<512x128xf32>
    tpu.vector_store %arg8[%c0_6, %c0_7], %7 {strides = array<i32>} : memref<512x128xf32, #tpu.memory_space<vmem>>, vector<512x128xf32>,
    %c0_i32_8 = arith.constant 0 : i32
    %9 = arith.cmpi eq, %arg2, %c0_i32_8 : i32
    %10 = arith.extui %9 : i1 to i32
    %c0_i32_9 = arith.constant 0 : i32
    %11 = arith.cmpi ne, %10, %c0_i32_9 : i32
    scf.if %11 {
      %c0_10 = arith.constant 0 : index
      %c0_11 = arith.constant 0 : index
      %12 = vector.load %arg8[%c0_10, %c0_11] : memref<512x128xf32, #tpu.memory_space<vmem>>, vector<512x128xf32>
      %c0_12 = arith.constant 0 : index
      %c0_13 = arith.constant 0 : index
      %13 = vector.load %arg5[%c0_12, %c0_13] : memref<1x128xf32, #tpu.memory_space<vmem>>, vector<1x128xf32>
      %14 = vector.broadcast %13 : vector<1x128xf32> to vector<512x128xf32>
      %15 = arith.mulf %12, %14 : vector<512x128xf32>
      %c0_14 = arith.constant 0 : index
      %c0_15 = arith.constant 0 : index
      %16 = vector.load %arg6[%c0_14, %c0_15] : memref<1x128xf32, #tpu.memory_space<vmem>>, vector<1x128xf32>
      %17 = vector.broadcast %16 : vector<1x128xf32> to vector<512x128xf32>
      %18 = arith.addf %15, %17 : vector<512x128xf32>
      %cst_16 = arith.constant 0.000000e+00 : f32
      %19 = vector.broadcast %cst_16 : f32 to vector<512x128xf32>
      %20 = arith.maximumf %18, %19 : vector<512x128xf32>
      %21 = arith.truncf %20 : vector<512x128xf32> to vector<512x128xbf16>
      %c0_17 = arith.constant 0 : index
      %c0_18 = arith.constant 0 : index
      %22 = vector.load %arg7[%c0_17, %c0_18] : memref<512x128xbf16, #tpu.memory_space<vmem>>, vector<512x128xbf16>
      tpu.vector_store %arg7[%c0_17, %c0_18], %21 {strides = array<i32>} : memref<512x128xbf16, #tpu.memory_space<vmem>>, vector<512x128xbf16>,
    } else {
    }
    return
  }
  func.func @transform_0(%arg0: i32, %arg1: i32, %arg2: i32) -> (i32, i32) {
    %c0_i32 = arith.constant 0 : i32
    return %arg0, %arg2 : i32, i32
  }
  func.func @transform_1(%arg0: i32, %arg1: i32, %arg2: i32) -> (i32, i32) {
    %c0_i32 = arith.constant 0 : i32
    return %arg2, %arg1 : i32, i32
  }
  func.func @transform_2(%arg0: i32, %arg1: i32, %arg2: i32) -> (i32, i32) {
    %c0_i32 = arith.constant 0 : i32
    %c0_i32_0 = arith.constant 0 : i32
    return %c0_i32, %arg1 : i32, i32
  }
  func.func @transform_3(%arg0: i32, %arg1: i32, %arg2: i32) -> (i32, i32) {
    %c0_i32 = arith.constant 0 : i32
    %c0_i32_0 = arith.constant 0 : i32
    return %c0_i32, %arg1 : i32, i32
  }
  func.func @transform_4(%arg0: i32, %arg1: i32, %arg2: i32) -> (i32, i32) {
    %c0_i32 = arith.constant 0 : i32
    return %arg0, %arg1 : i32, i32
  }
}

module attributes {stable_mosaic.version = 11 : i64} {
  func.func @_max9_kernel(%arg0: i32, %arg1: memref<16x512xbf16, #tpu.memory_space<vmem>>, %arg2: memref<16x512xbf16, #tpu.memory_space<vmem>>, %arg3: memref<16x512xbf16, #tpu.memory_space<vmem>>, %arg4: memref<16x512xbf16, #tpu.memory_space<vmem>>, %arg5: memref<16x512xbf16, #tpu.memory_space<vmem>>, %arg6: memref<16x512xbf16, #tpu.memory_space<vmem>>, %arg7: memref<16x512xbf16, #tpu.memory_space<vmem>>, %arg8: memref<16x512xbf16, #tpu.memory_space<vmem>>, %arg9: memref<16x512xbf16, #tpu.memory_space<vmem>>, %arg10: memref<16x512xbf16, #tpu.memory_space<vmem>>) attributes {dimension_semantics = [#tpu.dimension_semantics<parallel>], iteration_bounds = array<i64: 1>, scalar_prefetch = 0 : i64, scratch_operands = 0 : i64, tpu.core_type = #tpu.core_type<tc>, window_params = [{transform_indices = @transform_0, window_bounds = array<i64: 16, 512>}, {transform_indices = @transform_1, window_bounds = array<i64: 16, 512>}, {transform_indices = @transform_2, window_bounds = array<i64: 16, 512>}, {transform_indices = @transform_3, window_bounds = array<i64: 16, 512>}, {transform_indices = @transform_4, window_bounds = array<i64: 16, 512>}, {transform_indices = @transform_5, window_bounds = array<i64: 16, 512>}, {transform_indices = @transform_6, window_bounds = array<i64: 16, 512>}, {transform_indices = @transform_7, window_bounds = array<i64: 16, 512>}, {transform_indices = @transform_8, window_bounds = array<i64: 16, 512>}, {transform_indices = @transform_9, window_bounds = array<i64: 16, 512>}]} {
    %c0 = arith.constant 0 : index
    %c0_0 = arith.constant 0 : index
    %0 = vector.load %arg1[%c0, %c0_0] : memref<16x512xbf16, #tpu.memory_space<vmem>>, vector<16x512xbf16>
    %c0_1 = arith.constant 0 : index
    %c0_2 = arith.constant 0 : index
    %1 = vector.load %arg2[%c0_1, %c0_2] : memref<16x512xbf16, #tpu.memory_space<vmem>>, vector<16x512xbf16>
    %2 = arith.maximumf %0, %1 : vector<16x512xbf16>
    %c0_3 = arith.constant 0 : index
    %c0_4 = arith.constant 0 : index
    %3 = vector.load %arg3[%c0_3, %c0_4] : memref<16x512xbf16, #tpu.memory_space<vmem>>, vector<16x512xbf16>
    %4 = arith.maximumf %2, %3 : vector<16x512xbf16>
    %c0_5 = arith.constant 0 : index
    %c0_6 = arith.constant 0 : index
    %5 = vector.load %arg4[%c0_5, %c0_6] : memref<16x512xbf16, #tpu.memory_space<vmem>>, vector<16x512xbf16>
    %6 = arith.maximumf %4, %5 : vector<16x512xbf16>
    %c0_7 = arith.constant 0 : index
    %c0_8 = arith.constant 0 : index
    %7 = vector.load %arg5[%c0_7, %c0_8] : memref<16x512xbf16, #tpu.memory_space<vmem>>, vector<16x512xbf16>
    %8 = arith.maximumf %6, %7 : vector<16x512xbf16>
    %c0_9 = arith.constant 0 : index
    %c0_10 = arith.constant 0 : index
    %9 = vector.load %arg6[%c0_9, %c0_10] : memref<16x512xbf16, #tpu.memory_space<vmem>>, vector<16x512xbf16>
    %10 = arith.maximumf %8, %9 : vector<16x512xbf16>
    %c0_11 = arith.constant 0 : index
    %c0_12 = arith.constant 0 : index
    %11 = vector.load %arg7[%c0_11, %c0_12] : memref<16x512xbf16, #tpu.memory_space<vmem>>, vector<16x512xbf16>
    %12 = arith.maximumf %10, %11 : vector<16x512xbf16>
    %c0_13 = arith.constant 0 : index
    %c0_14 = arith.constant 0 : index
    %13 = vector.load %arg8[%c0_13, %c0_14] : memref<16x512xbf16, #tpu.memory_space<vmem>>, vector<16x512xbf16>
    %14 = arith.maximumf %12, %13 : vector<16x512xbf16>
    %c0_15 = arith.constant 0 : index
    %c0_16 = arith.constant 0 : index
    %15 = vector.load %arg9[%c0_15, %c0_16] : memref<16x512xbf16, #tpu.memory_space<vmem>>, vector<16x512xbf16>
    %16 = arith.maximumf %14, %15 : vector<16x512xbf16>
    %c0_17 = arith.constant 0 : index
    %c0_18 = arith.constant 0 : index
    %17 = vector.load %arg10[%c0_17, %c0_18] : memref<16x512xbf16, #tpu.memory_space<vmem>>, vector<16x512xbf16>
    tpu.vector_store %arg10[%c0_17, %c0_18], %16 {strides = array<i32>} : memref<16x512xbf16, #tpu.memory_space<vmem>>, vector<16x512xbf16>,
    return
  }
  func.func @transform_0(%arg0: i32) -> (i32, i32) {
    %c0_i32 = arith.constant 0 : i32
    %c0_i32_0 = arith.constant 0 : i32
    return %arg0, %c0_i32 : i32, i32
  }
  func.func @transform_1(%arg0: i32) -> (i32, i32) {
    %c0_i32 = arith.constant 0 : i32
    %c0_i32_0 = arith.constant 0 : i32
    return %arg0, %c0_i32 : i32, i32
  }
  func.func @transform_2(%arg0: i32) -> (i32, i32) {
    %c0_i32 = arith.constant 0 : i32
    %c0_i32_0 = arith.constant 0 : i32
    return %arg0, %c0_i32 : i32, i32
  }
  func.func @transform_3(%arg0: i32) -> (i32, i32) {
    %c0_i32 = arith.constant 0 : i32
    %c0_i32_0 = arith.constant 0 : i32
    return %arg0, %c0_i32 : i32, i32
  }
  func.func @transform_4(%arg0: i32) -> (i32, i32) {
    %c0_i32 = arith.constant 0 : i32
    %c0_i32_0 = arith.constant 0 : i32
    return %arg0, %c0_i32 : i32, i32
  }
  func.func @transform_5(%arg0: i32) -> (i32, i32) {
    %c0_i32 = arith.constant 0 : i32
    %c0_i32_0 = arith.constant 0 : i32
    return %arg0, %c0_i32 : i32, i32
  }
  func.func @transform_6(%arg0: i32) -> (i32, i32) {
    %c0_i32 = arith.constant 0 : i32
    %c0_i32_0 = arith.constant 0 : i32
    return %arg0, %c0_i32 : i32, i32
  }
  func.func @transform_7(%arg0: i32) -> (i32, i32) {
    %c0_i32 = arith.constant 0 : i32
    %c0_i32_0 = arith.constant 0 : i32
    return %arg0, %c0_i32 : i32, i32
  }
  func.func @transform_8(%arg0: i32) -> (i32, i32) {
    %c0_i32 = arith.constant 0 : i32
    %c0_i32_0 = arith.constant 0 : i32
    return %arg0, %c0_i32 : i32, i32
  }
  func.func @transform_9(%arg0: i32) -> (i32, i32) {
    %c0_i32 = arith.constant 0 : i32
    %c0_i32_0 = arith.constant 0 : i32
    return %arg0, %c0_i32 : i32, i32
  }
}

module attributes {stable_mosaic.version = 11 : i64} {
  func.func @_mm_bn_kernel(%arg0: i32, %arg1: i32, %arg2: i32, %arg3: memref<128x640xbf16, #tpu.memory_space<vmem>>, %arg4: memref<640x128xbf16, #tpu.memory_space<vmem>>, %arg5: memref<1x128xf32, #tpu.memory_space<vmem>>, %arg6: memref<1x128xf32, #tpu.memory_space<vmem>>, %arg7: memref<128x128xbf16, #tpu.memory_space<vmem>>, %arg8: memref<128x128xf32, #tpu.memory_space<vmem>>) attributes {dimension_semantics = [#tpu.dimension_semantics<parallel>, #tpu.dimension_semantics<parallel>, #tpu.dimension_semantics<arbitrary>], iteration_bounds = array<i64: 1, 1, 1>, scalar_prefetch = 0 : i64, scratch_operands = 1 : i64, tpu.core_type = #tpu.core_type<tc>, window_params = [{transform_indices = @transform_0, window_bounds = array<i64: 128, 640>}, {transform_indices = @transform_1, window_bounds = array<i64: 640, 128>}, {transform_indices = @transform_2, window_bounds = array<i64: 1, 128>}, {transform_indices = @transform_3, window_bounds = array<i64: 1, 128>}, {transform_indices = @transform_4, window_bounds = array<i64: 128, 128>}]} {
    %c0_i32 = arith.constant 0 : i32
    %0 = arith.cmpi eq, %arg2, %c0_i32 : i32
    %1 = arith.extui %0 : i1 to i32
    %c0_i32_0 = arith.constant 0 : i32
    %2 = arith.cmpi ne, %1, %c0_i32_0 : i32
    scf.if %2 {
      %cst_10 = arith.constant 0.000000e+00 : f32
      %12 = vector.broadcast %cst_10 : f32 to vector<128x128xf32>
      %c0_11 = arith.constant 0 : index
      %c0_12 = arith.constant 0 : index
      %13 = vector.load %arg8[%c0_11, %c0_12] : memref<128x128xf32, #tpu.memory_space<vmem>>, vector<128x128xf32>
      tpu.vector_store %arg8[%c0_11, %c0_12], %12 {strides = array<i32>} : memref<128x128xf32, #tpu.memory_space<vmem>>, vector<128x128xf32>,
    } else {
    }
    %c0 = arith.constant 0 : index
    %c0_1 = arith.constant 0 : index
    %3 = vector.load %arg8[%c0, %c0_1] : memref<128x128xf32, #tpu.memory_space<vmem>>, vector<128x128xf32>
    %c0_2 = arith.constant 0 : index
    %c0_3 = arith.constant 0 : index
    %4 = vector.load %arg3[%c0_2, %c0_3] : memref<128x640xbf16, #tpu.memory_space<vmem>>, vector<128x640xbf16>
    %c0_4 = arith.constant 0 : index
    %c0_5 = arith.constant 0 : index
    %5 = vector.load %arg4[%c0_4, %c0_5] : memref<640x128xbf16, #tpu.memory_space<vmem>>, vector<640x128xbf16>
    %cst = arith.constant dense<0.000000e+00> : vector<128x128xf32>
    %6 = tpu.matmul %4, %5, %cst {dimension_numbers = #tpu.dot_dimension_numbers<[1], [0], [0], [1], [0, 0, 1, 1], [], []>} : vector<128x640xbf16>, vector<640x128xbf16>, vector<128x128xf32> -> vector<128x128xf32>
    %7 = arith.addf %3, %6 : vector<128x128xf32>
    %c0_6 = arith.constant 0 : index
    %c0_7 = arith.constant 0 : index
    %8 = vector.load %arg8[%c0_6, %c0_7] : memref<128x128xf32, #tpu.memory_space<vmem>>, vector<128x128xf32>
    tpu.vector_store %arg8[%c0_6, %c0_7], %7 {strides = array<i32>} : memref<128x128xf32, #tpu.memory_space<vmem>>, vector<128x128xf32>,
    %c0_i32_8 = arith.constant 0 : i32
    %9 = arith.cmpi eq, %arg2, %c0_i32_8 : i32
    %10 = arith.extui %9 : i1 to i32
    %c0_i32_9 = arith.constant 0 : i32
    %11 = arith.cmpi ne, %10, %c0_i32_9 : i32
    scf.if %11 {
      %c0_10 = arith.constant 0 : index
      %c0_11 = arith.constant 0 : index
      %12 = vector.load %arg8[%c0_10, %c0_11] : memref<128x128xf32, #tpu.memory_space<vmem>>, vector<128x128xf32>
      %c0_12 = arith.constant 0 : index
      %c0_13 = arith.constant 0 : index
      %13 = vector.load %arg5[%c0_12, %c0_13] : memref<1x128xf32, #tpu.memory_space<vmem>>, vector<1x128xf32>
      %14 = vector.broadcast %13 : vector<1x128xf32> to vector<128x128xf32>
      %15 = arith.mulf %12, %14 : vector<128x128xf32>
      %c0_14 = arith.constant 0 : index
      %c0_15 = arith.constant 0 : index
      %16 = vector.load %arg6[%c0_14, %c0_15] : memref<1x128xf32, #tpu.memory_space<vmem>>, vector<1x128xf32>
      %17 = vector.broadcast %16 : vector<1x128xf32> to vector<128x128xf32>
      %18 = arith.addf %15, %17 : vector<128x128xf32>
      %cst_16 = arith.constant 0.000000e+00 : f32
      %19 = vector.broadcast %cst_16 : f32 to vector<128x128xf32>
      %20 = arith.maximumf %18, %19 : vector<128x128xf32>
      %21 = arith.truncf %20 : vector<128x128xf32> to vector<128x128xbf16>
      %c0_17 = arith.constant 0 : index
      %c0_18 = arith.constant 0 : index
      %22 = vector.load %arg7[%c0_17, %c0_18] : memref<128x128xbf16, #tpu.memory_space<vmem>>, vector<128x128xbf16>
      tpu.vector_store %arg7[%c0_17, %c0_18], %21 {strides = array<i32>} : memref<128x128xbf16, #tpu.memory_space<vmem>>, vector<128x128xbf16>,
    } else {
    }
    return
  }
  func.func @transform_0(%arg0: i32, %arg1: i32, %arg2: i32) -> (i32, i32) {
    %c0_i32 = arith.constant 0 : i32
    return %arg0, %arg2 : i32, i32
  }
  func.func @transform_1(%arg0: i32, %arg1: i32, %arg2: i32) -> (i32, i32) {
    %c0_i32 = arith.constant 0 : i32
    return %arg2, %arg1 : i32, i32
  }
  func.func @transform_2(%arg0: i32, %arg1: i32, %arg2: i32) -> (i32, i32) {
    %c0_i32 = arith.constant 0 : i32
    %c0_i32_0 = arith.constant 0 : i32
    return %c0_i32, %arg1 : i32, i32
  }
  func.func @transform_3(%arg0: i32, %arg1: i32, %arg2: i32) -> (i32, i32) {
    %c0_i32 = arith.constant 0 : i32
    %c0_i32_0 = arith.constant 0 : i32
    return %c0_i32, %arg1 : i32, i32
  }
  func.func @transform_4(%arg0: i32, %arg1: i32, %arg2: i32) -> (i32, i32) {
    %c0_i32 = arith.constant 0 : i32
    return %arg0, %arg1 : i32, i32
  }
}

module attributes {stable_mosaic.version = 11 : i64} {
  func.func @_mm_bn_res_kernel(%arg0: i32, %arg1: i32, %arg2: i32, %arg3: memref<128x640xbf16, #tpu.memory_space<vmem>>, %arg4: memref<640x128xbf16, #tpu.memory_space<vmem>>, %arg5: memref<1x128xf32, #tpu.memory_space<vmem>>, %arg6: memref<1x128xf32, #tpu.memory_space<vmem>>, %arg7: memref<128x128xbf16, #tpu.memory_space<vmem>>, %arg8: memref<128x128xbf16, #tpu.memory_space<vmem>>, %arg9: memref<128x128xf32, #tpu.memory_space<vmem>>) attributes {dimension_semantics = [#tpu.dimension_semantics<parallel>, #tpu.dimension_semantics<parallel>, #tpu.dimension_semantics<arbitrary>], iteration_bounds = array<i64: 1, 1, 1>, scalar_prefetch = 0 : i64, scratch_operands = 1 : i64, tpu.core_type = #tpu.core_type<tc>, window_params = [{transform_indices = @transform_0, window_bounds = array<i64: 128, 640>}, {transform_indices = @transform_1, window_bounds = array<i64: 640, 128>}, {transform_indices = @transform_2, window_bounds = array<i64: 1, 128>}, {transform_indices = @transform_3, window_bounds = array<i64: 1, 128>}, {transform_indices = @transform_4, window_bounds = array<i64: 128, 128>}, {transform_indices = @transform_5, window_bounds = array<i64: 128, 128>}]} {
    %c0_i32 = arith.constant 0 : i32
    %0 = arith.cmpi eq, %arg2, %c0_i32 : i32
    %1 = arith.extui %0 : i1 to i32
    %c0_i32_0 = arith.constant 0 : i32
    %2 = arith.cmpi ne, %1, %c0_i32_0 : i32
    scf.if %2 {
      %cst_10 = arith.constant 0.000000e+00 : f32
      %12 = vector.broadcast %cst_10 : f32 to vector<128x128xf32>
      %c0_11 = arith.constant 0 : index
      %c0_12 = arith.constant 0 : index
      %13 = vector.load %arg9[%c0_11, %c0_12] : memref<128x128xf32, #tpu.memory_space<vmem>>, vector<128x128xf32>
      tpu.vector_store %arg9[%c0_11, %c0_12], %12 {strides = array<i32>} : memref<128x128xf32, #tpu.memory_space<vmem>>, vector<128x128xf32>,
    } else {
    }
    %c0 = arith.constant 0 : index
    %c0_1 = arith.constant 0 : index
    %3 = vector.load %arg9[%c0, %c0_1] : memref<128x128xf32, #tpu.memory_space<vmem>>, vector<128x128xf32>
    %c0_2 = arith.constant 0 : index
    %c0_3 = arith.constant 0 : index
    %4 = vector.load %arg3[%c0_2, %c0_3] : memref<128x640xbf16, #tpu.memory_space<vmem>>, vector<128x640xbf16>
    %c0_4 = arith.constant 0 : index
    %c0_5 = arith.constant 0 : index
    %5 = vector.load %arg4[%c0_4, %c0_5] : memref<640x128xbf16, #tpu.memory_space<vmem>>, vector<640x128xbf16>
    %cst = arith.constant dense<0.000000e+00> : vector<128x128xf32>
    %6 = tpu.matmul %4, %5, %cst {dimension_numbers = #tpu.dot_dimension_numbers<[1], [0], [0], [1], [0, 0, 1, 1], [], []>} : vector<128x640xbf16>, vector<640x128xbf16>, vector<128x128xf32> -> vector<128x128xf32>
    %7 = arith.addf %3, %6 : vector<128x128xf32>
    %c0_6 = arith.constant 0 : index
    %c0_7 = arith.constant 0 : index
    %8 = vector.load %arg9[%c0_6, %c0_7] : memref<128x128xf32, #tpu.memory_space<vmem>>, vector<128x128xf32>
    tpu.vector_store %arg9[%c0_6, %c0_7], %7 {strides = array<i32>} : memref<128x128xf32, #tpu.memory_space<vmem>>, vector<128x128xf32>,
    %c0_i32_8 = arith.constant 0 : i32
    %9 = arith.cmpi eq, %arg2, %c0_i32_8 : i32
    %10 = arith.extui %9 : i1 to i32
    %c0_i32_9 = arith.constant 0 : i32
    %11 = arith.cmpi ne, %10, %c0_i32_9 : i32
    scf.if %11 {
      %c0_10 = arith.constant 0 : index
      %c0_11 = arith.constant 0 : index
      %12 = vector.load %arg9[%c0_10, %c0_11] : memref<128x128xf32, #tpu.memory_space<vmem>>, vector<128x128xf32>
      %c0_12 = arith.constant 0 : index
      %c0_13 = arith.constant 0 : index
      %13 = vector.load %arg5[%c0_12, %c0_13] : memref<1x128xf32, #tpu.memory_space<vmem>>, vector<1x128xf32>
      %14 = vector.broadcast %13 : vector<1x128xf32> to vector<128x128xf32>
      %15 = arith.mulf %12, %14 : vector<128x128xf32>
      %c0_14 = arith.constant 0 : index
      %c0_15 = arith.constant 0 : index
      %16 = vector.load %arg6[%c0_14, %c0_15] : memref<1x128xf32, #tpu.memory_space<vmem>>, vector<1x128xf32>
      %17 = vector.broadcast %16 : vector<1x128xf32> to vector<128x128xf32>
      %18 = arith.addf %15, %17 : vector<128x128xf32>
      %c0_16 = arith.constant 0 : index
      %c0_17 = arith.constant 0 : index
      %19 = vector.load %arg7[%c0_16, %c0_17] : memref<128x128xbf16, #tpu.memory_space<vmem>>, vector<128x128xbf16>
      %20 = arith.extf %19 : vector<128x128xbf16> to vector<128x128xf32>
      %21 = arith.addf %18, %20 : vector<128x128xf32>
      %cst_18 = arith.constant 0.000000e+00 : f32
      %22 = vector.broadcast %cst_18 : f32 to vector<128x128xf32>
      %23 = arith.maximumf %21, %22 : vector<128x128xf32>
      %24 = arith.truncf %23 : vector<128x128xf32> to vector<128x128xbf16>
      %c0_19 = arith.constant 0 : index
      %c0_20 = arith.constant 0 : index
      %25 = vector.load %arg8[%c0_19, %c0_20] : memref<128x128xbf16, #tpu.memory_space<vmem>>, vector<128x128xbf16>
      tpu.vector_store %arg8[%c0_19, %c0_20], %24 {strides = array<i32>} : memref<128x128xbf16, #tpu.memory_space<vmem>>, vector<128x128xbf16>,
    } else {
    }
    return
  }
  func.func @transform_0(%arg0: i32, %arg1: i32, %arg2: i32) -> (i32, i32) {
    %c0_i32 = arith.constant 0 : i32
    return %arg0, %arg2 : i32, i32
  }
  func.func @transform_1(%arg0: i32, %arg1: i32, %arg2: i32) -> (i32, i32) {
    %c0_i32 = arith.constant 0 : i32
    return %arg2, %arg1 : i32, i32
  }
  func.func @transform_2(%arg0: i32, %arg1: i32, %arg2: i32) -> (i32, i32) {
    %c0_i32 = arith.constant 0 : i32
    %c0_i32_0 = arith.constant 0 : i32
    return %c0_i32, %arg1 : i32, i32
  }
  func.func @transform_3(%arg0: i32, %arg1: i32, %arg2: i32) -> (i32, i32) {
    %c0_i32 = arith.constant 0 : i32
    %c0_i32_0 = arith.constant 0 : i32
    return %c0_i32, %arg1 : i32, i32
  }
  func.func @transform_4(%arg0: i32, %arg1: i32, %arg2: i32) -> (i32, i32) {
    %c0_i32 = arith.constant 0 : i32
    return %arg0, %arg1 : i32, i32
  }
  func.func @transform_5(%arg0: i32, %arg1: i32, %arg2: i32) -> (i32, i32) {
    %c0_i32 = arith.constant 0 : i32
    return %arg0, %arg1 : i32, i32
  }
}

module attributes {stable_mosaic.version = 11 : i64} {
  func.func @_mm_bn_kernel(%arg0: i32, %arg1: i32, %arg2: i32, %arg3: memref<32x640xbf16, #tpu.memory_space<vmem>>, %arg4: memref<640x128xbf16, #tpu.memory_space<vmem>>, %arg5: memref<1x128xf32, #tpu.memory_space<vmem>>, %arg6: memref<1x128xf32, #tpu.memory_space<vmem>>, %arg7: memref<32x128xbf16, #tpu.memory_space<vmem>>, %arg8: memref<32x128xf32, #tpu.memory_space<vmem>>) attributes {dimension_semantics = [#tpu.dimension_semantics<parallel>, #tpu.dimension_semantics<parallel>, #tpu.dimension_semantics<arbitrary>], iteration_bounds = array<i64: 1, 1, 1>, scalar_prefetch = 0 : i64, scratch_operands = 1 : i64, tpu.core_type = #tpu.core_type<tc>, window_params = [{transform_indices = @transform_0, window_bounds = array<i64: 32, 640>}, {transform_indices = @transform_1, window_bounds = array<i64: 640, 128>}, {transform_indices = @transform_2, window_bounds = array<i64: 1, 128>}, {transform_indices = @transform_3, window_bounds = array<i64: 1, 128>}, {transform_indices = @transform_4, window_bounds = array<i64: 32, 128>}]} {
    %c0_i32 = arith.constant 0 : i32
    %0 = arith.cmpi eq, %arg2, %c0_i32 : i32
    %1 = arith.extui %0 : i1 to i32
    %c0_i32_0 = arith.constant 0 : i32
    %2 = arith.cmpi ne, %1, %c0_i32_0 : i32
    scf.if %2 {
      %cst_10 = arith.constant 0.000000e+00 : f32
      %12 = vector.broadcast %cst_10 : f32 to vector<32x128xf32>
      %c0_11 = arith.constant 0 : index
      %c0_12 = arith.constant 0 : index
      %13 = vector.load %arg8[%c0_11, %c0_12] : memref<32x128xf32, #tpu.memory_space<vmem>>, vector<32x128xf32>
      tpu.vector_store %arg8[%c0_11, %c0_12], %12 {strides = array<i32>} : memref<32x128xf32, #tpu.memory_space<vmem>>, vector<32x128xf32>,
    } else {
    }
    %c0 = arith.constant 0 : index
    %c0_1 = arith.constant 0 : index
    %3 = vector.load %arg8[%c0, %c0_1] : memref<32x128xf32, #tpu.memory_space<vmem>>, vector<32x128xf32>
    %c0_2 = arith.constant 0 : index
    %c0_3 = arith.constant 0 : index
    %4 = vector.load %arg3[%c0_2, %c0_3] : memref<32x640xbf16, #tpu.memory_space<vmem>>, vector<32x640xbf16>
    %c0_4 = arith.constant 0 : index
    %c0_5 = arith.constant 0 : index
    %5 = vector.load %arg4[%c0_4, %c0_5] : memref<640x128xbf16, #tpu.memory_space<vmem>>, vector<640x128xbf16>
    %cst = arith.constant dense<0.000000e+00> : vector<32x128xf32>
    %6 = tpu.matmul %4, %5, %cst {dimension_numbers = #tpu.dot_dimension_numbers<[1], [0], [0], [1], [0, 0, 1, 1], [], []>} : vector<32x640xbf16>, vector<640x128xbf16>, vector<32x128xf32> -> vector<32x128xf32>
    %7 = arith.addf %3, %6 : vector<32x128xf32>
    %c0_6 = arith.constant 0 : index
    %c0_7 = arith.constant 0 : index
    %8 = vector.load %arg8[%c0_6, %c0_7] : memref<32x128xf32, #tpu.memory_space<vmem>>, vector<32x128xf32>
    tpu.vector_store %arg8[%c0_6, %c0_7], %7 {strides = array<i32>} : memref<32x128xf32, #tpu.memory_space<vmem>>, vector<32x128xf32>,
    %c0_i32_8 = arith.constant 0 : i32
    %9 = arith.cmpi eq, %arg2, %c0_i32_8 : i32
    %10 = arith.extui %9 : i1 to i32
    %c0_i32_9 = arith.constant 0 : i32
    %11 = arith.cmpi ne, %10, %c0_i32_9 : i32
    scf.if %11 {
      %c0_10 = arith.constant 0 : index
      %c0_11 = arith.constant 0 : index
      %12 = vector.load %arg8[%c0_10, %c0_11] : memref<32x128xf32, #tpu.memory_space<vmem>>, vector<32x128xf32>
      %c0_12 = arith.constant 0 : index
      %c0_13 = arith.constant 0 : index
      %13 = vector.load %arg5[%c0_12, %c0_13] : memref<1x128xf32, #tpu.memory_space<vmem>>, vector<1x128xf32>
      %14 = vector.broadcast %13 : vector<1x128xf32> to vector<32x128xf32>
      %15 = arith.mulf %12, %14 : vector<32x128xf32>
      %c0_14 = arith.constant 0 : index
      %c0_15 = arith.constant 0 : index
      %16 = vector.load %arg6[%c0_14, %c0_15] : memref<1x128xf32, #tpu.memory_space<vmem>>, vector<1x128xf32>
      %17 = vector.broadcast %16 : vector<1x128xf32> to vector<32x128xf32>
      %18 = arith.addf %15, %17 : vector<32x128xf32>
      %cst_16 = arith.constant 0.000000e+00 : f32
      %19 = vector.broadcast %cst_16 : f32 to vector<32x128xf32>
      %20 = arith.maximumf %18, %19 : vector<32x128xf32>
      %21 = arith.truncf %20 : vector<32x128xf32> to vector<32x128xbf16>
      %c0_17 = arith.constant 0 : index
      %c0_18 = arith.constant 0 : index
      %22 = vector.load %arg7[%c0_17, %c0_18] : memref<32x128xbf16, #tpu.memory_space<vmem>>, vector<32x128xbf16>
      tpu.vector_store %arg7[%c0_17, %c0_18], %21 {strides = array<i32>} : memref<32x128xbf16, #tpu.memory_space<vmem>>, vector<32x128xbf16>,
    } else {
    }
    return
  }
  func.func @transform_0(%arg0: i32, %arg1: i32, %arg2: i32) -> (i32, i32) {
    %c0_i32 = arith.constant 0 : i32
    return %arg0, %arg2 : i32, i32
  }
  func.func @transform_1(%arg0: i32, %arg1: i32, %arg2: i32) -> (i32, i32) {
    %c0_i32 = arith.constant 0 : i32
    return %arg2, %arg1 : i32, i32
  }
  func.func @transform_2(%arg0: i32, %arg1: i32, %arg2: i32) -> (i32, i32) {
    %c0_i32 = arith.constant 0 : i32
    %c0_i32_0 = arith.constant 0 : i32
    return %c0_i32, %arg1 : i32, i32
  }
  func.func @transform_3(%arg0: i32, %arg1: i32, %arg2: i32) -> (i32, i32) {
    %c0_i32 = arith.constant 0 : i32
    %c0_i32_0 = arith.constant 0 : i32
    return %c0_i32, %arg1 : i32, i32
  }
  func.func @transform_4(%arg0: i32, %arg1: i32, %arg2: i32) -> (i32, i32) {
    %c0_i32 = arith.constant 0 : i32
    return %arg0, %arg1 : i32, i32
  }
}

module attributes {stable_mosaic.version = 11 : i64} {
  func.func @_mm_bn_kernel(%arg0: i32, %arg1: i32, %arg2: i32, %arg3: memref<32x128xbf16, #tpu.memory_space<vmem>>, %arg4: memref<128x128xbf16, #tpu.memory_space<vmem>>, %arg5: memref<1x128xf32, #tpu.memory_space<vmem>>, %arg6: memref<1x128xf32, #tpu.memory_space<vmem>>, %arg7: memref<32x128xbf16, #tpu.memory_space<vmem>>, %arg8: memref<32x128xf32, #tpu.memory_space<vmem>>) attributes {dimension_semantics = [#tpu.dimension_semantics<parallel>, #tpu.dimension_semantics<parallel>, #tpu.dimension_semantics<arbitrary>], iteration_bounds = array<i64: 1, 1, 1>, scalar_prefetch = 0 : i64, scratch_operands = 1 : i64, tpu.core_type = #tpu.core_type<tc>, window_params = [{transform_indices = @transform_0, window_bounds = array<i64: 32, 128>}, {transform_indices = @transform_1, window_bounds = array<i64: 128, 128>}, {transform_indices = @transform_2, window_bounds = array<i64: 1, 128>}, {transform_indices = @transform_3, window_bounds = array<i64: 1, 128>}, {transform_indices = @transform_4, window_bounds = array<i64: 32, 128>}]} {
    %c0_i32 = arith.constant 0 : i32
    %0 = arith.cmpi eq, %arg2, %c0_i32 : i32
    %1 = arith.extui %0 : i1 to i32
    %c0_i32_0 = arith.constant 0 : i32
    %2 = arith.cmpi ne, %1, %c0_i32_0 : i32
    scf.if %2 {
      %cst_10 = arith.constant 0.000000e+00 : f32
      %12 = vector.broadcast %cst_10 : f32 to vector<32x128xf32>
      %c0_11 = arith.constant 0 : index
      %c0_12 = arith.constant 0 : index
      %13 = vector.load %arg8[%c0_11, %c0_12] : memref<32x128xf32, #tpu.memory_space<vmem>>, vector<32x128xf32>
      tpu.vector_store %arg8[%c0_11, %c0_12], %12 {strides = array<i32>} : memref<32x128xf32, #tpu.memory_space<vmem>>, vector<32x128xf32>,
    } else {
    }
    %c0 = arith.constant 0 : index
    %c0_1 = arith.constant 0 : index
    %3 = vector.load %arg8[%c0, %c0_1] : memref<32x128xf32, #tpu.memory_space<vmem>>, vector<32x128xf32>
    %c0_2 = arith.constant 0 : index
    %c0_3 = arith.constant 0 : index
    %4 = vector.load %arg3[%c0_2, %c0_3] : memref<32x128xbf16, #tpu.memory_space<vmem>>, vector<32x128xbf16>
    %c0_4 = arith.constant 0 : index
    %c0_5 = arith.constant 0 : index
    %5 = vector.load %arg4[%c0_4, %c0_5] : memref<128x128xbf16, #tpu.memory_space<vmem>>, vector<128x128xbf16>
    %cst = arith.constant dense<0.000000e+00> : vector<32x128xf32>
    %6 = tpu.matmul %4, %5, %cst {dimension_numbers = #tpu.dot_dimension_numbers<[1], [0], [0], [1], [0, 0, 1, 1], [], []>} : vector<32x128xbf16>, vector<128x128xbf16>, vector<32x128xf32> -> vector<32x128xf32>
    %7 = arith.addf %3, %6 : vector<32x128xf32>
    %c0_6 = arith.constant 0 : index
    %c0_7 = arith.constant 0 : index
    %8 = vector.load %arg8[%c0_6, %c0_7] : memref<32x128xf32, #tpu.memory_space<vmem>>, vector<32x128xf32>
    tpu.vector_store %arg8[%c0_6, %c0_7], %7 {strides = array<i32>} : memref<32x128xf32, #tpu.memory_space<vmem>>, vector<32x128xf32>,
    %c0_i32_8 = arith.constant 0 : i32
    %9 = arith.cmpi eq, %arg2, %c0_i32_8 : i32
    %10 = arith.extui %9 : i1 to i32
    %c0_i32_9 = arith.constant 0 : i32
    %11 = arith.cmpi ne, %10, %c0_i32_9 : i32
    scf.if %11 {
      %c0_10 = arith.constant 0 : index
      %c0_11 = arith.constant 0 : index
      %12 = vector.load %arg8[%c0_10, %c0_11] : memref<32x128xf32, #tpu.memory_space<vmem>>, vector<32x128xf32>
      %c0_12 = arith.constant 0 : index
      %c0_13 = arith.constant 0 : index
      %13 = vector.load %arg5[%c0_12, %c0_13] : memref<1x128xf32, #tpu.memory_space<vmem>>, vector<1x128xf32>
      %14 = vector.broadcast %13 : vector<1x128xf32> to vector<32x128xf32>
      %15 = arith.mulf %12, %14 : vector<32x128xf32>
      %c0_14 = arith.constant 0 : index
      %c0_15 = arith.constant 0 : index
      %16 = vector.load %arg6[%c0_14, %c0_15] : memref<1x128xf32, #tpu.memory_space<vmem>>, vector<1x128xf32>
      %17 = vector.broadcast %16 : vector<1x128xf32> to vector<32x128xf32>
      %18 = arith.addf %15, %17 : vector<32x128xf32>
      %19 = arith.truncf %18 : vector<32x128xf32> to vector<32x128xbf16>
      %c0_16 = arith.constant 0 : index
      %c0_17 = arith.constant 0 : index
      %20 = vector.load %arg7[%c0_16, %c0_17] : memref<32x128xbf16, #tpu.memory_space<vmem>>, vector<32x128xbf16>
      tpu.vector_store %arg7[%c0_16, %c0_17], %19 {strides = array<i32>} : memref<32x128xbf16, #tpu.memory_space<vmem>>, vector<32x128xbf16>,
    } else {
    }
    return
  }
  func.func @transform_0(%arg0: i32, %arg1: i32, %arg2: i32) -> (i32, i32) {
    %c0_i32 = arith.constant 0 : i32
    return %arg0, %arg2 : i32, i32
  }
  func.func @transform_1(%arg0: i32, %arg1: i32, %arg2: i32) -> (i32, i32) {
    %c0_i32 = arith.constant 0 : i32
    return %arg2, %arg1 : i32, i32
  }
  func.func @transform_2(%arg0: i32, %arg1: i32, %arg2: i32) -> (i32, i32) {
    %c0_i32 = arith.constant 0 : i32
    %c0_i32_0 = arith.constant 0 : i32
    return %c0_i32, %arg1 : i32, i32
  }
  func.func @transform_3(%arg0: i32, %arg1: i32, %arg2: i32) -> (i32, i32) {
    %c0_i32 = arith.constant 0 : i32
    %c0_i32_0 = arith.constant 0 : i32
    return %c0_i32, %arg1 : i32, i32
  }
  func.func @transform_4(%arg0: i32, %arg1: i32, %arg2: i32) -> (i32, i32) {
    %c0_i32 = arith.constant 0 : i32
    return %arg0, %arg1 : i32, i32
  }
}

module attributes {stable_mosaic.version = 11 : i64} {
  func.func @_mm_bn_res_kernel(%arg0: i32, %arg1: i32, %arg2: i32, %arg3: memref<32x384xbf16, #tpu.memory_space<vmem>>, %arg4: memref<384x128xbf16, #tpu.memory_space<vmem>>, %arg5: memref<1x128xf32, #tpu.memory_space<vmem>>, %arg6: memref<1x128xf32, #tpu.memory_space<vmem>>, %arg7: memref<32x128xbf16, #tpu.memory_space<vmem>>, %arg8: memref<32x128xbf16, #tpu.memory_space<vmem>>, %arg9: memref<32x128xf32, #tpu.memory_space<vmem>>) attributes {dimension_semantics = [#tpu.dimension_semantics<parallel>, #tpu.dimension_semantics<parallel>, #tpu.dimension_semantics<arbitrary>], iteration_bounds = array<i64: 1, 1, 3>, scalar_prefetch = 0 : i64, scratch_operands = 1 : i64, tpu.core_type = #tpu.core_type<tc>, window_params = [{transform_indices = @transform_0, window_bounds = array<i64: 32, 384>}, {transform_indices = @transform_1, window_bounds = array<i64: 384, 128>}, {transform_indices = @transform_2, window_bounds = array<i64: 1, 128>}, {transform_indices = @transform_3, window_bounds = array<i64: 1, 128>}, {transform_indices = @transform_4, window_bounds = array<i64: 32, 128>}, {transform_indices = @transform_5, window_bounds = array<i64: 32, 128>}]} {
    %c0_i32 = arith.constant 0 : i32
    %0 = arith.cmpi eq, %arg2, %c0_i32 : i32
    %1 = arith.extui %0 : i1 to i32
    %c0_i32_0 = arith.constant 0 : i32
    %2 = arith.cmpi ne, %1, %c0_i32_0 : i32
    scf.if %2 {
      %cst_9 = arith.constant 0.000000e+00 : f32
      %12 = vector.broadcast %cst_9 : f32 to vector<32x128xf32>
      %c0_10 = arith.constant 0 : index
      %c0_11 = arith.constant 0 : index
      %13 = vector.load %arg9[%c0_10, %c0_11] : memref<32x128xf32, #tpu.memory_space<vmem>>, vector<32x128xf32>
      tpu.vector_store %arg9[%c0_10, %c0_11], %12 {strides = array<i32>} : memref<32x128xf32, #tpu.memory_space<vmem>>, vector<32x128xf32>,
    } else {
    }
    %c0 = arith.constant 0 : index
    %c0_1 = arith.constant 0 : index
    %3 = vector.load %arg9[%c0, %c0_1] : memref<32x128xf32, #tpu.memory_space<vmem>>, vector<32x128xf32>
    %c0_2 = arith.constant 0 : index
    %c0_3 = arith.constant 0 : index
    %4 = vector.load %arg3[%c0_2, %c0_3] : memref<32x384xbf16, #tpu.memory_space<vmem>>, vector<32x384xbf16>
    %c0_4 = arith.constant 0 : index
    %c0_5 = arith.constant 0 : index
    %5 = vector.load %arg4[%c0_4, %c0_5] : memref<384x128xbf16, #tpu.memory_space<vmem>>, vector<384x128xbf16>
    %cst = arith.constant dense<0.000000e+00> : vector<32x128xf32>
    %6 = tpu.matmul %4, %5, %cst {dimension_numbers = #tpu.dot_dimension_numbers<[1], [0], [0], [1], [0, 0, 1, 1], [], []>} : vector<32x384xbf16>, vector<384x128xbf16>, vector<32x128xf32> -> vector<32x128xf32>
    %7 = arith.addf %3, %6 : vector<32x128xf32>
    %c0_6 = arith.constant 0 : index
    %c0_7 = arith.constant 0 : index
    %8 = vector.load %arg9[%c0_6, %c0_7] : memref<32x128xf32, #tpu.memory_space<vmem>>, vector<32x128xf32>
    tpu.vector_store %arg9[%c0_6, %c0_7], %7 {strides = array<i32>} : memref<32x128xf32, #tpu.memory_space<vmem>>, vector<32x128xf32>,
    %c2_i32 = arith.constant 2 : i32
    %9 = arith.cmpi eq, %arg2, %c2_i32 : i32
    %10 = arith.extui %9 : i1 to i32
    %c0_i32_8 = arith.constant 0 : i32
    %11 = arith.cmpi ne, %10, %c0_i32_8 : i32
    scf.if %11 {
      %c0_9 = arith.constant 0 : index
      %c0_10 = arith.constant 0 : index
      %12 = vector.load %arg9[%c0_9, %c0_10] : memref<32x128xf32, #tpu.memory_space<vmem>>, vector<32x128xf32>
      %c0_11 = arith.constant 0 : index
      %c0_12 = arith.constant 0 : index
      %13 = vector.load %arg5[%c0_11, %c0_12] : memref<1x128xf32, #tpu.memory_space<vmem>>, vector<1x128xf32>
      %14 = vector.broadcast %13 : vector<1x128xf32> to vector<32x128xf32>
      %15 = arith.mulf %12, %14 : vector<32x128xf32>
      %c0_13 = arith.constant 0 : index
      %c0_14 = arith.constant 0 : index
      %16 = vector.load %arg6[%c0_13, %c0_14] : memref<1x128xf32, #tpu.memory_space<vmem>>, vector<1x128xf32>
      %17 = vector.broadcast %16 : vector<1x128xf32> to vector<32x128xf32>
      %18 = arith.addf %15, %17 : vector<32x128xf32>
      %c0_15 = arith.constant 0 : index
      %c0_16 = arith.constant 0 : index
      %19 = vector.load %arg7[%c0_15, %c0_16] : memref<32x128xbf16, #tpu.memory_space<vmem>>, vector<32x128xbf16>
      %20 = arith.extf %19 : vector<32x128xbf16> to vector<32x128xf32>
      %21 = arith.addf %18, %20 : vector<32x128xf32>
      %cst_17 = arith.constant 0.000000e+00 : f32
      %22 = vector.broadcast %cst_17 : f32 to vector<32x128xf32>
      %23 = arith.maximumf %21, %22 : vector<32x128xf32>
      %24 = arith.truncf %23 : vector<32x128xf32> to vector<32x128xbf16>
      %c0_18 = arith.constant 0 : index
      %c0_19 = arith.constant 0 : index
      %25 = vector.load %arg8[%c0_18, %c0_19] : memref<32x128xbf16, #tpu.memory_space<vmem>>, vector<32x128xbf16>
      tpu.vector_store %arg8[%c0_18, %c0_19], %24 {strides = array<i32>} : memref<32x128xbf16, #tpu.memory_space<vmem>>, vector<32x128xbf16>,
    } else {
    }
    return
  }
  func.func @transform_0(%arg0: i32, %arg1: i32, %arg2: i32) -> (i32, i32) {
    %c0_i32 = arith.constant 0 : i32
    return %arg0, %arg2 : i32, i32
  }
  func.func @transform_1(%arg0: i32, %arg1: i32, %arg2: i32) -> (i32, i32) {
    %c0_i32 = arith.constant 0 : i32
    return %arg2, %arg1 : i32, i32
  }
  func.func @transform_2(%arg0: i32, %arg1: i32, %arg2: i32) -> (i32, i32) {
    %c0_i32 = arith.constant 0 : i32
    %c0_i32_0 = arith.constant 0 : i32
    return %c0_i32, %arg1 : i32, i32
  }
  func.func @transform_3(%arg0: i32, %arg1: i32, %arg2: i32) -> (i32, i32) {
    %c0_i32 = arith.constant 0 : i32
    %c0_i32_0 = arith.constant 0 : i32
    return %c0_i32, %arg1 : i32, i32
  }
  func.func @transform_4(%arg0: i32, %arg1: i32, %arg2: i32) -> (i32, i32) {
    %c0_i32 = arith.constant 0 : i32
    return %arg0, %arg1 : i32, i32
  }
  func.func @transform_5(%arg0: i32, %arg1: i32, %arg2: i32) -> (i32, i32) {
    %c0_i32 = arith.constant 0 : i32
    return %arg0, %arg1 : i32, i32
  }
}

module attributes {stable_mosaic.version = 11 : i64} {
  func.func @_mm_bn_kernel(%arg0: i32, %arg1: i32, %arg2: i32, %arg3: memref<32x384xbf16, #tpu.memory_space<vmem>>, %arg4: memref<384x128xbf16, #tpu.memory_space<vmem>>, %arg5: memref<1x128xf32, #tpu.memory_space<vmem>>, %arg6: memref<1x128xf32, #tpu.memory_space<vmem>>, %arg7: memref<32x128xbf16, #tpu.memory_space<vmem>>, %arg8: memref<32x128xf32, #tpu.memory_space<vmem>>) attributes {dimension_semantics = [#tpu.dimension_semantics<parallel>, #tpu.dimension_semantics<parallel>, #tpu.dimension_semantics<arbitrary>], iteration_bounds = array<i64: 1, 1, 3>, scalar_prefetch = 0 : i64, scratch_operands = 1 : i64, tpu.core_type = #tpu.core_type<tc>, window_params = [{transform_indices = @transform_0, window_bounds = array<i64: 32, 384>}, {transform_indices = @transform_1, window_bounds = array<i64: 384, 128>}, {transform_indices = @transform_2, window_bounds = array<i64: 1, 128>}, {transform_indices = @transform_3, window_bounds = array<i64: 1, 128>}, {transform_indices = @transform_4, window_bounds = array<i64: 32, 128>}]} {
    %c0_i32 = arith.constant 0 : i32
    %0 = arith.cmpi eq, %arg2, %c0_i32 : i32
    %1 = arith.extui %0 : i1 to i32
    %c0_i32_0 = arith.constant 0 : i32
    %2 = arith.cmpi ne, %1, %c0_i32_0 : i32
    scf.if %2 {
      %cst_9 = arith.constant 0.000000e+00 : f32
      %12 = vector.broadcast %cst_9 : f32 to vector<32x128xf32>
      %c0_10 = arith.constant 0 : index
      %c0_11 = arith.constant 0 : index
      %13 = vector.load %arg8[%c0_10, %c0_11] : memref<32x128xf32, #tpu.memory_space<vmem>>, vector<32x128xf32>
      tpu.vector_store %arg8[%c0_10, %c0_11], %12 {strides = array<i32>} : memref<32x128xf32, #tpu.memory_space<vmem>>, vector<32x128xf32>,
    } else {
    }
    %c0 = arith.constant 0 : index
    %c0_1 = arith.constant 0 : index
    %3 = vector.load %arg8[%c0, %c0_1] : memref<32x128xf32, #tpu.memory_space<vmem>>, vector<32x128xf32>
    %c0_2 = arith.constant 0 : index
    %c0_3 = arith.constant 0 : index
    %4 = vector.load %arg3[%c0_2, %c0_3] : memref<32x384xbf16, #tpu.memory_space<vmem>>, vector<32x384xbf16>
    %c0_4 = arith.constant 0 : index
    %c0_5 = arith.constant 0 : index
    %5 = vector.load %arg4[%c0_4, %c0_5] : memref<384x128xbf16, #tpu.memory_space<vmem>>, vector<384x128xbf16>
    %cst = arith.constant dense<0.000000e+00> : vector<32x128xf32>
    %6 = tpu.matmul %4, %5, %cst {dimension_numbers = #tpu.dot_dimension_numbers<[1], [0], [0], [1], [0, 0, 1, 1], [], []>} : vector<32x384xbf16>, vector<384x128xbf16>, vector<32x128xf32> -> vector<32x128xf32>
    %7 = arith.addf %3, %6 : vector<32x128xf32>
    %c0_6 = arith.constant 0 : index
    %c0_7 = arith.constant 0 : index
    %8 = vector.load %arg8[%c0_6, %c0_7] : memref<32x128xf32, #tpu.memory_space<vmem>>, vector<32x128xf32>
    tpu.vector_store %arg8[%c0_6, %c0_7], %7 {strides = array<i32>} : memref<32x128xf32, #tpu.memory_space<vmem>>, vector<32x128xf32>,
    %c2_i32 = arith.constant 2 : i32
    %9 = arith.cmpi eq, %arg2, %c2_i32 : i32
    %10 = arith.extui %9 : i1 to i32
    %c0_i32_8 = arith.constant 0 : i32
    %11 = arith.cmpi ne, %10, %c0_i32_8 : i32
    scf.if %11 {
      %c0_9 = arith.constant 0 : index
      %c0_10 = arith.constant 0 : index
      %12 = vector.load %arg8[%c0_9, %c0_10] : memref<32x128xf32, #tpu.memory_space<vmem>>, vector<32x128xf32>
      %c0_11 = arith.constant 0 : index
      %c0_12 = arith.constant 0 : index
      %13 = vector.load %arg5[%c0_11, %c0_12] : memref<1x128xf32, #tpu.memory_space<vmem>>, vector<1x128xf32>
      %14 = vector.broadcast %13 : vector<1x128xf32> to vector<32x128xf32>
      %15 = arith.mulf %12, %14 : vector<32x128xf32>
      %c0_13 = arith.constant 0 : index
      %c0_14 = arith.constant 0 : index
      %16 = vector.load %arg6[%c0_13, %c0_14] : memref<1x128xf32, #tpu.memory_space<vmem>>, vector<1x128xf32>
      %17 = vector.broadcast %16 : vector<1x128xf32> to vector<32x128xf32>
      %18 = arith.addf %15, %17 : vector<32x128xf32>
      %cst_15 = arith.constant 0.000000e+00 : f32
      %19 = vector.broadcast %cst_15 : f32 to vector<32x128xf32>
      %20 = arith.maximumf %18, %19 : vector<32x128xf32>
      %21 = arith.truncf %20 : vector<32x128xf32> to vector<32x128xbf16>
      %c0_16 = arith.constant 0 : index
      %c0_17 = arith.constant 0 : index
      %22 = vector.load %arg7[%c0_16, %c0_17] : memref<32x128xbf16, #tpu.memory_space<vmem>>, vector<32x128xbf16>
      tpu.vector_store %arg7[%c0_16, %c0_17], %21 {strides = array<i32>} : memref<32x128xbf16, #tpu.memory_space<vmem>>, vector<32x128xbf16>,
    } else {
    }
    return
  }
  func.func @transform_0(%arg0: i32, %arg1: i32, %arg2: i32) -> (i32, i32) {
    %c0_i32 = arith.constant 0 : i32
    return %arg0, %arg2 : i32, i32
  }
  func.func @transform_1(%arg0: i32, %arg1: i32, %arg2: i32) -> (i32, i32) {
    %c0_i32 = arith.constant 0 : i32
    return %arg2, %arg1 : i32, i32
  }
  func.func @transform_2(%arg0: i32, %arg1: i32, %arg2: i32) -> (i32, i32) {
    %c0_i32 = arith.constant 0 : i32
    %c0_i32_0 = arith.constant 0 : i32
    return %c0_i32, %arg1 : i32, i32
  }
  func.func @transform_3(%arg0: i32, %arg1: i32, %arg2: i32) -> (i32, i32) {
    %c0_i32 = arith.constant 0 : i32
    %c0_i32_0 = arith.constant 0 : i32
    return %c0_i32, %arg1 : i32, i32
  }
  func.func @transform_4(%arg0: i32, %arg1: i32, %arg2: i32) -> (i32, i32) {
    %c0_i32 = arith.constant 0 : i32
    return %arg0, %arg1 : i32, i32
  }
}

module attributes {stable_mosaic.version = 11 : i64} {
  func.func @_mm_bn_kernel(%arg0: i32, %arg1: i32, %arg2: i32, %arg3: memref<8x384xbf16, #tpu.memory_space<vmem>>, %arg4: memref<384x256xbf16, #tpu.memory_space<vmem>>, %arg5: memref<1x256xf32, #tpu.memory_space<vmem>>, %arg6: memref<1x256xf32, #tpu.memory_space<vmem>>, %arg7: memref<8x256xbf16, #tpu.memory_space<vmem>>, %arg8: memref<8x256xf32, #tpu.memory_space<vmem>>) attributes {dimension_semantics = [#tpu.dimension_semantics<parallel>, #tpu.dimension_semantics<parallel>, #tpu.dimension_semantics<arbitrary>], iteration_bounds = array<i64: 1, 1, 3>, scalar_prefetch = 0 : i64, scratch_operands = 1 : i64, tpu.core_type = #tpu.core_type<tc>, window_params = [{transform_indices = @transform_0, window_bounds = array<i64: 8, 384>}, {transform_indices = @transform_1, window_bounds = array<i64: 384, 256>}, {transform_indices = @transform_2, window_bounds = array<i64: 1, 256>}, {transform_indices = @transform_3, window_bounds = array<i64: 1, 256>}, {transform_indices = @transform_4, window_bounds = array<i64: 8, 256>}]} {
    %c0_i32 = arith.constant 0 : i32
    %0 = arith.cmpi eq, %arg2, %c0_i32 : i32
    %1 = arith.extui %0 : i1 to i32
    %c0_i32_0 = arith.constant 0 : i32
    %2 = arith.cmpi ne, %1, %c0_i32_0 : i32
    scf.if %2 {
      %cst_9 = arith.constant 0.000000e+00 : f32
      %12 = vector.broadcast %cst_9 : f32 to vector<8x256xf32>
      %c0_10 = arith.constant 0 : index
      %c0_11 = arith.constant 0 : index
      %13 = vector.load %arg8[%c0_10, %c0_11] : memref<8x256xf32, #tpu.memory_space<vmem>>, vector<8x256xf32>
      tpu.vector_store %arg8[%c0_10, %c0_11], %12 {strides = array<i32>} : memref<8x256xf32, #tpu.memory_space<vmem>>, vector<8x256xf32>,
    } else {
    }
    %c0 = arith.constant 0 : index
    %c0_1 = arith.constant 0 : index
    %3 = vector.load %arg8[%c0, %c0_1] : memref<8x256xf32, #tpu.memory_space<vmem>>, vector<8x256xf32>
    %c0_2 = arith.constant 0 : index
    %c0_3 = arith.constant 0 : index
    %4 = vector.load %arg3[%c0_2, %c0_3] : memref<8x384xbf16, #tpu.memory_space<vmem>>, vector<8x384xbf16>
    %c0_4 = arith.constant 0 : index
    %c0_5 = arith.constant 0 : index
    %5 = vector.load %arg4[%c0_4, %c0_5] : memref<384x256xbf16, #tpu.memory_space<vmem>>, vector<384x256xbf16>
    %cst = arith.constant dense<0.000000e+00> : vector<8x256xf32>
    %6 = tpu.matmul %4, %5, %cst {dimension_numbers = #tpu.dot_dimension_numbers<[1], [0], [0], [1], [0, 0, 1, 1], [], []>} : vector<8x384xbf16>, vector<384x256xbf16>, vector<8x256xf32> -> vector<8x256xf32>
    %7 = arith.addf %3, %6 : vector<8x256xf32>
    %c0_6 = arith.constant 0 : index
    %c0_7 = arith.constant 0 : index
    %8 = vector.load %arg8[%c0_6, %c0_7] : memref<8x256xf32, #tpu.memory_space<vmem>>, vector<8x256xf32>
    tpu.vector_store %arg8[%c0_6, %c0_7], %7 {strides = array<i32>} : memref<8x256xf32, #tpu.memory_space<vmem>>, vector<8x256xf32>,
    %c2_i32 = arith.constant 2 : i32
    %9 = arith.cmpi eq, %arg2, %c2_i32 : i32
    %10 = arith.extui %9 : i1 to i32
    %c0_i32_8 = arith.constant 0 : i32
    %11 = arith.cmpi ne, %10, %c0_i32_8 : i32
    scf.if %11 {
      %c0_9 = arith.constant 0 : index
      %c0_10 = arith.constant 0 : index
      %12 = vector.load %arg8[%c0_9, %c0_10] : memref<8x256xf32, #tpu.memory_space<vmem>>, vector<8x256xf32>
      %c0_11 = arith.constant 0 : index
      %c0_12 = arith.constant 0 : index
      %13 = vector.load %arg5[%c0_11, %c0_12] : memref<1x256xf32, #tpu.memory_space<vmem>>, vector<1x256xf32>
      %14 = vector.broadcast %13 : vector<1x256xf32> to vector<8x256xf32>
      %15 = arith.mulf %12, %14 : vector<8x256xf32>
      %c0_13 = arith.constant 0 : index
      %c0_14 = arith.constant 0 : index
      %16 = vector.load %arg6[%c0_13, %c0_14] : memref<1x256xf32, #tpu.memory_space<vmem>>, vector<1x256xf32>
      %17 = vector.broadcast %16 : vector<1x256xf32> to vector<8x256xf32>
      %18 = arith.addf %15, %17 : vector<8x256xf32>
      %cst_15 = arith.constant 0.000000e+00 : f32
      %19 = vector.broadcast %cst_15 : f32 to vector<8x256xf32>
      %20 = arith.maximumf %18, %19 : vector<8x256xf32>
      %21 = arith.truncf %20 : vector<8x256xf32> to vector<8x256xbf16>
      %c0_16 = arith.constant 0 : index
      %c0_17 = arith.constant 0 : index
      %22 = vector.load %arg7[%c0_16, %c0_17] : memref<8x256xbf16, #tpu.memory_space<vmem>>, vector<8x256xbf16>
      tpu.vector_store %arg7[%c0_16, %c0_17], %21 {strides = array<i32>} : memref<8x256xbf16, #tpu.memory_space<vmem>>, vector<8x256xbf16>,
    } else {
    }
    return
  }
  func.func @transform_0(%arg0: i32, %arg1: i32, %arg2: i32) -> (i32, i32) {
    %c0_i32 = arith.constant 0 : i32
    return %arg0, %arg2 : i32, i32
  }
  func.func @transform_1(%arg0: i32, %arg1: i32, %arg2: i32) -> (i32, i32) {
    %c0_i32 = arith.constant 0 : i32
    return %arg2, %arg1 : i32, i32
  }
  func.func @transform_2(%arg0: i32, %arg1: i32, %arg2: i32) -> (i32, i32) {
    %c0_i32 = arith.constant 0 : i32
    %c0_i32_0 = arith.constant 0 : i32
    return %c0_i32, %arg1 : i32, i32
  }
  func.func @transform_3(%arg0: i32, %arg1: i32, %arg2: i32) -> (i32, i32) {
    %c0_i32 = arith.constant 0 : i32
    %c0_i32_0 = arith.constant 0 : i32
    return %c0_i32, %arg1 : i32, i32
  }
  func.func @transform_4(%arg0: i32, %arg1: i32, %arg2: i32) -> (i32, i32) {
    %c0_i32 = arith.constant 0 : i32
    return %arg0, %arg1 : i32, i32
  }
}

module attributes {stable_mosaic.version = 11 : i64} {
  func.func @_mm_bn_kernel(%arg0: i32, %arg1: i32, %arg2: i32, %arg3: memref<8x128xbf16, #tpu.memory_space<vmem>>, %arg4: memref<128x256xbf16, #tpu.memory_space<vmem>>, %arg5: memref<1x256xf32, #tpu.memory_space<vmem>>, %arg6: memref<1x256xf32, #tpu.memory_space<vmem>>, %arg7: memref<8x256xbf16, #tpu.memory_space<vmem>>, %arg8: memref<8x256xf32, #tpu.memory_space<vmem>>) attributes {dimension_semantics = [#tpu.dimension_semantics<parallel>, #tpu.dimension_semantics<parallel>, #tpu.dimension_semantics<arbitrary>], iteration_bounds = array<i64: 1, 1, 1>, scalar_prefetch = 0 : i64, scratch_operands = 1 : i64, tpu.core_type = #tpu.core_type<tc>, window_params = [{transform_indices = @transform_0, window_bounds = array<i64: 8, 128>}, {transform_indices = @transform_1, window_bounds = array<i64: 128, 256>}, {transform_indices = @transform_2, window_bounds = array<i64: 1, 256>}, {transform_indices = @transform_3, window_bounds = array<i64: 1, 256>}, {transform_indices = @transform_4, window_bounds = array<i64: 8, 256>}]} {
    %c0_i32 = arith.constant 0 : i32
    %0 = arith.cmpi eq, %arg2, %c0_i32 : i32
    %1 = arith.extui %0 : i1 to i32
    %c0_i32_0 = arith.constant 0 : i32
    %2 = arith.cmpi ne, %1, %c0_i32_0 : i32
    scf.if %2 {
      %cst_10 = arith.constant 0.000000e+00 : f32
      %12 = vector.broadcast %cst_10 : f32 to vector<8x256xf32>
      %c0_11 = arith.constant 0 : index
      %c0_12 = arith.constant 0 : index
      %13 = vector.load %arg8[%c0_11, %c0_12] : memref<8x256xf32, #tpu.memory_space<vmem>>, vector<8x256xf32>
      tpu.vector_store %arg8[%c0_11, %c0_12], %12 {strides = array<i32>} : memref<8x256xf32, #tpu.memory_space<vmem>>, vector<8x256xf32>,
    } else {
    }
    %c0 = arith.constant 0 : index
    %c0_1 = arith.constant 0 : index
    %3 = vector.load %arg8[%c0, %c0_1] : memref<8x256xf32, #tpu.memory_space<vmem>>, vector<8x256xf32>
    %c0_2 = arith.constant 0 : index
    %c0_3 = arith.constant 0 : index
    %4 = vector.load %arg3[%c0_2, %c0_3] : memref<8x128xbf16, #tpu.memory_space<vmem>>, vector<8x128xbf16>
    %c0_4 = arith.constant 0 : index
    %c0_5 = arith.constant 0 : index
    %5 = vector.load %arg4[%c0_4, %c0_5] : memref<128x256xbf16, #tpu.memory_space<vmem>>, vector<128x256xbf16>
    %cst = arith.constant dense<0.000000e+00> : vector<8x256xf32>
    %6 = tpu.matmul %4, %5, %cst {dimension_numbers = #tpu.dot_dimension_numbers<[1], [0], [0], [1], [0, 0, 1, 1], [], []>} : vector<8x128xbf16>, vector<128x256xbf16>, vector<8x256xf32> -> vector<8x256xf32>
    %7 = arith.addf %3, %6 : vector<8x256xf32>
    %c0_6 = arith.constant 0 : index
    %c0_7 = arith.constant 0 : index
    %8 = vector.load %arg8[%c0_6, %c0_7] : memref<8x256xf32, #tpu.memory_space<vmem>>, vector<8x256xf32>
    tpu.vector_store %arg8[%c0_6, %c0_7], %7 {strides = array<i32>} : memref<8x256xf32, #tpu.memory_space<vmem>>, vector<8x256xf32>,
    %c0_i32_8 = arith.constant 0 : i32
    %9 = arith.cmpi eq, %arg2, %c0_i32_8 : i32
    %10 = arith.extui %9 : i1 to i32
    %c0_i32_9 = arith.constant 0 : i32
    %11 = arith.cmpi ne, %10, %c0_i32_9 : i32
    scf.if %11 {
      %c0_10 = arith.constant 0 : index
      %c0_11 = arith.constant 0 : index
      %12 = vector.load %arg8[%c0_10, %c0_11] : memref<8x256xf32, #tpu.memory_space<vmem>>, vector<8x256xf32>
      %c0_12 = arith.constant 0 : index
      %c0_13 = arith.constant 0 : index
      %13 = vector.load %arg5[%c0_12, %c0_13] : memref<1x256xf32, #tpu.memory_space<vmem>>, vector<1x256xf32>
      %14 = vector.broadcast %13 : vector<1x256xf32> to vector<8x256xf32>
      %15 = arith.mulf %12, %14 : vector<8x256xf32>
      %c0_14 = arith.constant 0 : index
      %c0_15 = arith.constant 0 : index
      %16 = vector.load %arg6[%c0_14, %c0_15] : memref<1x256xf32, #tpu.memory_space<vmem>>, vector<1x256xf32>
      %17 = vector.broadcast %16 : vector<1x256xf32> to vector<8x256xf32>
      %18 = arith.addf %15, %17 : vector<8x256xf32>
      %19 = arith.truncf %18 : vector<8x256xf32> to vector<8x256xbf16>
      %c0_16 = arith.constant 0 : index
      %c0_17 = arith.constant 0 : index
      %20 = vector.load %arg7[%c0_16, %c0_17] : memref<8x256xbf16, #tpu.memory_space<vmem>>, vector<8x256xbf16>
      tpu.vector_store %arg7[%c0_16, %c0_17], %19 {strides = array<i32>} : memref<8x256xbf16, #tpu.memory_space<vmem>>, vector<8x256xbf16>,
    } else {
    }
    return
  }
  func.func @transform_0(%arg0: i32, %arg1: i32, %arg2: i32) -> (i32, i32) {
    %c0_i32 = arith.constant 0 : i32
    return %arg0, %arg2 : i32, i32
  }
  func.func @transform_1(%arg0: i32, %arg1: i32, %arg2: i32) -> (i32, i32) {
    %c0_i32 = arith.constant 0 : i32
    return %arg2, %arg1 : i32, i32
  }
  func.func @transform_2(%arg0: i32, %arg1: i32, %arg2: i32) -> (i32, i32) {
    %c0_i32 = arith.constant 0 : i32
    %c0_i32_0 = arith.constant 0 : i32
    return %c0_i32, %arg1 : i32, i32
  }
  func.func @transform_3(%arg0: i32, %arg1: i32, %arg2: i32) -> (i32, i32) {
    %c0_i32 = arith.constant 0 : i32
    %c0_i32_0 = arith.constant 0 : i32
    return %c0_i32, %arg1 : i32, i32
  }
  func.func @transform_4(%arg0: i32, %arg1: i32, %arg2: i32) -> (i32, i32) {
    %c0_i32 = arith.constant 0 : i32
    return %arg0, %arg1 : i32, i32
  }
}

module attributes {stable_mosaic.version = 11 : i64} {
  func.func @_mm_bn_res_kernel(%arg0: i32, %arg1: i32, %arg2: i32, %arg3: memref<8x768xbf16, #tpu.memory_space<vmem>>, %arg4: memref<768x256xbf16, #tpu.memory_space<vmem>>, %arg5: memref<1x256xf32, #tpu.memory_space<vmem>>, %arg6: memref<1x256xf32, #tpu.memory_space<vmem>>, %arg7: memref<8x256xbf16, #tpu.memory_space<vmem>>, %arg8: memref<8x256xbf16, #tpu.memory_space<vmem>>, %arg9: memref<8x256xf32, #tpu.memory_space<vmem>>) attributes {dimension_semantics = [#tpu.dimension_semantics<parallel>, #tpu.dimension_semantics<parallel>, #tpu.dimension_semantics<arbitrary>], iteration_bounds = array<i64: 1, 1, 3>, scalar_prefetch = 0 : i64, scratch_operands = 1 : i64, tpu.core_type = #tpu.core_type<tc>, window_params = [{transform_indices = @transform_0, window_bounds = array<i64: 8, 768>}, {transform_indices = @transform_1, window_bounds = array<i64: 768, 256>}, {transform_indices = @transform_2, window_bounds = array<i64: 1, 256>}, {transform_indices = @transform_3, window_bounds = array<i64: 1, 256>}, {transform_indices = @transform_4, window_bounds = array<i64: 8, 256>}, {transform_indices = @transform_5, window_bounds = array<i64: 8, 256>}]} {
    %c0_i32 = arith.constant 0 : i32
    %0 = arith.cmpi eq, %arg2, %c0_i32 : i32
    %1 = arith.extui %0 : i1 to i32
    %c0_i32_0 = arith.constant 0 : i32
    %2 = arith.cmpi ne, %1, %c0_i32_0 : i32
    scf.if %2 {
      %cst_9 = arith.constant 0.000000e+00 : f32
      %12 = vector.broadcast %cst_9 : f32 to vector<8x256xf32>
      %c0_10 = arith.constant 0 : index
      %c0_11 = arith.constant 0 : index
      %13 = vector.load %arg9[%c0_10, %c0_11] : memref<8x256xf32, #tpu.memory_space<vmem>>, vector<8x256xf32>
      tpu.vector_store %arg9[%c0_10, %c0_11], %12 {strides = array<i32>} : memref<8x256xf32, #tpu.memory_space<vmem>>, vector<8x256xf32>,
    } else {
    }
    %c0 = arith.constant 0 : index
    %c0_1 = arith.constant 0 : index
    %3 = vector.load %arg9[%c0, %c0_1] : memref<8x256xf32, #tpu.memory_space<vmem>>, vector<8x256xf32>
    %c0_2 = arith.constant 0 : index
    %c0_3 = arith.constant 0 : index
    %4 = vector.load %arg3[%c0_2, %c0_3] : memref<8x768xbf16, #tpu.memory_space<vmem>>, vector<8x768xbf16>
    %c0_4 = arith.constant 0 : index
    %c0_5 = arith.constant 0 : index
    %5 = vector.load %arg4[%c0_4, %c0_5] : memref<768x256xbf16, #tpu.memory_space<vmem>>, vector<768x256xbf16>
    %cst = arith.constant dense<0.000000e+00> : vector<8x256xf32>
    %6 = tpu.matmul %4, %5, %cst {dimension_numbers = #tpu.dot_dimension_numbers<[1], [0], [0], [1], [0, 0, 1, 1], [], []>} : vector<8x768xbf16>, vector<768x256xbf16>, vector<8x256xf32> -> vector<8x256xf32>
    %7 = arith.addf %3, %6 : vector<8x256xf32>
    %c0_6 = arith.constant 0 : index
    %c0_7 = arith.constant 0 : index
    %8 = vector.load %arg9[%c0_6, %c0_7] : memref<8x256xf32, #tpu.memory_space<vmem>>, vector<8x256xf32>
    tpu.vector_store %arg9[%c0_6, %c0_7], %7 {strides = array<i32>} : memref<8x256xf32, #tpu.memory_space<vmem>>, vector<8x256xf32>,
    %c2_i32 = arith.constant 2 : i32
    %9 = arith.cmpi eq, %arg2, %c2_i32 : i32
    %10 = arith.extui %9 : i1 to i32
    %c0_i32_8 = arith.constant 0 : i32
    %11 = arith.cmpi ne, %10, %c0_i32_8 : i32
    scf.if %11 {
      %c0_9 = arith.constant 0 : index
      %c0_10 = arith.constant 0 : index
      %12 = vector.load %arg9[%c0_9, %c0_10] : memref<8x256xf32, #tpu.memory_space<vmem>>, vector<8x256xf32>
      %c0_11 = arith.constant 0 : index
      %c0_12 = arith.constant 0 : index
      %13 = vector.load %arg5[%c0_11, %c0_12] : memref<1x256xf32, #tpu.memory_space<vmem>>, vector<1x256xf32>
      %14 = vector.broadcast %13 : vector<1x256xf32> to vector<8x256xf32>
      %15 = arith.mulf %12, %14 : vector<8x256xf32>
      %c0_13 = arith.constant 0 : index
      %c0_14 = arith.constant 0 : index
      %16 = vector.load %arg6[%c0_13, %c0_14] : memref<1x256xf32, #tpu.memory_space<vmem>>, vector<1x256xf32>
      %17 = vector.broadcast %16 : vector<1x256xf32> to vector<8x256xf32>
      %18 = arith.addf %15, %17 : vector<8x256xf32>
      %c0_15 = arith.constant 0 : index
      %c0_16 = arith.constant 0 : index
      %19 = vector.load %arg7[%c0_15, %c0_16] : memref<8x256xbf16, #tpu.memory_space<vmem>>, vector<8x256xbf16>
      %20 = arith.extf %19 : vector<8x256xbf16> to vector<8x256xf32>
      %21 = arith.addf %18, %20 : vector<8x256xf32>
      %cst_17 = arith.constant 0.000000e+00 : f32
      %22 = vector.broadcast %cst_17 : f32 to vector<8x256xf32>
      %23 = arith.maximumf %21, %22 : vector<8x256xf32>
      %24 = arith.truncf %23 : vector<8x256xf32> to vector<8x256xbf16>
      %c0_18 = arith.constant 0 : index
      %c0_19 = arith.constant 0 : index
      %25 = vector.load %arg8[%c0_18, %c0_19] : memref<8x256xbf16, #tpu.memory_space<vmem>>, vector<8x256xbf16>
      tpu.vector_store %arg8[%c0_18, %c0_19], %24 {strides = array<i32>} : memref<8x256xbf16, #tpu.memory_space<vmem>>, vector<8x256xbf16>,
    } else {
    }
    return
  }
  func.func @transform_0(%arg0: i32, %arg1: i32, %arg2: i32) -> (i32, i32) {
    %c0_i32 = arith.constant 0 : i32
    return %arg0, %arg2 : i32, i32
  }
  func.func @transform_1(%arg0: i32, %arg1: i32, %arg2: i32) -> (i32, i32) {
    %c0_i32 = arith.constant 0 : i32
    return %arg2, %arg1 : i32, i32
  }
  func.func @transform_2(%arg0: i32, %arg1: i32, %arg2: i32) -> (i32, i32) {
    %c0_i32 = arith.constant 0 : i32
    %c0_i32_0 = arith.constant 0 : i32
    return %c0_i32, %arg1 : i32, i32
  }
  func.func @transform_3(%arg0: i32, %arg1: i32, %arg2: i32) -> (i32, i32) {
    %c0_i32 = arith.constant 0 : i32
    %c0_i32_0 = arith.constant 0 : i32
    return %c0_i32, %arg1 : i32, i32
  }
  func.func @transform_4(%arg0: i32, %arg1: i32, %arg2: i32) -> (i32, i32) {
    %c0_i32 = arith.constant 0 : i32
    return %arg0, %arg1 : i32, i32
  }
  func.func @transform_5(%arg0: i32, %arg1: i32, %arg2: i32) -> (i32, i32) {
    %c0_i32 = arith.constant 0 : i32
    return %arg0, %arg1 : i32, i32
  }
}

module attributes {stable_mosaic.version = 11 : i64} {
  func.func @_mm_bn_kernel(%arg0: i32, %arg1: i32, %arg2: i32, %arg3: memref<8x768xbf16, #tpu.memory_space<vmem>>, %arg4: memref<768x256xbf16, #tpu.memory_space<vmem>>, %arg5: memref<1x256xf32, #tpu.memory_space<vmem>>, %arg6: memref<1x256xf32, #tpu.memory_space<vmem>>, %arg7: memref<8x256xbf16, #tpu.memory_space<vmem>>, %arg8: memref<8x256xf32, #tpu.memory_space<vmem>>) attributes {dimension_semantics = [#tpu.dimension_semantics<parallel>, #tpu.dimension_semantics<parallel>, #tpu.dimension_semantics<arbitrary>], iteration_bounds = array<i64: 1, 1, 3>, scalar_prefetch = 0 : i64, scratch_operands = 1 : i64, tpu.core_type = #tpu.core_type<tc>, window_params = [{transform_indices = @transform_0, window_bounds = array<i64: 8, 768>}, {transform_indices = @transform_1, window_bounds = array<i64: 768, 256>}, {transform_indices = @transform_2, window_bounds = array<i64: 1, 256>}, {transform_indices = @transform_3, window_bounds = array<i64: 1, 256>}, {transform_indices = @transform_4, window_bounds = array<i64: 8, 256>}]} {
    %c0_i32 = arith.constant 0 : i32
    %0 = arith.cmpi eq, %arg2, %c0_i32 : i32
    %1 = arith.extui %0 : i1 to i32
    %c0_i32_0 = arith.constant 0 : i32
    %2 = arith.cmpi ne, %1, %c0_i32_0 : i32
    scf.if %2 {
      %cst_9 = arith.constant 0.000000e+00 : f32
      %12 = vector.broadcast %cst_9 : f32 to vector<8x256xf32>
      %c0_10 = arith.constant 0 : index
      %c0_11 = arith.constant 0 : index
      %13 = vector.load %arg8[%c0_10, %c0_11] : memref<8x256xf32, #tpu.memory_space<vmem>>, vector<8x256xf32>
      tpu.vector_store %arg8[%c0_10, %c0_11], %12 {strides = array<i32>} : memref<8x256xf32, #tpu.memory_space<vmem>>, vector<8x256xf32>,
    } else {
    }
    %c0 = arith.constant 0 : index
    %c0_1 = arith.constant 0 : index
    %3 = vector.load %arg8[%c0, %c0_1] : memref<8x256xf32, #tpu.memory_space<vmem>>, vector<8x256xf32>
    %c0_2 = arith.constant 0 : index
    %c0_3 = arith.constant 0 : index
    %4 = vector.load %arg3[%c0_2, %c0_3] : memref<8x768xbf16, #tpu.memory_space<vmem>>, vector<8x768xbf16>
    %c0_4 = arith.constant 0 : index
    %c0_5 = arith.constant 0 : index
    %5 = vector.load %arg4[%c0_4, %c0_5] : memref<768x256xbf16, #tpu.memory_space<vmem>>, vector<768x256xbf16>
    %cst = arith.constant dense<0.000000e+00> : vector<8x256xf32>
    %6 = tpu.matmul %4, %5, %cst {dimension_numbers = #tpu.dot_dimension_numbers<[1], [0], [0], [1], [0, 0, 1, 1], [], []>} : vector<8x768xbf16>, vector<768x256xbf16>, vector<8x256xf32> -> vector<8x256xf32>
    %7 = arith.addf %3, %6 : vector<8x256xf32>
    %c0_6 = arith.constant 0 : index
    %c0_7 = arith.constant 0 : index
    %8 = vector.load %arg8[%c0_6, %c0_7] : memref<8x256xf32, #tpu.memory_space<vmem>>, vector<8x256xf32>
    tpu.vector_store %arg8[%c0_6, %c0_7], %7 {strides = array<i32>} : memref<8x256xf32, #tpu.memory_space<vmem>>, vector<8x256xf32>,
    %c2_i32 = arith.constant 2 : i32
    %9 = arith.cmpi eq, %arg2, %c2_i32 : i32
    %10 = arith.extui %9 : i1 to i32
    %c0_i32_8 = arith.constant 0 : i32
    %11 = arith.cmpi ne, %10, %c0_i32_8 : i32
    scf.if %11 {
      %c0_9 = arith.constant 0 : index
      %c0_10 = arith.constant 0 : index
      %12 = vector.load %arg8[%c0_9, %c0_10] : memref<8x256xf32, #tpu.memory_space<vmem>>, vector<8x256xf32>
      %c0_11 = arith.constant 0 : index
      %c0_12 = arith.constant 0 : index
      %13 = vector.load %arg5[%c0_11, %c0_12] : memref<1x256xf32, #tpu.memory_space<vmem>>, vector<1x256xf32>
      %14 = vector.broadcast %13 : vector<1x256xf32> to vector<8x256xf32>
      %15 = arith.mulf %12, %14 : vector<8x256xf32>
      %c0_13 = arith.constant 0 : index
      %c0_14 = arith.constant 0 : index
      %16 = vector.load %arg6[%c0_13, %c0_14] : memref<1x256xf32, #tpu.memory_space<vmem>>, vector<1x256xf32>
      %17 = vector.broadcast %16 : vector<1x256xf32> to vector<8x256xf32>
      %18 = arith.addf %15, %17 : vector<8x256xf32>
      %cst_15 = arith.constant 0.000000e+00 : f32
      %19 = vector.broadcast %cst_15 : f32 to vector<8x256xf32>
      %20 = arith.maximumf %18, %19 : vector<8x256xf32>
      %21 = arith.truncf %20 : vector<8x256xf32> to vector<8x256xbf16>
      %c0_16 = arith.constant 0 : index
      %c0_17 = arith.constant 0 : index
      %22 = vector.load %arg7[%c0_16, %c0_17] : memref<8x256xbf16, #tpu.memory_space<vmem>>, vector<8x256xbf16>
      tpu.vector_store %arg7[%c0_16, %c0_17], %21 {strides = array<i32>} : memref<8x256xbf16, #tpu.memory_space<vmem>>, vector<8x256xbf16>,
    } else {
    }
    return
  }
  func.func @transform_0(%arg0: i32, %arg1: i32, %arg2: i32) -> (i32, i32) {
    %c0_i32 = arith.constant 0 : i32
    return %arg0, %arg2 : i32, i32
  }
  func.func @transform_1(%arg0: i32, %arg1: i32, %arg2: i32) -> (i32, i32) {
    %c0_i32 = arith.constant 0 : i32
    return %arg2, %arg1 : i32, i32
  }
  func.func @transform_2(%arg0: i32, %arg1: i32, %arg2: i32) -> (i32, i32) {
    %c0_i32 = arith.constant 0 : i32
    %c0_i32_0 = arith.constant 0 : i32
    return %c0_i32, %arg1 : i32, i32
  }
  func.func @transform_3(%arg0: i32, %arg1: i32, %arg2: i32) -> (i32, i32) {
    %c0_i32 = arith.constant 0 : i32
    %c0_i32_0 = arith.constant 0 : i32
    return %c0_i32, %arg1 : i32, i32
  }
  func.func @transform_4(%arg0: i32, %arg1: i32, %arg2: i32) -> (i32, i32) {
    %c0_i32 = arith.constant 0 : i32
    return %arg0, %arg1 : i32, i32
  }
}

module attributes {stable_mosaic.version = 11 : i64} {
  func.func @_mm_bn_kernel(%arg0: i32, %arg1: i32, %arg2: i32, %arg3: memref<8x768xbf16, #tpu.memory_space<vmem>>, %arg4: memref<768x512xbf16, #tpu.memory_space<vmem>>, %arg5: memref<1x512xf32, #tpu.memory_space<vmem>>, %arg6: memref<1x512xf32, #tpu.memory_space<vmem>>, %arg7: memref<8x512xbf16, #tpu.memory_space<vmem>>, %arg8: memref<8x512xf32, #tpu.memory_space<vmem>>) attributes {dimension_semantics = [#tpu.dimension_semantics<parallel>, #tpu.dimension_semantics<parallel>, #tpu.dimension_semantics<arbitrary>], iteration_bounds = array<i64: 1, 1, 3>, scalar_prefetch = 0 : i64, scratch_operands = 1 : i64, tpu.core_type = #tpu.core_type<tc>, window_params = [{transform_indices = @transform_0, window_bounds = array<i64: 8, 768>}, {transform_indices = @transform_1, window_bounds = array<i64: 768, 512>}, {transform_indices = @transform_2, window_bounds = array<i64: 1, 512>}, {transform_indices = @transform_3, window_bounds = array<i64: 1, 512>}, {transform_indices = @transform_4, window_bounds = array<i64: 8, 512>}]} {
    %c0_i32 = arith.constant 0 : i32
    %0 = arith.cmpi eq, %arg2, %c0_i32 : i32
    %1 = arith.extui %0 : i1 to i32
    %c0_i32_0 = arith.constant 0 : i32
    %2 = arith.cmpi ne, %1, %c0_i32_0 : i32
    scf.if %2 {
      %cst_9 = arith.constant 0.000000e+00 : f32
      %12 = vector.broadcast %cst_9 : f32 to vector<8x512xf32>
      %c0_10 = arith.constant 0 : index
      %c0_11 = arith.constant 0 : index
      %13 = vector.load %arg8[%c0_10, %c0_11] : memref<8x512xf32, #tpu.memory_space<vmem>>, vector<8x512xf32>
      tpu.vector_store %arg8[%c0_10, %c0_11], %12 {strides = array<i32>} : memref<8x512xf32, #tpu.memory_space<vmem>>, vector<8x512xf32>,
    } else {
    }
    %c0 = arith.constant 0 : index
    %c0_1 = arith.constant 0 : index
    %3 = vector.load %arg8[%c0, %c0_1] : memref<8x512xf32, #tpu.memory_space<vmem>>, vector<8x512xf32>
    %c0_2 = arith.constant 0 : index
    %c0_3 = arith.constant 0 : index
    %4 = vector.load %arg3[%c0_2, %c0_3] : memref<8x768xbf16, #tpu.memory_space<vmem>>, vector<8x768xbf16>
    %c0_4 = arith.constant 0 : index
    %c0_5 = arith.constant 0 : index
    %5 = vector.load %arg4[%c0_4, %c0_5] : memref<768x512xbf16, #tpu.memory_space<vmem>>, vector<768x512xbf16>
    %cst = arith.constant dense<0.000000e+00> : vector<8x512xf32>
    %6 = tpu.matmul %4, %5, %cst {dimension_numbers = #tpu.dot_dimension_numbers<[1], [0], [0], [1], [0, 0, 1, 1], [], []>} : vector<8x768xbf16>, vector<768x512xbf16>, vector<8x512xf32> -> vector<8x512xf32>
    %7 = arith.addf %3, %6 : vector<8x512xf32>
    %c0_6 = arith.constant 0 : index
    %c0_7 = arith.constant 0 : index
    %8 = vector.load %arg8[%c0_6, %c0_7] : memref<8x512xf32, #tpu.memory_space<vmem>>, vector<8x512xf32>
    tpu.vector_store %arg8[%c0_6, %c0_7], %7 {strides = array<i32>} : memref<8x512xf32, #tpu.memory_space<vmem>>, vector<8x512xf32>,
    %c2_i32 = arith.constant 2 : i32
    %9 = arith.cmpi eq, %arg2, %c2_i32 : i32
    %10 = arith.extui %9 : i1 to i32
    %c0_i32_8 = arith.constant 0 : i32
    %11 = arith.cmpi ne, %10, %c0_i32_8 : i32
    scf.if %11 {
      %c0_9 = arith.constant 0 : index
      %c0_10 = arith.constant 0 : index
      %12 = vector.load %arg8[%c0_9, %c0_10] : memref<8x512xf32, #tpu.memory_space<vmem>>, vector<8x512xf32>
      %c0_11 = arith.constant 0 : index
      %c0_12 = arith.constant 0 : index
      %13 = vector.load %arg5[%c0_11, %c0_12] : memref<1x512xf32, #tpu.memory_space<vmem>>, vector<1x512xf32>
      %14 = vector.broadcast %13 : vector<1x512xf32> to vector<8x512xf32>
      %15 = arith.mulf %12, %14 : vector<8x512xf32>
      %c0_13 = arith.constant 0 : index
      %c0_14 = arith.constant 0 : index
      %16 = vector.load %arg6[%c0_13, %c0_14] : memref<1x512xf32, #tpu.memory_space<vmem>>, vector<1x512xf32>
      %17 = vector.broadcast %16 : vector<1x512xf32> to vector<8x512xf32>
      %18 = arith.addf %15, %17 : vector<8x512xf32>
      %cst_15 = arith.constant 0.000000e+00 : f32
      %19 = vector.broadcast %cst_15 : f32 to vector<8x512xf32>
      %20 = arith.maximumf %18, %19 : vector<8x512xf32>
      %21 = arith.truncf %20 : vector<8x512xf32> to vector<8x512xbf16>
      %c0_16 = arith.constant 0 : index
      %c0_17 = arith.constant 0 : index
      %22 = vector.load %arg7[%c0_16, %c0_17] : memref<8x512xbf16, #tpu.memory_space<vmem>>, vector<8x512xbf16>
      tpu.vector_store %arg7[%c0_16, %c0_17], %21 {strides = array<i32>} : memref<8x512xbf16, #tpu.memory_space<vmem>>, vector<8x512xbf16>,
    } else {
    }
    return
  }
  func.func @transform_0(%arg0: i32, %arg1: i32, %arg2: i32) -> (i32, i32) {
    %c0_i32 = arith.constant 0 : i32
    return %arg0, %arg2 : i32, i32
  }
  func.func @transform_1(%arg0: i32, %arg1: i32, %arg2: i32) -> (i32, i32) {
    %c0_i32 = arith.constant 0 : i32
    return %arg2, %arg1 : i32, i32
  }
  func.func @transform_2(%arg0: i32, %arg1: i32, %arg2: i32) -> (i32, i32) {
    %c0_i32 = arith.constant 0 : i32
    %c0_i32_0 = arith.constant 0 : i32
    return %c0_i32, %arg1 : i32, i32
  }
  func.func @transform_3(%arg0: i32, %arg1: i32, %arg2: i32) -> (i32, i32) {
    %c0_i32 = arith.constant 0 : i32
    %c0_i32_0 = arith.constant 0 : i32
    return %c0_i32, %arg1 : i32, i32
  }
  func.func @transform_4(%arg0: i32, %arg1: i32, %arg2: i32) -> (i32, i32) {
    %c0_i32 = arith.constant 0 : i32
    return %arg0, %arg1 : i32, i32
  }
}

module attributes {stable_mosaic.version = 11 : i64} {
  func.func @_mm_bn_kernel(%arg0: i32, %arg1: i32, %arg2: i32, %arg3: memref<8x256xbf16, #tpu.memory_space<vmem>>, %arg4: memref<256x512xbf16, #tpu.memory_space<vmem>>, %arg5: memref<1x512xf32, #tpu.memory_space<vmem>>, %arg6: memref<1x512xf32, #tpu.memory_space<vmem>>, %arg7: memref<8x512xbf16, #tpu.memory_space<vmem>>, %arg8: memref<8x512xf32, #tpu.memory_space<vmem>>) attributes {dimension_semantics = [#tpu.dimension_semantics<parallel>, #tpu.dimension_semantics<parallel>, #tpu.dimension_semantics<arbitrary>], iteration_bounds = array<i64: 1, 1, 1>, scalar_prefetch = 0 : i64, scratch_operands = 1 : i64, tpu.core_type = #tpu.core_type<tc>, window_params = [{transform_indices = @transform_0, window_bounds = array<i64: 8, 256>}, {transform_indices = @transform_1, window_bounds = array<i64: 256, 512>}, {transform_indices = @transform_2, window_bounds = array<i64: 1, 512>}, {transform_indices = @transform_3, window_bounds = array<i64: 1, 512>}, {transform_indices = @transform_4, window_bounds = array<i64: 8, 512>}]} {
    %c0_i32 = arith.constant 0 : i32
    %0 = arith.cmpi eq, %arg2, %c0_i32 : i32
    %1 = arith.extui %0 : i1 to i32
    %c0_i32_0 = arith.constant 0 : i32
    %2 = arith.cmpi ne, %1, %c0_i32_0 : i32
    scf.if %2 {
      %cst_10 = arith.constant 0.000000e+00 : f32
      %12 = vector.broadcast %cst_10 : f32 to vector<8x512xf32>
      %c0_11 = arith.constant 0 : index
      %c0_12 = arith.constant 0 : index
      %13 = vector.load %arg8[%c0_11, %c0_12] : memref<8x512xf32, #tpu.memory_space<vmem>>, vector<8x512xf32>
      tpu.vector_store %arg8[%c0_11, %c0_12], %12 {strides = array<i32>} : memref<8x512xf32, #tpu.memory_space<vmem>>, vector<8x512xf32>,
    } else {
    }
    %c0 = arith.constant 0 : index
    %c0_1 = arith.constant 0 : index
    %3 = vector.load %arg8[%c0, %c0_1] : memref<8x512xf32, #tpu.memory_space<vmem>>, vector<8x512xf32>
    %c0_2 = arith.constant 0 : index
    %c0_3 = arith.constant 0 : index
    %4 = vector.load %arg3[%c0_2, %c0_3] : memref<8x256xbf16, #tpu.memory_space<vmem>>, vector<8x256xbf16>
    %c0_4 = arith.constant 0 : index
    %c0_5 = arith.constant 0 : index
    %5 = vector.load %arg4[%c0_4, %c0_5] : memref<256x512xbf16, #tpu.memory_space<vmem>>, vector<256x512xbf16>
    %cst = arith.constant dense<0.000000e+00> : vector<8x512xf32>
    %6 = tpu.matmul %4, %5, %cst {dimension_numbers = #tpu.dot_dimension_numbers<[1], [0], [0], [1], [0, 0, 1, 1], [], []>} : vector<8x256xbf16>, vector<256x512xbf16>, vector<8x512xf32> -> vector<8x512xf32>
    %7 = arith.addf %3, %6 : vector<8x512xf32>
    %c0_6 = arith.constant 0 : index
    %c0_7 = arith.constant 0 : index
    %8 = vector.load %arg8[%c0_6, %c0_7] : memref<8x512xf32, #tpu.memory_space<vmem>>, vector<8x512xf32>
    tpu.vector_store %arg8[%c0_6, %c0_7], %7 {strides = array<i32>} : memref<8x512xf32, #tpu.memory_space<vmem>>, vector<8x512xf32>,
    %c0_i32_8 = arith.constant 0 : i32
    %9 = arith.cmpi eq, %arg2, %c0_i32_8 : i32
    %10 = arith.extui %9 : i1 to i32
    %c0_i32_9 = arith.constant 0 : i32
    %11 = arith.cmpi ne, %10, %c0_i32_9 : i32
    scf.if %11 {
      %c0_10 = arith.constant 0 : index
      %c0_11 = arith.constant 0 : index
      %12 = vector.load %arg8[%c0_10, %c0_11] : memref<8x512xf32, #tpu.memory_space<vmem>>, vector<8x512xf32>
      %c0_12 = arith.constant 0 : index
      %c0_13 = arith.constant 0 : index
      %13 = vector.load %arg5[%c0_12, %c0_13] : memref<1x512xf32, #tpu.memory_space<vmem>>, vector<1x512xf32>
      %14 = vector.broadcast %13 : vector<1x512xf32> to vector<8x512xf32>
      %15 = arith.mulf %12, %14 : vector<8x512xf32>
      %c0_14 = arith.constant 0 : index
      %c0_15 = arith.constant 0 : index
      %16 = vector.load %arg6[%c0_14, %c0_15] : memref<1x512xf32, #tpu.memory_space<vmem>>, vector<1x512xf32>
      %17 = vector.broadcast %16 : vector<1x512xf32> to vector<8x512xf32>
      %18 = arith.addf %15, %17 : vector<8x512xf32>
      %19 = arith.truncf %18 : vector<8x512xf32> to vector<8x512xbf16>
      %c0_16 = arith.constant 0 : index
      %c0_17 = arith.constant 0 : index
      %20 = vector.load %arg7[%c0_16, %c0_17] : memref<8x512xbf16, #tpu.memory_space<vmem>>, vector<8x512xbf16>
      tpu.vector_store %arg7[%c0_16, %c0_17], %19 {strides = array<i32>} : memref<8x512xbf16, #tpu.memory_space<vmem>>, vector<8x512xbf16>,
    } else {
    }
    return
  }
  func.func @transform_0(%arg0: i32, %arg1: i32, %arg2: i32) -> (i32, i32) {
    %c0_i32 = arith.constant 0 : i32
    return %arg0, %arg2 : i32, i32
  }
  func.func @transform_1(%arg0: i32, %arg1: i32, %arg2: i32) -> (i32, i32) {
    %c0_i32 = arith.constant 0 : i32
    return %arg2, %arg1 : i32, i32
  }
  func.func @transform_2(%arg0: i32, %arg1: i32, %arg2: i32) -> (i32, i32) {
    %c0_i32 = arith.constant 0 : i32
    %c0_i32_0 = arith.constant 0 : i32
    return %c0_i32, %arg1 : i32, i32
  }
  func.func @transform_3(%arg0: i32, %arg1: i32, %arg2: i32) -> (i32, i32) {
    %c0_i32 = arith.constant 0 : i32
    %c0_i32_0 = arith.constant 0 : i32
    return %c0_i32, %arg1 : i32, i32
  }
  func.func @transform_4(%arg0: i32, %arg1: i32, %arg2: i32) -> (i32, i32) {
    %c0_i32 = arith.constant 0 : i32
    return %arg0, %arg1 : i32, i32
  }
}

module attributes {stable_mosaic.version = 11 : i64} {
  func.func @_mm_bn_res_kernel(%arg0: i32, %arg1: i32, %arg2: i32, %arg3: memref<8x768xbf16, #tpu.memory_space<vmem>>, %arg4: memref<768x512xbf16, #tpu.memory_space<vmem>>, %arg5: memref<1x512xf32, #tpu.memory_space<vmem>>, %arg6: memref<1x512xf32, #tpu.memory_space<vmem>>, %arg7: memref<8x512xbf16, #tpu.memory_space<vmem>>, %arg8: memref<8x512xbf16, #tpu.memory_space<vmem>>, %arg9: memref<8x512xf32, #tpu.memory_space<vmem>>) attributes {dimension_semantics = [#tpu.dimension_semantics<parallel>, #tpu.dimension_semantics<parallel>, #tpu.dimension_semantics<arbitrary>], iteration_bounds = array<i64: 1, 1, 6>, scalar_prefetch = 0 : i64, scratch_operands = 1 : i64, tpu.core_type = #tpu.core_type<tc>, window_params = [{transform_indices = @transform_0, window_bounds = array<i64: 8, 768>}, {transform_indices = @transform_1, window_bounds = array<i64: 768, 512>}, {transform_indices = @transform_2, window_bounds = array<i64: 1, 512>}, {transform_indices = @transform_3, window_bounds = array<i64: 1, 512>}, {transform_indices = @transform_4, window_bounds = array<i64: 8, 512>}, {transform_indices = @transform_5, window_bounds = array<i64: 8, 512>}]} {
    %c0_i32 = arith.constant 0 : i32
    %0 = arith.cmpi eq, %arg2, %c0_i32 : i32
    %1 = arith.extui %0 : i1 to i32
    %c0_i32_0 = arith.constant 0 : i32
    %2 = arith.cmpi ne, %1, %c0_i32_0 : i32
    scf.if %2 {
      %cst_9 = arith.constant 0.000000e+00 : f32
      %12 = vector.broadcast %cst_9 : f32 to vector<8x512xf32>
      %c0_10 = arith.constant 0 : index
      %c0_11 = arith.constant 0 : index
      %13 = vector.load %arg9[%c0_10, %c0_11] : memref<8x512xf32, #tpu.memory_space<vmem>>, vector<8x512xf32>
      tpu.vector_store %arg9[%c0_10, %c0_11], %12 {strides = array<i32>} : memref<8x512xf32, #tpu.memory_space<vmem>>, vector<8x512xf32>,
    } else {
    }
    %c0 = arith.constant 0 : index
    %c0_1 = arith.constant 0 : index
    %3 = vector.load %arg9[%c0, %c0_1] : memref<8x512xf32, #tpu.memory_space<vmem>>, vector<8x512xf32>
    %c0_2 = arith.constant 0 : index
    %c0_3 = arith.constant 0 : index
    %4 = vector.load %arg3[%c0_2, %c0_3] : memref<8x768xbf16, #tpu.memory_space<vmem>>, vector<8x768xbf16>
    %c0_4 = arith.constant 0 : index
    %c0_5 = arith.constant 0 : index
    %5 = vector.load %arg4[%c0_4, %c0_5] : memref<768x512xbf16, #tpu.memory_space<vmem>>, vector<768x512xbf16>
    %cst = arith.constant dense<0.000000e+00> : vector<8x512xf32>
    %6 = tpu.matmul %4, %5, %cst {dimension_numbers = #tpu.dot_dimension_numbers<[1], [0], [0], [1], [0, 0, 1, 1], [], []>} : vector<8x768xbf16>, vector<768x512xbf16>, vector<8x512xf32> -> vector<8x512xf32>
    %7 = arith.addf %3, %6 : vector<8x512xf32>
    %c0_6 = arith.constant 0 : index
    %c0_7 = arith.constant 0 : index
    %8 = vector.load %arg9[%c0_6, %c0_7] : memref<8x512xf32, #tpu.memory_space<vmem>>, vector<8x512xf32>
    tpu.vector_store %arg9[%c0_6, %c0_7], %7 {strides = array<i32>} : memref<8x512xf32, #tpu.memory_space<vmem>>, vector<8x512xf32>,
    %c5_i32 = arith.constant 5 : i32
    %9 = arith.cmpi eq, %arg2, %c5_i32 : i32
    %10 = arith.extui %9 : i1 to i32
    %c0_i32_8 = arith.constant 0 : i32
    %11 = arith.cmpi ne, %10, %c0_i32_8 : i32
    scf.if %11 {
      %c0_9 = arith.constant 0 : index
      %c0_10 = arith.constant 0 : index
      %12 = vector.load %arg9[%c0_9, %c0_10] : memref<8x512xf32, #tpu.memory_space<vmem>>, vector<8x512xf32>
      %c0_11 = arith.constant 0 : index
      %c0_12 = arith.constant 0 : index
      %13 = vector.load %arg5[%c0_11, %c0_12] : memref<1x512xf32, #tpu.memory_space<vmem>>, vector<1x512xf32>
      %14 = vector.broadcast %13 : vector<1x512xf32> to vector<8x512xf32>
      %15 = arith.mulf %12, %14 : vector<8x512xf32>
      %c0_13 = arith.constant 0 : index
      %c0_14 = arith.constant 0 : index
      %16 = vector.load %arg6[%c0_13, %c0_14] : memref<1x512xf32, #tpu.memory_space<vmem>>, vector<1x512xf32>
      %17 = vector.broadcast %16 : vector<1x512xf32> to vector<8x512xf32>
      %18 = arith.addf %15, %17 : vector<8x512xf32>
      %c0_15 = arith.constant 0 : index
      %c0_16 = arith.constant 0 : index
      %19 = vector.load %arg7[%c0_15, %c0_16] : memref<8x512xbf16, #tpu.memory_space<vmem>>, vector<8x512xbf16>
      %20 = arith.extf %19 : vector<8x512xbf16> to vector<8x512xf32>
      %21 = arith.addf %18, %20 : vector<8x512xf32>
      %cst_17 = arith.constant 0.000000e+00 : f32
      %22 = vector.broadcast %cst_17 : f32 to vector<8x512xf32>
      %23 = arith.maximumf %21, %22 : vector<8x512xf32>
      %24 = arith.truncf %23 : vector<8x512xf32> to vector<8x512xbf16>
      %c0_18 = arith.constant 0 : index
      %c0_19 = arith.constant 0 : index
      %25 = vector.load %arg8[%c0_18, %c0_19] : memref<8x512xbf16, #tpu.memory_space<vmem>>, vector<8x512xbf16>
      tpu.vector_store %arg8[%c0_18, %c0_19], %24 {strides = array<i32>} : memref<8x512xbf16, #tpu.memory_space<vmem>>, vector<8x512xbf16>,
    } else {
    }
    return
  }
  func.func @transform_0(%arg0: i32, %arg1: i32, %arg2: i32) -> (i32, i32) {
    %c0_i32 = arith.constant 0 : i32
    return %arg0, %arg2 : i32, i32
  }
  func.func @transform_1(%arg0: i32, %arg1: i32, %arg2: i32) -> (i32, i32) {
    %c0_i32 = arith.constant 0 : i32
    return %arg2, %arg1 : i32, i32
  }
  func.func @transform_2(%arg0: i32, %arg1: i32, %arg2: i32) -> (i32, i32) {
    %c0_i32 = arith.constant 0 : i32
    %c0_i32_0 = arith.constant 0 : i32
    return %c0_i32, %arg1 : i32, i32
  }
  func.func @transform_3(%arg0: i32, %arg1: i32, %arg2: i32) -> (i32, i32) {
    %c0_i32 = arith.constant 0 : i32
    %c0_i32_0 = arith.constant 0 : i32
    return %c0_i32, %arg1 : i32, i32
  }
  func.func @transform_4(%arg0: i32, %arg1: i32, %arg2: i32) -> (i32, i32) {
    %c0_i32 = arith.constant 0 : i32
    return %arg0, %arg1 : i32, i32
  }
  func.func @transform_5(%arg0: i32, %arg1: i32, %arg2: i32) -> (i32, i32) {
    %c0_i32 = arith.constant 0 : i32
    return %arg0, %arg1 : i32, i32
  }
}

module attributes {stable_mosaic.version = 11 : i64} {
  func.func @_mm_bn_kernel(%arg0: i32, %arg1: i32, %arg2: i32, %arg3: memref<8x768xbf16, #tpu.memory_space<vmem>>, %arg4: memref<768x512xbf16, #tpu.memory_space<vmem>>, %arg5: memref<1x512xf32, #tpu.memory_space<vmem>>, %arg6: memref<1x512xf32, #tpu.memory_space<vmem>>, %arg7: memref<8x512xbf16, #tpu.memory_space<vmem>>, %arg8: memref<8x512xf32, #tpu.memory_space<vmem>>) attributes {dimension_semantics = [#tpu.dimension_semantics<parallel>, #tpu.dimension_semantics<parallel>, #tpu.dimension_semantics<arbitrary>], iteration_bounds = array<i64: 1, 1, 6>, scalar_prefetch = 0 : i64, scratch_operands = 1 : i64, tpu.core_type = #tpu.core_type<tc>, window_params = [{transform_indices = @transform_0, window_bounds = array<i64: 8, 768>}, {transform_indices = @transform_1, window_bounds = array<i64: 768, 512>}, {transform_indices = @transform_2, window_bounds = array<i64: 1, 512>}, {transform_indices = @transform_3, window_bounds = array<i64: 1, 512>}, {transform_indices = @transform_4, window_bounds = array<i64: 8, 512>}]} {
    %c0_i32 = arith.constant 0 : i32
    %0 = arith.cmpi eq, %arg2, %c0_i32 : i32
    %1 = arith.extui %0 : i1 to i32
    %c0_i32_0 = arith.constant 0 : i32
    %2 = arith.cmpi ne, %1, %c0_i32_0 : i32
    scf.if %2 {
      %cst_9 = arith.constant 0.000000e+00 : f32
      %12 = vector.broadcast %cst_9 : f32 to vector<8x512xf32>
      %c0_10 = arith.constant 0 : index
      %c0_11 = arith.constant 0 : index
      %13 = vector.load %arg8[%c0_10, %c0_11] : memref<8x512xf32, #tpu.memory_space<vmem>>, vector<8x512xf32>
      tpu.vector_store %arg8[%c0_10, %c0_11], %12 {strides = array<i32>} : memref<8x512xf32, #tpu.memory_space<vmem>>, vector<8x512xf32>,
    } else {
    }
    %c0 = arith.constant 0 : index
    %c0_1 = arith.constant 0 : index
    %3 = vector.load %arg8[%c0, %c0_1] : memref<8x512xf32, #tpu.memory_space<vmem>>, vector<8x512xf32>
    %c0_2 = arith.constant 0 : index
    %c0_3 = arith.constant 0 : index
    %4 = vector.load %arg3[%c0_2, %c0_3] : memref<8x768xbf16, #tpu.memory_space<vmem>>, vector<8x768xbf16>
    %c0_4 = arith.constant 0 : index
    %c0_5 = arith.constant 0 : index
    %5 = vector.load %arg4[%c0_4, %c0_5] : memref<768x512xbf16, #tpu.memory_space<vmem>>, vector<768x512xbf16>
    %cst = arith.constant dense<0.000000e+00> : vector<8x512xf32>
    %6 = tpu.matmul %4, %5, %cst {dimension_numbers = #tpu.dot_dimension_numbers<[1], [0], [0], [1], [0, 0, 1, 1], [], []>} : vector<8x768xbf16>, vector<768x512xbf16>, vector<8x512xf32> -> vector<8x512xf32>
    %7 = arith.addf %3, %6 : vector<8x512xf32>
    %c0_6 = arith.constant 0 : index
    %c0_7 = arith.constant 0 : index
    %8 = vector.load %arg8[%c0_6, %c0_7] : memref<8x512xf32, #tpu.memory_space<vmem>>, vector<8x512xf32>
    tpu.vector_store %arg8[%c0_6, %c0_7], %7 {strides = array<i32>} : memref<8x512xf32, #tpu.memory_space<vmem>>, vector<8x512xf32>,
    %c5_i32 = arith.constant 5 : i32
    %9 = arith.cmpi eq, %arg2, %c5_i32 : i32
    %10 = arith.extui %9 : i1 to i32
    %c0_i32_8 = arith.constant 0 : i32
    %11 = arith.cmpi ne, %10, %c0_i32_8 : i32
    scf.if %11 {
      %c0_9 = arith.constant 0 : index
      %c0_10 = arith.constant 0 : index
      %12 = vector.load %arg8[%c0_9, %c0_10] : memref<8x512xf32, #tpu.memory_space<vmem>>, vector<8x512xf32>
      %c0_11 = arith.constant 0 : index
      %c0_12 = arith.constant 0 : index
      %13 = vector.load %arg5[%c0_11, %c0_12] : memref<1x512xf32, #tpu.memory_space<vmem>>, vector<1x512xf32>
      %14 = vector.broadcast %13 : vector<1x512xf32> to vector<8x512xf32>
      %15 = arith.mulf %12, %14 : vector<8x512xf32>
      %c0_13 = arith.constant 0 : index
      %c0_14 = arith.constant 0 : index
      %16 = vector.load %arg6[%c0_13, %c0_14] : memref<1x512xf32, #tpu.memory_space<vmem>>, vector<1x512xf32>
      %17 = vector.broadcast %16 : vector<1x512xf32> to vector<8x512xf32>
      %18 = arith.addf %15, %17 : vector<8x512xf32>
      %cst_15 = arith.constant 0.000000e+00 : f32
      %19 = vector.broadcast %cst_15 : f32 to vector<8x512xf32>
      %20 = arith.maximumf %18, %19 : vector<8x512xf32>
      %21 = arith.truncf %20 : vector<8x512xf32> to vector<8x512xbf16>
      %c0_16 = arith.constant 0 : index
      %c0_17 = arith.constant 0 : index
      %22 = vector.load %arg7[%c0_16, %c0_17] : memref<8x512xbf16, #tpu.memory_space<vmem>>, vector<8x512xbf16>
      tpu.vector_store %arg7[%c0_16, %c0_17], %21 {strides = array<i32>} : memref<8x512xbf16, #tpu.memory_space<vmem>>, vector<8x512xbf16>,
    } else {
    }
    return
  }
  func.func @transform_0(%arg0: i32, %arg1: i32, %arg2: i32) -> (i32, i32) {
    %c0_i32 = arith.constant 0 : i32
    return %arg0, %arg2 : i32, i32
  }
  func.func @transform_1(%arg0: i32, %arg1: i32, %arg2: i32) -> (i32, i32) {
    %c0_i32 = arith.constant 0 : i32
    return %arg2, %arg1 : i32, i32
  }
  func.func @transform_2(%arg0: i32, %arg1: i32, %arg2: i32) -> (i32, i32) {
    %c0_i32 = arith.constant 0 : i32
    %c0_i32_0 = arith.constant 0 : i32
    return %c0_i32, %arg1 : i32, i32
  }
  func.func @transform_3(%arg0: i32, %arg1: i32, %arg2: i32) -> (i32, i32) {
    %c0_i32 = arith.constant 0 : i32
    %c0_i32_0 = arith.constant 0 : i32
    return %c0_i32, %arg1 : i32, i32
  }
  func.func @transform_4(%arg0: i32, %arg1: i32, %arg2: i32) -> (i32, i32) {
    %c0_i32 = arith.constant 0 : i32
    return %arg0, %arg1 : i32, i32
  }
}

</mosaic_0001>

<bundles_post_ra>
// kernel: resnet18_backbone.22
= control target key start
LH: loop header
LB: loop body
LE: loop exit
PB: predicated region body
PF: predicated region fallthrough
CT: control target
= control target key end

     0   :  { %s278_s0 = inlined_call_operand.vmem [shape: bf16[16,512], index: 0, kind: input, shape index: {}]   ;;  %s279_s1 = inlined_call_operand.vmem [shape: bf16[16,512], index: 1, kind: input, shape index: {}]   ;;  %s280_s2 = inlined_call_operand.vmem [shape: bf16[16,512], index: 2, kind: input, shape index: {}]   ;;  %s281_s3 = inlined_call_operand.vmem [shape: bf16[16,512], index: 3, kind: input, shape index: {}]   ;;  %s282_s4 = inlined_call_operand.vmem [shape: bf16[16,512], index: 4, kind: input, shape index: {}]   ;;  %s283_s5 = inlined_call_operand.vmem [shape: bf16[16,512], index: 5, kind: input, shape index: {}]   ;;  %s284_s6 = inlined_call_operand.vmem [shape: bf16[16,512], index: 6, kind: input, shape index: {}]   ;;  %s285_s7 = inlined_call_operand.vmem [shape: bf16[16,512], index: 7, kind: input, shape index: {}]   ;;  %s286_s8 = inlined_call_operand.vmem [shape: bf16[16,512], index: 8, kind: input, shape index: {}]   ;;  %s287_s9 = inlined_call_operand.vmem [shape: bf16[16,512], index: 9, kind: output, shape index: {}]  }
   0x1   :  { %v32_v0 = vld [vmem:[%s278_s0] sm:$0xff]  ;;  %v33_v6 = vld [vmem:[%s278_s0 + $0x8] sm:$0xff]  ;;  %v34_v15 = vld [vmem:[%s278_s0 + $0x10] sm:$0xff] }
   0x2   :  { %v36_v1 = vld [vmem:[%s279_s1] sm:$0xff]  ;;  %v37_v7 = vld [vmem:[%s279_s1 + $0x8] sm:$0xff]  ;;  %v38_v16 = vld [vmem:[%s279_s1 + $0x10] sm:$0xff] }
   0x3   :  { %v44_v2 = vld [vmem:[%s280_s2] sm:$0xff]  ;;  %v40_v3 = vmax.bf16 %v36_v1, %v32_v0  ;;  %v45_v8 = vld [vmem:[%s280_s2 + $0x8] sm:$0xff]  ;;  %v41_v10 = vmax.bf16 %v37_v7, %v33_v6  ;;  %v46_v17 = vld [vmem:[%s280_s2 + $0x10] sm:$0xff]  ;;  %v42_v20 = vmax.bf16 %v38_v16, %v34_v15 }
   0x4   :  { %v52_v4 = vld [vmem:[%s281_s3] sm:$0xff]  ;;  %v53_v13 = vld [vmem:[%s281_s3 + $0x8] sm:$0xff]  ;;  %v54_v24 = vld [vmem:[%s281_s3 + $0x10] sm:$0xff] }
   0x5   :  { %v48_v5 = vmax.bf16 %v44_v2, %v40_v3  ;;  %v60_v9 = vld [vmem:[%s282_s4] sm:$0xff]  ;;  %v49_v14 = vmax.bf16 %v45_v8, %v41_v10  ;;  %v61_v19 = vld [vmem:[%s282_s4 + $0x8] sm:$0xff]  ;;  %v50_v26 = vmax.bf16 %v46_v17, %v42_v20  ;;  %v35_v27 = vld [vmem:[%s278_s0 + $0x18] sm:$0xff] }
   0x6   :  { %v68_v12 = vld [vmem:[%s283_s5] sm:$0xff]  ;;  %v69_v23 = vld [vmem:[%s283_s5 + $0x8] sm:$0xff]  ;;  %v39_v28 = vld [vmem:[%s279_s1 + $0x18] sm:$0xff] }
   0x7   :  { %v56_v11 = vmax.bf16 %v52_v4, %v48_v5  ;;  %v76_v21 = vld [vmem:[%s284_s6] sm:$0xff]  ;;  %v57_v22 = vmax.bf16 %v53_v13, %v49_v14  ;;  %v47_v29 = vld [vmem:[%s280_s2 + $0x18] sm:$0xff]  ;;  %v62_v32 = vld [vmem:[%s282_s4 + $0x10] sm:$0xff]  ;;  %v43_v33 = vmax.bf16 %v39_v28, %v35_v27  ;;  %v58_v36 = vmax.bf16 %v54_v24, %v50_v26 }
   0x8   :  { %v84_v30 = vld [vmem:[%s285_s7] sm:$0xff]  ;;  %v77_v35 = vld [vmem:[%s284_s6 + $0x8] sm:$0xff]  ;;  %v55_v37 = vld [vmem:[%s281_s3 + $0x18] sm:$0xff] }
   0x9   :  { %v64_v18 = vmax.bf16 %v60_v9, %v56_v11  ;;  %v65_v31 = vmax.bf16 %v61_v19, %v57_v22  ;;  %v92_v38 = vld [vmem:[%s286_s8] sm:$0xff]  ;;  %v70_v40 = vld [vmem:[%s283_s5 + $0x10] sm:$0xff]  ;;  %v51_v41 = vmax.bf16 %v47_v29, %v43_v33  ;;  %v85_v43 = vld [vmem:[%s285_s7 + $0x8] sm:$0xff]  ;;  %v66_v44 = vmax.bf16 %v62_v32, %v58_v36 }
   0xa   :  { %v63_v45 = vld [vmem:[%s282_s4 + $0x18] sm:$0xff]  ;;  %v78_v47 = vld [vmem:[%s284_s6 + $0x10] sm:$0xff]  ;;  %v93_v50 = vld [vmem:[%s286_s8 + $0x8] sm:$0xff] }
   0xb   :  { %v72_v25 = vmax.bf16 %v68_v12, %v64_v18  ;;  %v73_v39 = vmax.bf16 %v69_v23, %v65_v31  ;;  %v59_v48 = vmax.bf16 %v55_v37, %v51_v41  ;;  %v74_v51 = vmax.bf16 %v70_v40, %v66_v44  ;;  %v71_v52 = vld [vmem:[%s283_s5 + $0x18] sm:$0xff]  ;;  %v86_v54 = vld [vmem:[%s285_s7 + $0x10] sm:$0xff] }
   0xc   :  { %v79_v57 = vld [vmem:[%s284_s6 + $0x18] sm:$0xff]  ;;  %v94_v59 = vld [vmem:[%s286_s8 + $0x10] sm:$0xff] }
   0xd   :  { %v80_v34 = vmax.bf16 %v76_v21, %v72_v25  ;;  %v81_v46 = vmax.bf16 %v77_v35, %v73_v39  ;;  %v67_v55 = vmax.bf16 %v63_v45, %v59_v48  ;;  %v82_v56 = vmax.bf16 %v78_v47, %v74_v51  ;;  %v87_v62 = vld [vmem:[%s285_s7 + $0x18] sm:$0xff] }
   0xe   :  { %v95_v1 = vld [vmem:[%s286_s8 + $0x18] sm:$0xff] }
   0xf   :  { %v88_v42 = vmax.bf16 %v84_v30, %v80_v34  ;;  %v89_v53 = vmax.bf16 %v85_v43, %v81_v46  ;;  %v75_v60 = vmax.bf16 %v71_v52, %v67_v55  ;;  %v90_v61 = vmax.bf16 %v86_v54, %v82_v56 }
  0x11   :  { %v96_v49 = vmax.bf16 %v92_v38, %v88_v42  ;;  %v97_v58 = vmax.bf16 %v93_v50, %v89_v53  ;;  %v83_v63 = vmax.bf16 %v79_v57, %v75_v60  ;;  %v98_v0 = vmax.bf16 %v94_v59, %v90_v61 }
  0x13   :  { %100 = vst [vmem:[%s287_s9] sm:$0xff] %v96_v49  ;;  %101 = vst [vmem:[%s287_s9 + $0x8] sm:$0xff] %v97_v58  ;;  %v91_v2 = vmax.bf16 %v87_v62, %v83_v63 }
  0x14   :  { %102 = vst [vmem:[%s287_s9 + $0x10] sm:$0xff] %v98_v0 }
  0x15   :  { %v99_v3 = vmax.bf16 %v95_v1, %v91_v2 }
  0x17   :  { %103 = vst [vmem:[%s287_s9 + $0x18] sm:$0xff] %v99_v3 }

// kernel: resnet18_backbone.21
= control target key start
LH: loop header
LB: loop body
LE: loop exit
PB: predicated region body
PF: predicated region fallthrough
CT: control target
= control target key end

     0   :  { %v2222_v0 = vmov 0   ;;  %s2754_s1 = inlined_call_operand.vmem [shape: bf16[256,128], index: 1, kind: input, shape index: {}]   ;;  %s2755_s0 = inlined_call_operand.vmem [shape: bf16[512,256], index: 0, kind: input, shape index: {}]   ;;  %s2756_s2 = inlined_call_operand.vmem [shape: f32[1,128], index: 2, kind: input, shape index: {}]   ;;  %s2757_s3 = inlined_call_operand.vmem [shape: f32[1,128], index: 3, kind: input, shape index: {}]   ;;  %s2758_s4 = inlined_call_operand.vmem [shape: bf16[512,128], index: 4, kind: output, shape index: {}]  }
   0x1   :  { %662 = vmatprep.subr.bf16.mxu0 %v2222_v0  ;;  %2077 = vmatprep.subr.bf16.mxu1 %v2222_v0  ;;  %v2110_v1 = vld [vmem:[%s2754_s1] sm:$0xff]   ;;  %v2111_v2 = vld [vmem:[%s2754_s1 + $0x8] sm:$0xff]   ;;  %v2112_v3 = vld [vmem:[%s2754_s1 + $0x10] sm:$0xff]  }
   0x2   :  { %663 = vmatpush1.bf16.msra.mxu0 %v2110_v1  ;;  %2093 = vmatpush1.bf16.msra.mxu1 %v2110_v1  ;;  %v2113_v4 = vld [vmem:[%s2754_s1 + $0x18] sm:$0xff]   ;;  %v2114_v5 = vld [vmem:[%s2754_s1 + $0x20] sm:$0xff]   ;;  %v2115_v7 = vld [vmem:[%s2754_s1 + $0x28] sm:$0xff]  }
   0x3   :  { %664 = vmatprep.subr.bf16.mxu0 %v2222_v0  ;;  %2078 = vmatprep.subr.bf16.mxu1 %v2222_v0  ;;  %v2128_v6 = vld [vmem:[%s2755_s0 + $0x4] ss:$8 sps:$4 sm:$0xff]   ;;  %v2116_v9 = vld [vmem:[%s2754_s1 + $0x30] sm:$0xff]   ;;  %v2117_v10 = vld [vmem:[%s2754_s1 + $0x38] sm:$0xff]  }
   0x4   :  { %v2131_v8 = vld [vmem:[%s2755_s0 + $0x104] ss:$8 sps:$4 sm:$0xff]   ;;  %694 = vmatprep.mubr.bf16.mxu0 %v2128_v6  ;;  %v2120_v13 = vld [vmem:[%s2754_s1 + $0x50] sm:$0xff]   ;;  %v2121_v14 = vld [vmem:[%s2754_s1 + $0x58] sm:$0xff]  }
   0x5   :  { %822 = vmatprep.mubr.bf16.mxu1 %v2131_v8  ;;  %v2118_v11 = vld [vmem:[%s2754_s1 + $0x40] sm:$0xff]   ;;  %v2119_v12 = vld [vmem:[%s2754_s1 + $0x48] sm:$0xff]   ;;  %v2124_v17 = vld [vmem:[%s2754_s1 + $0x70] sm:$0xff]  }
   0x6   :  { %665 = vmatpush1.bf16.msra.mxu0 %v2111_v2  ;;  %2094 = vmatpush1.bf16.msra.mxu1 %v2111_v2  ;;  %v2122_v15 = vld [vmem:[%s2754_s1 + $0x60] sm:$0xff]   ;;  %v2123_v16 = vld [vmem:[%s2754_s1 + $0x68] sm:$0xff]   ;;  %v2125_v18 = vld [vmem:[%s2754_s1 + $0x78] sm:$0xff]  }
   0x7   :  { %666 = vmatprep.subr.bf16.mxu0 %v2222_v0  ;;  %2079 = vmatprep.subr.bf16.mxu1 %v2222_v0  ;;  %v2126_v19 = vld [vmem:[%s2755_s0] ss:$8 sps:$4 sm:$0xff]   ;;  %v2132_v21 = vld [vmem:[%s2755_s0 + $0x14] ss:$8 sps:$4 sm:$0xff]   ;;  %v2136_v23 = vld [vmem:[%s2755_s0 + $0x10] ss:$8 sps:$4 sm:$0xff]  }
   0x8   :  { %v2129_v20 = vld [vmem:[%s2755_s0 + $0x100] ss:$8 sps:$4 sm:$0xff]   ;;  %v2134_v22 = vld [vmem:[%s2755_s0 + $0x114] ss:$8 sps:$4 sm:$0xff]   ;;  %v2137_v24 = vld [vmem:[%s2755_s0 + $0x110] ss:$8 sps:$4 sm:$0xff]  }
   0x9   :  { %v2138_v25 = vld [vmem:[%s2755_s0 + $0x24] ss:$8 sps:$4 sm:$0xff]   ;;  %v2142_v27 = vld [vmem:[%s2755_s0 + $0x20] ss:$8 sps:$4 sm:$0xff]   ;;  %v2144_v29 = vld [vmem:[%s2755_s0 + $0x34] ss:$8 sps:$4 sm:$0xff]  }
   0xa   :  { %667 = vmatpush1.bf16.msra.mxu0 %v2112_v3  ;;  %2095 = vmatpush1.bf16.msra.mxu1 %v2112_v3  ;;  %v2140_v26 = vld [vmem:[%s2755_s0 + $0x124] ss:$8 sps:$4 sm:$0xff]   ;;  %v2143_v28 = vld [vmem:[%s2755_s0 + $0x120] ss:$8 sps:$4 sm:$0xff]   ;;  %v2146_v30 = vld [vmem:[%s2755_s0 + $0x134] ss:$8 sps:$4 sm:$0xff]  }
   0xb   :  { %668 = vmatprep.subr.bf16.mxu0 %v2222_v0  ;;  %2080 = vmatprep.subr.bf16.mxu1 %v2222_v0  ;;  %v2148_v31 = vld [vmem:[%s2755_s0 + $0x30] ss:$8 sps:$4 sm:$0xff]   ;;  %v2150_v33 = vld [vmem:[%s2755_s0 + $0x44] ss:$8 sps:$4 sm:$0xff]   ;;  %v2154_v35 = vld [vmem:[%s2755_s0 + $0x40] ss:$8 sps:$4 sm:$0xff]  }
   0xc   :  { %v2149_v32 = vld [vmem:[%s2755_s0 + $0x130] ss:$8 sps:$4 sm:$0xff]   ;;  %v2152_v34 = vld [vmem:[%s2755_s0 + $0x144] ss:$8 sps:$4 sm:$0xff]   ;;  %v2155_v36 = vld [vmem:[%s2755_s0 + $0x140] ss:$8 sps:$4 sm:$0xff]  }
   0xd   :  { %v2156_v37 = vld [vmem:[%s2755_s0 + $0x54] ss:$8 sps:$4 sm:$0xff]   ;;  %v2160_v39 = vld [vmem:[%s2755_s0 + $0x50] ss:$8 sps:$4 sm:$0xff]   ;;  %v2162_v41 = vld [vmem:[%s2755_s0 + $0x64] ss:$8 sps:$4 sm:$0xff]  }
   0xe   :  { %669 = vmatpush1.bf16.msra.mxu0 %v2113_v4  ;;  %2096 = vmatpush1.bf16.msra.mxu1 %v2113_v4  ;;  %v2158_v38 = vld [vmem:[%s2755_s0 + $0x154] ss:$8 sps:$4 sm:$0xff]   ;;  %v2161_v40 = vld [vmem:[%s2755_s0 + $0x150] ss:$8 sps:$4 sm:$0xff]   ;;  %v2164_v42 = vld [vmem:[%s2755_s0 + $0x164] ss:$8 sps:$4 sm:$0xff]  }
   0xf   :  { %670 = vmatprep.subr.bf16.mxu0 %v2222_v0  ;;  %2081 = vmatprep.subr.bf16.mxu1 %v2222_v0  ;;  %v2166_v43 = vld [vmem:[%s2755_s0 + $0x60] ss:$8 sps:$4 sm:$0xff]   ;;  %v2168_v45 = vld [vmem:[%s2755_s0 + $0x74] ss:$8 sps:$4 sm:$0xff]   ;;  %v2172_v47 = vld [vmem:[%s2755_s0 + $0x70] ss:$8 sps:$4 sm:$0xff]  }
  0x10   :  { %v2167_v44 = vld [vmem:[%s2755_s0 + $0x160] ss:$8 sps:$4 sm:$0xff]   ;;  %v2170_v46 = vld [vmem:[%s2755_s0 + $0x174] ss:$8 sps:$4 sm:$0xff]   ;;  %v2173_v48 = vld [vmem:[%s2755_s0 + $0x170] ss:$8 sps:$4 sm:$0xff]  }
  0x11   :  { %v2174_v49 = vld [vmem:[%s2755_s0 + $0x84] ss:$8 sps:$4 sm:$0xff]   ;;  %v2178_v51 = vld [vmem:[%s2755_s0 + $0x80] ss:$8 sps:$4 sm:$0xff]   ;;  %v2180_v53 = vld [vmem:[%s2755_s0 + $0x94] ss:$8 sps:$4 sm:$0xff]  }
  0x12   :  { %671 = vmatpush1.bf16.msra.mxu0 %v2114_v5  ;;  %2097 = vmatpush1.bf16.msra.mxu1 %v2114_v5  ;;  %v2176_v50 = vld [vmem:[%s2755_s0 + $0x184] ss:$8 sps:$4 sm:$0xff]   ;;  %v2179_v52 = vld [vmem:[%s2755_s0 + $0x180] ss:$8 sps:$4 sm:$0xff]   ;;  %v2182_v54 = vld [vmem:[%s2755_s0 + $0x194] ss:$8 sps:$4 sm:$0xff]  }
  0x13   :  { %672 = vmatprep.subr.bf16.mxu0 %v2222_v0  ;;  %2082 = vmatprep.subr.bf16.mxu1 %v2222_v0  ;;  %v2184_v55 = vld [vmem:[%s2755_s0 + $0x90] ss:$8 sps:$4 sm:$0xff]   ;;  %v2186_v57 = vld [vmem:[%s2755_s0 + $0xa4] ss:$8 sps:$4 sm:$0xff]   ;;  %v2190_v59 = vld [vmem:[%s2755_s0 + $0xa0] ss:$8 sps:$4 sm:$0xff]  }
  0x14   :  { %v2185_v56 = vld [vmem:[%s2755_s0 + $0x190] ss:$8 sps:$4 sm:$0xff]   ;;  %v2188_v58 = vld [vmem:[%s2755_s0 + $0x1a4] ss:$8 sps:$4 sm:$0xff]   ;;  %v2191_v60 = vld [vmem:[%s2755_s0 + $0x1a0] ss:$8 sps:$4 sm:$0xff]  }
  0x15   :  { %v2192_v61 = vld [vmem:[%s2755_s0 + $0xb4] ss:$8 sps:$4 sm:$0xff]   ;;  %v2196_v63 = vld [vmem:[%s2755_s0 + $0xb0] ss:$8 sps:$4 sm:$0xff]   ;;  %v2198_v1 = vld [vmem:[%s2755_s0 + $0xc4] ss:$8 sps:$4 sm:$0xff]  }
  0x16   :  { %673 = vmatpush1.bf16.msra.mxu0 %v2115_v7  ;;  %2098 = vmatpush1.bf16.msra.mxu1 %v2115_v7  ;;  %v2194_v62 = vld [vmem:[%s2755_s0 + $0x1b4] ss:$8 sps:$4 sm:$0xff]   ;;  %v2200_v2 = vld [vmem:[%s2755_s0 + $0x1c4] ss:$8 sps:$4 sm:$0xff]   ;;  %v2202_v3 = vld [vmem:[%s2755_s0 + $0xc0] ss:$8 sps:$4 sm:$0xff]  }
  0x17   :  { %674 = vmatprep.subr.bf16.mxu0 %v2222_v0  ;;  %2083 = vmatprep.subr.bf16.mxu1 %v2222_v0  ;;  %v2203_v4 = vld [vmem:[%s2755_s0 + $0x1c0] ss:$8 sps:$4 sm:$0xff]   ;;  %v2204_v5 = vld [vmem:[%s2755_s0 + $0xd4] ss:$8 sps:$4 sm:$0xff]   ;;  %v2208_v7 = vld [vmem:[%s2755_s0 + $0xd0] ss:$8 sps:$4 sm:$0xff]  }
  0x18   :  { %v2206_v6 = vld [vmem:[%s2755_s0 + $0x1d4] ss:$8 sps:$4 sm:$0xff]   ;;  %v2209_v8 = vld [vmem:[%s2755_s0 + $0x1d0] ss:$8 sps:$4 sm:$0xff]  }
  0x1a   :  { %675 = vmatpush1.bf16.msra.mxu0 %v2116_v9  ;;  %2099 = vmatpush1.bf16.msra.mxu1 %v2116_v9  ;;  %v2210_v9 = vld [vmem:[%s2755_s0 + $0xe4] ss:$8 sps:$4 sm:$0xff]  }
  0x1b   :  { %676 = vmatprep.subr.bf16.mxu0 %v2222_v0  ;;  %2084 = vmatprep.subr.bf16.mxu1 %v2222_v0 }
  0x1e   :  { %677 = vmatpush1.bf16.msra.mxu0 %v2117_v10  ;;  %2100 = vmatpush1.bf16.msra.mxu1 %v2117_v10  ;;  %v2212_v10 = vld [vmem:[%s2755_s0 + $0x1e4] ss:$8 sps:$4 sm:$0xff]  }
  0x1f   :  { %678 = vmatprep.subr.bf16.mxu0 %v2222_v0  ;;  %2085 = vmatprep.subr.bf16.mxu1 %v2222_v0 }
  0x22   :  { %679 = vmatpush1.bf16.msra.mxu0 %v2118_v11  ;;  %2101 = vmatpush1.bf16.msra.mxu1 %v2118_v11  ;;  %v2214_v11 = vld [vmem:[%s2755_s0 + $0xe0] ss:$8 sps:$4 sm:$0xff]  }
  0x23   :  { %680 = vmatprep.subr.bf16.mxu0 %v2222_v0  ;;  %2086 = vmatprep.subr.bf16.mxu1 %v2222_v0 }
  0x26   :  { %681 = vmatpush1.bf16.msra.mxu0 %v2119_v12  ;;  %2102 = vmatpush1.bf16.msra.mxu1 %v2119_v12  ;;  %v2215_v12 = vld [vmem:[%s2755_s0 + $0x1e0] ss:$8 sps:$4 sm:$0xff]  }
  0x27   :  { %682 = vmatprep.subr.bf16.mxu0 %v2222_v0  ;;  %2087 = vmatprep.subr.bf16.mxu1 %v2222_v0 }
  0x2a   :  { %683 = vmatpush1.bf16.msra.mxu0 %v2120_v13  ;;  %2103 = vmatpush1.bf16.msra.mxu1 %v2120_v13  ;;  %v2216_v13 = vld [vmem:[%s2755_s0 + $0xf4] ss:$8 sps:$4 sm:$0xff]  }
  0x2b   :  { %684 = vmatprep.subr.bf16.mxu0 %v2222_v0  ;;  %2088 = vmatprep.subr.bf16.mxu1 %v2222_v0 }
  0x2e   :  { %685 = vmatpush1.bf16.msra.mxu0 %v2121_v14  ;;  %2104 = vmatpush1.bf16.msra.mxu1 %v2121_v14  ;;  %v2218_v14 = vld [vmem:[%s2755_s0 + $0x1f4] ss:$8 sps:$4 sm:$0xff]  }
  0x2f   :  { %686 = vmatprep.subr.bf16.mxu0 %v2222_v0  ;;  %2089 = vmatprep.subr.bf16.mxu1 %v2222_v0 }
  0x32   :  { %687 = vmatpush1.bf16.msra.mxu0 %v2122_v15  ;;  %2105 = vmatpush1.bf16.msra.mxu1 %v2122_v15  ;;  %v2220_v15 = vld [vmem:[%s2755_s0 + $0xf0] ss:$8 sps:$4 sm:$0xff]  }
  0x33   :  { %688 = vmatprep.subr.bf16.mxu0 %v2222_v0  ;;  %2090 = vmatprep.subr.bf16.mxu1 %v2222_v0 }
  0x36   :  { %689 = vmatpush1.bf16.msra.mxu0 %v2123_v16  ;;  %2106 = vmatpush1.bf16.msra.mxu1 %v2123_v16  ;;  %v2221_v16 = vld [vmem:[%s2755_s0 + $0x1f0] ss:$8 sps:$4 sm:$0xff]  }
  0x37   :  { %690 = vmatprep.subr.bf16.mxu0 %v2222_v0  ;;  %2091 = vmatprep.subr.bf16.mxu1 %v2222_v0 }
  0x3a   :  { %691 = vmatpush1.bf16.msra.mxu0 %v2124_v17  ;;  %2107 = vmatpush1.bf16.msra.mxu1 %v2124_v17  ;;  %v2523_v17 = vld [vmem:[%s2756_s2] ss:$0 sm:$0xff] }
  0x3b   :  { %692 = vmatprep.subr.bf16.mxu0 %v2222_v0  ;;  %2092 = vmatprep.subr.bf16.mxu1 %v2222_v0  ;;  %v2197_v0 = vld [vmem:[%s2755_s0 + $0x1b0] ss:$8 sps:$4 sm:$0xff]  }
  0x3e   :  { %693 = vmatpush1.bf16.msra.mxu0 %v2125_v18  ;;  %2108 = vmatpush1.bf16.msra.mxu1 %v2125_v18 }
  0x41   :  { %695 = vmatmul.mubr.bf16.vlgmr.msra.gmra.mrb[0].mxu0 %v2126_v19  ;;  %823 = vmatmul.mubr.bf16.vlgmr.msra.gmra.mrb[0].mxu1 %v2129_v20  ;;  %v2528_v19 = vld [vmem:[%s2757_s3] ss:$0 sm:$0xff] }
  0x42   :  { %702 = vmatprep.mubr.bf16.mxu0 %v2132_v21  ;;  %830 = vmatprep.mubr.bf16.mxu1 %v2134_v22 }
  0x49   :  { %703 = vmatmul.mubr.bf16.gmra.mrb[4].mxu0 %v2136_v23  ;;  %831 = vmatmul.mubr.bf16.gmra.mrb[4].mxu1 %v2137_v24 }
  0x4a   :  { %710 = vmatprep.mubr.bf16.mxu0 %v2138_v25  ;;  %838 = vmatprep.mubr.bf16.mxu1 %v2140_v26 }
  0x51   :  { %711 = vmatmul.mubr.bf16.gmra.mrb[8].mxu0 %v2142_v27  ;;  %839 = vmatmul.mubr.bf16.gmra.mrb[8].mxu1 %v2143_v28 }
  0x52   :  { %718 = vmatprep.mubr.bf16.mxu0 %v2144_v29  ;;  %846 = vmatprep.mubr.bf16.mxu1 %v2146_v30 }
  0x59   :  { %719 = vmatmul.mubr.bf16.gmra.mrb[12].mxu0 %v2148_v31  ;;  %847 = vmatmul.mubr.bf16.gmra.mrb[12].mxu1 %v2149_v32 }
  0x5a   :  { %726 = vmatprep.mubr.bf16.mxu0 %v2150_v33  ;;  %854 = vmatprep.mubr.bf16.mxu1 %v2152_v34 }
  0x61   :  { %727 = vmatmul.mubr.bf16.gmra.mrb[16].mxu0 %v2154_v35  ;;  %855 = vmatmul.mubr.bf16.gmra.mrb[16].mxu1 %v2155_v36 }
  0x62   :  { %734 = vmatprep.mubr.bf16.mxu0 %v2156_v37  ;;  %862 = vmatprep.mubr.bf16.mxu1 %v2158_v38 }
  0x69   :  { %735 = vmatmul.mubr.bf16.gmra.mrb[20].mxu0 %v2160_v39  ;;  %863 = vmatmul.mubr.bf16.gmra.mrb[20].mxu1 %v2161_v40 }
  0x6a   :  { %742 = vmatprep.mubr.bf16.mxu0 %v2162_v41  ;;  %870 = vmatprep.mubr.bf16.mxu1 %v2164_v42 }
  0x71   :  { %743 = vmatmul.mubr.bf16.gmra.mrb[24].mxu0 %v2166_v43  ;;  %871 = vmatmul.mubr.bf16.gmra.mrb[24].mxu1 %v2167_v44 }
  0x72   :  { %750 = vmatprep.mubr.bf16.mxu0 %v2168_v45  ;;  %878 = vmatprep.mubr.bf16.mxu1 %v2170_v46 }
  0x79   :  { %751 = vmatmul.mubr.bf16.gmra.mrb[28].mxu0 %v2172_v47  ;;  %879 = vmatmul.mubr.bf16.gmra.mrb[28].mxu1 %v2173_v48 }
  0x7a   :  { %758 = vmatprep.mubr.bf16.mxu0 %v2174_v49  ;;  %886 = vmatprep.mubr.bf16.mxu1 %v2176_v50 }
  0x81   :  { %759 = vmatmul.mubr.bf16.gmra.mrb[32].mxu0 %v2178_v51  ;;  %887 = vmatmul.mubr.bf16.gmra.mrb[32].mxu1 %v2179_v52 }
  0x82   :  { %766 = vmatprep.mubr.bf16.mxu0 %v2180_v53  ;;  %894 = vmatprep.mubr.bf16.mxu1 %v2182_v54 }
  0x89   :  { %767 = vmatmul.mubr.bf16.gmra.mrb[36].mxu0 %v2184_v55  ;;  %895 = vmatmul.mubr.bf16.gmra.mrb[36].mxu1 %v2185_v56 }
  0x8a   :  { %774 = vmatprep.mubr.bf16.mxu0 %v2186_v57  ;;  %902 = vmatprep.mubr.bf16.mxu1 %v2188_v58 }
  0x91   :  { %775 = vmatmul.mubr.bf16.gmra.mrb[40].mxu0 %v2190_v59  ;;  %903 = vmatmul.mubr.bf16.gmra.mrb[40].mxu1 %v2191_v60 }
  0x92   :  { %782 = vmatprep.mubr.bf16.mxu0 %v2192_v61  ;;  %910 = vmatprep.mubr.bf16.mxu1 %v2194_v62 }
  0x99   :  { %783 = vmatmul.mubr.bf16.gmra.mrb[44].mxu0 %v2196_v63  ;;  %911 = vmatmul.mubr.bf16.gmra.mrb[44].mxu1 %v2197_v0 }
  0x9a   :  { %790 = vmatprep.mubr.bf16.mxu0 %v2198_v1  ;;  %918 = vmatprep.mubr.bf16.mxu1 %v2200_v2 }
  0xa1   :  { %791 = vmatmul.mubr.bf16.gmra.mrb[48].mxu0 %v2202_v3  ;;  %919 = vmatmul.mubr.bf16.gmra.mrb[48].mxu1 %v2203_v4 }
  0xa2   :  { %798 = vmatprep.mubr.bf16.mxu0 %v2204_v5  ;;  %926 = vmatprep.mubr.bf16.mxu1 %v2206_v6 }
  0xa9   :  { %799 = vmatmul.mubr.bf16.gmra.mrb[52].mxu0 %v2208_v7  ;;  %927 = vmatmul.mubr.bf16.gmra.mrb[52].mxu1 %v2209_v8 }
  0xaa   :  { %806 = vmatprep.mubr.bf16.mxu0 %v2210_v9  ;;  %934 = vmatprep.mubr.bf16.mxu1 %v2212_v10 }
  0xb1   :  { %807 = vmatmul.mubr.bf16.gmra.mrb[56].mxu0 %v2214_v11  ;;  %935 = vmatmul.mubr.bf16.gmra.mrb[56].mxu1 %v2215_v12 }
  0xb2   :  { %814 = vmatprep.mubr.bf16.mxu0 %v2216_v13  ;;  %942 = vmatprep.mubr.bf16.mxu1 %v2218_v14 }
  0xb9   :  { %815 = vmatmul.mubr.bf16.gmra.mrb[60].mxu0 %v2220_v15  ;;  %943 = vmatmul.mubr.bf16.gmra.mrb[60].mxu1 %v2221_v16 }
 0x114   :  { %v696_v18 = vpop.f32.mrb[0].mxu0  ;;  %v824_v20 = vpop.f32.mrb[0].mxu1 }
 0x115   :  { %v1153_v21 = vmul.f32 %v2523_v17, %v696_v18  ;;  %v1185_v22 = vmul.f32 %v2523_v17, %v824_v20  ;;  %v698_v23 = vpop.f32.mrb[1].mxu0  ;;  %v826_v24 = vpop.f32.mrb[1].mxu1 }
 0x116   :  { %v699_v25 = vpop.f32.mrb[2].mxu0  ;;  %v827_v26 = vpop.f32.mrb[2].mxu1 }
 0x117   :  { %v1224_v27 = vadd.f32 %v2528_v19, %v1153_v21  ;;  %v1256_v28 = vadd.f32 %v2528_v19, %v1185_v22  ;;  %v1154_v29 = vmul.f32 %v2523_v17, %v699_v25  ;;  %v1186_v30 = vmul.f32 %v2523_v17, %v827_v26  ;;  %v701_v31 = vpop.f32.mrb[3].mxu0  ;;  %v829_v32 = vpop.f32.mrb[3].mxu1 }
 0x119   :  { %v1225_v33 = vadd.f32 %v2528_v19, %v1154_v29  ;;  %v1257_v34 = vadd.f32 %v2528_v19, %v1186_v30  ;;  %v1288_v35 = vmax.f32 %v1224_v27, 0.0  ;;  %v1320_v36 = vmax.f32 %v1256_v28, 0.0 }
 0x11b   :  { %v1289_v37 = vmax.f32 %v1225_v33, 0.0  ;;  %v1321_v38 = vmax.f32 %v1257_v34, 0.0 }
 0x11c   :  { %v704_v39 = vpop.f32.mrb[4].mxu0  ;;  %v832_v40 = vpop.f32.mrb[4].mxu1 }
 0x11d   :  { %v1889_v41 = vpack.c.bf16 %v1289_v37, %v1288_v35  ;;  %v1969_v42 = vpack.c.bf16 %v1321_v38, %v1320_v36  ;;  %v1155_v43 = vmul.f32 %v2523_v17, %v704_v39  ;;  %v1187_v44 = vmul.f32 %v2523_v17, %v832_v40  ;;  %v706_v45 = vpop.f32.mrb[5].mxu0  ;;  %v834_v46 = vpop.f32.mrb[5].mxu1 }
 0x11e   :  { %v707_v47 = vpop.f32.mrb[6].mxu0  ;;  %v835_v48 = vpop.f32.mrb[6].mxu1 }
 0x11f   :  { %1890 = vst [vmem:[%s2758_s4] sm:$0xff] %v1889_v41   ;;  %2061 = vst [vmem:[%s2758_s4 + $0x80] sm:$0xff] %v1969_v42   ;;  %v1226_v49 = vadd.f32 %v2528_v19, %v1155_v43  ;;  %v1258_v50 = vadd.f32 %v2528_v19, %v1187_v44  ;;  %v1156_v51 = vmul.f32 %v2523_v17, %v707_v47  ;;  %v709_v53 = vpop.f32.mrb[7].mxu0  ;;  %v837_v54 = vpop.f32.mrb[7].mxu1 }
 0x120   :  { %v1188_v52 = vmul.f32 %v2523_v17, %v835_v48 }
 0x121   :  { %v1227_v55 = vadd.f32 %v2528_v19, %v1156_v51  ;;  %v1290_v57 = vmax.f32 %v1226_v49, 0.0  ;;  %v1322_v58 = vmax.f32 %v1258_v50, 0.0 }
 0x122   :  { %v1259_v56 = vadd.f32 %v2528_v19, %v1188_v52 }
 0x123   :  { %v1291_v59 = vmax.f32 %v1227_v55, 0.0 }
 0x124   :  { %v1323_v60 = vmax.f32 %v1259_v56, 0.0  ;;  %v712_v61 = vpop.f32.mrb[8].mxu0  ;;  %v840_v62 = vpop.f32.mrb[8].mxu1 }
 0x125   :  { %v1894_v63 = vpack.c.bf16 %v1291_v59, %v1290_v57  ;;  %v1157_v1 = vmul.f32 %v2523_v17, %v712_v61  ;;  %v1189_v2 = vmul.f32 %v2523_v17, %v840_v62  ;;  %v714_v3 = vpop.f32.mrb[9].mxu0  ;;  %v842_v4 = vpop.f32.mrb[9].mxu1 }
 0x126   :  { %v1974_v0 = vpack.c.bf16 %v1323_v60, %v1322_v58  ;;  %v715_v5 = vpop.f32.mrb[10].mxu0  ;;  %v843_v6 = vpop.f32.mrb[10].mxu1 }
 0x127   :  { %2046 = vst [vmem:[%s2758_s4 + $0x8] sm:$0xff] %v1894_v63   ;;  %v1228_v7 = vadd.f32 %v2528_v19, %v1157_v1  ;;  %v1260_v8 = vadd.f32 %v2528_v19, %v1189_v2  ;;  %v1158_v9 = vmul.f32 %v2523_v17, %v715_v5  ;;  %v1190_v10 = vmul.f32 %v2523_v17, %v843_v6  ;;  %v717_v11 = vpop.f32.mrb[11].mxu0  ;;  %v845_v12 = vpop.f32.mrb[11].mxu1 }
 0x128   :  { %2062 = vst [vmem:[%s2758_s4 + $0x88] sm:$0xff] %v1974_v0  }
 0x129   :  { %v1229_v13 = vadd.f32 %v2528_v19, %v1158_v9  ;;  %v1261_v14 = vadd.f32 %v2528_v19, %v1190_v10  ;;  %v1292_v15 = vmax.f32 %v1228_v7, 0.0  ;;  %v1324_v16 = vmax.f32 %v1260_v8, 0.0 }
 0x12b   :  { %v1293_v18 = vmax.f32 %v1229_v13, 0.0  ;;  %v1325_v20 = vmax.f32 %v1261_v14, 0.0 }
 0x12c   :  { %v720_v21 = vpop.f32.mrb[12].mxu0  ;;  %v848_v22 = vpop.f32.mrb[12].mxu1 }
 0x12d   :  { %v1899_v23 = vpack.c.bf16 %v1293_v18, %v1292_v15  ;;  %v1979_v24 = vpack.c.bf16 %v1325_v20, %v1324_v16  ;;  %v1159_v25 = vmul.f32 %v2523_v17, %v720_v21  ;;  %v1191_v26 = vmul.f32 %v2523_v17, %v848_v22  ;;  %v722_v27 = vpop.f32.mrb[13].mxu0  ;;  %v850_v28 = vpop.f32.mrb[13].mxu1 }
 0x12e   :  { %v723_v29 = vpop.f32.mrb[14].mxu0  ;;  %v851_v30 = vpop.f32.mrb[14].mxu1 }
 0x12f   :  { %2047 = vst [vmem:[%s2758_s4 + $0x10] sm:$0xff] %v1899_v23   ;;  %2063 = vst [vmem:[%s2758_s4 + $0x90] sm:$0xff] %v1979_v24   ;;  %v1230_v31 = vadd.f32 %v2528_v19, %v1159_v25  ;;  %v1262_v32 = vadd.f32 %v2528_v19, %v1191_v26  ;;  %v1160_v33 = vmul.f32 %v2523_v17, %v723_v29  ;;  %v725_v35 = vpop.f32.mrb[15].mxu0  ;;  %v853_v36 = vpop.f32.mrb[15].mxu1 }
 0x130   :  { %v1192_v34 = vmul.f32 %v2523_v17, %v851_v30 }
 0x131   :  { %v1231_v37 = vadd.f32 %v2528_v19, %v1160_v33  ;;  %v1294_v39 = vmax.f32 %v1230_v31, 0.0  ;;  %v1326_v40 = vmax.f32 %v1262_v32, 0.0 }
 0x132   :  { %v1263_v38 = vadd.f32 %v2528_v19, %v1192_v34 }
 0x133   :  { %v1295_v41 = vmax.f32 %v1231_v37, 0.0 }
 0x134   :  { %v1327_v42 = vmax.f32 %v1263_v38, 0.0  ;;  %v728_v43 = vpop.f32.mrb[16].mxu0  ;;  %v856_v44 = vpop.f32.mrb[16].mxu1 }
 0x135   :  { %v1904_v45 = vpack.c.bf16 %v1295_v41, %v1294_v39  ;;  %v1161_v47 = vmul.f32 %v2523_v17, %v728_v43  ;;  %v1193_v48 = vmul.f32 %v2523_v17, %v856_v44  ;;  %v730_v49 = vpop.f32.mrb[17].mxu0  ;;  %v858_v50 = vpop.f32.mrb[17].mxu1 }
 0x136   :  { %v1984_v46 = vpack.c.bf16 %v1327_v42, %v1326_v40  ;;  %v731_v51 = vpop.f32.mrb[18].mxu0  ;;  %v859_v52 = vpop.f32.mrb[18].mxu1 }
 0x137   :  { %2048 = vst [vmem:[%s2758_s4 + $0x18] sm:$0xff] %v1904_v45   ;;  %v1232_v53 = vadd.f32 %v2528_v19, %v1161_v47  ;;  %v1264_v54 = vadd.f32 %v2528_v19, %v1193_v48  ;;  %v1162_v55 = vmul.f32 %v2523_v17, %v731_v51  ;;  %v1194_v56 = vmul.f32 %v2523_v17, %v859_v52  ;;  %v733_v57 = vpop.f32.mrb[19].mxu0  ;;  %v861_v58 = vpop.f32.mrb[19].mxu1 }
 0x138   :  { %2064 = vst [vmem:[%s2758_s4 + $0x98] sm:$0xff] %v1984_v46  }
 0x139   :  { %v1233_v59 = vadd.f32 %v2528_v19, %v1162_v55  ;;  %v1265_v60 = vadd.f32 %v2528_v19, %v1194_v56  ;;  %v1296_v61 = vmax.f32 %v1232_v53, 0.0  ;;  %v1328_v62 = vmax.f32 %v1264_v54, 0.0 }
 0x13b   :  { %v1297_v63 = vmax.f32 %v1233_v59, 0.0  ;;  %v1329_v0 = vmax.f32 %v1265_v60, 0.0 }
 0x13c   :  { %v736_v1 = vpop.f32.mrb[20].mxu0  ;;  %v864_v2 = vpop.f32.mrb[20].mxu1 }
 0x13d   :  { %v1909_v3 = vpack.c.bf16 %v1297_v63, %v1296_v61  ;;  %v1989_v4 = vpack.c.bf16 %v1329_v0, %v1328_v62  ;;  %v1163_v5 = vmul.f32 %v2523_v17, %v736_v1  ;;  %v1195_v6 = vmul.f32 %v2523_v17, %v864_v2  ;;  %v738_v7 = vpop.f32.mrb[21].mxu0  ;;  %v866_v8 = vpop.f32.mrb[21].mxu1 }
 0x13e   :  { %v739_v9 = vpop.f32.mrb[22].mxu0  ;;  %v867_v10 = vpop.f32.mrb[22].mxu1 }
 0x13f   :  { %2049 = vst [vmem:[%s2758_s4 + $0x20] sm:$0xff] %v1909_v3   ;;  %2065 = vst [vmem:[%s2758_s4 + $0xa0] sm:$0xff] %v1989_v4   ;;  %v1234_v11 = vadd.f32 %v2528_v19, %v1163_v5  ;;  %v1266_v12 = vadd.f32 %v2528_v19, %v1195_v6  ;;  %v1164_v13 = vmul.f32 %v2523_v17, %v739_v9  ;;  %v741_v15 = vpop.f32.mrb[23].mxu0  ;;  %v869_v16 = vpop.f32.mrb[23].mxu1 }
 0x140   :  { %v1196_v14 = vmul.f32 %v2523_v17, %v867_v10 }
 0x141   :  { %v1235_v18 = vadd.f32 %v2528_v19, %v1164_v13  ;;  %v1298_v21 = vmax.f32 %v1234_v11, 0.0  ;;  %v1330_v22 = vmax.f32 %v1266_v12, 0.0 }
 0x142   :  { %v1267_v20 = vadd.f32 %v2528_v19, %v1196_v14 }
 0x143   :  { %v1299_v23 = vmax.f32 %v1235_v18, 0.0 }
 0x144   :  { %v1331_v24 = vmax.f32 %v1267_v20, 0.0  ;;  %v744_v25 = vpop.f32.mrb[24].mxu0  ;;  %v872_v26 = vpop.f32.mrb[24].mxu1 }
 0x145   :  { %v1914_v27 = vpack.c.bf16 %v1299_v23, %v1298_v21  ;;  %v1165_v29 = vmul.f32 %v2523_v17, %v744_v25  ;;  %v1197_v30 = vmul.f32 %v2523_v17, %v872_v26  ;;  %v746_v31 = vpop.f32.mrb[25].mxu0  ;;  %v874_v32 = vpop.f32.mrb[25].mxu1 }
 0x146   :  { %v1994_v28 = vpack.c.bf16 %v1331_v24, %v1330_v22  ;;  %v747_v33 = vpop.f32.mrb[26].mxu0  ;;  %v875_v34 = vpop.f32.mrb[26].mxu1 }
 0x147   :  { %2050 = vst [vmem:[%s2758_s4 + $0x28] sm:$0xff] %v1914_v27   ;;  %v1236_v35 = vadd.f32 %v2528_v19, %v1165_v29  ;;  %v1268_v36 = vadd.f32 %v2528_v19, %v1197_v30  ;;  %v1166_v37 = vmul.f32 %v2523_v17, %v747_v33  ;;  %v1198_v38 = vmul.f32 %v2523_v17, %v875_v34  ;;  %v749_v39 = vpop.f32.mrb[27].mxu0  ;;  %v877_v40 = vpop.f32.mrb[27].mxu1 }
 0x148   :  { %2066 = vst [vmem:[%s2758_s4 + $0xa8] sm:$0xff] %v1994_v28  }
 0x149   :  { %v1237_v41 = vadd.f32 %v2528_v19, %v1166_v37  ;;  %v1269_v42 = vadd.f32 %v2528_v19, %v1198_v38  ;;  %v1300_v43 = vmax.f32 %v1236_v35, 0.0  ;;  %v1332_v44 = vmax.f32 %v1268_v36, 0.0 }
 0x14b   :  { %v1301_v45 = vmax.f32 %v1237_v41, 0.0  ;;  %v1333_v46 = vmax.f32 %v1269_v42, 0.0 }
 0x14c   :  { %v752_v47 = vpop.f32.mrb[28].mxu0  ;;  %v880_v48 = vpop.f32.mrb[28].mxu1 }
 0x14d   :  { %v1919_v49 = vpack.c.bf16 %v1301_v45, %v1300_v43  ;;  %v1999_v50 = vpack.c.bf16 %v1333_v46, %v1332_v44  ;;  %v1167_v51 = vmul.f32 %v2523_v17, %v752_v47  ;;  %v1199_v52 = vmul.f32 %v2523_v17, %v880_v48  ;;  %v754_v53 = vpop.f32.mrb[29].mxu0  ;;  %v882_v54 = vpop.f32.mrb[29].mxu1 }
 0x14e   :  { %v755_v55 = vpop.f32.mrb[30].mxu0  ;;  %v883_v56 = vpop.f32.mrb[30].mxu1 }
 0x14f   :  { %2051 = vst [vmem:[%s2758_s4 + $0x30] sm:$0xff] %v1919_v49   ;;  %2067 = vst [vmem:[%s2758_s4 + $0xb0] sm:$0xff] %v1999_v50   ;;  %v1238_v57 = vadd.f32 %v2528_v19, %v1167_v51  ;;  %v1270_v58 = vadd.f32 %v2528_v19, %v1199_v52  ;;  %v1168_v59 = vmul.f32 %v2523_v17, %v755_v55  ;;  %v757_v61 = vpop.f32.mrb[31].mxu0  ;;  %v885_v62 = vpop.f32.mrb[31].mxu1 }
 0x150   :  { %v1200_v60 = vmul.f32 %v2523_v17, %v883_v56 }
 0x151   :  { %v1239_v63 = vadd.f32 %v2528_v19, %v1168_v59  ;;  %v1302_v1 = vmax.f32 %v1238_v57, 0.0  ;;  %v1334_v2 = vmax.f32 %v1270_v58, 0.0 }
 0x152   :  { %v1271_v0 = vadd.f32 %v2528_v19, %v1200_v60 }
 0x153   :  { %v1303_v3 = vmax.f32 %v1239_v63, 0.0 }
 0x154   :  { %v1335_v4 = vmax.f32 %v1271_v0, 0.0  ;;  %v760_v5 = vpop.f32.mrb[32].mxu0  ;;  %v888_v6 = vpop.f32.mrb[32].mxu1 }
 0x155   :  { %v1924_v7 = vpack.c.bf16 %v1303_v3, %v1302_v1  ;;  %v1169_v9 = vmul.f32 %v2523_v17, %v760_v5  ;;  %v1201_v10 = vmul.f32 %v2523_v17, %v888_v6  ;;  %v762_v11 = vpop.f32.mrb[33].mxu0  ;;  %v890_v12 = vpop.f32.mrb[33].mxu1 }
 0x156   :  { %v2004_v8 = vpack.c.bf16 %v1335_v4, %v1334_v2  ;;  %v763_v13 = vpop.f32.mrb[34].mxu0  ;;  %v891_v14 = vpop.f32.mrb[34].mxu1 }
 0x157   :  { %2052 = vst [vmem:[%s2758_s4 + $0x38] sm:$0xff] %v1924_v7   ;;  %v1240_v15 = vadd.f32 %v2528_v19, %v1169_v9  ;;  %v1272_v16 = vadd.f32 %v2528_v19, %v1201_v10  ;;  %v1170_v18 = vmul.f32 %v2523_v17, %v763_v13  ;;  %v1202_v20 = vmul.f32 %v2523_v17, %v891_v14  ;;  %v765_v21 = vpop.f32.mrb[35].mxu0  ;;  %v893_v22 = vpop.f32.mrb[35].mxu1 }
 0x158   :  { %2068 = vst [vmem:[%s2758_s4 + $0xb8] sm:$0xff] %v2004_v8  }
 0x159   :  { %v1241_v23 = vadd.f32 %v2528_v19, %v1170_v18  ;;  %v1273_v24 = vadd.f32 %v2528_v19, %v1202_v20  ;;  %v1304_v25 = vmax.f32 %v1240_v15, 0.0  ;;  %v1336_v26 = vmax.f32 %v1272_v16, 0.0 }
 0x15b   :  { %v1305_v27 = vmax.f32 %v1241_v23, 0.0  ;;  %v1337_v28 = vmax.f32 %v1273_v24, 0.0 }
 0x15c   :  { %v768_v29 = vpop.f32.mrb[36].mxu0  ;;  %v896_v30 = vpop.f32.mrb[36].mxu1 }
 0x15d   :  { %v1929_v31 = vpack.c.bf16 %v1305_v27, %v1304_v25  ;;  %v2009_v32 = vpack.c.bf16 %v1337_v28, %v1336_v26  ;;  %v1171_v33 = vmul.f32 %v2523_v17, %v768_v29  ;;  %v1203_v34 = vmul.f32 %v2523_v17, %v896_v30  ;;  %v770_v35 = vpop.f32.mrb[37].mxu0  ;;  %v898_v36 = vpop.f32.mrb[37].mxu1 }
 0x15e   :  { %v771_v37 = vpop.f32.mrb[38].mxu0  ;;  %v899_v38 = vpop.f32.mrb[38].mxu1 }
 0x15f   :  { %2053 = vst [vmem:[%s2758_s4 + $0x40] sm:$0xff] %v1929_v31   ;;  %2069 = vst [vmem:[%s2758_s4 + $0xc0] sm:$0xff] %v2009_v32   ;;  %v1242_v39 = vadd.f32 %v2528_v19, %v1171_v33  ;;  %v1274_v40 = vadd.f32 %v2528_v19, %v1203_v34  ;;  %v1172_v41 = vmul.f32 %v2523_v17, %v771_v37  ;;  %v773_v43 = vpop.f32.mrb[39].mxu0  ;;  %v901_v44 = vpop.f32.mrb[39].mxu1 }
 0x160   :  { %v1204_v42 = vmul.f32 %v2523_v17, %v899_v38 }
 0x161   :  { %v1243_v45 = vadd.f32 %v2528_v19, %v1172_v41  ;;  %v1306_v47 = vmax.f32 %v1242_v39, 0.0  ;;  %v1338_v48 = vmax.f32 %v1274_v40, 0.0 }
 0x162   :  { %v1275_v46 = vadd.f32 %v2528_v19, %v1204_v42 }
 0x163   :  { %v1307_v49 = vmax.f32 %v1243_v45, 0.0 }
 0x164   :  { %v1339_v50 = vmax.f32 %v1275_v46, 0.0  ;;  %v776_v51 = vpop.f32.mrb[40].mxu0  ;;  %v904_v52 = vpop.f32.mrb[40].mxu1 }
 0x165   :  { %v1934_v53 = vpack.c.bf16 %v1307_v49, %v1306_v47  ;;  %v1173_v55 = vmul.f32 %v2523_v17, %v776_v51  ;;  %v1205_v56 = vmul.f32 %v2523_v17, %v904_v52  ;;  %v778_v57 = vpop.f32.mrb[41].mxu0  ;;  %v906_v58 = vpop.f32.mrb[41].mxu1 }
 0x166   :  { %v2014_v54 = vpack.c.bf16 %v1339_v50, %v1338_v48  ;;  %v779_v59 = vpop.f32.mrb[42].mxu0  ;;  %v907_v60 = vpop.f32.mrb[42].mxu1 }
 0x167   :  { %2054 = vst [vmem:[%s2758_s4 + $0x48] sm:$0xff] %v1934_v53   ;;  %v1244_v61 = vadd.f32 %v2528_v19, %v1173_v55  ;;  %v1276_v62 = vadd.f32 %v2528_v19, %v1205_v56  ;;  %v1174_v63 = vmul.f32 %v2523_v17, %v779_v59  ;;  %v1206_v0 = vmul.f32 %v2523_v17, %v907_v60  ;;  %v781_v1 = vpop.f32.mrb[43].mxu0  ;;  %v909_v2 = vpop.f32.mrb[43].mxu1 }
 0x168   :  { %2070 = vst [vmem:[%s2758_s4 + $0xc8] sm:$0xff] %v2014_v54  }
 0x169   :  { %v1245_v3 = vadd.f32 %v2528_v19, %v1174_v63  ;;  %v1277_v4 = vadd.f32 %v2528_v19, %v1206_v0  ;;  %v1308_v5 = vmax.f32 %v1244_v61, 0.0  ;;  %v1340_v6 = vmax.f32 %v1276_v62, 0.0 }
 0x16b   :  { %v1309_v7 = vmax.f32 %v1245_v3, 0.0  ;;  %v1341_v8 = vmax.f32 %v1277_v4, 0.0 }
 0x16c   :  { %v784_v9 = vpop.f32.mrb[44].mxu0  ;;  %v912_v10 = vpop.f32.mrb[44].mxu1 }
 0x16d   :  { %v1939_v11 = vpack.c.bf16 %v1309_v7, %v1308_v5  ;;  %v2019_v12 = vpack.c.bf16 %v1341_v8, %v1340_v6  ;;  %v1175_v13 = vmul.f32 %v2523_v17, %v784_v9  ;;  %v1207_v14 = vmul.f32 %v2523_v17, %v912_v10  ;;  %v786_v15 = vpop.f32.mrb[45].mxu0  ;;  %v914_v16 = vpop.f32.mrb[45].mxu1 }
 0x16e   :  { %v787_v18 = vpop.f32.mrb[46].mxu0  ;;  %v915_v20 = vpop.f32.mrb[46].mxu1 }
 0x16f   :  { %2055 = vst [vmem:[%s2758_s4 + $0x50] sm:$0xff] %v1939_v11   ;;  %2071 = vst [vmem:[%s2758_s4 + $0xd0] sm:$0xff] %v2019_v12   ;;  %v1246_v21 = vadd.f32 %v2528_v19, %v1175_v13  ;;  %v1278_v22 = vadd.f32 %v2528_v19, %v1207_v14  ;;  %v1176_v23 = vmul.f32 %v2523_v17, %v787_v18  ;;  %v789_v25 = vpop.f32.mrb[47].mxu0  ;;  %v917_v26 = vpop.f32.mrb[47].mxu1 }
 0x170   :  { %v1208_v24 = vmul.f32 %v2523_v17, %v915_v20 }
 0x171   :  { %v1247_v27 = vadd.f32 %v2528_v19, %v1176_v23  ;;  %v1310_v29 = vmax.f32 %v1246_v21, 0.0  ;;  %v1342_v30 = vmax.f32 %v1278_v22, 0.0 }
 0x172   :  { %v1279_v28 = vadd.f32 %v2528_v19, %v1208_v24 }
 0x173   :  { %v1311_v31 = vmax.f32 %v1247_v27, 0.0 }
 0x174   :  { %v1343_v32 = vmax.f32 %v1279_v28, 0.0  ;;  %v792_v33 = vpop.f32.mrb[48].mxu0  ;;  %v920_v34 = vpop.f32.mrb[48].mxu1 }
 0x175   :  { %v1944_v35 = vpack.c.bf16 %v1311_v31, %v1310_v29  ;;  %v1177_v37 = vmul.f32 %v2523_v17, %v792_v33  ;;  %v1209_v38 = vmul.f32 %v2523_v17, %v920_v34  ;;  %v794_v39 = vpop.f32.mrb[49].mxu0  ;;  %v922_v40 = vpop.f32.mrb[49].mxu1 }
 0x176   :  { %v2024_v36 = vpack.c.bf16 %v1343_v32, %v1342_v30  ;;  %v795_v41 = vpop.f32.mrb[50].mxu0  ;;  %v923_v42 = vpop.f32.mrb[50].mxu1 }
 0x177   :  { %2056 = vst [vmem:[%s2758_s4 + $0x58] sm:$0xff] %v1944_v35   ;;  %v1248_v43 = vadd.f32 %v2528_v19, %v1177_v37  ;;  %v1280_v44 = vadd.f32 %v2528_v19, %v1209_v38  ;;  %v1178_v45 = vmul.f32 %v2523_v17, %v795_v41  ;;  %v1210_v46 = vmul.f32 %v2523_v17, %v923_v42  ;;  %v797_v47 = vpop.f32.mrb[51].mxu0  ;;  %v925_v48 = vpop.f32.mrb[51].mxu1 }
 0x178   :  { %2072 = vst [vmem:[%s2758_s4 + $0xd8] sm:$0xff] %v2024_v36  }
 0x179   :  { %v1249_v49 = vadd.f32 %v2528_v19, %v1178_v45  ;;  %v1281_v50 = vadd.f32 %v2528_v19, %v1210_v46  ;;  %v1312_v51 = vmax.f32 %v1248_v43, 0.0  ;;  %v1344_v52 = vmax.f32 %v1280_v44, 0.0 }
 0x17b   :  { %v1313_v53 = vmax.f32 %v1249_v49, 0.0  ;;  %v1345_v54 = vmax.f32 %v1281_v50, 0.0 }
 0x17c   :  { %v800_v55 = vpop.f32.mrb[52].mxu0  ;;  %v928_v56 = vpop.f32.mrb[52].mxu1 }
 0x17d   :  { %v1949_v57 = vpack.c.bf16 %v1313_v53, %v1312_v51  ;;  %v2029_v58 = vpack.c.bf16 %v1345_v54, %v1344_v52  ;;  %v1179_v59 = vmul.f32 %v2523_v17, %v800_v55  ;;  %v1211_v60 = vmul.f32 %v2523_v17, %v928_v56  ;;  %v802_v61 = vpop.f32.mrb[53].mxu0  ;;  %v930_v62 = vpop.f32.mrb[53].mxu1 }
 0x17e   :  { %v803_v63 = vpop.f32.mrb[54].mxu0  ;;  %v931_v0 = vpop.f32.mrb[54].mxu1 }
 0x17f   :  { %2057 = vst [vmem:[%s2758_s4 + $0x60] sm:$0xff] %v1949_v57   ;;  %2073 = vst [vmem:[%s2758_s4 + $0xe0] sm:$0xff] %v2029_v58   ;;  %v1250_v1 = vadd.f32 %v2528_v19, %v1179_v59  ;;  %v1282_v2 = vadd.f32 %v2528_v19, %v1211_v60  ;;  %v1180_v3 = vmul.f32 %v2523_v17, %v803_v63  ;;  %v805_v5 = vpop.f32.mrb[55].mxu0  ;;  %v933_v6 = vpop.f32.mrb[55].mxu1 }
 0x180   :  { %v1212_v4 = vmul.f32 %v2523_v17, %v931_v0 }
 0x181   :  { %v1251_v7 = vadd.f32 %v2528_v19, %v1180_v3  ;;  %v1314_v9 = vmax.f32 %v1250_v1, 0.0  ;;  %v1346_v10 = vmax.f32 %v1282_v2, 0.0 }
 0x182   :  { %v1283_v8 = vadd.f32 %v2528_v19, %v1212_v4 }
 0x183   :  { %v1315_v11 = vmax.f32 %v1251_v7, 0.0 }
 0x184   :  { %v1347_v12 = vmax.f32 %v1283_v8, 0.0  ;;  %v808_v13 = vpop.f32.mrb[56].mxu0  ;;  %v936_v14 = vpop.f32.mrb[56].mxu1 }
 0x185   :  { %v1954_v15 = vpack.c.bf16 %v1315_v11, %v1314_v9  ;;  %v1181_v18 = vmul.f32 %v2523_v17, %v808_v13  ;;  %v1213_v20 = vmul.f32 %v2523_v17, %v936_v14  ;;  %v810_v21 = vpop.f32.mrb[57].mxu0  ;;  %v938_v22 = vpop.f32.mrb[57].mxu1 }
 0x186   :  { %v2034_v16 = vpack.c.bf16 %v1347_v12, %v1346_v10  ;;  %v811_v23 = vpop.f32.mrb[58].mxu0  ;;  %v939_v24 = vpop.f32.mrb[58].mxu1 }
 0x187   :  { %2058 = vst [vmem:[%s2758_s4 + $0x68] sm:$0xff] %v1954_v15   ;;  %v1252_v25 = vadd.f32 %v2528_v19, %v1181_v18  ;;  %v1284_v26 = vadd.f32 %v2528_v19, %v1213_v20  ;;  %v1182_v27 = vmul.f32 %v2523_v17, %v811_v23  ;;  %v1214_v28 = vmul.f32 %v2523_v17, %v939_v24  ;;  %v813_v29 = vpop.f32.mrb[59].mxu0  ;;  %v941_v30 = vpop.f32.mrb[59].mxu1 }
 0x188   :  { %2074 = vst [vmem:[%s2758_s4 + $0xe8] sm:$0xff] %v2034_v16  }
 0x189   :  { %v1253_v31 = vadd.f32 %v2528_v19, %v1182_v27  ;;  %v1285_v32 = vadd.f32 %v2528_v19, %v1214_v28  ;;  %v1316_v33 = vmax.f32 %v1252_v25, 0.0  ;;  %v1348_v34 = vmax.f32 %v1284_v26, 0.0 }
 0x18b   :  { %v1317_v35 = vmax.f32 %v1253_v31, 0.0  ;;  %v1349_v36 = vmax.f32 %v1285_v32, 0.0 }
 0x18c   :  { %v816_v37 = vpop.f32.mrb[60].mxu0  ;;  %v944_v38 = vpop.f32.mrb[60].mxu1 }
 0x18d   :  { %v1959_v39 = vpack.c.bf16 %v1317_v35, %v1316_v33  ;;  %v2039_v40 = vpack.c.bf16 %v1349_v36, %v1348_v34  ;;  %v1183_v41 = vmul.f32 %v2523_v17, %v816_v37  ;;  %v1215_v42 = vmul.f32 %v2523_v17, %v944_v38  ;;  %v818_v43 = vpop.f32.mrb[61].mxu0  ;;  %v946_v44 = vpop.f32.mrb[61].mxu1 }
 0x18e   :  { %v819_v45 = vpop.f32.mrb[62].mxu0  ;;  %v947_v46 = vpop.f32.mrb[62].mxu1 }
 0x18f   :  { %2059 = vst [vmem:[%s2758_s4 + $0x70] sm:$0xff] %v1959_v39   ;;  %2075 = vst [vmem:[%s2758_s4 + $0xf0] sm:$0xff] %v2039_v40   ;;  %v1254_v47 = vadd.f32 %v2528_v19, %v1183_v41  ;;  %v1286_v48 = vadd.f32 %v2528_v19, %v1215_v42  ;;  %v1184_v49 = vmul.f32 %v2523_v17, %v819_v45  ;;  %v821_v51 = vpop.f32.mrb[63].mxu0  ;;  %v949_v52 = vpop.f32.mrb[63].mxu1 }
 0x190   :  { %v1216_v50 = vmul.f32 %v2523_v17, %v947_v46 }
 0x191   :  { %v1255_v53 = vadd.f32 %v2528_v19, %v1184_v49  ;;  %v1318_v55 = vmax.f32 %v1254_v47, 0.0  ;;  %v1350_v56 = vmax.f32 %v1286_v48, 0.0 }
 0x192   :  { %v1287_v54 = vadd.f32 %v2528_v19, %v1216_v50 }
 0x193   :  { %v1319_v57 = vmax.f32 %v1255_v53, 0.0 }
 0x194   :  { %v1351_v58 = vmax.f32 %v1287_v54, 0.0 }
 0x195   :  { %v1964_v59 = vpack.c.bf16 %v1319_v57, %v1318_v55 }
 0x196   :  { %v2044_v60 = vpack.c.bf16 %v1351_v58, %v1350_v56 }
 0x197   :  { %2060 = vst [vmem:[%s2758_s4 + $0x78] sm:$0xff] %v1964_v59  }
 0x198   :  { %2076 = vst [vmem:[%s2758_s4 + $0xf8] sm:$0xff] %v2044_v60  }

// kernel: resnet18_backbone.23
= control target key start
LH: loop header
LB: loop body
LE: loop exit
PB: predicated region body
PF: predicated region fallthrough
CT: control target
= control target key end

     0   :  { %s1934_s1 = inlined_call_operand.vmem [shape: bf16[640,128], index: 1, kind: input, shape index: {}]   ;;  %s1935_s0 = inlined_call_operand.vmem [shape: bf16[128,640], index: 0, kind: input, shape index: {}]   ;;  %s1936_s2 = inlined_call_operand.vmem [shape: f32[1,128], index: 2, kind: input, shape index: {}]   ;;  %s1937_s3 = inlined_call_operand.vmem [shape: f32[1,128], index: 3, kind: input, shape index: {}]   ;;  %s1938_s4 = inlined_call_operand.vmem [shape: bf16[128,128], index: 4, kind: output, shape index: {}]  }
   0x1   :  { %v1471_v0 = vld [vmem:[%s1934_s1 + $0x40] sm:$0xff]   ;;  %v1475_v4 = vld [vmem:[%s1934_s1 + $0x48] sm:$0xff]   ;;  %v1479_v8 = vld [vmem:[%s1934_s1 + $0x50] sm:$0xff]  }
   0x2   :  { %v1472_v1 = vld [vmem:[%s1934_s1 + $0xc0] sm:$0xff]   ;;  %1279 = vmatprep.subr.bf16.mxu0 %v1471_v0  ;;  %v1476_v5 = vld [vmem:[%s1934_s1 + $0xc8] sm:$0xff]   ;;  %v1480_v9 = vld [vmem:[%s1934_s1 + $0xd0] sm:$0xff]  }
   0x3   :  { %v1473_v2 = vld [vmem:[%s1934_s1] sm:$0xff]   ;;  %1343 = vmatprep.subr.bf16.mxu1 %v1472_v1  ;;  %v1477_v6 = vld [vmem:[%s1934_s1 + $0x8] sm:$0xff]   ;;  %v1481_v10 = vld [vmem:[%s1934_s1 + $0x10] sm:$0xff]  }
   0x4   :  { %v1474_v3 = vld [vmem:[%s1934_s1 + $0x80] sm:$0xff]   ;;  %1280 = vmatpush3.bf16.msra.mxu0 %v1473_v2  ;;  %v1478_v7 = vld [vmem:[%s1934_s1 + $0x88] sm:$0xff]   ;;  %v1482_v11 = vld [vmem:[%s1934_s1 + $0x90] sm:$0xff]  }
   0x5   :  { %1344 = vmatpush3.bf16.msra.mxu1 %v1474_v3  ;;  %1281 = vmatprep.subr.bf16.mxu0 %v1475_v4  ;;  %v1483_v12 = vld [vmem:[%s1934_s1 + $0x58] sm:$0xff]   ;;  %v1487_v16 = vld [vmem:[%s1934_s1 + $0x60] sm:$0xff]   ;;  %v1491_v20 = vld [vmem:[%s1934_s1 + $0x68] sm:$0xff]  }
   0x6   :  { %1345 = vmatprep.subr.bf16.mxu1 %v1476_v5  ;;  %v1484_v13 = vld [vmem:[%s1934_s1 + $0xd8] sm:$0xff]   ;;  %v1488_v17 = vld [vmem:[%s1934_s1 + $0xe0] sm:$0xff]   ;;  %v1492_v21 = vld [vmem:[%s1934_s1 + $0xe8] sm:$0xff]  }
   0x7   :  { %v1485_v14 = vld [vmem:[%s1934_s1 + $0x18] sm:$0xff]   ;;  %v1489_v18 = vld [vmem:[%s1934_s1 + $0x20] sm:$0xff]   ;;  %v1493_v22 = vld [vmem:[%s1934_s1 + $0x28] sm:$0xff]  }
   0x8   :  { %1282 = vmatpush3.bf16.msra.mxu0 %v1477_v6  ;;  %v1486_v15 = vld [vmem:[%s1934_s1 + $0x98] sm:$0xff]   ;;  %v1490_v19 = vld [vmem:[%s1934_s1 + $0xa0] sm:$0xff]   ;;  %v1494_v23 = vld [vmem:[%s1934_s1 + $0xa8] sm:$0xff]  }
   0x9   :  { %1346 = vmatpush3.bf16.msra.mxu1 %v1478_v7  ;;  %1283 = vmatprep.subr.bf16.mxu0 %v1479_v8  ;;  %v1495_v24 = vld [vmem:[%s1934_s1 + $0x70] sm:$0xff]   ;;  %v1499_v28 = vld [vmem:[%s1934_s1 + $0x78] sm:$0xff]   ;;  %v1508_v35 = vld [vmem:[%s1935_s0 + $0xc] ss:$20 sps:$4 sm:$0xff]  }
   0xa   :  { %1347 = vmatprep.subr.bf16.mxu1 %v1480_v9  ;;  %v1496_v25 = vld [vmem:[%s1934_s1 + $0xf0] sm:$0xff]   ;;  %v1500_v29 = vld [vmem:[%s1934_s1 + $0xf8] sm:$0xff]   ;;  %v1509_v36 = vld [vmem:[%s1934_s1 + $0x100] sm:$0xff]   ;;  %759 = vmatprep.mubr.bf16.mxu1 %v1508_v35 }
   0xb   :  { %v1497_v26 = vld [vmem:[%s1934_s1 + $0x30] sm:$0xff]   ;;  %v1501_v30 = vld [vmem:[%s1934_s1 + $0x38] sm:$0xff]   ;;  %v1510_v37 = vld [vmem:[%s1935_s0 + $0x2c] ss:$20 sps:$4 sm:$0xff]  }
   0xc   :  { %1284 = vmatpush3.bf16.msra.mxu0 %v1481_v10  ;;  %v1498_v27 = vld [vmem:[%s1934_s1 + $0xb0] sm:$0xff]   ;;  %v1502_v31 = vld [vmem:[%s1934_s1 + $0xb8] sm:$0xff]   ;;  %v1516_v39 = vld [vmem:[%s1934_s1 + $0x108] sm:$0xff]  }
   0xd   :  { %1348 = vmatpush3.bf16.msra.mxu1 %v1482_v11  ;;  %1285 = vmatprep.subr.bf16.mxu0 %v1483_v12  ;;  %v1503_v32 = vld [vmem:[%s1935_s0] ss:$20 sps:$4 sm:$0xff]   ;;  %v1505_v33 = vld [vmem:[%s1935_s0 + $0x4] ss:$20 sps:$4 sm:$0xff]   ;;  %v1506_v34 = vld [vmem:[%s1935_s0 + $0x8] ss:$20 sps:$4 sm:$0xff]  }
   0xe   :  { %1349 = vmatprep.subr.bf16.mxu1 %v1484_v13  ;;  %662 = vmatprep.mubr.bf16.mxu0 %v1505_v33  ;;  %v1512_v38 = vld [vmem:[%s1935_s0 + $0x34] ss:$20 sps:$4 sm:$0xff]   ;;  %v1515_v41 = vld [vmem:[%s1935_s0 + $0x30] ss:$20 sps:$4 sm:$0xff]   ;;  %v1530_v45 = vld [vmem:[%s1934_s1 + $0x118] sm:$0xff]  }
   0xf   :  { %v1514_v40 = vld [vmem:[%s1935_s0 + $0x28] ss:$20 sps:$4 sm:$0xff]   ;;  %v1523_v44 = vld [vmem:[%s1934_s1 + $0x110] sm:$0xff]   ;;  %v1522_v47 = vld [vmem:[%s1935_s0 + $0x58] ss:$20 sps:$4 sm:$0xff]  }
  0x10   :  { %1286 = vmatpush3.bf16.msra.mxu0 %v1485_v14  ;;  %v1517_v42 = vld [vmem:[%s1935_s0 + $0x54] ss:$20 sps:$4 sm:$0xff]   ;;  %v1519_v43 = vld [vmem:[%s1935_s0 + $0x5c] ss:$20 sps:$4 sm:$0xff]   ;;  %v1526_v49 = vld [vmem:[%s1935_s0 + $0x84] ss:$20 sps:$4 sm:$0xff]  }
  0x11   :  { %1350 = vmatpush3.bf16.msra.mxu1 %v1486_v15  ;;  %1287 = vmatprep.subr.bf16.mxu0 %v1487_v16  ;;  %v1521_v46 = vld [vmem:[%s1935_s0 + $0x50] ss:$20 sps:$4 sm:$0xff]   ;;  %v1544_v51 = vld [vmem:[%s1934_s1 + $0x128] sm:$0xff]   ;;  %v1529_v53 = vld [vmem:[%s1935_s0 + $0x80] ss:$20 sps:$4 sm:$0xff]  }
  0x12   :  { %1351 = vmatprep.subr.bf16.mxu1 %v1488_v17  ;;  %v1524_v48 = vld [vmem:[%s1935_s0 + $0x7c] ss:$20 sps:$4 sm:$0xff]   ;;  %v1537_v50 = vld [vmem:[%s1934_s1 + $0x120] sm:$0xff]   ;;  %v1528_v52 = vld [vmem:[%s1935_s0 + $0x78] ss:$20 sps:$4 sm:$0xff]  }
  0x13   :  { %v1531_v54 = vld [vmem:[%s1935_s0 + $0xa4] ss:$20 sps:$4 sm:$0xff]   ;;  %v1551_v55 = vld [vmem:[%s1934_s1 + $0x130] sm:$0xff]   ;;  %v1533_v56 = vld [vmem:[%s1935_s0 + $0xac] ss:$20 sps:$4 sm:$0xff]  }
  0x14   :  { %1288 = vmatpush3.bf16.msra.mxu0 %v1489_v18  ;;  %v1558_v57 = vld [vmem:[%s1934_s1 + $0x138] sm:$0xff]   ;;  %v1535_v58 = vld [vmem:[%s1935_s0 + $0xa0] ss:$20 sps:$4 sm:$0xff]   ;;  %v1543_v63 = vld [vmem:[%s1935_s0 + $0xd0] ss:$20 sps:$4 sm:$0xff]  }
  0x15   :  { %1352 = vmatpush3.bf16.msra.mxu1 %v1490_v19  ;;  %1289 = vmatprep.subr.bf16.mxu0 %v1491_v20  ;;  %v1536_v59 = vld [vmem:[%s1935_s0 + $0xa8] ss:$20 sps:$4 sm:$0xff]   ;;  %v1538_v60 = vld [vmem:[%s1935_s0 + $0xcc] ss:$20 sps:$4 sm:$0xff]   ;;  %v1549_v2 = vld [vmem:[%s1935_s0 + $0xf0] ss:$20 sps:$4 sm:$0xff]  }
  0x16   :  { %1353 = vmatprep.subr.bf16.mxu1 %v1492_v21  ;;  %v1540_v61 = vld [vmem:[%s1935_s0 + $0xd4] ss:$20 sps:$4 sm:$0xff]   ;;  %v1547_v1 = vld [vmem:[%s1935_s0 + $0xfc] ss:$20 sps:$4 sm:$0xff]   ;;  %v1550_v3 = vld [vmem:[%s1935_s0 + $0xf8] ss:$20 sps:$4 sm:$0xff]  }
  0x17   :  { %v1542_v62 = vld [vmem:[%s1935_s0 + $0xc8] ss:$20 sps:$4 sm:$0xff]   ;;  %v1554_v5 = vld [vmem:[%s1935_s0 + $0x124] ss:$20 sps:$4 sm:$0xff]   ;;  %v1557_v7 = vld [vmem:[%s1935_s0 + $0x120] ss:$20 sps:$4 sm:$0xff]  }
  0x18   :  { %1290 = vmatpush3.bf16.msra.mxu0 %v1493_v22  ;;  %v1545_v0 = vld [vmem:[%s1935_s0 + $0xf4] ss:$20 sps:$4 sm:$0xff]   ;;  %v1552_v4 = vld [vmem:[%s1935_s0 + $0x11c] ss:$20 sps:$4 sm:$0xff]   ;;  %v1556_v6 = vld [vmem:[%s1935_s0 + $0x118] ss:$20 sps:$4 sm:$0xff]  }
  0x19   :  { %1354 = vmatpush3.bf16.msra.mxu1 %v1494_v23  ;;  %1291 = vmatprep.subr.bf16.mxu0 %v1495_v24  ;;  %v1559_v8 = vld [vmem:[%s1935_s0 + $0x10] ss:$20 sps:$4 sm:$0xff]   ;;  %v1561_v10 = vld [vmem:[%s1935_s0 + $0x38] ss:$20 sps:$4 sm:$0xff]   ;;  %v1563_v12 = vld [vmem:[%s1935_s0 + $0x60] ss:$20 sps:$4 sm:$0xff]  }
  0x1a   :  { %1355 = vmatprep.subr.bf16.mxu1 %v1496_v25  ;;  %v1560_v9 = vld [vmem:[%s1935_s0 + $0xb0] ss:$20 sps:$4 sm:$0xff]   ;;  %v1562_v11 = vld [vmem:[%s1935_s0 + $0xd8] ss:$20 sps:$4 sm:$0xff]   ;;  %v1564_v13 = vld [vmem:[%s1935_s0 + $0x100] ss:$20 sps:$4 sm:$0xff]  }
  0x1b   :  { %v1565_v14 = vld [vmem:[%s1935_s0 + $0x88] ss:$20 sps:$4 sm:$0xff]  }
  0x1c   :  { %1292 = vmatpush3.bf16.msra.mxu0 %v1497_v26  ;;  %v1566_v15 = vld [vmem:[%s1935_s0 + $0x128] ss:$20 sps:$4 sm:$0xff]  }
  0x1d   :  { %1356 = vmatpush3.bf16.msra.mxu1 %v1498_v27  ;;  %1293 = vmatprep.subr.bf16.mxu0 %v1499_v28 }
  0x1e   :  { %1357 = vmatprep.subr.bf16.mxu1 %v1500_v29 }
  0x20   :  { %1294 = vmatpush3.bf16.msra.mxu0 %v1501_v30 }
  0x21   :  { %1358 = vmatpush3.bf16.msra.mxu1 %v1502_v31  ;;  %1423 = vmatprep.subr.bf16.mxu0 %v1509_v36 }
  0x22   :  { %1455 = vmatprep.subr.bf16.mxu1 %v1509_v36 }
  0x23   :  { %663 = vmatmul.mubr.bf16.vlgmr.msra.gmra.mrb[0].mxu0 %v1503_v32 }
  0x24   :  { %760 = vmatmul.mubr.bf16.vlgmr.msra.gmra.mrb[0].mxu1 %v1506_v34  ;;  %1424 = vmatpush3.bf16.msra.mxu0 %v1509_v36 }
  0x25   :  { %1463 = vmatpush3.bf16.msra.mxu1 %v1509_v36  ;;  %670 = vmatprep.mubr.bf16.mxu0 %v1510_v37 }
  0x26   :  { %767 = vmatprep.mubr.bf16.mxu1 %v1512_v38  ;;  %1425 = vmatprep.subr.bf16.mxu0 %v1516_v39 }
  0x27   :  { %1456 = vmatprep.subr.bf16.mxu1 %v1516_v39 }
  0x28   :  { %1426 = vmatpush3.bf16.msra.mxu0 %v1516_v39 }
  0x29   :  { %1464 = vmatpush3.bf16.msra.mxu1 %v1516_v39  ;;  %1427 = vmatprep.subr.bf16.mxu0 %v1523_v44 }
  0x2a   :  { %1457 = vmatprep.subr.bf16.mxu1 %v1523_v44 }
  0x2b   :  { %671 = vmatmul.mubr.bf16.gmra.mrb[4].mxu0 %v1514_v40 }
  0x2c   :  { %768 = vmatmul.mubr.bf16.gmra.mrb[4].mxu1 %v1515_v41  ;;  %678 = vmatprep.mubr.bf16.mxu0 %v1517_v42 }
  0x2d   :  { %775 = vmatprep.mubr.bf16.mxu1 %v1519_v43  ;;  %1428 = vmatpush3.bf16.msra.mxu0 %v1523_v44 }
  0x2e   :  { %1465 = vmatpush3.bf16.msra.mxu1 %v1523_v44  ;;  %1429 = vmatprep.subr.bf16.mxu0 %v1530_v45 }
  0x2f   :  { %1458 = vmatprep.subr.bf16.mxu1 %v1530_v45 }
  0x31   :  { %1430 = vmatpush3.bf16.msra.mxu0 %v1530_v45 }
  0x32   :  { %1466 = vmatpush3.bf16.msra.mxu1 %v1530_v45  ;;  %1431 = vmatprep.subr.bf16.mxu0 %v1537_v50 }
  0x33   :  { %679 = vmatmul.mubr.bf16.gmra.mrb[8].mxu0 %v1521_v46  ;;  %1459 = vmatprep.subr.bf16.mxu1 %v1537_v50 }
  0x34   :  { %776 = vmatmul.mubr.bf16.gmra.mrb[8].mxu1 %v1522_v47  ;;  %686 = vmatprep.mubr.bf16.mxu0 %v1524_v48 }
  0x35   :  { %783 = vmatprep.mubr.bf16.mxu1 %v1526_v49  ;;  %1432 = vmatpush3.bf16.msra.mxu0 %v1537_v50 }
  0x36   :  { %1467 = vmatpush3.bf16.msra.mxu1 %v1537_v50  ;;  %1433 = vmatprep.subr.bf16.mxu0 %v1544_v51 }
  0x37   :  { %1460 = vmatprep.subr.bf16.mxu1 %v1544_v51 }
  0x39   :  { %1434 = vmatpush3.bf16.msra.mxu0 %v1544_v51 }
  0x3a   :  { %1468 = vmatpush3.bf16.msra.mxu1 %v1544_v51  ;;  %1435 = vmatprep.subr.bf16.mxu0 %v1551_v55 }
  0x3b   :  { %687 = vmatmul.mubr.bf16.gmra.mrb[12].mxu0 %v1528_v52  ;;  %1461 = vmatprep.subr.bf16.mxu1 %v1551_v55 }
  0x3c   :  { %784 = vmatmul.mubr.bf16.gmra.mrb[12].mxu1 %v1529_v53  ;;  %694 = vmatprep.mubr.bf16.mxu0 %v1531_v54 }
  0x3d   :  { %791 = vmatprep.mubr.bf16.mxu1 %v1533_v56  ;;  %1436 = vmatpush3.bf16.msra.mxu0 %v1551_v55 }
  0x3e   :  { %1469 = vmatpush3.bf16.msra.mxu1 %v1551_v55  ;;  %1437 = vmatprep.subr.bf16.mxu0 %v1558_v57 }
  0x3f   :  { %1462 = vmatprep.subr.bf16.mxu1 %v1558_v57 }
  0x41   :  { %1438 = vmatpush3.bf16.msra.mxu0 %v1558_v57 }
  0x42   :  { %1470 = vmatpush3.bf16.msra.mxu1 %v1558_v57 }
  0x43   :  { %695 = vmatmul.mubr.bf16.gmra.mrb[16].mxu0 %v1535_v58 }
  0x44   :  { %792 = vmatmul.mubr.bf16.gmra.mrb[16].mxu1 %v1536_v59  ;;  %702 = vmatprep.mubr.bf16.mxu0 %v1538_v60 }
  0x45   :  { %799 = vmatprep.mubr.bf16.mxu1 %v1540_v61 }
  0x4b   :  { %703 = vmatmul.mubr.bf16.gmra.mrb[20].mxu0 %v1542_v62 }
  0x4c   :  { %800 = vmatmul.mubr.bf16.gmra.mrb[20].mxu1 %v1543_v63  ;;  %710 = vmatprep.mubr.bf16.mxu0 %v1545_v0 }
  0x4d   :  { %807 = vmatprep.mubr.bf16.mxu1 %v1547_v1 }
  0x53   :  { %711 = vmatmul.mubr.bf16.gmra.mrb[24].mxu0 %v1549_v2 }
  0x54   :  { %808 = vmatmul.mubr.bf16.gmra.mrb[24].mxu1 %v1550_v3  ;;  %718 = vmatprep.mubr.bf16.mxu0 %v1552_v4 }
  0x55   :  { %815 = vmatprep.mubr.bf16.mxu1 %v1554_v5 }
  0x5b   :  { %719 = vmatmul.mubr.bf16.gmra.mrb[28].mxu0 %v1556_v6 }
  0x5c   :  { %816 = vmatmul.mubr.bf16.gmra.mrb[28].mxu1 %v1557_v7  ;;  %1439 = vmatprep.mubr.bf16.mxu0 %v1559_v8 }
  0x5d   :  { %1447 = vmatprep.mubr.bf16.mxu1 %v1560_v9 }
  0x63   :  { %1440 = vmatmul.mubr.bf16.vlgmr.msra.gmra.mrb[32].mxu0 %v1561_v10 }
  0x64   :  { %1448 = vmatmul.mubr.bf16.vlgmr.msra.gmra.mrb[32].mxu1 %v1562_v11  ;;  %1443 = vmatprep.mubr.bf16.mxu0 %v1563_v12 }
  0x65   :  { %1451 = vmatprep.mubr.bf16.mxu1 %v1564_v13 }
  0x6b   :  { %1444 = vmatmul.mubr.bf16.gmra.mrb[36].mxu0 %v1565_v14 }
  0x6c   :  { %1452 = vmatmul.mubr.bf16.gmra.mrb[36].mxu1 %v1566_v15 }
  0xf6   :  { %v1295_v16 = vpop.f32.mrb[0].mxu0 }
  0xf7   :  { %v1359_v17 = vpop.f32.mrb[0].mxu1  ;;  %v1296_v18 = vpop.f32.mrb[1].mxu0 }
  0xf8   :  { %v1297_v19 = vadd.f32 %v1296_v18, %v1295_v16  ;;  %v1360_v20 = vpop.f32.mrb[1].mxu1  ;;  %v1298_v21 = vpop.f32.mrb[2].mxu0 }
  0xf9   :  { %v1361_v22 = vadd.f32 %v1360_v20, %v1359_v17  ;;  %v1362_v23 = vpop.f32.mrb[2].mxu1  ;;  %v1299_v24 = vpop.f32.mrb[3].mxu0 }
  0xfa   :  { %v1300_v25 = vadd.f32 %v1299_v24, %v1298_v21  ;;  %v1363_v26 = vpop.f32.mrb[3].mxu1 }
  0xfb   :  { %v1364_v27 = vadd.f32 %v1363_v26, %v1362_v23  ;;  %v1832_v28 = vadd.f32 %v1361_v22, %v1297_v19 }
  0xfd   :  { %v1834_v29 = vadd.f32 %v1364_v27, %v1300_v25 }
  0xfe   :  { %v1301_v30 = vpop.f32.mrb[4].mxu0 }
  0xff   :  { %v1365_v31 = vpop.f32.mrb[4].mxu1  ;;  %v1302_v32 = vpop.f32.mrb[5].mxu0 }
 0x100   :  { %v1303_v33 = vadd.f32 %v1302_v32, %v1301_v30  ;;  %v1366_v34 = vpop.f32.mrb[5].mxu1  ;;  %v1304_v35 = vpop.f32.mrb[6].mxu0 }
 0x101   :  { %v1367_v36 = vadd.f32 %v1366_v34, %v1365_v31  ;;  %v1368_v37 = vpop.f32.mrb[6].mxu1  ;;  %v1305_v38 = vpop.f32.mrb[7].mxu0 }
 0x102   :  { %v1306_v39 = vadd.f32 %v1305_v38, %v1304_v35  ;;  %v1369_v40 = vpop.f32.mrb[7].mxu1 }
 0x103   :  { %v1370_v41 = vadd.f32 %v1369_v40, %v1368_v37  ;;  %v1836_v42 = vadd.f32 %v1367_v36, %v1303_v33 }
 0x105   :  { %v1838_v43 = vadd.f32 %v1370_v41, %v1306_v39 }
 0x106   :  { %v1307_v44 = vpop.f32.mrb[8].mxu0 }
 0x107   :  { %v1371_v45 = vpop.f32.mrb[8].mxu1  ;;  %v1308_v46 = vpop.f32.mrb[9].mxu0 }
 0x108   :  { %v1309_v47 = vadd.f32 %v1308_v46, %v1307_v44  ;;  %v1372_v48 = vpop.f32.mrb[9].mxu1  ;;  %v1310_v49 = vpop.f32.mrb[10].mxu0 }
 0x109   :  { %v1373_v50 = vadd.f32 %v1372_v48, %v1371_v45  ;;  %v1374_v51 = vpop.f32.mrb[10].mxu1  ;;  %v1311_v52 = vpop.f32.mrb[11].mxu0 }
 0x10a   :  { %v1312_v53 = vadd.f32 %v1311_v52, %v1310_v49  ;;  %v1375_v54 = vpop.f32.mrb[11].mxu1 }
 0x10b   :  { %v1376_v55 = vadd.f32 %v1375_v54, %v1374_v51  ;;  %v1840_v56 = vadd.f32 %v1373_v50, %v1309_v47 }
 0x10d   :  { %v1842_v57 = vadd.f32 %v1376_v55, %v1312_v53 }
 0x10e   :  { %v1313_v58 = vpop.f32.mrb[12].mxu0 }
 0x10f   :  { %v1377_v59 = vpop.f32.mrb[12].mxu1  ;;  %v1314_v60 = vpop.f32.mrb[13].mxu0 }
 0x110   :  { %v1315_v61 = vadd.f32 %v1314_v60, %v1313_v58  ;;  %v1378_v62 = vpop.f32.mrb[13].mxu1  ;;  %v1316_v63 = vpop.f32.mrb[14].mxu0 }
 0x111   :  { %v1379_v0 = vadd.f32 %v1378_v62, %v1377_v59  ;;  %v1380_v1 = vpop.f32.mrb[14].mxu1  ;;  %v1317_v2 = vpop.f32.mrb[15].mxu0 }
 0x112   :  { %v1318_v3 = vadd.f32 %v1317_v2, %v1316_v63  ;;  %v1381_v4 = vpop.f32.mrb[15].mxu1 }
 0x113   :  { %v1382_v5 = vadd.f32 %v1381_v4, %v1380_v1  ;;  %v1844_v6 = vadd.f32 %v1379_v0, %v1315_v61 }
 0x115   :  { %v1846_v7 = vadd.f32 %v1382_v5, %v1318_v3 }
 0x116   :  { %v1319_v8 = vpop.f32.mrb[16].mxu0 }
 0x117   :  { %v1383_v9 = vpop.f32.mrb[16].mxu1  ;;  %v1320_v10 = vpop.f32.mrb[17].mxu0 }
 0x118   :  { %v1321_v11 = vadd.f32 %v1320_v10, %v1319_v8  ;;  %v1384_v12 = vpop.f32.mrb[17].mxu1  ;;  %v1322_v13 = vpop.f32.mrb[18].mxu0 }
 0x119   :  { %v1385_v14 = vadd.f32 %v1384_v12, %v1383_v9  ;;  %v1386_v15 = vpop.f32.mrb[18].mxu1  ;;  %v1323_v16 = vpop.f32.mrb[19].mxu0  ;;  %v1859_v9 = vld [vmem:[%s1936_s2] ss:$0 sm:$0xff] }
 0x11a   :  { %v1324_v17 = vadd.f32 %v1323_v16, %v1322_v13  ;;  %v1387_v18 = vpop.f32.mrb[19].mxu1  ;;  %v1865_v13 = vld [vmem:[%s1937_s3] ss:$0 sm:$0xff] }
 0x11b   :  { %v1388_v19 = vadd.f32 %v1387_v18, %v1386_v15  ;;  %v794_v20 = vadd.f32 %v1385_v14, %v1321_v11 }
 0x11d   :  { %v1848_v21 = vadd.f32 %v1388_v19, %v1324_v17 }
 0x11e   :  { %v1325_v22 = vpop.f32.mrb[20].mxu0 }
 0x11f   :  { %v1389_v23 = vpop.f32.mrb[20].mxu1  ;;  %v1326_v24 = vpop.f32.mrb[21].mxu0 }
 0x120   :  { %v1327_v25 = vadd.f32 %v1326_v24, %v1325_v22  ;;  %v1390_v26 = vpop.f32.mrb[21].mxu1  ;;  %v1328_v27 = vpop.f32.mrb[22].mxu0 }
 0x121   :  { %v1391_v30 = vadd.f32 %v1390_v26, %v1389_v23  ;;  %v1392_v31 = vpop.f32.mrb[22].mxu1  ;;  %v1329_v32 = vpop.f32.mrb[23].mxu0 }
 0x122   :  { %v1330_v33 = vadd.f32 %v1329_v32, %v1328_v27  ;;  %v1393_v34 = vpop.f32.mrb[23].mxu1 }
 0x123   :  { %v1394_v35 = vadd.f32 %v1393_v34, %v1392_v31  ;;  %v802_v36 = vadd.f32 %v1391_v30, %v1327_v25 }
 0x125   :  { %v805_v37 = vadd.f32 %v1394_v35, %v1330_v33 }
 0x126   :  { %v1331_v38 = vpop.f32.mrb[24].mxu0 }
 0x127   :  { %v1395_v39 = vpop.f32.mrb[24].mxu1  ;;  %v1332_v40 = vpop.f32.mrb[25].mxu0 }
 0x128   :  { %v1333_v41 = vadd.f32 %v1332_v40, %v1331_v38  ;;  %v1396_v44 = vpop.f32.mrb[25].mxu1  ;;  %v1334_v45 = vpop.f32.mrb[26].mxu0 }
 0x129   :  { %v1397_v46 = vadd.f32 %v1396_v44, %v1395_v39  ;;  %v1398_v47 = vpop.f32.mrb[26].mxu1  ;;  %v1335_v48 = vpop.f32.mrb[27].mxu0 }
 0x12a   :  { %v1336_v49 = vadd.f32 %v1335_v48, %v1334_v45  ;;  %v1399_v50 = vpop.f32.mrb[27].mxu1 }
 0x12b   :  { %v1400_v51 = vadd.f32 %v1399_v50, %v1398_v47  ;;  %v1850_v52 = vadd.f32 %v1397_v46, %v1333_v41 }
 0x12d   :  { %v1852_v53 = vadd.f32 %v1400_v51, %v1336_v49 }
 0x12e   :  { %v1337_v54 = vpop.f32.mrb[28].mxu0 }
 0x12f   :  { %v1401_v55 = vpop.f32.mrb[28].mxu1  ;;  %v1338_v58 = vpop.f32.mrb[29].mxu0 }
 0x130   :  { %v1339_v59 = vadd.f32 %v1338_v58, %v1337_v54  ;;  %v1402_v60 = vpop.f32.mrb[29].mxu1  ;;  %v1340_v61 = vpop.f32.mrb[30].mxu0 }
 0x131   :  { %v1403_v62 = vadd.f32 %v1402_v60, %v1401_v55  ;;  %v1404_v63 = vpop.f32.mrb[30].mxu1  ;;  %v1341_v0 = vpop.f32.mrb[31].mxu0 }
 0x132   :  { %v1342_v1 = vadd.f32 %v1341_v0, %v1340_v61  ;;  %v1405_v2 = vpop.f32.mrb[31].mxu1 }
 0x133   :  { %v1406_v3 = vadd.f32 %v1405_v2, %v1404_v63  ;;  %v818_v4 = vadd.f32 %v1403_v62, %v1339_v59 }
 0x135   :  { %v1854_v5 = vadd.f32 %v1406_v3, %v1342_v1 }
 0x136   :  { %v1441_v8 = vpop.f32.mrb[32].mxu0 }
 0x137   :  { %v867_v10 = vadd.f32 %v1441_v8, %v1836_v42  ;;  %v1449_v11 = vpop.f32.mrb[32].mxu1  ;;  %v858_v12 = vpop.f32.mrb[33].mxu0 }
 0x138   :  { %v899_v14 = vadd.f32 %v1449_v11, %v802_v36  ;;  %v859_v15 = vadd.f32 %v858_v12, %v1832_v28  ;;  %v890_v16 = vpop.f32.mrb[33].mxu1  ;;  %v1442_v17 = vpop.f32.mrb[34].mxu0 }
 0x139   :  { %v981_v18 = vmul.f32 %v1859_v9, %v867_v10  ;;  %v891_v19 = vadd.f32 %v890_v16, %v794_v20  ;;  %v870_v22 = vadd.f32 %v1442_v17, %v1838_v43  ;;  %v1450_v23 = vpop.f32.mrb[34].mxu1  ;;  %v861_v24 = vpop.f32.mrb[35].mxu0 }
 0x13a   :  { %v989_v42 = vmul.f32 %v1859_v9, %v899_v14  ;;  %v979_v25 = vmul.f32 %v1859_v9, %v859_v15  ;;  %v902_v26 = vadd.f32 %v1450_v23, %v805_v37  ;;  %v862_v27 = vadd.f32 %v861_v24, %v1834_v29  ;;  %v893_v30 = vpop.f32.mrb[35].mxu1 }
 0x13b   :  { %v1004_v31 = vadd.f32 %v1865_v13, %v981_v18  ;;  %v987_v28 = vmul.f32 %v1859_v9, %v891_v19  ;;  %v982_v32 = vmul.f32 %v1859_v9, %v870_v22  ;;  %v894_v20 = vadd.f32 %v893_v30, %v1848_v21 }
 0x13c   :  { %v1012_v43 = vadd.f32 %v1865_v13, %v989_v42  ;;  %v1002_v33 = vadd.f32 %v1865_v13, %v979_v25  ;;  %v990_v34 = vmul.f32 %v1859_v9, %v902_v26  ;;  %v980_v35 = vmul.f32 %v1859_v9, %v862_v27 }
 0x13d   :  { %v1020_v36 = vmax.f32 %v1004_v31, 0.0  ;;  %v1010_v29 = vadd.f32 %v1865_v13, %v987_v28  ;;  %v1005_v37 = vadd.f32 %v1865_v13, %v982_v32  ;;  %v988_v38 = vmul.f32 %v1859_v9, %v894_v20 }
 0x13e   :  { %v1028_v39 = vmax.f32 %v1012_v43, 0.0  ;;  %v1018_v40 = vmax.f32 %v1002_v33, 0.0  ;;  %v1013_v41 = vadd.f32 %v1865_v13, %v990_v34  ;;  %v1003_v21 = vadd.f32 %v1865_v13, %v980_v35  ;;  %v1445_v44 = vpop.f32.mrb[36].mxu0 }
 0x13f   :  { %v1026_v45 = vmax.f32 %v1010_v29, 0.0  ;;  %v1021_v46 = vmax.f32 %v1005_v37, 0.0  ;;  %v1011_v47 = vadd.f32 %v1865_v13, %v988_v38  ;;  %v883_v48 = vadd.f32 %v1445_v44, %v1844_v6  ;;  %v1453_v49 = vpop.f32.mrb[36].mxu1  ;;  %v874_v50 = vpop.f32.mrb[37].mxu0 }
 0x140   :  { %v1029_v51 = vmax.f32 %v1013_v41, 0.0  ;;  %v1019_v54 = vmax.f32 %v1003_v21, 0.0  ;;  %v915_v55 = vadd.f32 %v1453_v49, %v818_v4  ;;  %v875_v58 = vadd.f32 %v874_v50, %v1840_v56  ;;  %v906_v59 = vpop.f32.mrb[37].mxu1  ;;  %v1446_v60 = vpop.f32.mrb[38].mxu0 }
 0x141   :  { %v1240_v61 = vpack.c.bf16 %v1021_v46, %v1020_v36  ;;  %v1027_v62 = vmax.f32 %v1011_v47, 0.0  ;;  %v985_v63 = vmul.f32 %v1859_v9, %v883_v48  ;;  %v907_v0 = vadd.f32 %v906_v59, %v1850_v52  ;;  %v1454_v1 = vpop.f32.mrb[38].mxu1  ;;  %v877_v2 = vpop.f32.mrb[39].mxu0 }
 0x142   :  { %v1260_v3 = vpack.c.bf16 %v1029_v51, %v1028_v39  ;;  %v1235_v8 = vpack.c.bf16 %v1019_v54, %v1018_v40  ;;  %v993_v6 = vmul.f32 %v1859_v9, %v915_v55  ;;  %v983_v10 = vmul.f32 %v1859_v9, %v875_v58  ;;  %v909_v11 = vpop.f32.mrb[39].mxu1 }
 0x143   :  { %1272 = vst [vmem:[%s1938_s4 + $0x8] sm:$0xff] %v1240_v61   ;;  %v1255_v56 = vpack.c.bf16 %v1027_v62, %v1026_v45  ;;  %v991_v4 = vmul.f32 %v1859_v9, %v907_v0  ;;  %v886_v12 = vadd.f32 %v1446_v60, %v1846_v7  ;;  %v918_v52 = vadd.f32 %v1454_v1, %v1854_v5 }
 0x144   :  { %1276 = vst [vmem:[%s1938_s4 + $0x28] sm:$0xff] %v1260_v3   ;;  %1236 = vst [vmem:[%s1938_s4] sm:$0xff] %v1235_v8   ;;  %v878_v14 = vadd.f32 %v877_v2, %v1842_v57  ;;  %v1008_v15 = vadd.f32 %v1865_v13, %v985_v63  ;;  %v910_v16 = vadd.f32 %v909_v11, %v1852_v53 }
 0x145   :  { %1275 = vst [vmem:[%s1938_s4 + $0x20] sm:$0xff] %v1255_v56   ;;  %v986_v7 = vmul.f32 %v1859_v9, %v886_v12  ;;  %v1016_v17 = vadd.f32 %v1865_v13, %v993_v6  ;;  %v1006_v18 = vadd.f32 %v1865_v13, %v983_v10  ;;  %v994_v19 = vmul.f32 %v1859_v9, %v918_v52 }
 0x146   :  { %v984_v5 = vmul.f32 %v1859_v9, %v878_v14  ;;  %v1014_v57 = vadd.f32 %v1865_v13, %v991_v4  ;;  %v992_v23 = vmul.f32 %v1859_v9, %v910_v16  ;;  %v1024_v25 = vmax.f32 %v1008_v15, 0.0 }
 0x147   :  { %v1009_v22 = vadd.f32 %v1865_v13, %v986_v7  ;;  %v1017_v24 = vadd.f32 %v1865_v13, %v994_v19  ;;  %v1032_v27 = vmax.f32 %v1016_v17, 0.0  ;;  %v1022_v30 = vmax.f32 %v1006_v18, 0.0 }
 0x148   :  { %v1007_v42 = vadd.f32 %v1865_v13, %v984_v5  ;;  %v1015_v26 = vadd.f32 %v1865_v13, %v992_v23  ;;  %v1030_v32 = vmax.f32 %v1014_v57, 0.0 }
 0x149   :  { %v1025_v53 = vmax.f32 %v1009_v22, 0.0  ;;  %v1033_v31 = vmax.f32 %v1017_v24, 0.0 }
 0x14a   :  { %v1023_v28 = vmax.f32 %v1007_v42, 0.0  ;;  %v1031_v43 = vmax.f32 %v1015_v26, 0.0 }
 0x14b   :  { %v1250_v20 = vpack.c.bf16 %v1025_v53, %v1024_v25  ;;  %v1270_v33 = vpack.c.bf16 %v1033_v31, %v1032_v27 }
 0x14c   :  { %v1245_v34 = vpack.c.bf16 %v1023_v28, %v1022_v30  ;;  %v1265_v9 = vpack.c.bf16 %v1031_v43, %v1030_v32 }
 0x14d   :  { %1274 = vst [vmem:[%s1938_s4 + $0x18] sm:$0xff] %v1250_v20   ;;  %1278 = vst [vmem:[%s1938_s4 + $0x38] sm:$0xff] %v1270_v33  }
 0x14e   :  { %1273 = vst [vmem:[%s1938_s4 + $0x10] sm:$0xff] %v1245_v34   ;;  %1277 = vst [vmem:[%s1938_s4 + $0x30] sm:$0xff] %v1265_v9  }

// kernel: resnet18_backbone.24
= control target key start
LH: loop header
LB: loop body
LE: loop exit
PB: predicated region body
PF: predicated region fallthrough
CT: control target
= control target key end

     0   :  { %s2102_s1 = inlined_call_operand.vmem [shape: bf16[640,128], index: 1, kind: input, shape index: {}]   ;;  %s2103_s0 = inlined_call_operand.vmem [shape: bf16[128,640], index: 0, kind: input, shape index: {}]   ;;  %s2104_s4 = inlined_call_operand.vmem [shape: bf16[128,128], index: 4, kind: input, shape index: {}]   ;;  %s2105_s2 = inlined_call_operand.vmem [shape: f32[1,128], index: 2, kind: input, shape index: {}]   ;;  %s2106_s3 = inlined_call_operand.vmem [shape: f32[1,128], index: 3, kind: input, shape index: {}]   ;;  %s2107_s5 = inlined_call_operand.vmem [shape: bf16[128,128], index: 5, kind: output, shape index: {}]  }
   0x1   :  { %v1561_v0 = vld [vmem:[%s2102_s1 + $0x40] sm:$0xff]   ;;  %v1565_v4 = vld [vmem:[%s2102_s1 + $0x48] sm:$0xff]   ;;  %v1569_v8 = vld [vmem:[%s2102_s1 + $0x50] sm:$0xff]  }
   0x2   :  { %v1562_v1 = vld [vmem:[%s2102_s1 + $0xc0] sm:$0xff]   ;;  %1369 = vmatprep.subr.bf16.mxu0 %v1561_v0  ;;  %v1566_v5 = vld [vmem:[%s2102_s1 + $0xc8] sm:$0xff]   ;;  %v1570_v9 = vld [vmem:[%s2102_s1 + $0xd0] sm:$0xff]  }
   0x3   :  { %v1563_v2 = vld [vmem:[%s2102_s1] sm:$0xff]   ;;  %1433 = vmatprep.subr.bf16.mxu1 %v1562_v1  ;;  %v1567_v6 = vld [vmem:[%s2102_s1 + $0x8] sm:$0xff]   ;;  %v1571_v10 = vld [vmem:[%s2102_s1 + $0x10] sm:$0xff]  }
   0x4   :  { %v1564_v3 = vld [vmem:[%s2102_s1 + $0x80] sm:$0xff]   ;;  %1370 = vmatpush3.bf16.msra.mxu0 %v1563_v2  ;;  %v1568_v7 = vld [vmem:[%s2102_s1 + $0x88] sm:$0xff]   ;;  %v1572_v11 = vld [vmem:[%s2102_s1 + $0x90] sm:$0xff]  }
   0x5   :  { %1434 = vmatpush3.bf16.msra.mxu1 %v1564_v3  ;;  %1371 = vmatprep.subr.bf16.mxu0 %v1565_v4  ;;  %v1573_v12 = vld [vmem:[%s2102_s1 + $0x58] sm:$0xff]   ;;  %v1577_v16 = vld [vmem:[%s2102_s1 + $0x60] sm:$0xff]   ;;  %v1581_v20 = vld [vmem:[%s2102_s1 + $0x68] sm:$0xff]  }
   0x6   :  { %1435 = vmatprep.subr.bf16.mxu1 %v1566_v5  ;;  %v1574_v13 = vld [vmem:[%s2102_s1 + $0xd8] sm:$0xff]   ;;  %v1578_v17 = vld [vmem:[%s2102_s1 + $0xe0] sm:$0xff]   ;;  %v1582_v21 = vld [vmem:[%s2102_s1 + $0xe8] sm:$0xff]  }
   0x7   :  { %v1575_v14 = vld [vmem:[%s2102_s1 + $0x18] sm:$0xff]   ;;  %v1579_v18 = vld [vmem:[%s2102_s1 + $0x20] sm:$0xff]   ;;  %v1583_v22 = vld [vmem:[%s2102_s1 + $0x28] sm:$0xff]  }
   0x8   :  { %1372 = vmatpush3.bf16.msra.mxu0 %v1567_v6  ;;  %v1576_v15 = vld [vmem:[%s2102_s1 + $0x98] sm:$0xff]   ;;  %v1580_v19 = vld [vmem:[%s2102_s1 + $0xa0] sm:$0xff]   ;;  %v1584_v23 = vld [vmem:[%s2102_s1 + $0xa8] sm:$0xff]  }
   0x9   :  { %1436 = vmatpush3.bf16.msra.mxu1 %v1568_v7  ;;  %1373 = vmatprep.subr.bf16.mxu0 %v1569_v8  ;;  %v1585_v24 = vld [vmem:[%s2102_s1 + $0x70] sm:$0xff]   ;;  %v1589_v28 = vld [vmem:[%s2102_s1 + $0x78] sm:$0xff]   ;;  %v1598_v35 = vld [vmem:[%s2103_s0 + $0xc] ss:$20 sps:$4 sm:$0xff]  }
   0xa   :  { %1437 = vmatprep.subr.bf16.mxu1 %v1570_v9  ;;  %v1586_v25 = vld [vmem:[%s2102_s1 + $0xf0] sm:$0xff]   ;;  %v1590_v29 = vld [vmem:[%s2102_s1 + $0xf8] sm:$0xff]   ;;  %v1599_v36 = vld [vmem:[%s2102_s1 + $0x100] sm:$0xff]   ;;  %762 = vmatprep.mubr.bf16.mxu1 %v1598_v35 }
   0xb   :  { %v1587_v26 = vld [vmem:[%s2102_s1 + $0x30] sm:$0xff]   ;;  %v1591_v30 = vld [vmem:[%s2102_s1 + $0x38] sm:$0xff]   ;;  %v1600_v37 = vld [vmem:[%s2103_s0 + $0x2c] ss:$20 sps:$4 sm:$0xff]  }
   0xc   :  { %1374 = vmatpush3.bf16.msra.mxu0 %v1571_v10  ;;  %v1588_v27 = vld [vmem:[%s2102_s1 + $0xb0] sm:$0xff]   ;;  %v1592_v31 = vld [vmem:[%s2102_s1 + $0xb8] sm:$0xff]   ;;  %v1606_v39 = vld [vmem:[%s2102_s1 + $0x108] sm:$0xff]  }
   0xd   :  { %1438 = vmatpush3.bf16.msra.mxu1 %v1572_v11  ;;  %1375 = vmatprep.subr.bf16.mxu0 %v1573_v12  ;;  %v1593_v32 = vld [vmem:[%s2103_s0] ss:$20 sps:$4 sm:$0xff]   ;;  %v1595_v33 = vld [vmem:[%s2103_s0 + $0x4] ss:$20 sps:$4 sm:$0xff]   ;;  %v1596_v34 = vld [vmem:[%s2103_s0 + $0x8] ss:$20 sps:$4 sm:$0xff]  }
   0xe   :  { %1439 = vmatprep.subr.bf16.mxu1 %v1574_v13  ;;  %665 = vmatprep.mubr.bf16.mxu0 %v1595_v33  ;;  %v1602_v38 = vld [vmem:[%s2103_s0 + $0x34] ss:$20 sps:$4 sm:$0xff]   ;;  %v1605_v41 = vld [vmem:[%s2103_s0 + $0x30] ss:$20 sps:$4 sm:$0xff]   ;;  %v1620_v45 = vld [vmem:[%s2102_s1 + $0x118] sm:$0xff]  }
   0xf   :  { %v1604_v40 = vld [vmem:[%s2103_s0 + $0x28] ss:$20 sps:$4 sm:$0xff]   ;;  %v1613_v44 = vld [vmem:[%s2102_s1 + $0x110] sm:$0xff]   ;;  %v1612_v47 = vld [vmem:[%s2103_s0 + $0x58] ss:$20 sps:$4 sm:$0xff]  }
  0x10   :  { %1376 = vmatpush3.bf16.msra.mxu0 %v1575_v14  ;;  %v1607_v42 = vld [vmem:[%s2103_s0 + $0x54] ss:$20 sps:$4 sm:$0xff]   ;;  %v1609_v43 = vld [vmem:[%s2103_s0 + $0x5c] ss:$20 sps:$4 sm:$0xff]   ;;  %v1616_v49 = vld [vmem:[%s2103_s0 + $0x84] ss:$20 sps:$4 sm:$0xff]  }
  0x11   :  { %1440 = vmatpush3.bf16.msra.mxu1 %v1576_v15  ;;  %1377 = vmatprep.subr.bf16.mxu0 %v1577_v16  ;;  %v1611_v46 = vld [vmem:[%s2103_s0 + $0x50] ss:$20 sps:$4 sm:$0xff]   ;;  %v1634_v51 = vld [vmem:[%s2102_s1 + $0x128] sm:$0xff]   ;;  %v1619_v53 = vld [vmem:[%s2103_s0 + $0x80] ss:$20 sps:$4 sm:$0xff]  }
  0x12   :  { %1441 = vmatprep.subr.bf16.mxu1 %v1578_v17  ;;  %v1614_v48 = vld [vmem:[%s2103_s0 + $0x7c] ss:$20 sps:$4 sm:$0xff]   ;;  %v1627_v50 = vld [vmem:[%s2102_s1 + $0x120] sm:$0xff]   ;;  %v1618_v52 = vld [vmem:[%s2103_s0 + $0x78] ss:$20 sps:$4 sm:$0xff]  }
  0x13   :  { %v1621_v54 = vld [vmem:[%s2103_s0 + $0xa4] ss:$20 sps:$4 sm:$0xff]   ;;  %v1641_v55 = vld [vmem:[%s2102_s1 + $0x130] sm:$0xff]   ;;  %v1623_v56 = vld [vmem:[%s2103_s0 + $0xac] ss:$20 sps:$4 sm:$0xff]  }
  0x14   :  { %1378 = vmatpush3.bf16.msra.mxu0 %v1579_v18  ;;  %v1648_v57 = vld [vmem:[%s2102_s1 + $0x138] sm:$0xff]   ;;  %v1625_v58 = vld [vmem:[%s2103_s0 + $0xa0] ss:$20 sps:$4 sm:$0xff]   ;;  %v1633_v63 = vld [vmem:[%s2103_s0 + $0xd0] ss:$20 sps:$4 sm:$0xff]  }
  0x15   :  { %1442 = vmatpush3.bf16.msra.mxu1 %v1580_v19  ;;  %1379 = vmatprep.subr.bf16.mxu0 %v1581_v20  ;;  %v1626_v59 = vld [vmem:[%s2103_s0 + $0xa8] ss:$20 sps:$4 sm:$0xff]   ;;  %v1628_v60 = vld [vmem:[%s2103_s0 + $0xcc] ss:$20 sps:$4 sm:$0xff]   ;;  %v1639_v2 = vld [vmem:[%s2103_s0 + $0xf0] ss:$20 sps:$4 sm:$0xff]  }
  0x16   :  { %1443 = vmatprep.subr.bf16.mxu1 %v1582_v21  ;;  %v1630_v61 = vld [vmem:[%s2103_s0 + $0xd4] ss:$20 sps:$4 sm:$0xff]   ;;  %v1637_v1 = vld [vmem:[%s2103_s0 + $0xfc] ss:$20 sps:$4 sm:$0xff]   ;;  %v1640_v3 = vld [vmem:[%s2103_s0 + $0xf8] ss:$20 sps:$4 sm:$0xff]  }
  0x17   :  { %v1632_v62 = vld [vmem:[%s2103_s0 + $0xc8] ss:$20 sps:$4 sm:$0xff]   ;;  %v1644_v5 = vld [vmem:[%s2103_s0 + $0x124] ss:$20 sps:$4 sm:$0xff]   ;;  %v1647_v7 = vld [vmem:[%s2103_s0 + $0x120] ss:$20 sps:$4 sm:$0xff]  }
  0x18   :  { %1380 = vmatpush3.bf16.msra.mxu0 %v1583_v22  ;;  %v1635_v0 = vld [vmem:[%s2103_s0 + $0xf4] ss:$20 sps:$4 sm:$0xff]   ;;  %v1642_v4 = vld [vmem:[%s2103_s0 + $0x11c] ss:$20 sps:$4 sm:$0xff]   ;;  %v1646_v6 = vld [vmem:[%s2103_s0 + $0x118] ss:$20 sps:$4 sm:$0xff]  }
  0x19   :  { %1444 = vmatpush3.bf16.msra.mxu1 %v1584_v23  ;;  %1381 = vmatprep.subr.bf16.mxu0 %v1585_v24  ;;  %v1649_v8 = vld [vmem:[%s2103_s0 + $0x10] ss:$20 sps:$4 sm:$0xff]   ;;  %v1651_v10 = vld [vmem:[%s2103_s0 + $0x38] ss:$20 sps:$4 sm:$0xff]   ;;  %v1653_v12 = vld [vmem:[%s2103_s0 + $0x60] ss:$20 sps:$4 sm:$0xff]  }
  0x1a   :  { %1445 = vmatprep.subr.bf16.mxu1 %v1586_v25  ;;  %v1650_v9 = vld [vmem:[%s2103_s0 + $0xb0] ss:$20 sps:$4 sm:$0xff]   ;;  %v1652_v11 = vld [vmem:[%s2103_s0 + $0xd8] ss:$20 sps:$4 sm:$0xff]   ;;  %v1654_v13 = vld [vmem:[%s2103_s0 + $0x100] ss:$20 sps:$4 sm:$0xff]  }
  0x1b   :  { %v1655_v14 = vld [vmem:[%s2103_s0 + $0x88] ss:$20 sps:$4 sm:$0xff]  }
  0x1c   :  { %1382 = vmatpush3.bf16.msra.mxu0 %v1587_v26  ;;  %v1656_v15 = vld [vmem:[%s2103_s0 + $0x128] ss:$20 sps:$4 sm:$0xff]  }
  0x1d   :  { %1446 = vmatpush3.bf16.msra.mxu1 %v1588_v27  ;;  %1383 = vmatprep.subr.bf16.mxu0 %v1589_v28 }
  0x1e   :  { %1447 = vmatprep.subr.bf16.mxu1 %v1590_v29 }
  0x20   :  { %1384 = vmatpush3.bf16.msra.mxu0 %v1591_v30 }
  0x21   :  { %1448 = vmatpush3.bf16.msra.mxu1 %v1592_v31  ;;  %1513 = vmatprep.subr.bf16.mxu0 %v1599_v36 }
  0x22   :  { %1545 = vmatprep.subr.bf16.mxu1 %v1599_v36 }
  0x23   :  { %666 = vmatmul.mubr.bf16.vlgmr.msra.gmra.mrb[0].mxu0 %v1593_v32 }
  0x24   :  { %763 = vmatmul.mubr.bf16.vlgmr.msra.gmra.mrb[0].mxu1 %v1596_v34  ;;  %1514 = vmatpush3.bf16.msra.mxu0 %v1599_v36 }
  0x25   :  { %1553 = vmatpush3.bf16.msra.mxu1 %v1599_v36  ;;  %673 = vmatprep.mubr.bf16.mxu0 %v1600_v37 }
  0x26   :  { %770 = vmatprep.mubr.bf16.mxu1 %v1602_v38  ;;  %1515 = vmatprep.subr.bf16.mxu0 %v1606_v39 }
  0x27   :  { %1546 = vmatprep.subr.bf16.mxu1 %v1606_v39 }
  0x28   :  { %1516 = vmatpush3.bf16.msra.mxu0 %v1606_v39 }
  0x29   :  { %1554 = vmatpush3.bf16.msra.mxu1 %v1606_v39  ;;  %1517 = vmatprep.subr.bf16.mxu0 %v1613_v44 }
  0x2a   :  { %1547 = vmatprep.subr.bf16.mxu1 %v1613_v44 }
  0x2b   :  { %674 = vmatmul.mubr.bf16.gmra.mrb[4].mxu0 %v1604_v40 }
  0x2c   :  { %771 = vmatmul.mubr.bf16.gmra.mrb[4].mxu1 %v1605_v41  ;;  %681 = vmatprep.mubr.bf16.mxu0 %v1607_v42 }
  0x2d   :  { %778 = vmatprep.mubr.bf16.mxu1 %v1609_v43  ;;  %1518 = vmatpush3.bf16.msra.mxu0 %v1613_v44 }
  0x2e   :  { %1555 = vmatpush3.bf16.msra.mxu1 %v1613_v44  ;;  %1519 = vmatprep.subr.bf16.mxu0 %v1620_v45 }
  0x2f   :  { %1548 = vmatprep.subr.bf16.mxu1 %v1620_v45 }
  0x31   :  { %1520 = vmatpush3.bf16.msra.mxu0 %v1620_v45 }
  0x32   :  { %1556 = vmatpush3.bf16.msra.mxu1 %v1620_v45  ;;  %1521 = vmatprep.subr.bf16.mxu0 %v1627_v50 }
  0x33   :  { %682 = vmatmul.mubr.bf16.gmra.mrb[8].mxu0 %v1611_v46  ;;  %1549 = vmatprep.subr.bf16.mxu1 %v1627_v50 }
  0x34   :  { %779 = vmatmul.mubr.bf16.gmra.mrb[8].mxu1 %v1612_v47  ;;  %689 = vmatprep.mubr.bf16.mxu0 %v1614_v48 }
  0x35   :  { %786 = vmatprep.mubr.bf16.mxu1 %v1616_v49  ;;  %1522 = vmatpush3.bf16.msra.mxu0 %v1627_v50 }
  0x36   :  { %1557 = vmatpush3.bf16.msra.mxu1 %v1627_v50  ;;  %1523 = vmatprep.subr.bf16.mxu0 %v1634_v51 }
  0x37   :  { %1550 = vmatprep.subr.bf16.mxu1 %v1634_v51 }
  0x39   :  { %1524 = vmatpush3.bf16.msra.mxu0 %v1634_v51 }
  0x3a   :  { %1558 = vmatpush3.bf16.msra.mxu1 %v1634_v51  ;;  %1525 = vmatprep.subr.bf16.mxu0 %v1641_v55 }
  0x3b   :  { %690 = vmatmul.mubr.bf16.gmra.mrb[12].mxu0 %v1618_v52  ;;  %1551 = vmatprep.subr.bf16.mxu1 %v1641_v55 }
  0x3c   :  { %787 = vmatmul.mubr.bf16.gmra.mrb[12].mxu1 %v1619_v53  ;;  %697 = vmatprep.mubr.bf16.mxu0 %v1621_v54 }
  0x3d   :  { %794 = vmatprep.mubr.bf16.mxu1 %v1623_v56  ;;  %1526 = vmatpush3.bf16.msra.mxu0 %v1641_v55 }
  0x3e   :  { %1559 = vmatpush3.bf16.msra.mxu1 %v1641_v55  ;;  %1527 = vmatprep.subr.bf16.mxu0 %v1648_v57 }
  0x3f   :  { %1552 = vmatprep.subr.bf16.mxu1 %v1648_v57 }
  0x41   :  { %1528 = vmatpush3.bf16.msra.mxu0 %v1648_v57 }
  0x42   :  { %1560 = vmatpush3.bf16.msra.mxu1 %v1648_v57 }
  0x43   :  { %698 = vmatmul.mubr.bf16.gmra.mrb[16].mxu0 %v1625_v58 }
  0x44   :  { %795 = vmatmul.mubr.bf16.gmra.mrb[16].mxu1 %v1626_v59  ;;  %705 = vmatprep.mubr.bf16.mxu0 %v1628_v60 }
  0x45   :  { %802 = vmatprep.mubr.bf16.mxu1 %v1630_v61 }
  0x4b   :  { %706 = vmatmul.mubr.bf16.gmra.mrb[20].mxu0 %v1632_v62 }
  0x4c   :  { %803 = vmatmul.mubr.bf16.gmra.mrb[20].mxu1 %v1633_v63  ;;  %713 = vmatprep.mubr.bf16.mxu0 %v1635_v0 }
  0x4d   :  { %810 = vmatprep.mubr.bf16.mxu1 %v1637_v1 }
  0x53   :  { %714 = vmatmul.mubr.bf16.gmra.mrb[24].mxu0 %v1639_v2 }
  0x54   :  { %811 = vmatmul.mubr.bf16.gmra.mrb[24].mxu1 %v1640_v3  ;;  %721 = vmatprep.mubr.bf16.mxu0 %v1642_v4 }
  0x55   :  { %818 = vmatprep.mubr.bf16.mxu1 %v1644_v5 }
  0x5b   :  { %722 = vmatmul.mubr.bf16.gmra.mrb[28].mxu0 %v1646_v6 }
  0x5c   :  { %819 = vmatmul.mubr.bf16.gmra.mrb[28].mxu1 %v1647_v7  ;;  %1529 = vmatprep.mubr.bf16.mxu0 %v1649_v8 }
  0x5d   :  { %1537 = vmatprep.mubr.bf16.mxu1 %v1650_v9 }
  0x63   :  { %1530 = vmatmul.mubr.bf16.vlgmr.msra.gmra.mrb[32].mxu0 %v1651_v10 }
  0x64   :  { %1538 = vmatmul.mubr.bf16.vlgmr.msra.gmra.mrb[32].mxu1 %v1652_v11  ;;  %1533 = vmatprep.mubr.bf16.mxu0 %v1653_v12 }
  0x65   :  { %1541 = vmatprep.mubr.bf16.mxu1 %v1654_v13 }
  0x6b   :  { %1534 = vmatmul.mubr.bf16.gmra.mrb[36].mxu0 %v1655_v14 }
  0x6c   :  { %1542 = vmatmul.mubr.bf16.gmra.mrb[36].mxu1 %v1656_v15 }
  0xf6   :  { %v1385_v16 = vpop.f32.mrb[0].mxu0 }
  0xf7   :  { %v1449_v17 = vpop.f32.mrb[0].mxu1  ;;  %v1386_v18 = vpop.f32.mrb[1].mxu0 }
  0xf8   :  { %v1387_v19 = vadd.f32 %v1386_v18, %v1385_v16  ;;  %v1450_v20 = vpop.f32.mrb[1].mxu1  ;;  %v1388_v21 = vpop.f32.mrb[2].mxu0 }
  0xf9   :  { %v1451_v22 = vadd.f32 %v1450_v20, %v1449_v17  ;;  %v1452_v23 = vpop.f32.mrb[2].mxu1  ;;  %v1389_v24 = vpop.f32.mrb[3].mxu0 }
  0xfa   :  { %v1390_v25 = vadd.f32 %v1389_v24, %v1388_v21  ;;  %v1453_v26 = vpop.f32.mrb[3].mxu1 }
  0xfb   :  { %v1454_v27 = vadd.f32 %v1453_v26, %v1452_v23  ;;  %v1927_v28 = vadd.f32 %v1451_v22, %v1387_v19 }
  0xfd   :  { %v1929_v29 = vadd.f32 %v1454_v27, %v1390_v25 }
  0xfe   :  { %v1391_v30 = vpop.f32.mrb[4].mxu0 }
  0xff   :  { %v1455_v31 = vpop.f32.mrb[4].mxu1  ;;  %v1392_v32 = vpop.f32.mrb[5].mxu0 }
 0x100   :  { %v1393_v33 = vadd.f32 %v1392_v32, %v1391_v30  ;;  %v1456_v34 = vpop.f32.mrb[5].mxu1  ;;  %v1394_v35 = vpop.f32.mrb[6].mxu0 }
 0x101   :  { %v1457_v36 = vadd.f32 %v1456_v34, %v1455_v31  ;;  %v1458_v37 = vpop.f32.mrb[6].mxu1  ;;  %v1395_v38 = vpop.f32.mrb[7].mxu0 }
 0x102   :  { %v1396_v39 = vadd.f32 %v1395_v38, %v1394_v35  ;;  %v1459_v40 = vpop.f32.mrb[7].mxu1 }
 0x103   :  { %v1460_v41 = vadd.f32 %v1459_v40, %v1458_v37  ;;  %v1931_v42 = vadd.f32 %v1457_v36, %v1393_v33 }
 0x105   :  { %v1933_v43 = vadd.f32 %v1460_v41, %v1396_v39 }
 0x106   :  { %v1397_v44 = vpop.f32.mrb[8].mxu0 }
 0x107   :  { %v1461_v45 = vpop.f32.mrb[8].mxu1  ;;  %v1398_v46 = vpop.f32.mrb[9].mxu0 }
 0x108   :  { %v1399_v47 = vadd.f32 %v1398_v46, %v1397_v44  ;;  %v1462_v48 = vpop.f32.mrb[9].mxu1  ;;  %v1400_v49 = vpop.f32.mrb[10].mxu0 }
 0x109   :  { %v1463_v50 = vadd.f32 %v1462_v48, %v1461_v45  ;;  %v1464_v51 = vpop.f32.mrb[10].mxu1  ;;  %v1401_v52 = vpop.f32.mrb[11].mxu0 }
 0x10a   :  { %v1402_v53 = vadd.f32 %v1401_v52, %v1400_v49  ;;  %v1465_v54 = vpop.f32.mrb[11].mxu1 }
 0x10b   :  { %v1466_v55 = vadd.f32 %v1465_v54, %v1464_v51  ;;  %v1935_v56 = vadd.f32 %v1463_v50, %v1399_v47 }
 0x10d   :  { %v1937_v57 = vadd.f32 %v1466_v55, %v1402_v53 }
 0x10e   :  { %v1403_v58 = vpop.f32.mrb[12].mxu0 }
 0x10f   :  { %v1467_v59 = vpop.f32.mrb[12].mxu1  ;;  %v1404_v60 = vpop.f32.mrb[13].mxu0 }
 0x110   :  { %v1405_v61 = vadd.f32 %v1404_v60, %v1403_v58  ;;  %v1468_v62 = vpop.f32.mrb[13].mxu1  ;;  %v1406_v63 = vpop.f32.mrb[14].mxu0 }
 0x111   :  { %v1469_v0 = vadd.f32 %v1468_v62, %v1467_v59  ;;  %v1470_v1 = vpop.f32.mrb[14].mxu1  ;;  %v1407_v2 = vpop.f32.mrb[15].mxu0 }
 0x112   :  { %v1408_v3 = vadd.f32 %v1407_v2, %v1406_v63  ;;  %v1471_v4 = vpop.f32.mrb[15].mxu1 }
 0x113   :  { %v1472_v5 = vadd.f32 %v1471_v4, %v1470_v1  ;;  %v1939_v6 = vadd.f32 %v1469_v0, %v1405_v61  ;;  %v1961_v4 = vld [vmem:[%s2104_s4 + $0x28] sm:$0xff]  }
 0x115   :  { %v1941_v7 = vadd.f32 %v1472_v5, %v1408_v3  ;;  %v1956_v3 = vld [vmem:[%s2104_s4 + $0x8] sm:$0xff]  }
 0x116   :  { %v1409_v8 = vpop.f32.mrb[16].mxu0 }
 0x117   :  { %v1473_v9 = vpop.f32.mrb[16].mxu1  ;;  %v1410_v10 = vpop.f32.mrb[17].mxu0 }
 0x118   :  { %v1411_v11 = vadd.f32 %v1410_v10, %v1409_v8  ;;  %v1474_v12 = vpop.f32.mrb[17].mxu1  ;;  %v1412_v13 = vpop.f32.mrb[18].mxu0  ;;  %v1966_v8 = vld [vmem:[%s2104_s4] sm:$0xff]  }
 0x119   :  { %v1475_v14 = vadd.f32 %v1474_v12, %v1473_v9  ;;  %v1476_v15 = vpop.f32.mrb[18].mxu1  ;;  %v1413_v16 = vpop.f32.mrb[19].mxu0  ;;  %v1971_v9 = vld [vmem:[%s2104_s4 + $0x20] sm:$0xff]   ;;  %v1289_v12 = vunpack.c.l.bf16 %v1956_v3 }
 0x11a   :  { %v1414_v17 = vadd.f32 %v1413_v16, %v1412_v13  ;;  %v1477_v18 = vpop.f32.mrb[19].mxu1  ;;  %v1305_v13 = vunpack.c.l.bf16 %v1961_v4 }
 0x11b   :  { %v1478_v19 = vadd.f32 %v1477_v18, %v1476_v15  ;;  %v1943_v20 = vadd.f32 %v1475_v14, %v1411_v11  ;;  %v1978_v11 = vld [vmem:[%s2104_s4 + $0x18] sm:$0xff]   ;;  %v1990_v15 = vld [vmem:[%s2104_s4 + $0x10] sm:$0xff]   ;;  %v1997_v18 = vld [vmem:[%s2105_s2] ss:$0 sm:$0xff] }
 0x11c   :  { %v1985_v14 = vld [vmem:[%s2104_s4 + $0x38] sm:$0xff]  }
 0x11d   :  { %v1945_v21 = vadd.f32 %v1478_v19, %v1414_v17  ;;  %v1285_v19 = vunpack.c.l.bf16 %v1966_v8 }
 0x11e   :  { %v1415_v22 = vpop.f32.mrb[20].mxu0 }
 0x11f   :  { %v1479_v23 = vpop.f32.mrb[20].mxu1  ;;  %v1416_v24 = vpop.f32.mrb[21].mxu0 }
 0x120   :  { %v1417_v25 = vadd.f32 %v1416_v24, %v1415_v22  ;;  %v1480_v26 = vpop.f32.mrb[21].mxu1  ;;  %v1418_v27 = vpop.f32.mrb[22].mxu0  ;;  %v1301_v22 = vunpack.c.l.bf16 %v1971_v9  ;;  %v1306_v24 = vunpack.c.h.bf16 %v1961_v4 }
 0x121   :  { %v1481_v30 = vadd.f32 %v1480_v26, %v1479_v23  ;;  %v1482_v31 = vpop.f32.mrb[22].mxu1  ;;  %v1419_v32 = vpop.f32.mrb[23].mxu0  ;;  %v1290_v23 = vunpack.c.h.bf16 %v1956_v3 }
 0x122   :  { %v1420_v33 = vadd.f32 %v1419_v32, %v1418_v27  ;;  %v1483_v34 = vpop.f32.mrb[23].mxu1  ;;  %v1302_v32 = vunpack.c.h.bf16 %v1971_v9 }
 0x123   :  { %v1484_v35 = vadd.f32 %v1483_v34, %v1482_v31  ;;  %v805_v36 = vadd.f32 %v1481_v30, %v1417_v25  ;;  %v2006_v25 = vld [vmem:[%s2104_s4 + $0x30] sm:$0xff]   ;;  %v1286_v31 = vunpack.c.h.bf16 %v1966_v8  ;;  %v2015_v34 = vld [vmem:[%s2106_s3] ss:$0 sm:$0xff] }
 0x125   :  { %v1947_v37 = vadd.f32 %v1484_v35, %v1420_v33  ;;  %v1297_v33 = vunpack.c.l.bf16 %v1978_v11 }
 0x126   :  { %v1421_v38 = vpop.f32.mrb[24].mxu0 }
 0x127   :  { %v1485_v39 = vpop.f32.mrb[24].mxu1  ;;  %v1422_v40 = vpop.f32.mrb[25].mxu0 }
 0x128   :  { %v1423_v41 = vadd.f32 %v1422_v40, %v1421_v38  ;;  %v1486_v44 = vpop.f32.mrb[25].mxu1  ;;  %v1424_v45 = vpop.f32.mrb[26].mxu0 }
 0x129   :  { %v1487_v46 = vadd.f32 %v1486_v44, %v1485_v39  ;;  %v1488_v47 = vpop.f32.mrb[26].mxu1  ;;  %v1425_v48 = vpop.f32.mrb[27].mxu0 }
 0x12a   :  { %v1426_v49 = vadd.f32 %v1425_v48, %v1424_v45  ;;  %v1489_v50 = vpop.f32.mrb[27].mxu1 }
 0x12b   :  { %v1490_v51 = vadd.f32 %v1489_v50, %v1488_v47  ;;  %v1949_v52 = vadd.f32 %v1487_v46, %v1423_v41  ;;  %v1293_v41 = vunpack.c.l.bf16 %v1990_v15 }
 0x12d   :  { %v1951_v53 = vadd.f32 %v1490_v51, %v1426_v49  ;;  %v1309_v49 = vunpack.c.l.bf16 %v2006_v25 }
 0x12e   :  { %v1427_v54 = vpop.f32.mrb[28].mxu0 }
 0x12f   :  { %v1491_v55 = vpop.f32.mrb[28].mxu1  ;;  %v1428_v58 = vpop.f32.mrb[29].mxu0 }
 0x130   :  { %v1429_v59 = vadd.f32 %v1428_v58, %v1427_v54  ;;  %v1492_v60 = vpop.f32.mrb[29].mxu1  ;;  %v1430_v61 = vpop.f32.mrb[30].mxu0 }
 0x131   :  { %v1493_v62 = vadd.f32 %v1492_v60, %v1491_v55  ;;  %v1494_v63 = vpop.f32.mrb[30].mxu1  ;;  %v1431_v0 = vpop.f32.mrb[31].mxu0 }
 0x132   :  { %v1432_v1 = vadd.f32 %v1431_v0, %v1430_v61  ;;  %v1495_v2 = vpop.f32.mrb[31].mxu1 }
 0x133   :  { %v1496_v5 = vadd.f32 %v1495_v2, %v1494_v63  ;;  %v1973_v10 = vadd.f32 %v1493_v62, %v1429_v59 }
 0x135   :  { %v1992_v16 = vadd.f32 %v1496_v5, %v1432_v1 }
 0x136   :  { %v1531_v17 = vpop.f32.mrb[32].mxu0 }
 0x137   :  { %v870_v26 = vadd.f32 %v1531_v17, %v1931_v42  ;;  %v1539_v27 = vpop.f32.mrb[32].mxu1  ;;  %v861_v30 = vpop.f32.mrb[33].mxu0  ;;  %v1313_v42 = vunpack.c.l.bf16 %v1985_v14 }
 0x138   :  { %v902_v35 = vadd.f32 %v1539_v27, %v805_v36  ;;  %v862_v38 = vadd.f32 %v861_v30, %v1927_v28  ;;  %v893_v39 = vpop.f32.mrb[33].mxu1  ;;  %v1532_v40 = vpop.f32.mrb[34].mxu0 }
 0x139   :  { %v984_v44 = vmul.f32 %v1997_v18, %v870_v26  ;;  %v894_v45 = vadd.f32 %v893_v39, %v1943_v20  ;;  %v873_v46 = vadd.f32 %v1532_v40, %v1933_v43  ;;  %v1540_v47 = vpop.f32.mrb[34].mxu1  ;;  %v864_v48 = vpop.f32.mrb[35].mxu0 }
 0x13a   :  { %v992_v36 = vmul.f32 %v1997_v18, %v902_v35  ;;  %v982_v28 = vmul.f32 %v1997_v18, %v862_v38  ;;  %v905_v50 = vadd.f32 %v1540_v47, %v1947_v37  ;;  %v865_v51 = vadd.f32 %v864_v48, %v1929_v29  ;;  %v896_v54 = vpop.f32.mrb[35].mxu1 }
 0x13b   :  { %v1007_v55 = vadd.f32 %v2015_v34, %v984_v44  ;;  %v990_v58 = vmul.f32 %v1997_v18, %v894_v45  ;;  %v985_v20 = vmul.f32 %v1997_v18, %v873_v46  ;;  %v897_v43 = vadd.f32 %v896_v54, %v1945_v21 }
 0x13c   :  { %v1015_v59 = vadd.f32 %v2015_v34, %v992_v36  ;;  %v1005_v60 = vadd.f32 %v2015_v34, %v982_v28  ;;  %v993_v61 = vmul.f32 %v1997_v18, %v905_v50  ;;  %v983_v62 = vmul.f32 %v1997_v18, %v865_v51 }
 0x13d   :  { %v1055_v37 = vadd.f32 %v1289_v12, %v1007_v55  ;;  %v1013_v29 = vadd.f32 %v2015_v34, %v990_v58  ;;  %v1008_v63 = vadd.f32 %v2015_v34, %v985_v20  ;;  %v991_v0 = vmul.f32 %v1997_v18, %v897_v43 }
 0x13e   :  { %v1063_v1 = vadd.f32 %v1305_v13, %v1015_v59  ;;  %v1053_v2 = vadd.f32 %v1285_v19, %v1005_v60  ;;  %v1016_v3 = vadd.f32 %v2015_v34, %v993_v61  ;;  %v1006_v21 = vadd.f32 %v2015_v34, %v983_v62  ;;  %v1535_v4 = vpop.f32.mrb[36].mxu0 }
 0x13f   :  { %v1071_v5 = vmax.f32 %v1055_v37, 0.0  ;;  %v1061_v8 = vadd.f32 %v1301_v22, %v1013_v29  ;;  %v1056_v9 = vadd.f32 %v1290_v23, %v1008_v63  ;;  %v1014_v17 = vadd.f32 %v2015_v34, %v991_v0  ;;  %v1543_v26 = vpop.f32.mrb[36].mxu1  ;;  %v877_v12 = vpop.f32.mrb[37].mxu0 }
 0x140   :  { %v1079_v27 = vmax.f32 %v1063_v1, 0.0  ;;  %v1069_v30 = vmax.f32 %v1053_v2, 0.0  ;;  %v1064_v35 = vadd.f32 %v1306_v24, %v1016_v3  ;;  %v1054_v38 = vadd.f32 %v1286_v31, %v1006_v21  ;;  %v909_v39 = vpop.f32.mrb[37].mxu1  ;;  %v1536_v40 = vpop.f32.mrb[38].mxu0 }
 0x141   :  { %v1077_v13 = vmax.f32 %v1061_v8, 0.0  ;;  %v1072_v19 = vmax.f32 %v1056_v9, 0.0  ;;  %v1062_v44 = vadd.f32 %v1302_v32, %v1014_v17  ;;  %v886_v45 = vadd.f32 %v1535_v4, %v1939_v6  ;;  %v1544_v46 = vpop.f32.mrb[38].mxu1  ;;  %v880_v47 = vpop.f32.mrb[39].mxu0 }
 0x142   :  { %v1080_v48 = vmax.f32 %v1064_v35, 0.0  ;;  %v1070_v22 = vmax.f32 %v1054_v38, 0.0  ;;  %v918_v23 = vadd.f32 %v1543_v26, %v1973_v10  ;;  %v878_v36 = vadd.f32 %v877_v12, %v1935_v56  ;;  %v912_v28 = vpop.f32.mrb[39].mxu1 }
 0x143   :  { %v1323_v50 = vpack.c.bf16 %v1072_v19, %v1071_v5  ;;  %v1078_v51 = vmax.f32 %v1062_v44, 0.0  ;;  %v988_v24 = vmul.f32 %v1997_v18, %v886_v45  ;;  %v910_v31 = vadd.f32 %v909_v39, %v1949_v52 }
 0x144   :  { %v1343_v54 = vpack.c.bf16 %v1080_v48, %v1079_v27  ;;  %v1318_v55 = vpack.c.bf16 %v1070_v22, %v1069_v30  ;;  %v996_v32 = vmul.f32 %v1997_v18, %v918_v23  ;;  %v986_v6 = vmul.f32 %v1997_v18, %v878_v36 }
 0x145   :  { %1362 = vst [vmem:[%s2107_s5 + $0x8] sm:$0xff] %v1323_v50   ;;  %v1338_v10 = vpack.c.bf16 %v1078_v51, %v1077_v13  ;;  %v1011_v56 = vadd.f32 %v2015_v34, %v988_v24  ;;  %v994_v58 = vmul.f32 %v1997_v18, %v910_v31  ;;  %v889_v20 = vadd.f32 %v1536_v40, %v1941_v7 }
 0x146   :  { %1366 = vst [vmem:[%s2107_s5 + $0x28] sm:$0xff] %v1343_v54   ;;  %1319 = vst [vmem:[%s2107_s5] sm:$0xff] %v1318_v55   ;;  %v1019_v52 = vadd.f32 %v2015_v34, %v996_v32  ;;  %v1009_v43 = vadd.f32 %v2015_v34, %v986_v6  ;;  %v921_v59 = vadd.f32 %v1544_v46, %v1992_v16  ;;  %v1298_v62 = vunpack.c.h.bf16 %v1978_v11 }
 0x147   :  { %v881_v60 = vadd.f32 %v880_v47, %v1937_v57  ;;  %1365 = vst [vmem:[%s2107_s5 + $0x20] sm:$0xff] %v1338_v10   ;;  %v1017_v7 = vadd.f32 %v2015_v34, %v994_v58  ;;  %v989_v61 = vmul.f32 %v1997_v18, %v889_v20  ;;  %v913_v37 = vadd.f32 %v912_v28, %v1951_v53 }
 0x148   :  { %v997_v29 = vmul.f32 %v1997_v18, %v921_v59  ;;  %v1314_v63 = vunpack.c.h.bf16 %v1985_v14  ;;  %v1294_v57 = vunpack.c.h.bf16 %v1990_v15  ;;  %v1059_v0 = vadd.f32 %v1297_v33, %v1011_v56 }
 0x149   :  { %v987_v16 = vmul.f32 %v1997_v18, %v881_v60  ;;  %v1012_v1 = vadd.f32 %v2015_v34, %v989_v61  ;;  %v995_v2 = vmul.f32 %v1997_v18, %v913_v37  ;;  %v1310_v3 = vunpack.c.h.bf16 %v2006_v25 }
 0x14a   :  { %v1067_v53 = vadd.f32 %v1313_v42, %v1019_v52  ;;  %v1057_v21 = vadd.f32 %v1293_v41, %v1009_v43  ;;  %v1020_v4 = vadd.f32 %v2015_v34, %v997_v29  ;;  %v1065_v11 = vadd.f32 %v1309_v49, %v1017_v7 }
 0x14b   :  { %v1010_v5 = vadd.f32 %v2015_v34, %v987_v16  ;;  %v1060_v33 = vadd.f32 %v1298_v62, %v1012_v1  ;;  %v1018_v8 = vadd.f32 %v2015_v34, %v995_v2  ;;  %v1075_v17 = vmax.f32 %v1059_v0, 0.0 }
 0x14c   :  { %v1068_v9 = vadd.f32 %v1314_v63, %v1020_v4  ;;  %v1083_v14 = vmax.f32 %v1067_v53, 0.0  ;;  %v1073_v42 = vmax.f32 %v1057_v21, 0.0  ;;  %v1081_v41 = vmax.f32 %v1065_v11, 0.0 }
 0x14d   :  { %v1058_v18 = vadd.f32 %v1294_v57, %v1010_v5  ;;  %v1076_v26 = vmax.f32 %v1060_v33, 0.0  ;;  %v1066_v12 = vadd.f32 %v1310_v3, %v1018_v8 }
 0x14e   :  { %v1084_v27 = vmax.f32 %v1068_v9, 0.0 }
 0x14f   :  { %v1074_v15 = vmax.f32 %v1058_v18, 0.0  ;;  %v1333_v30 = vpack.c.bf16 %v1076_v26, %v1075_v17  ;;  %v1082_v35 = vmax.f32 %v1066_v12, 0.0 }
 0x150   :  { %v1353_v38 = vpack.c.bf16 %v1084_v27, %v1083_v14 }
 0x151   :  { %v1328_v39 = vpack.c.bf16 %v1074_v15, %v1073_v42  ;;  %1364 = vst [vmem:[%s2107_s5 + $0x18] sm:$0xff] %v1333_v30   ;;  %v1348_v25 = vpack.c.bf16 %v1082_v35, %v1081_v41 }
 0x152   :  { %1368 = vst [vmem:[%s2107_s5 + $0x38] sm:$0xff] %v1353_v38  }
 0x153   :  { %1363 = vst [vmem:[%s2107_s5 + $0x10] sm:$0xff] %v1328_v39   ;;  %1367 = vst [vmem:[%s2107_s5 + $0x30] sm:$0xff] %v1348_v25  }

// kernel: resnet18_backbone.28
= control target key start
LH: loop header
LB: loop body
LE: loop exit
PB: predicated region body
PF: predicated region fallthrough
CT: control target
= control target key end

     0   :  { %s1024_s1 = inlined_call_operand.vmem [shape: bf16[640,128], index: 1, kind: input, shape index: {}]   ;;  %s1025_s0 = inlined_call_operand.vmem [shape: bf16[32,640], index: 0, kind: input, shape index: {}]   ;;  %s1026_s2 = inlined_call_operand.vmem [shape: f32[1,128], index: 2, kind: input, shape index: {}]   ;;  %s1027_s3 = inlined_call_operand.vmem [shape: f32[1,128], index: 3, kind: input, shape index: {}]   ;;  %s1028_s4 = inlined_call_operand.vmem [shape: bf16[32,128], index: 4, kind: output, shape index: {}]  }
   0x1   :  { %v783_v0 = vld [vmem:[%s1024_s1 + $0x40] sm:$0xff]   ;;  %v787_v4 = vld [vmem:[%s1024_s1 + $0x48] sm:$0xff]   ;;  %v791_v8 = vld [vmem:[%s1024_s1 + $0x50] sm:$0xff]  }
   0x2   :  { %v784_v1 = vld [vmem:[%s1024_s1 + $0xc0] sm:$0xff]   ;;  %697 = vmatprep.subr.bf16.mxu0 %v783_v0  ;;  %v788_v5 = vld [vmem:[%s1024_s1 + $0xc8] sm:$0xff]   ;;  %v792_v9 = vld [vmem:[%s1024_s1 + $0xd0] sm:$0xff]  }
   0x3   :  { %v785_v2 = vld [vmem:[%s1024_s1] sm:$0xff]   ;;  %725 = vmatprep.subr.bf16.mxu1 %v784_v1  ;;  %v789_v6 = vld [vmem:[%s1024_s1 + $0x8] sm:$0xff]   ;;  %v793_v10 = vld [vmem:[%s1024_s1 + $0x10] sm:$0xff]  }
   0x4   :  { %v786_v3 = vld [vmem:[%s1024_s1 + $0x80] sm:$0xff]   ;;  %698 = vmatpush3.bf16.msra.mxu0 %v785_v2  ;;  %v790_v7 = vld [vmem:[%s1024_s1 + $0x88] sm:$0xff]   ;;  %v794_v11 = vld [vmem:[%s1024_s1 + $0x90] sm:$0xff]  }
   0x5   :  { %726 = vmatpush3.bf16.msra.mxu1 %v786_v3  ;;  %699 = vmatprep.subr.bf16.mxu0 %v787_v4  ;;  %v795_v12 = vld [vmem:[%s1024_s1 + $0x58] sm:$0xff]   ;;  %v799_v16 = vld [vmem:[%s1024_s1 + $0x60] sm:$0xff]   ;;  %v803_v20 = vld [vmem:[%s1024_s1 + $0x68] sm:$0xff]  }
   0x6   :  { %727 = vmatprep.subr.bf16.mxu1 %v788_v5  ;;  %v796_v13 = vld [vmem:[%s1024_s1 + $0xd8] sm:$0xff]   ;;  %v800_v17 = vld [vmem:[%s1024_s1 + $0xe0] sm:$0xff]   ;;  %v804_v21 = vld [vmem:[%s1024_s1 + $0xe8] sm:$0xff]  }
   0x7   :  { %v797_v14 = vld [vmem:[%s1024_s1 + $0x18] sm:$0xff]   ;;  %v801_v18 = vld [vmem:[%s1024_s1 + $0x20] sm:$0xff]   ;;  %v805_v22 = vld [vmem:[%s1024_s1 + $0x28] sm:$0xff]  }
   0x8   :  { %700 = vmatpush3.bf16.msra.mxu0 %v789_v6  ;;  %v798_v15 = vld [vmem:[%s1024_s1 + $0x98] sm:$0xff]   ;;  %v802_v19 = vld [vmem:[%s1024_s1 + $0xa0] sm:$0xff]   ;;  %v806_v23 = vld [vmem:[%s1024_s1 + $0xa8] sm:$0xff]  }
   0x9   :  { %728 = vmatpush3.bf16.msra.mxu1 %v790_v7  ;;  %701 = vmatprep.subr.bf16.mxu0 %v791_v8  ;;  %v807_v24 = vld [vmem:[%s1024_s1 + $0x70] sm:$0xff]   ;;  %v811_v28 = vld [vmem:[%s1024_s1 + $0x78] sm:$0xff]   ;;  %v820_v35 = vld [vmem:[%s1025_s0 + $0xc] ss:$20 sps:$4 sm:$0xff]  }
   0xa   :  { %729 = vmatprep.subr.bf16.mxu1 %v792_v9  ;;  %v808_v25 = vld [vmem:[%s1024_s1 + $0xf0] sm:$0xff]   ;;  %v812_v29 = vld [vmem:[%s1024_s1 + $0xf8] sm:$0xff]   ;;  %v821_v36 = vld [vmem:[%s1024_s1 + $0x100] sm:$0xff]   ;;  %495 = vmatprep.mubr.bf16.mxu1 %v820_v35 }
   0xb   :  { %v809_v26 = vld [vmem:[%s1024_s1 + $0x30] sm:$0xff]   ;;  %v813_v30 = vld [vmem:[%s1024_s1 + $0x38] sm:$0xff]   ;;  %v822_v37 = vld [vmem:[%s1024_s1 + $0x108] sm:$0xff]  }
   0xc   :  { %702 = vmatpush3.bf16.msra.mxu0 %v793_v10  ;;  %v810_v27 = vld [vmem:[%s1024_s1 + $0xb0] sm:$0xff]   ;;  %v814_v31 = vld [vmem:[%s1024_s1 + $0xb8] sm:$0xff]   ;;  %v826_v39 = vld [vmem:[%s1025_s0 + $0x2c] ss:$20 sps:$4 sm:$0xff]  }
   0xd   :  { %730 = vmatpush3.bf16.msra.mxu1 %v794_v11  ;;  %703 = vmatprep.subr.bf16.mxu0 %v795_v12  ;;  %v815_v32 = vld [vmem:[%s1025_s0] ss:$20 sps:$4 sm:$0xff]   ;;  %v817_v33 = vld [vmem:[%s1025_s0 + $0x4] ss:$20 sps:$4 sm:$0xff]   ;;  %v818_v34 = vld [vmem:[%s1025_s0 + $0x8] ss:$20 sps:$4 sm:$0xff]  }
   0xe   :  { %731 = vmatprep.subr.bf16.mxu1 %v796_v13  ;;  %446 = vmatprep.mubr.bf16.mxu0 %v817_v33  ;;  %v823_v38 = vld [vmem:[%s1024_s1 + $0x110] sm:$0xff]   ;;  %v824_v41 = vld [vmem:[%s1024_s1 + $0x118] sm:$0xff]   ;;  %v825_v45 = vld [vmem:[%s1024_s1 + $0x120] sm:$0xff]  }
   0xf   :  { %v828_v40 = vld [vmem:[%s1025_s0 + $0x34] ss:$20 sps:$4 sm:$0xff]   ;;  %v832_v43 = vld [vmem:[%s1025_s0 + $0x30] ss:$20 sps:$4 sm:$0xff]   ;;  %v834_v48 = vld [vmem:[%s1024_s1 + $0x138] sm:$0xff]  }
  0x10   :  { %704 = vmatpush3.bf16.msra.mxu0 %v797_v14  ;;  %v831_v42 = vld [vmem:[%s1025_s0 + $0x28] ss:$20 sps:$4 sm:$0xff]   ;;  %v835_v44 = vld [vmem:[%s1025_s0 + $0x10] ss:$20 sps:$4 sm:$0xff]   ;;  %v836_v49 = vld [vmem:[%s1025_s0 + $0x38] ss:$20 sps:$4 sm:$0xff]  }
  0x11   :  { %732 = vmatpush3.bf16.msra.mxu1 %v798_v15  ;;  %705 = vmatprep.subr.bf16.mxu0 %v799_v16  ;;  %v830_v46 = vld [vmem:[%s1024_s1 + $0x128] sm:$0xff]   ;;  %v833_v47 = vld [vmem:[%s1024_s1 + $0x130] sm:$0xff]   ;;  %v676_v15 = vld [vmem:[%s1026_s2] ss:$0 sm:$0xff] }
  0x12   :  { %733 = vmatprep.subr.bf16.mxu1 %v800_v17 }
  0x14   :  { %706 = vmatpush3.bf16.msra.mxu0 %v801_v18  ;;  %v677_v18 = vld [vmem:[%s1027_s3] ss:$0 sm:$0xff] }
  0x15   :  { %734 = vmatpush3.bf16.msra.mxu1 %v802_v19  ;;  %707 = vmatprep.subr.bf16.mxu0 %v803_v20 }
  0x16   :  { %735 = vmatprep.subr.bf16.mxu1 %v804_v21 }
  0x18   :  { %708 = vmatpush3.bf16.msra.mxu0 %v805_v22 }
  0x19   :  { %736 = vmatpush3.bf16.msra.mxu1 %v806_v23  ;;  %709 = vmatprep.subr.bf16.mxu0 %v807_v24 }
  0x1a   :  { %737 = vmatprep.subr.bf16.mxu1 %v808_v25 }
  0x1c   :  { %710 = vmatpush3.bf16.msra.mxu0 %v809_v26 }
  0x1d   :  { %738 = vmatpush3.bf16.msra.mxu1 %v810_v27  ;;  %711 = vmatprep.subr.bf16.mxu0 %v811_v28 }
  0x1e   :  { %739 = vmatprep.subr.bf16.mxu1 %v812_v29 }
  0x20   :  { %712 = vmatpush3.bf16.msra.mxu0 %v813_v30 }
  0x21   :  { %740 = vmatpush3.bf16.msra.mxu1 %v814_v31  ;;  %763 = vmatprep.subr.bf16.mxu0 %v821_v36 }
  0x23   :  { %447 = vmatmul.mubr.bf16.vlgmr.msra.gmra.mrb[0].mxu0 %v815_v32 }
  0x24   :  { %496 = vmatmul.mubr.bf16.vlgmr.msra.gmra.mrb[0].mxu1 %v818_v34  ;;  %764 = vmatpush3.bf16.msra.mxu0 %v821_v36 }
  0x25   :  { %765 = vmatprep.subr.bf16.mxu0 %v822_v37  ;;  %454 = vmatprep.mubr.bf16.mxu0 %v826_v39 }
  0x26   :  { %503 = vmatprep.mubr.bf16.mxu1 %v828_v40 }
  0x28   :  { %766 = vmatpush3.bf16.msra.mxu0 %v822_v37 }
  0x29   :  { %767 = vmatprep.subr.bf16.mxu0 %v823_v38 }
  0x2b   :  { %455 = vmatmul.mubr.bf16.gmra.mrb[4].mxu0 %v831_v42 }
  0x2c   :  { %504 = vmatmul.mubr.bf16.gmra.mrb[4].mxu1 %v832_v43  ;;  %768 = vmatpush3.bf16.msra.mxu0 %v823_v38 }
  0x2d   :  { %769 = vmatprep.subr.bf16.mxu0 %v824_v41  ;;  %779 = vmatprep.mubr.bf16.mxu0 %v835_v44 }
  0x30   :  { %770 = vmatpush3.bf16.msra.mxu0 %v824_v41 }
  0x31   :  { %771 = vmatprep.subr.bf16.mxu0 %v825_v45 }
  0x34   :  { %772 = vmatpush3.bf16.msra.mxu0 %v825_v45 }
  0x35   :  { %773 = vmatprep.subr.bf16.mxu0 %v830_v46 }
  0x38   :  { %774 = vmatpush3.bf16.msra.mxu0 %v830_v46 }
  0x39   :  { %775 = vmatprep.subr.bf16.mxu0 %v833_v47 }
  0x3c   :  { %776 = vmatpush3.bf16.msra.mxu0 %v833_v47 }
  0x3d   :  { %777 = vmatprep.subr.bf16.mxu0 %v834_v48 }
  0x40   :  { %778 = vmatpush3.bf16.msra.mxu0 %v834_v48 }
  0x43   :  { %780 = vmatmul.mubr.bf16.vlgmr.msra.gmra.mrb[8].mxu0 %v836_v49 }
  0xf6   :  { %v713_v50 = vpop.f32.mrb[0].mxu0 }
  0xf7   :  { %v741_v51 = vpop.f32.mrb[0].mxu1  ;;  %v714_v52 = vpop.f32.mrb[1].mxu0 }
  0xf8   :  { %v715_v53 = vadd.f32 %v714_v52, %v713_v50  ;;  %v742_v54 = vpop.f32.mrb[1].mxu1  ;;  %v716_v55 = vpop.f32.mrb[2].mxu0 }
  0xf9   :  { %v743_v56 = vadd.f32 %v742_v54, %v741_v51  ;;  %v744_v57 = vpop.f32.mrb[2].mxu1  ;;  %v717_v58 = vpop.f32.mrb[3].mxu0 }
  0xfa   :  { %v718_v59 = vadd.f32 %v717_v58, %v716_v55  ;;  %v745_v60 = vpop.f32.mrb[3].mxu1 }
  0xfb   :  { %v746_v61 = vadd.f32 %v745_v60, %v744_v57  ;;  %v498_v62 = vadd.f32 %v743_v56, %v715_v53 }
  0xfd   :  { %v501_v63 = vadd.f32 %v746_v61, %v718_v59 }
  0xfe   :  { %v719_v0 = vpop.f32.mrb[4].mxu0 }
  0xff   :  { %v747_v1 = vpop.f32.mrb[4].mxu1  ;;  %v720_v2 = vpop.f32.mrb[5].mxu0 }
 0x100   :  { %v721_v3 = vadd.f32 %v720_v2, %v719_v0  ;;  %v748_v4 = vpop.f32.mrb[5].mxu1  ;;  %v722_v5 = vpop.f32.mrb[6].mxu0 }
 0x101   :  { %v749_v6 = vadd.f32 %v748_v4, %v747_v1  ;;  %v750_v7 = vpop.f32.mrb[6].mxu1  ;;  %v723_v8 = vpop.f32.mrb[7].mxu0 }
 0x102   :  { %v724_v9 = vadd.f32 %v723_v8, %v722_v5  ;;  %v751_v10 = vpop.f32.mrb[7].mxu1 }
 0x103   :  { %v752_v11 = vadd.f32 %v751_v10, %v750_v7  ;;  %v506_v12 = vadd.f32 %v749_v6, %v721_v3 }
 0x105   :  { %v509_v13 = vadd.f32 %v752_v11, %v724_v9 }
 0x116   :  { %v781_v14 = vpop.f32.mrb[8].mxu0 }
 0x117   :  { %v555_v16 = vadd.f32 %v781_v14, %v506_v12  ;;  %v546_v17 = vpop.f32.mrb[9].mxu0 }
 0x118   :  { %v547_v19 = vadd.f32 %v546_v17, %v498_v62  ;;  %v782_v20 = vpop.f32.mrb[10].mxu0 }
 0x119   :  { %v585_v21 = vmul.f32 %v676_v15, %v555_v16  ;;  %v558_v22 = vadd.f32 %v782_v20, %v509_v13  ;;  %v549_v23 = vpop.f32.mrb[11].mxu0 }
 0x11a   :  { %v583_v24 = vmul.f32 %v676_v15, %v547_v19  ;;  %v550_v25 = vadd.f32 %v549_v23, %v501_v63 }
 0x11b   :  { %v596_v26 = vadd.f32 %v677_v18, %v585_v21  ;;  %v586_v27 = vmul.f32 %v676_v15, %v558_v22 }
 0x11c   :  { %v594_v28 = vadd.f32 %v677_v18, %v583_v24  ;;  %v584_v29 = vmul.f32 %v676_v15, %v550_v25 }
 0x11d   :  { %v597_v30 = vadd.f32 %v677_v18, %v586_v27  ;;  %v600_v32 = vmax.f32 %v596_v26, 0.0 }
 0x11e   :  { %v595_v31 = vadd.f32 %v677_v18, %v584_v29  ;;  %v598_v34 = vmax.f32 %v594_v28, 0.0 }
 0x11f   :  { %v601_v33 = vmax.f32 %v597_v30, 0.0 }
 0x120   :  { %v599_v35 = vmax.f32 %v595_v31, 0.0 }
 0x121   :  { %v694_v36 = vpack.c.bf16 %v601_v33, %v600_v32 }
 0x122   :  { %v689_v37 = vpack.c.bf16 %v599_v35, %v598_v34 }
 0x123   :  { %696 = vst [vmem:[%s1028_s4 + $0x8] sm:$0xff] %v694_v36  }
 0x124   :  { %690 = vst [vmem:[%s1028_s4] sm:$0xff] %v689_v37  }

// kernel: resnet18_backbone.27
= control target key start
LH: loop header
LB: loop body
LE: loop exit
PB: predicated region body
PF: predicated region fallthrough
CT: control target
= control target key end

     0   :  { %s358_s1 = inlined_call_operand.vmem [shape: bf16[128,128], index: 1, kind: input, shape index: {}]   ;;  %s359_s0 = inlined_call_operand.vmem [shape: bf16[32,128], index: 0, kind: input, shape index: {}]   ;;  %s360_s2 = inlined_call_operand.vmem [shape: f32[1,128], index: 2, kind: input, shape index: {}]   ;;  %s361_s3 = inlined_call_operand.vmem [shape: f32[1,128], index: 3, kind: input, shape index: {}]   ;;  %s362_s4 = inlined_call_operand.vmem [shape: bf16[32,128], index: 4, kind: output, shape index: {}]  }
   0x1   :  { %v281_v0 = vld [vmem:[%s358_s1] sm:$0xff]   ;;  %v282_v1 = vld [vmem:[%s358_s1 + $0x8] sm:$0xff]   ;;  %v283_v2 = vld [vmem:[%s358_s1 + $0x10] sm:$0xff]  }
   0x2   :  { %261 = vmatprep.subr.bf16.mxu0 %v281_v0  ;;  %v284_v3 = vld [vmem:[%s358_s1 + $0x18] sm:$0xff]   ;;  %v289_v4 = vld [vmem:[%s359_s0] sm:$0xff]   ;;  %v286_v6 = vld [vmem:[%s358_s1 + $0x28] sm:$0xff]  }
   0x3   :  { %262 = vmatpush3.bf16.msra.mxu0 %v281_v0  ;;  %277 = vmatprep.mubr.bf16.mxu0 %v289_v4  ;;  %v285_v5 = vld [vmem:[%s358_s1 + $0x20] sm:$0xff]   ;;  %v287_v7 = vld [vmem:[%s358_s1 + $0x30] sm:$0xff]   ;;  %v288_v8 = vld [vmem:[%s358_s1 + $0x38] sm:$0xff]  }
   0x4   :  { %263 = vmatprep.subr.bf16.mxu0 %v282_v1  ;;  %v290_v9 = vld [vmem:[%s359_s0 + $0x8] sm:$0xff]   ;;  %v230_v10 = vld [vmem:[%s360_s2] ss:$0 sm:$0xff] }
   0x5   :  { %v231_v14 = vld [vmem:[%s361_s3] ss:$0 sm:$0xff] }
   0x7   :  { %264 = vmatpush3.bf16.msra.mxu0 %v282_v1 }
   0x8   :  { %265 = vmatprep.subr.bf16.mxu0 %v283_v2 }
   0xb   :  { %266 = vmatpush3.bf16.msra.mxu0 %v283_v2 }
   0xc   :  { %267 = vmatprep.subr.bf16.mxu0 %v284_v3 }
   0xf   :  { %268 = vmatpush3.bf16.msra.mxu0 %v284_v3 }
  0x10   :  { %269 = vmatprep.subr.bf16.mxu0 %v285_v5 }
  0x13   :  { %270 = vmatpush3.bf16.msra.mxu0 %v285_v5 }
  0x14   :  { %271 = vmatprep.subr.bf16.mxu0 %v286_v6 }
  0x17   :  { %272 = vmatpush3.bf16.msra.mxu0 %v286_v6 }
  0x18   :  { %273 = vmatprep.subr.bf16.mxu0 %v287_v7 }
  0x1b   :  { %274 = vmatpush3.bf16.msra.mxu0 %v287_v7 }
  0x1c   :  { %275 = vmatprep.subr.bf16.mxu0 %v288_v8 }
  0x1f   :  { %276 = vmatpush3.bf16.msra.mxu0 %v288_v8 }
  0x22   :  { %278 = vmatmul.mubr.bf16.vlgmr.msra.gmra.mrb[0].mxu0 %v290_v9 }
  0xf5   :  { %v279_v11 = vpop.f32.mrb[0].mxu0 }
  0xf6   :  { %v183_v12 = vmul.f32 %v279_v11, %v230_v10  ;;  %v144_v13 = vpop.f32.mrb[1].mxu0 }
  0xf7   :  { %v181_v15 = vmul.f32 %v230_v10, %v144_v13  ;;  %v280_v16 = vpop.f32.mrb[2].mxu0 }
  0xf8   :  { %v184_v17 = vmul.f32 %v280_v16, %v230_v10  ;;  %v147_v18 = vpop.f32.mrb[3].mxu0  ;;  %v194_v20 = vadd.f32 %v231_v14, %v183_v12 }
  0xf9   :  { %v182_v19 = vmul.f32 %v230_v10, %v147_v18  ;;  %v192_v22 = vadd.f32 %v231_v14, %v181_v15 }
  0xfa   :  { %v195_v21 = vadd.f32 %v231_v14, %v184_v17 }
  0xfb   :  { %v193_v23 = vadd.f32 %v231_v14, %v182_v19 }
  0xfc   :  { %v248_v24 = vpack.c.bf16 %v195_v21, %v194_v20 }
  0xfd   :  { %v243_v25 = vpack.c.bf16 %v193_v23, %v192_v22 }
  0xfe   :  { %250 = vst [vmem:[%s362_s4 + $0x8] sm:$0xff] %v248_v24  }
  0xff   :  { %244 = vst [vmem:[%s362_s4] sm:$0xff] %v243_v25  }

// kernel: resnet18_backbone.29
= control target key start
LH: loop header
LB: loop body
LE: loop exit
PB: predicated region body
PF: predicated region fallthrough
CT: control target
= control target key end

     0   :  { %s1247_s18 = smov 0   ;;  %s1249_s19 = smov 0   ;;  %s1366_s0 = inlined_call_operand.vmem [shape: bf16[32,1152], index: 0, kind: input, shape index: {}]   ;;  %s1367_s1 = inlined_call_operand.vmem [shape: bf16[1152,128], index: 1, kind: input, shape index: {}]   ;;  %s1368_s2 = inlined_call_operand.vmem [shape: f32[1,128], index: 2, kind: input, shape index: {}]   ;;  %s1369_s3 = inlined_call_operand.vmem [shape: f32[1,128], index: 3, kind: input, shape index: {}]   ;;  %s1370_s4 = inlined_call_operand.vmem [shape: bf16[32,128], index: 4, kind: input, shape index: {}]   ;;  %s1371_s5 = inlined_call_operand.vmem [shape: bf16[32,128], index: 5, kind: output, shape index: {}]  }
   0x1   :  { %s1251_s20 = smov 0   ;;  %s1253_s21 = smov 0  }
   0x2   :  { %s1255_s22 = smov 0  }
   0x3 LB: > { %s27_s23 = sadd.s32 1, %s1210_s21  ;;  %p50_p1 = scmp.ne.s32.totalorder %s1202_s19, %s1198_s18  ;;  %s1214_s22 = sphi %s1255_s22, %s15_s22   ;;  %s1210_s21 = sphi %s1253_s21, %s1375_s21   ;;  %s1206_s20 = sphi %s1251_s20, %s1374_s20   ;;  %s1202_s19 = sphi %s1249_s19, %s1373_s19   ;;  %s1198_s18 = sphi %s1247_s18, %s1372_s18  }
   0x4   : > { %p28_p0 = scmp.ge.s32.totalorder %s27_s23, 3  ;;  %p51_p2 = scmp.eq.s32.totalorder %s1214_s22, 0 }
   0x5   : > { %s43_s25 = sadd.s32 1, %s1202_s19  ;;  %p964_p5 = scmp.ge.s32.totalorder %s1214_s22, 3 }
   0x6   : > { %s1377_s23 = smov (%p28_p0, %s27_s23), 0  ;;  %p52_p3 = por %p51_p2, %p50_p1 }
   0x7   : > { %s39_s24 = ssub.s32 %s1210_s21, %s1377_s23  ;;  %236 = sbr.rel (%p964_p5) target bundleno = 23 (0x17), region = 28 }
   0x8   : > { %p41_p4 = scmp.eq.s32.totalorder %s39_s24, 0 }
   0xa   : > { %s1282_s26 = scalar_select %p41_p4, %s1202_s19, %s43_s25  }
   0xe   : > { %239 = sbr.rel (!%p52_p3) target bundleno = 23 (0x17), region = 32  ;;  %s241_s27 = sand.u32 (%p52_p3), 1, %s1202_s19  }
   0xf   : > { %s1018_s28 = smul.u32 (%p52_p3), 12, %s1210_s21 }
  0x10   : > { %s1101_s29 = smul.u32 (%p52_p3), 48, %s241_s27 }
  0x11   : > { %s249_s7 = scalar_lea.vmem (%p52_p3), %s1366_s0, %s1018_s28 }
  0x12   : > { %v264_v0 = vld [vmem:[%s249_s7] sm:$0xff] (%p52_p3)  ;;  %v268_v2 = vld [vmem:[%s249_s7 + $0x48] sm:$0xff] (%p52_p3)  ;;  %s243_s8 = scalar_lea.vmem (%p52_p3), [#allocation3], %s1101_s29  ;;  %v970_v6 = vld [vmem:[%s249_s7 + $0x50] sm:$0xf] (%p52_p3) }
  0x13   : > { %v266_v1 = vld [vmem:[%s249_s7 + $0x24] sm:$0xff] (%p52_p3)  ;;  %265 = vst [vmem:[%s243_s8] sm:$0xff] (%p52_p3), %v264_v0  ;;  %269 = vst [vmem:[%s243_s8 + $0x18] sm:$0xff] (%p52_p3), %v268_v2  ;;  %v270_v3 = vld [vmem:[%s249_s7 + $0x6c] sm:$0xff] (%p52_p3) }
  0x14   : > { %267 = vst [vmem:[%s243_s8 + $0xc] sm:$0xff] (%p52_p3), %v266_v1  ;;  %v966_v4 = vld [vmem:[%s249_s7 + $0x8] sm:$0xf] (%p52_p3)  ;;  %v968_v5 = vld [vmem:[%s249_s7 + $0x2c] sm:$0xf] (%p52_p3)  ;;  %271 = vst [vmem:[%s243_s8 + $0x24] sm:$0xff] (%p52_p3), %v270_v3 }
  0x15   : > { %967 = vst [vmem:[%s243_s8 + $0x8] sm:$0xf] %v966_v4  ;;  %969 = vst [vmem:[%s243_s8 + $0x14] sm:$0xf] %v968_v5  ;;  %v972_v7 = vld [vmem:[%s249_s7 + $0x74] sm:$0xf] }
  0x16   : > { %971 = vst [vmem:[%s243_s8 + $0x20] sm:$0xf] %v970_v6  ;;  %973 = vst [vmem:[%s243_s8 + $0x2c] sm:$0xf] %v972_v7 }
  0x17 PF: > { %p974_p6 = scmp.ge.s32.totalorder %s1214_s22, 1  ;;  %p303_p7 = scmp.lt.s32.totalorder %s1214_s22, 4 }
  0x19   : > { %p304_p8 = pnand %p974_p6, %p303_p7 }
  0x1a   : > { %s310_s9 = sand.u32 (!%p304_p8), 1, %s1198_s18   ;;  %s364_s10 = smul.u32 (!%p304_p8), 48, %s1206_s20 }
  0x1b   : > { %307 = sbr.rel (%p304_p8) target bundleno = 322 (0x142), region = 62  ;;  %p976_p10 = scmp.ne.s32.totalorder (!%p304_p8), %s1206_s20, 0 }
  0x1c   : > { %s1102_s11 = smul.u32 (!%p304_p8), 48, %s310_s9  ;;  %p365_p9 = scmp.lt.s32.totalorder (!%p304_p8), %s364_s10, 143 }
  0x1e   : > { %s1299_s16 = scalar_lea.vmem (!%p304_p8), [#allocation3], %s1102_s11 }
  0x22   : > { %s1379_s10 = smov (!%p365_p9, %s364_s10), 143  ;;  %401 = sbr.rel (%p976_p10) target bundleno = 41 (0x29), region = 70 }
  0x23   : > { %s975_s12 = sshll.u32 %s1379_s10, 2  ;;  %v1216_v8 = vmov (!%p976_p10), 0.0  }
  0x24   : > { %s1297_s15 = scalar_lea.vmem %s1367_s1, %s975_s12  ;;  %402 = vst [vmem:[#allocation2] sm:$0xff] (!%p976_p10), %v1216_v8  ;;  %403 = vst [vmem:[#allocation2 + $0x8] sm:$0xff] (!%p976_p10), %v1216_v8 }
  0x25   : > { %404 = vst [vmem:[#allocation2 + $0x10] sm:$0xff] (!%p976_p10), %v1216_v8  ;;  %405 = vst [vmem:[#allocation2 + $0x18] sm:$0xff] (!%p976_p10), %v1216_v8 }
  0x29 PF: > { %v1144_v9 = vld [vmem:[%s1297_s15 + $0x40] sm:$0xff]   ;;  %v1147_v12 = vld [vmem:[%s1297_s15 + $0x48] sm:$0xff]   ;;  %v1150_v15 = vld [vmem:[%s1297_s15 + $0x50] sm:$0xff]   ;;  %p1007_p11 = scmp.ne.s32.totalorder %s1206_s20, 2 }
  0x2a   : > { %v1145_v10 = vld [vmem:[%s1297_s15] sm:$0xff]   ;;  %1043 = vmatprep.subr.bf16.mxu0 %v1144_v9  ;;  %v1148_v13 = vld [vmem:[%s1297_s15 + $0x8] sm:$0xff]   ;;  %v1151_v16 = vld [vmem:[%s1297_s15 + $0x10] sm:$0xff]  }
  0x2b   : > { %v1146_v11 = vld [vmem:[%s1297_s15 + $0x80] sm:$0xff]   ;;  %1044 = vmatpush3.bf16.msra.mxu0 %v1145_v10  ;;  %v1149_v14 = vld [vmem:[%s1297_s15 + $0x88] sm:$0xff]   ;;  %v1152_v17 = vld [vmem:[%s1297_s15 + $0x90] sm:$0xff]  }
  0x2c   : > { %1081 = vmatprep.subr.bf16.mxu1 %v1146_v11  ;;  %1045 = vmatprep.subr.bf16.mxu0 %v1147_v12  ;;  %v1153_v18 = vld [vmem:[%s1297_s15 + $0x58] sm:$0xff]   ;;  %v1156_v21 = vld [vmem:[%s1297_s15 + $0x60] sm:$0xff]   ;;  %v1159_v24 = vld [vmem:[%s1297_s15 + $0x68] sm:$0xff]  }
  0x2d   : > { %1082 = vmatpush3.bf16.msra.mxu1 %v1146_v11  ;;  %v1154_v19 = vld [vmem:[%s1297_s15 + $0x18] sm:$0xff]   ;;  %v1158_v22 = vld [vmem:[%s1297_s15 + $0xa0] sm:$0xff]   ;;  %v1161_v25 = vld [vmem:[%s1297_s15 + $0xa8] sm:$0xff]  }
  0x2e   : > { %1083 = vmatprep.subr.bf16.mxu1 %v1149_v14  ;;  %v1155_v20 = vld [vmem:[%s1297_s15 + $0x98] sm:$0xff]   ;;  %v1157_v23 = vld [vmem:[%s1297_s15 + $0x20] sm:$0xff]   ;;  %v1160_v26 = vld [vmem:[%s1297_s15 + $0x28] sm:$0xff]  }
  0x2f   : > { %1046 = vmatpush3.bf16.msra.mxu0 %v1148_v13  ;;  %v1162_v27 = vld [vmem:[%s1297_s15 + $0x70] sm:$0xff]   ;;  %v1165_v30 = vld [vmem:[%s1297_s15 + $0x78] sm:$0xff]   ;;  %v406_v45 = vld [vmem:[#allocation2] sm:$0xff] }
  0x30   : > { %1047 = vmatprep.subr.bf16.mxu0 %v1150_v15  ;;  %v1163_v28 = vld [vmem:[%s1297_s15 + $0x30] sm:$0xff]   ;;  %v1167_v31 = vld [vmem:[%s1297_s15 + $0xb8] sm:$0xff]   ;;  %v407_v50 = vld [vmem:[#allocation2 + $0x8] sm:$0xff] }
  0x31   : > { %1084 = vmatpush3.bf16.msra.mxu1 %v1149_v14  ;;  %v1164_v29 = vld [vmem:[%s1297_s15 + $0xb0] sm:$0xff]   ;;  %v1166_v34 = vld [vmem:[%s1297_s15 + $0x38] sm:$0xff]   ;;  %v1008_v5 = vld [vmem:[%s1368_s2] ss:$0 sm:$0xff] (!%p1007_p11) }
  0x32   : > { %1085 = vmatprep.subr.bf16.mxu1 %v1152_v17  ;;  %v1170_v32 = vld [vmem:[%s1299_s16 + $0x4] ss:$12 sps:$4 sm:$0xff]   ;;  %v1171_v33 = vld [vmem:[%s1299_s16 + $0x8] ss:$12 sps:$4 sm:$0xff]   ;;  %v1168_v35 = vld [vmem:[%s1299_s16] ss:$12 sps:$4 sm:$0xff]  }
  0x33   : > { %1048 = vmatpush3.bf16.msra.mxu0 %v1151_v16  ;;  %674 = vmatprep.mubr.bf16.mxu0 %v1170_v32  ;;  %v1173_v36 = vld [vmem:[%s1299_s16 + $0x1c] ss:$12 sps:$4 sm:$0xff]   ;;  %v1172_v37 = vld [vmem:[%s1299_s16 + $0x20] ss:$12 sps:$4 sm:$0xff]   ;;  %v1175_v38 = vld [vmem:[%s1299_s16 + $0x18] ss:$12 sps:$4 sm:$0xff]  }
  0x34   : > { %1049 = vmatprep.subr.bf16.mxu0 %v1153_v18  ;;  %1097 = vmatprep.mubr.bf16.mxu1 %v1171_v33  ;;  %v408_v59 = vld [vmem:[#allocation2 + $0x10] sm:$0xff]  ;;  %v409_v63 = vld [vmem:[#allocation2 + $0x18] sm:$0xff]  ;;  %v1009_v8 = vld [vmem:[%s1369_s3] ss:$0 sm:$0xff] (!%p1007_p11) }
  0x35   : > { %1086 = vmatpush3.bf16.msra.mxu1 %v1152_v17  ;;  %v1024_v9 = vld [vmem:[%s1370_s4] sm:$0xff] (!%p1007_p11)   ;;  %v1041_v15 = vld [vmem:[%s1370_s4 + $0x8] sm:$0xff] (!%p1007_p11)  }
  0x36   : > { %1087 = vmatprep.subr.bf16.mxu1 %v1155_v20  ;;  %v1025_v11 = vunpack.c.l.bf16 (!%p1007_p11), %v1024_v9  ;;  %v1026_v12 = vunpack.c.h.bf16 (!%p1007_p11), %v1024_v9 }
  0x37   : > { %1050 = vmatpush3.bf16.msra.mxu0 %v1154_v19  ;;  %v1029_v19 = vunpack.c.l.bf16 (!%p1007_p11), %v1041_v15 }
  0x38   : > { %1051 = vmatprep.subr.bf16.mxu0 %v1156_v21  ;;  %v1030_v21 = vunpack.c.h.bf16 (!%p1007_p11), %v1041_v15 }
  0x39   : > { %1088 = vmatpush3.bf16.msra.mxu1 %v1155_v20 }
  0x3a   : > { %1089 = vmatprep.subr.bf16.mxu1 %v1158_v22 }
  0x3b   : > { %1052 = vmatpush3.bf16.msra.mxu0 %v1157_v23 }
  0x3c   : > { %1053 = vmatprep.subr.bf16.mxu0 %v1159_v24 }
  0x3d   : > { %1090 = vmatpush3.bf16.msra.mxu1 %v1158_v22 }
  0x3e   : > { %1091 = vmatprep.subr.bf16.mxu1 %v1161_v25 }
  0x3f   : > { %1054 = vmatpush3.bf16.msra.mxu0 %v1160_v26 }
  0x40   : > { %1055 = vmatprep.subr.bf16.mxu0 %v1162_v27 }
  0x41   : > { %1092 = vmatpush3.bf16.msra.mxu1 %v1161_v25 }
  0x42   : > { %1093 = vmatprep.subr.bf16.mxu1 %v1164_v29 }
  0x43   : > { %1056 = vmatpush3.bf16.msra.mxu0 %v1163_v28 }
  0x44   : > { %1057 = vmatprep.subr.bf16.mxu0 %v1165_v30 }
  0x45   : > { %1094 = vmatpush3.bf16.msra.mxu1 %v1164_v29 }
  0x46   : > { %1095 = vmatprep.subr.bf16.mxu1 %v1167_v31 }
  0x47   : > { %1058 = vmatpush3.bf16.msra.mxu0 %v1166_v34 }
  0x49   : > { %1096 = vmatpush3.bf16.msra.mxu1 %v1167_v31 }
  0x4a   : > { %675 = vmatmul.mubr.bf16.vlgmr.msra.gmra.mrb[0].mxu0 %v1168_v35 }
  0x4b   : > { %682 = vmatprep.mubr.bf16.mxu0 %v1173_v36 }
  0x4c   : > { %1098 = vmatmul.mubr.bf16.vlgmr.msra.gmra.mrb[0].mxu1 %v1172_v37 }
  0x52   : > { %683 = vmatmul.mubr.bf16.gmra.mrb[4].mxu0 %v1175_v38 }
 0x11d   : > { %v1059_v39 = vpop.f32.mrb[0].mxu0 }
 0x11e   : > { %v1060_v40 = vpop.f32.mrb[1].mxu0 }
 0x11f   : > { %v1061_v41 = vadd.f32 %v1060_v40, %v1059_v39  ;;  %v1062_v42 = vpop.f32.mrb[2].mxu0  ;;  %v1099_v43 = vpop.f32.mrb[0].mxu1 }
 0x120   : > { %v1063_v44 = vpop.f32.mrb[3].mxu0  ;;  %v725_v46 = vpop.f32.mrb[1].mxu1 }
 0x121   : > { %v1064_v47 = vadd.f32 %v1063_v44, %v1062_v42  ;;  %v726_v48 = vadd.f32 %v1061_v41, %v725_v46  ;;  %v1100_v49 = vpop.f32.mrb[2].mxu1 }
 0x122   : > { %v728_v51 = vpop.f32.mrb[3].mxu1 }
 0x123   : > { %v740_v52 = vadd.f32 %v726_v48, %v406_v45  ;;  %v729_v53 = vadd.f32 %v1064_v47, %v728_v51 }
 0x125   : > { %744 = vst [vmem:[#allocation2] sm:$0xff] %v740_v52  ;;  %v741_v54 = vadd.f32 %v729_v53, %v407_v50  ;;  %v1065_v55 = vpop.f32.mrb[4].mxu0 }
 0x126   : > { %v1066_v56 = vpop.f32.mrb[5].mxu0 }
 0x127   : > { %745 = vst [vmem:[#allocation2 + $0x8] sm:$0xff] %v741_v54  ;;  %v1067_v57 = vadd.f32 %v1066_v56, %v1065_v55  ;;  %v1068_v58 = vpop.f32.mrb[6].mxu0 }
 0x128   : > { %v1069_v60 = vpop.f32.mrb[7].mxu0 }
 0x129   : > { %v734_v61 = vadd.f32 %v1099_v43, %v1067_v57  ;;  %v1070_v62 = vadd.f32 %v1069_v60, %v1068_v58  ;;  %751 = sbr.rel (%p1007_p11) target bundleno = 322 (0x142), region = 74 }
 0x12b   : > { %v742_v0 = vadd.f32 %v734_v61, %v408_v59  ;;  %v737_v1 = vadd.f32 %v1100_v49, %v1070_v62 }
 0x12c   : > { %v752_v3 = vld [vmem:[#allocation2] sm:$0xff] (!%p1007_p11) }
 0x12d   : > { %746 = vst [vmem:[#allocation2 + $0x10] sm:$0xff] %v742_v0  ;;  %v743_v2 = vadd.f32 %v737_v1, %v409_v63  ;;  %v763_v6 = vmul.f32 (!%p1007_p11), %v1008_v5, %v752_v3 }
 0x12e   : > { %v753_v4 = vld [vmem:[#allocation2 + $0x8] sm:$0xff] (!%p1007_p11) }
 0x12f   : > { %747 = vst [vmem:[#allocation2 + $0x18] sm:$0xff] %v743_v2  ;;  %v764_v7 = vmul.f32 (!%p1007_p11), %v1008_v5, %v753_v4  ;;  %v774_v16 = vadd.f32 (!%p1007_p11), %v1009_v8, %v763_v6 }
 0x131   : > { %v775_v17 = vadd.f32 %v1009_v8, %v764_v7  ;;  %v786_v22 = vadd.f32 %v1025_v11, %v774_v16 }
 0x133   : > { %v787_v23 = vadd.f32 %v1026_v12, %v775_v17  ;;  %v790_v26 = vmax.f32 %v786_v22, 0.0 }
 0x134   : > { %v754_v10 = vld [vmem:[#allocation2 + $0x10] sm:$0xff] }
 0x135   : > { %v765_v14 = vmul.f32 %v1008_v5, %v754_v10  ;;  %v791_v27 = vmax.f32 %v787_v23, 0.0 }
 0x136   : > { %v755_v13 = vld [vmem:[#allocation2 + $0x18] sm:$0xff] }
 0x137   : > { %v766_v18 = vmul.f32 %v1008_v5, %v755_v13  ;;  %v776_v20 = vadd.f32 %v1009_v8, %v765_v14  ;;  %v1034_v30 = vpack.c.bf16 %v791_v27, %v790_v26 }
 0x139   : > { %v777_v24 = vadd.f32 %v1009_v8, %v766_v18  ;;  %v788_v25 = vadd.f32 %v1029_v19, %v776_v20  ;;  %1035 = vst [vmem:[%s1371_s5] sm:$0xff] %v1034_v30  }
 0x13b   : > { %v789_v28 = vadd.f32 %v1030_v21, %v777_v24  ;;  %v792_v29 = vmax.f32 %v788_v25, 0.0 }
 0x13d   : > { %v793_v31 = vmax.f32 %v789_v28, 0.0 }
 0x13f   : > { %v1039_v32 = vpack.c.bf16 %v793_v31, %v792_v29 }
 0x141   : > { %1042 = vst [vmem:[%s1371_s5 + $0x8] sm:$0xff] %v1039_v32  }
 0x142 PF: > { %s15_s22 = sadd.s32 1, %s1214_s22   ;;  %s1372_s18 = smov %s1202_s19 }
 0x143   : > { %p12_p12 = scmp.ge.s32.totalorder %s15_s22, 5   ;;  %s1373_s19 = smov %s1282_s26 }
 0x144   : > { %s1374_s20 = smov %s1210_s21  ;;  %s1375_s21 = smov %s1377_s23 }
 0x145   :  { %14 = sbr.rel (!%p12_p12) target bundleno = 3 (0x3), region = 127 }

// kernel: resnet18_backbone.30
= control target key start
LH: loop header
LB: loop body
LE: loop exit
PB: predicated region body
PF: predicated region fallthrough
CT: control target
= control target key end

     0   :  { %s1142_s15 = smov 0   ;;  %s1144_s16 = smov 0   ;;  %s1255_s0 = inlined_call_operand.vmem [shape: bf16[32,1152], index: 0, kind: input, shape index: {}]   ;;  %s1256_s1 = inlined_call_operand.vmem [shape: bf16[1152,128], index: 1, kind: input, shape index: {}]   ;;  %s1257_s2 = inlined_call_operand.vmem [shape: f32[1,128], index: 2, kind: input, shape index: {}]   ;;  %s1258_s3 = inlined_call_operand.vmem [shape: f32[1,128], index: 3, kind: input, shape index: {}]   ;;  %s1259_s4 = inlined_call_operand.vmem [shape: bf16[32,128], index: 4, kind: output, shape index: {}]  }
   0x1   :  { %s1146_s17 = smov 0   ;;  %s1148_s18 = smov 0  }
   0x2   :  { %s1150_s19 = smov 0  }
   0x3 LB: > { %s26_s20 = sadd.s32 1, %s1110_s18  ;;  %p49_p1 = scmp.ne.s32.totalorder %s1102_s16, %s1098_s15  ;;  %s1114_s19 = sphi %s1150_s19, %s14_s19   ;;  %s1110_s18 = sphi %s1148_s18, %s1263_s18   ;;  %s1106_s17 = sphi %s1146_s17, %s1262_s17   ;;  %s1102_s16 = sphi %s1144_s16, %s1261_s16   ;;  %s1098_s15 = sphi %s1142_s15, %s1260_s15  }
   0x4   : > { %p27_p0 = scmp.ge.s32.totalorder %s26_s20, 3  ;;  %p50_p2 = scmp.eq.s32.totalorder %s1114_s19, 0 }
   0x5   : > { %s42_s22 = sadd.s32 1, %s1102_s16  ;;  %p873_p5 = scmp.ge.s32.totalorder %s1114_s19, 3 }
   0x6   : > { %s1265_s20 = smov (%p27_p0, %s26_s20), 0  ;;  %p51_p3 = por %p50_p2, %p49_p1 }
   0x7   : > { %s38_s21 = ssub.s32 %s1110_s18, %s1265_s20  ;;  %195 = sbr.rel (%p873_p5) target bundleno = 23 (0x17), region = 24 }
   0x8   : > { %p40_p4 = scmp.eq.s32.totalorder %s38_s21, 0 }
   0xa   : > { %s1177_s23 = scalar_select %p40_p4, %s1102_s16, %s42_s22  }
   0xe   : > { %198 = sbr.rel (!%p51_p3) target bundleno = 23 (0x17), region = 28  ;;  %s200_s24 = sand.u32 (%p51_p3), 1, %s1102_s16  }
   0xf   : > { %s927_s25 = smul.u32 (%p51_p3), 12, %s1110_s18 }
  0x10   : > { %s1001_s26 = smul.u32 (%p51_p3), 48, %s200_s24 }
  0x11   : > { %s208_s29 = scalar_lea.vmem (%p51_p3), %s1255_s0, %s927_s25 }
  0x12   : > { %v223_v0 = vld [vmem:[%s208_s29] sm:$0xff] (%p51_p3)  ;;  %v227_v2 = vld [vmem:[%s208_s29 + $0x48] sm:$0xff] (%p51_p3)  ;;  %s202_s30 = scalar_lea.vmem (%p51_p3), [#allocation3], %s1001_s26  ;;  %v879_v6 = vld [vmem:[%s208_s29 + $0x50] sm:$0xf] (%p51_p3) }
  0x13   : > { %v225_v1 = vld [vmem:[%s208_s29 + $0x24] sm:$0xff] (%p51_p3)  ;;  %224 = vst [vmem:[%s202_s30] sm:$0xff] (%p51_p3), %v223_v0  ;;  %228 = vst [vmem:[%s202_s30 + $0x18] sm:$0xff] (%p51_p3), %v227_v2  ;;  %v229_v3 = vld [vmem:[%s208_s29 + $0x6c] sm:$0xff] (%p51_p3) }
  0x14   : > { %226 = vst [vmem:[%s202_s30 + $0xc] sm:$0xff] (%p51_p3), %v225_v1  ;;  %v875_v4 = vld [vmem:[%s208_s29 + $0x8] sm:$0xf] (%p51_p3)  ;;  %v877_v5 = vld [vmem:[%s208_s29 + $0x2c] sm:$0xf] (%p51_p3)  ;;  %230 = vst [vmem:[%s202_s30 + $0x24] sm:$0xff] (%p51_p3), %v229_v3 }
  0x15   : > { %876 = vst [vmem:[%s202_s30 + $0x8] sm:$0xf] %v875_v4  ;;  %878 = vst [vmem:[%s202_s30 + $0x14] sm:$0xf] %v877_v5  ;;  %v881_v7 = vld [vmem:[%s208_s29 + $0x74] sm:$0xf] }
  0x16   : > { %880 = vst [vmem:[%s202_s30 + $0x20] sm:$0xf] %v879_v6  ;;  %882 = vst [vmem:[%s202_s30 + $0x2c] sm:$0xf] %v881_v7 }
  0x17 PF: > { %p883_p6 = scmp.ge.s32.totalorder %s1114_s19, 1  ;;  %p262_p7 = scmp.lt.s32.totalorder %s1114_s19, 4 }
  0x19   : > { %p263_p8 = pnand %p883_p6, %p262_p7 }
  0x1a   : > { %s269_s5 = sand.u32 (!%p263_p8), 1, %s1098_s15   ;;  %s313_s6 = smul.u32 (!%p263_p8), 48, %s1106_s17 }
  0x1b   : > { %266 = sbr.rel (%p263_p8) target bundleno = 320 (0x140), region = 58  ;;  %p885_p10 = scmp.ne.s32.totalorder (!%p263_p8), %s1106_s17, 0 }
  0x1c   : > { %s1002_s7 = smul.u32 (!%p263_p8), 48, %s269_s5  ;;  %p314_p9 = scmp.lt.s32.totalorder (!%p263_p8), %s313_s6, 143 }
  0x1e   : > { %s1194_s12 = scalar_lea.vmem (!%p263_p8), [#allocation3], %s1002_s7 }
  0x22   : > { %s1267_s6 = smov (!%p314_p9, %s313_s6), 143  ;;  %341 = sbr.rel (%p885_p10) target bundleno = 41 (0x29), region = 66 }
  0x23   : > { %s884_s8 = sshll.u32 %s1267_s6, 2  ;;  %v1116_v8 = vmov (!%p885_p10), 0.0  }
  0x24   : > { %s1192_s11 = scalar_lea.vmem %s1256_s1, %s884_s8  ;;  %342 = vst [vmem:[#allocation2] sm:$0xff] (!%p885_p10), %v1116_v8  ;;  %343 = vst [vmem:[#allocation2 + $0x8] sm:$0xff] (!%p885_p10), %v1116_v8 }
  0x25   : > { %344 = vst [vmem:[#allocation2 + $0x10] sm:$0xff] (!%p885_p10), %v1116_v8  ;;  %345 = vst [vmem:[#allocation2 + $0x18] sm:$0xff] (!%p885_p10), %v1116_v8 }
  0x29 PF: > { %v1044_v9 = vld [vmem:[%s1192_s11 + $0x40] sm:$0xff]   ;;  %v1047_v12 = vld [vmem:[%s1192_s11 + $0x48] sm:$0xff]   ;;  %v1050_v15 = vld [vmem:[%s1192_s11 + $0x50] sm:$0xff]   ;;  %p916_p11 = scmp.ne.s32.totalorder %s1106_s17, 2 }
  0x2a   : > { %v1045_v10 = vld [vmem:[%s1192_s11] sm:$0xff]   ;;  %943 = vmatprep.subr.bf16.mxu0 %v1044_v9  ;;  %v1048_v13 = vld [vmem:[%s1192_s11 + $0x8] sm:$0xff]   ;;  %v1051_v16 = vld [vmem:[%s1192_s11 + $0x10] sm:$0xff]  }
  0x2b   : > { %v1046_v11 = vld [vmem:[%s1192_s11 + $0x80] sm:$0xff]   ;;  %944 = vmatpush3.bf16.msra.mxu0 %v1045_v10  ;;  %v1049_v14 = vld [vmem:[%s1192_s11 + $0x88] sm:$0xff]   ;;  %v1052_v17 = vld [vmem:[%s1192_s11 + $0x90] sm:$0xff]  }
  0x2c   : > { %981 = vmatprep.subr.bf16.mxu1 %v1046_v11  ;;  %945 = vmatprep.subr.bf16.mxu0 %v1047_v12  ;;  %v1053_v18 = vld [vmem:[%s1192_s11 + $0x58] sm:$0xff]   ;;  %v1056_v21 = vld [vmem:[%s1192_s11 + $0x60] sm:$0xff]   ;;  %v1059_v24 = vld [vmem:[%s1192_s11 + $0x68] sm:$0xff]  }
  0x2d   : > { %982 = vmatpush3.bf16.msra.mxu1 %v1046_v11  ;;  %v1054_v19 = vld [vmem:[%s1192_s11 + $0x18] sm:$0xff]   ;;  %v1058_v22 = vld [vmem:[%s1192_s11 + $0xa0] sm:$0xff]   ;;  %v1061_v25 = vld [vmem:[%s1192_s11 + $0xa8] sm:$0xff]  }
  0x2e   : > { %983 = vmatprep.subr.bf16.mxu1 %v1049_v14  ;;  %v1055_v20 = vld [vmem:[%s1192_s11 + $0x98] sm:$0xff]   ;;  %v1057_v23 = vld [vmem:[%s1192_s11 + $0x20] sm:$0xff]   ;;  %v1060_v26 = vld [vmem:[%s1192_s11 + $0x28] sm:$0xff]  }
  0x2f   : > { %946 = vmatpush3.bf16.msra.mxu0 %v1048_v13  ;;  %v1062_v27 = vld [vmem:[%s1192_s11 + $0x70] sm:$0xff]   ;;  %v1065_v30 = vld [vmem:[%s1192_s11 + $0x78] sm:$0xff]   ;;  %v346_v45 = vld [vmem:[#allocation2] sm:$0xff] }
  0x30   : > { %947 = vmatprep.subr.bf16.mxu0 %v1050_v15  ;;  %v1063_v28 = vld [vmem:[%s1192_s11 + $0x30] sm:$0xff]   ;;  %v1067_v31 = vld [vmem:[%s1192_s11 + $0xb8] sm:$0xff]   ;;  %v347_v50 = vld [vmem:[#allocation2 + $0x8] sm:$0xff] }
  0x31   : > { %984 = vmatpush3.bf16.msra.mxu1 %v1049_v14  ;;  %v1064_v29 = vld [vmem:[%s1192_s11 + $0xb0] sm:$0xff]   ;;  %v1066_v34 = vld [vmem:[%s1192_s11 + $0x38] sm:$0xff]   ;;  %v917_v5 = vld [vmem:[%s1257_s2] ss:$0 sm:$0xff] (!%p916_p11) }
  0x32   : > { %985 = vmatprep.subr.bf16.mxu1 %v1052_v17  ;;  %v1070_v32 = vld [vmem:[%s1194_s12 + $0x4] ss:$12 sps:$4 sm:$0xff]   ;;  %v1071_v33 = vld [vmem:[%s1194_s12 + $0x8] ss:$12 sps:$4 sm:$0xff]   ;;  %v1068_v35 = vld [vmem:[%s1194_s12] ss:$12 sps:$4 sm:$0xff]  }
  0x33   : > { %948 = vmatpush3.bf16.msra.mxu0 %v1051_v16  ;;  %614 = vmatprep.mubr.bf16.mxu0 %v1070_v32  ;;  %v1073_v36 = vld [vmem:[%s1194_s12 + $0x1c] ss:$12 sps:$4 sm:$0xff]   ;;  %v1072_v37 = vld [vmem:[%s1194_s12 + $0x20] ss:$12 sps:$4 sm:$0xff]   ;;  %v1075_v38 = vld [vmem:[%s1194_s12 + $0x18] ss:$12 sps:$4 sm:$0xff]  }
  0x34   : > { %949 = vmatprep.subr.bf16.mxu0 %v1053_v18  ;;  %997 = vmatprep.mubr.bf16.mxu1 %v1071_v33  ;;  %v348_v59 = vld [vmem:[#allocation2 + $0x10] sm:$0xff]  ;;  %v349_v63 = vld [vmem:[#allocation2 + $0x18] sm:$0xff]  ;;  %v918_v8 = vld [vmem:[%s1258_s3] ss:$0 sm:$0xff] (!%p916_p11) }
  0x35   : > { %986 = vmatpush3.bf16.msra.mxu1 %v1052_v17 }
  0x36   : > { %987 = vmatprep.subr.bf16.mxu1 %v1055_v20 }
  0x37   : > { %950 = vmatpush3.bf16.msra.mxu0 %v1054_v19 }
  0x38   : > { %951 = vmatprep.subr.bf16.mxu0 %v1056_v21 }
  0x39   : > { %988 = vmatpush3.bf16.msra.mxu1 %v1055_v20 }
  0x3a   : > { %989 = vmatprep.subr.bf16.mxu1 %v1058_v22 }
  0x3b   : > { %952 = vmatpush3.bf16.msra.mxu0 %v1057_v23 }
  0x3c   : > { %953 = vmatprep.subr.bf16.mxu0 %v1059_v24 }
  0x3d   : > { %990 = vmatpush3.bf16.msra.mxu1 %v1058_v22 }
  0x3e   : > { %991 = vmatprep.subr.bf16.mxu1 %v1061_v25 }
  0x3f   : > { %954 = vmatpush3.bf16.msra.mxu0 %v1060_v26 }
  0x40   : > { %955 = vmatprep.subr.bf16.mxu0 %v1062_v27 }
  0x41   : > { %992 = vmatpush3.bf16.msra.mxu1 %v1061_v25 }
  0x42   : > { %993 = vmatprep.subr.bf16.mxu1 %v1064_v29 }
  0x43   : > { %956 = vmatpush3.bf16.msra.mxu0 %v1063_v28 }
  0x44   : > { %957 = vmatprep.subr.bf16.mxu0 %v1065_v30 }
  0x45   : > { %994 = vmatpush3.bf16.msra.mxu1 %v1064_v29 }
  0x46   : > { %995 = vmatprep.subr.bf16.mxu1 %v1067_v31 }
  0x47   : > { %958 = vmatpush3.bf16.msra.mxu0 %v1066_v34 }
  0x49   : > { %996 = vmatpush3.bf16.msra.mxu1 %v1067_v31 }
  0x4a   : > { %615 = vmatmul.mubr.bf16.vlgmr.msra.gmra.mrb[0].mxu0 %v1068_v35 }
  0x4b   : > { %622 = vmatprep.mubr.bf16.mxu0 %v1073_v36 }
  0x4c   : > { %998 = vmatmul.mubr.bf16.vlgmr.msra.gmra.mrb[0].mxu1 %v1072_v37 }
  0x52   : > { %623 = vmatmul.mubr.bf16.gmra.mrb[4].mxu0 %v1075_v38 }
 0x11d   : > { %v959_v39 = vpop.f32.mrb[0].mxu0 }
 0x11e   : > { %v960_v40 = vpop.f32.mrb[1].mxu0 }
 0x11f   : > { %v961_v41 = vadd.f32 %v960_v40, %v959_v39  ;;  %v962_v42 = vpop.f32.mrb[2].mxu0  ;;  %v999_v43 = vpop.f32.mrb[0].mxu1 }
 0x120   : > { %v963_v44 = vpop.f32.mrb[3].mxu0  ;;  %v665_v46 = vpop.f32.mrb[1].mxu1 }
 0x121   : > { %v964_v47 = vadd.f32 %v963_v44, %v962_v42  ;;  %v666_v48 = vadd.f32 %v961_v41, %v665_v46  ;;  %v1000_v49 = vpop.f32.mrb[2].mxu1 }
 0x122   : > { %v668_v51 = vpop.f32.mrb[3].mxu1 }
 0x123   : > { %v680_v52 = vadd.f32 %v666_v48, %v346_v45  ;;  %v669_v53 = vadd.f32 %v964_v47, %v668_v51 }
 0x125   : > { %684 = vst [vmem:[#allocation2] sm:$0xff] %v680_v52  ;;  %v681_v54 = vadd.f32 %v669_v53, %v347_v50  ;;  %v965_v55 = vpop.f32.mrb[4].mxu0 }
 0x126   : > { %v966_v56 = vpop.f32.mrb[5].mxu0 }
 0x127   : > { %685 = vst [vmem:[#allocation2 + $0x8] sm:$0xff] %v681_v54  ;;  %v967_v57 = vadd.f32 %v966_v56, %v965_v55  ;;  %v968_v58 = vpop.f32.mrb[6].mxu0 }
 0x128   : > { %v969_v60 = vpop.f32.mrb[7].mxu0 }
 0x129   : > { %v674_v61 = vadd.f32 %v999_v43, %v967_v57  ;;  %v970_v62 = vadd.f32 %v969_v60, %v968_v58  ;;  %691 = sbr.rel (%p916_p11) target bundleno = 320 (0x140), region = 70 }
 0x12b   : > { %v682_v0 = vadd.f32 %v674_v61, %v348_v59  ;;  %v677_v1 = vadd.f32 %v1000_v49, %v970_v62 }
 0x12c   : > { %v692_v3 = vld [vmem:[#allocation2] sm:$0xff] (!%p916_p11) }
 0x12d   : > { %686 = vst [vmem:[#allocation2 + $0x10] sm:$0xff] %v682_v0  ;;  %v683_v2 = vadd.f32 %v677_v1, %v349_v63  ;;  %v703_v6 = vmul.f32 (!%p916_p11), %v917_v5, %v692_v3 }
 0x12e   : > { %v693_v4 = vld [vmem:[#allocation2 + $0x8] sm:$0xff] (!%p916_p11) }
 0x12f   : > { %687 = vst [vmem:[#allocation2 + $0x18] sm:$0xff] %v683_v2  ;;  %v704_v7 = vmul.f32 (!%p916_p11), %v917_v5, %v693_v4  ;;  %v714_v13 = vadd.f32 (!%p916_p11), %v918_v8, %v703_v6 }
 0x131   : > { %v715_v14 = vadd.f32 %v918_v8, %v704_v7  ;;  %v718_v17 = vmax.f32 %v714_v13, 0.0 }
 0x133   : > { %v719_v18 = vmax.f32 %v715_v14, 0.0 }
 0x134   : > { %v694_v9 = vld [vmem:[#allocation2 + $0x10] sm:$0xff] }
 0x135   : > { %v705_v11 = vmul.f32 %v917_v5, %v694_v9  ;;  %v935_v21 = vpack.c.bf16 %v719_v18, %v718_v17 }
 0x136   : > { %v695_v10 = vld [vmem:[#allocation2 + $0x18] sm:$0xff] }
 0x137   : > { %v706_v12 = vmul.f32 %v917_v5, %v695_v10  ;;  %v716_v15 = vadd.f32 %v918_v8, %v705_v11  ;;  %936 = vst [vmem:[%s1259_s4] sm:$0xff] %v935_v21  }
 0x139   : > { %v717_v16 = vadd.f32 %v918_v8, %v706_v12  ;;  %v720_v19 = vmax.f32 %v716_v15, 0.0 }
 0x13b   : > { %v721_v20 = vmax.f32 %v717_v16, 0.0 }
 0x13d   : > { %v940_v22 = vpack.c.bf16 %v721_v20, %v720_v19 }
 0x13f   : > { %942 = vst [vmem:[%s1259_s4 + $0x8] sm:$0xff] %v940_v22  }
 0x140 PF: > { %s14_s19 = sadd.s32 1, %s1114_s19   ;;  %s1260_s15 = smov %s1102_s16 }
 0x141   : > { %p11_p12 = scmp.ge.s32.totalorder %s14_s19, 5   ;;  %s1261_s16 = smov %s1177_s23 }
 0x142   : > { %s1262_s17 = smov %s1110_s18  ;;  %s1263_s18 = smov %s1265_s20 }
 0x143   :  { %13 = sbr.rel (!%p11_p12) target bundleno = 3 (0x3), region = 120 }

// kernel: resnet18_backbone.33
= control target key start
LH: loop header
LB: loop body
LE: loop exit
PB: predicated region body
PF: predicated region fallthrough
CT: control target
= control target key end

     0   :  { %s1114_s15 = smov 0   ;;  %s1116_s16 = smov 0   ;;  %s1216_s0 = inlined_call_operand.vmem [shape: bf16[8,1152], index: 0, kind: input, shape index: {}]   ;;  %s1217_s1 = inlined_call_operand.vmem [shape: bf16[1152,256], index: 1, kind: input, shape index: {}]   ;;  %s1218_s2 = inlined_call_operand.vmem [shape: f32[1,256], index: 2, kind: input, shape index: {}]   ;;  %s1219_s3 = inlined_call_operand.vmem [shape: f32[1,256], index: 3, kind: input, shape index: {}]   ;;  %s1220_s4 = inlined_call_operand.vmem [shape: bf16[8,256], index: 4, kind: output, shape index: {}]  }
   0x1   :  { %s1118_s17 = smov 0  }
   0x2 LB: > { %s26_s18 = sadd.s32 1, %s1081_s16  ;;  %p898_p0 = scmp.ge.s32.totalorder %s1085_s17, 1  ;;  %s1085_s17 = sphi %s1118_s17, %s14_s17   ;;  %s1081_s16 = sphi %s1116_s16, %s1222_s16   ;;  %s1077_s15 = sphi %s1114_s15, %s1221_s15  }
   0x3   : > { %p27_p1 = scmp.ge.s32.totalorder %s26_s18, 3  ;;  %p229_p2 = scmp.lt.s32.totalorder %s1085_s17, 4 }
   0x5   : > { %s1224_s18 = smov (%p27_p1, %s26_s18), 0  ;;  %p230_p3 = pnand %p898_p0, %p229_p2 }
   0x6   : > { %s281_s19 = smul.u32 (!%p230_p3), 3, %s1077_s15  ;;  %p902_p6 = scmp.ne.s32.totalorder (!%p230_p3), %s1077_s15, 0 }
   0x7   : > { %233 = sbr.rel (%p230_p3) target bundleno = 323 (0x143), region = 36 }
   0x8   : > { %s291_s20 = smul.u32 (!%p230_p3), 48, %s1077_s15  ;;  %p284_p4 = scmp.lt.s32.totalorder (!%p230_p3), %s281_s19, 8 }
   0xa   : > { %p293_p5 = scmp.lt.s32.totalorder (!%p230_p3), %s291_s20, 143 }
   0xe   : > { %s1226_s19 = smov (!%p284_p4, %s281_s19), 8  ;;  %s1228_s20 = smov (!%p293_p5, %s291_s20), 143 }
   0xf   : > { %s899_s21 = sshll.u32 %s1226_s19, 2  ;;  %s960_s25 = sshll.u32 %s1228_s20, 3  ;;  %v1087_v0 = vmov (!%p902_p6), 0.0  }
  0x10   : > { %s1139_s24 = scalar_lea.vmem %s1216_s0, %s899_s21  ;;  %s1144_s28 = scalar_lea.vmem %s1217_s1, %s960_s25  ;;  %328 = vst [vmem:[#allocation2] sm:$0xff] (!%p902_p6), %v1087_v0  ;;  %329 = vst [vmem:[#allocation2 + $0x8] sm:$0xff] (!%p902_p6), %v1087_v0 }
  0x11   : > { %327 = sbr.rel (%p902_p6) target bundleno = 24 (0x18), region = 40 }
  0x18 PF: > { %v988_v1 = vld [vmem:[%s1144_s28 + $0x4] ss:$8 sps:$4 sm:$0xff]   ;;  %v990_v2 = vld [vmem:[%s1144_s28] ss:$8 sps:$4 sm:$0xff]   ;;  %v1088_v3 = vmov 0   ;;  %p954_p7 = scmp.ne.s32.totalorder %s1077_s15, 2 }
  0x19   : > { %706 = vmatprep.mubr.bf16.mxu1 %v1088_v3  ;;  %633 = vmatprep.subr.bf16.mxu0 %v988_v1  ;;  %v991_v4 = vld [vmem:[%s1144_s28 + $0x14] ss:$8 sps:$4 sm:$0xff]   ;;  %v993_v5 = vld [vmem:[%s1144_s28 + $0x10] ss:$8 sps:$4 sm:$0xff]   ;;  %v994_v6 = vld [vmem:[%s1144_s28 + $0x24] ss:$8 sps:$4 sm:$0xff]  }
  0x1a   : > { %634 = vmatpush1.bf16.msra.mxu0 %v990_v2  ;;  %v996_v7 = vld [vmem:[%s1144_s28 + $0x20] ss:$8 sps:$4 sm:$0xff]   ;;  %v997_v8 = vld [vmem:[%s1144_s28 + $0x34] ss:$8 sps:$4 sm:$0xff]   ;;  %v999_v9 = vld [vmem:[%s1144_s28 + $0x30] ss:$8 sps:$4 sm:$0xff]  }
  0x1b   : > { %635 = vmatprep.subr.bf16.mxu0 %v991_v4  ;;  %v1012_v10 = vld [vmem:[%s1144_s28 + $0x104] ss:$8 sps:$4 sm:$0xff]   ;;  %v1014_v11 = vld [vmem:[%s1144_s28 + $0x100] ss:$8 sps:$4 sm:$0xff]   ;;  %v1018_v13 = vld [vmem:[%s1144_s28 + $0x114] ss:$8 sps:$4 sm:$0xff]   ;;  %v727_v4 = vlaneseq (!%p954_p7) }
  0x1c   : > { %v1000_v12 = vld [vmem:[%s1144_s28 + $0x44] ss:$8 sps:$4 sm:$0xff]   ;;  %674 = vmatprep.subr.bf16.mxu1 %v1012_v10  ;;  %v1020_v14 = vld [vmem:[%s1144_s28 + $0x110] ss:$8 sps:$4 sm:$0xff]   ;;  %v1002_v15 = vld [vmem:[%s1144_s28 + $0x40] ss:$8 sps:$4 sm:$0xff]  }
  0x1d   : > { %675 = vmatpush1.bf16.msra.mxu1 %v1014_v11  ;;  %v1003_v16 = vld [vmem:[%s1144_s28 + $0x54] ss:$8 sps:$4 sm:$0xff]   ;;  %v1024_v17 = vld [vmem:[%s1144_s28 + $0x124] ss:$8 sps:$4 sm:$0xff]   ;;  %v1026_v18 = vld [vmem:[%s1144_s28 + $0x120] ss:$8 sps:$4 sm:$0xff]  }
  0x1e   : > { %636 = vmatpush1.bf16.msra.mxu0 %v993_v5  ;;  %676 = vmatprep.subr.bf16.mxu1 %v1018_v13  ;;  %v1005_v19 = vld [vmem:[%s1144_s28 + $0x50] ss:$8 sps:$4 sm:$0xff]   ;;  %v1030_v20 = vld [vmem:[%s1144_s28 + $0x134] ss:$8 sps:$4 sm:$0xff]   ;;  %v1006_v21 = vld [vmem:[%s1144_s28 + $0x64] ss:$8 sps:$4 sm:$0xff]  }
  0x1f   : > { %637 = vmatprep.subr.bf16.mxu0 %v994_v6  ;;  %v1032_v22 = vld [vmem:[%s1144_s28 + $0x130] ss:$8 sps:$4 sm:$0xff]   ;;  %v1008_v23 = vld [vmem:[%s1144_s28 + $0x60] ss:$8 sps:$4 sm:$0xff]   ;;  %v1036_v24 = vld [vmem:[%s1144_s28 + $0x144] ss:$8 sps:$4 sm:$0xff]  }
  0x20   : > { %v1009_v25 = vld [vmem:[%s1144_s28 + $0x74] ss:$8 sps:$4 sm:$0xff]   ;;  %v1038_v26 = vld [vmem:[%s1144_s28 + $0x140] ss:$8 sps:$4 sm:$0xff]   ;;  %v1011_v27 = vld [vmem:[%s1144_s28 + $0x70] ss:$8 sps:$4 sm:$0xff]  }
  0x21   : > { %677 = vmatpush1.bf16.msra.mxu1 %v1020_v14  ;;  %v1042_v28 = vld [vmem:[%s1144_s28 + $0x154] ss:$8 sps:$4 sm:$0xff]   ;;  %v1015_v29 = vld [vmem:[%s1144_s28 + $0x84] ss:$8 sps:$4 sm:$0xff]   ;;  %v1044_v30 = vld [vmem:[%s1144_s28 + $0x150] ss:$8 sps:$4 sm:$0xff]  }
  0x22   : > { %638 = vmatpush1.bf16.msra.mxu0 %v996_v7  ;;  %678 = vmatprep.subr.bf16.mxu1 %v1024_v17  ;;  %v1017_v31 = vld [vmem:[%s1144_s28 + $0x80] ss:$8 sps:$4 sm:$0xff]   ;;  %v1048_v32 = vld [vmem:[%s1144_s28 + $0x164] ss:$8 sps:$4 sm:$0xff]   ;;  %v1021_v33 = vld [vmem:[%s1144_s28 + $0x94] ss:$8 sps:$4 sm:$0xff]  }
  0x23   : > { %639 = vmatprep.subr.bf16.mxu0 %v997_v8  ;;  %v332_v34 = vld [vmem:[%s1139_s24] sm:$0xff]  ;;  %v1023_v37 = vld [vmem:[%s1144_s28 + $0x90] ss:$8 sps:$4 sm:$0xff]   ;;  %v1054_v38 = vld [vmem:[%s1144_s28 + $0x174] ss:$8 sps:$4 sm:$0xff]   ;;  %v728_v5 = vshrl.u32 (!%p954_p7), %v727_v4, 7 }
  0x24   : > { %v904_v35 = vcombine.high %v332_v34, %v332_v34  ;;  %v1050_v36 = vld [vmem:[%s1144_s28 + $0x160] ss:$8 sps:$4 sm:$0xff]   ;;  %v1027_v39 = vld [vmem:[%s1144_s28 + $0xa4] ss:$8 sps:$4 sm:$0xff]   ;;  %v1056_v40 = vld [vmem:[%s1144_s28 + $0x170] ss:$8 sps:$4 sm:$0xff]   ;;  %v903_v53 = vcombine.low %v332_v34, %v332_v34 }
  0x25   : > { %679 = vmatpush1.bf16.msra.mxu1 %v1026_v18  ;;  %v1029_v41 = vld [vmem:[%s1144_s28 + $0xa0] ss:$8 sps:$4 sm:$0xff]   ;;  %v1033_v42 = vld [vmem:[%s1144_s28 + $0xb4] ss:$8 sps:$4 sm:$0xff]   ;;  %v1035_v44 = vld [vmem:[%s1144_s28 + $0xb0] ss:$8 sps:$4 sm:$0xff]  }
  0x26   : > { %640 = vmatpush1.bf16.msra.mxu0 %v999_v9  ;;  %680 = vmatprep.subr.bf16.mxu1 %v1030_v20  ;;  %v1060_v43 = vld [vmem:[%s1139_s24 + $0x8] ss:$0 sps:$4 sm:$0xff]   ;;  %v1039_v45 = vld [vmem:[%s1144_s28 + $0xc4] ss:$8 sps:$4 sm:$0xff]   ;;  %v1045_v47 = vld [vmem:[%s1144_s28 + $0xd4] ss:$8 sps:$4 sm:$0xff]  }
  0x27   : > { %641 = vmatprep.subr.bf16.mxu0 %v1000_v12  ;;  %665 = vmatprep.mubr.bf16.mxu0 %v904_v35  ;;  %v1041_v46 = vld [vmem:[%s1144_s28 + $0xc0] ss:$8 sps:$4 sm:$0xff]   ;;  %v1047_v48 = vld [vmem:[%s1144_s28 + $0xd0] ss:$8 sps:$4 sm:$0xff]   ;;  %v1051_v49 = vld [vmem:[%s1144_s28 + $0xe4] ss:$8 sps:$4 sm:$0xff]  }
  0x28   : > { %v1053_v50 = vld [vmem:[%s1144_s28 + $0xe0] ss:$8 sps:$4 sm:$0xff]   ;;  %v1057_v51 = vld [vmem:[%s1144_s28 + $0xf4] ss:$8 sps:$4 sm:$0xff]   ;;  %v1059_v52 = vld [vmem:[%s1144_s28 + $0xf0] ss:$8 sps:$4 sm:$0xff]  }
  0x29   : > { %681 = vmatpush1.bf16.msra.mxu1 %v1032_v22  ;;  %v330_v58 = vld [vmem:[#allocation2] sm:$0xff]  ;;  %v331_v61 = vld [vmem:[#allocation2 + $0x8] sm:$0xff]  ;;  %v729_v8 = vsub.s32 (!%p954_p7), 0, %v728_v5  ;;  %v733_v9 = vsub.s32 (!%p954_p7), 1, %v728_v5 }
  0x2a   : > { %642 = vmatpush1.bf16.msra.mxu0 %v1002_v15  ;;  %682 = vmatprep.subr.bf16.mxu1 %v1036_v24  ;;  %v725_v6 = vld [vmem:[%s1218_s2] sm:$0x3] (!%p954_p7) }
  0x2b   : > { %643 = vmatprep.subr.bf16.mxu0 %v1003_v16  ;;  %v739_v7 = vld [vmem:[%s1219_s3] sm:$0x3] (!%p954_p7)  ;;  %v730_v12 = vrot.slane (!%p954_p7), %v725_v6, %v729_v8  ;;  %v734_v13 = vrot.slane (!%p954_p7), %v725_v6, %v733_v9 }
  0x2c   : > { %v744_v14 = vrot.slane (!%p954_p7), %v739_v7, %v729_v8  ;;  %v748_v15 = vrot.slane (!%p954_p7), %v739_v7, %v733_v9 }
  0x2d   : > { %683 = vmatpush1.bf16.msra.mxu1 %v1038_v26 }
  0x2e   : > { %644 = vmatpush1.bf16.msra.mxu0 %v1005_v19  ;;  %684 = vmatprep.subr.bf16.mxu1 %v1042_v28 }
  0x2f   : > { %645 = vmatprep.subr.bf16.mxu0 %v1006_v21 }
  0x31   : > { %685 = vmatpush1.bf16.msra.mxu1 %v1044_v30 }
  0x32   : > { %646 = vmatpush1.bf16.msra.mxu0 %v1008_v23  ;;  %686 = vmatprep.subr.bf16.mxu1 %v1048_v32 }
  0x33   : > { %647 = vmatprep.subr.bf16.mxu0 %v1009_v25 }
  0x35   : > { %687 = vmatpush1.bf16.msra.mxu1 %v1050_v36 }
  0x36   : > { %648 = vmatpush1.bf16.msra.mxu0 %v1011_v27  ;;  %688 = vmatprep.subr.bf16.mxu1 %v1054_v38 }
  0x37   : > { %649 = vmatprep.subr.bf16.mxu0 %v1015_v29 }
  0x39   : > { %689 = vmatpush1.bf16.msra.mxu1 %v1056_v40 }
  0x3a   : > { %650 = vmatpush1.bf16.msra.mxu0 %v1017_v31 }
  0x3b   : > { %651 = vmatprep.subr.bf16.mxu0 %v1021_v33 }
  0x3c   : > { %707 = vmatmul.mubr.bf16.vlgmr.msra.gmra.mrb[0].mxu1 %v1060_v43 }
  0x3e   : > { %652 = vmatpush1.bf16.msra.mxu0 %v1023_v37 }
  0x3f   : > { %653 = vmatprep.subr.bf16.mxu0 %v1027_v39 }
  0x42   : > { %654 = vmatpush1.bf16.msra.mxu0 %v1029_v41 }
  0x43   : > { %655 = vmatprep.subr.bf16.mxu0 %v1033_v42 }
  0x46   : > { %656 = vmatpush1.bf16.msra.mxu0 %v1035_v44 }
  0x47   : > { %657 = vmatprep.subr.bf16.mxu0 %v1039_v45 }
  0x4a   : > { %658 = vmatpush1.bf16.msra.mxu0 %v1041_v46 }
  0x4b   : > { %659 = vmatprep.subr.bf16.mxu0 %v1045_v47 }
  0x4e   : > { %660 = vmatpush1.bf16.msra.mxu0 %v1047_v48 }
  0x4f   : > { %661 = vmatprep.subr.bf16.mxu0 %v1051_v49 }
  0x52   : > { %662 = vmatpush1.bf16.msra.mxu0 %v1053_v50 }
  0x53   : > { %663 = vmatprep.subr.bf16.mxu0 %v1057_v51 }
  0x56   : > { %664 = vmatpush1.bf16.msra.mxu0 %v1059_v52 }
  0x59   : > { %666 = vmatmul.mubr.bf16.vlgmr.msra.gmra.mrb[0].mxu0 %v903_v53 }
 0x10f   : > { %v708_v54 = vpop.f32.mrb[0].mxu1 }
 0x110   : > { %v710_v55 = vpop.f32.mrb[1].mxu1 }
 0x111   : > { %v712_v56 = vpop.f32.mrb[2].mxu1 }
 0x112   : > { %v713_v57 = vpop.f32.mrb[3].mxu1 }
 0x12c   : > { %v667_v59 = vpop.f32.mrb[0].mxu0  ;;  %722 = sbr.rel (%p954_p7) target bundleno = 323 (0x143), region = 44 }
 0x12d   : > { %v709_v60 = vadd.f32 %v708_v54, %v667_v59  ;;  %v669_v62 = vpop.f32.mrb[1].mxu0 }
 0x12e   : > { %v711_v63 = vadd.f32 %v710_v55, %v669_v62  ;;  %v671_v0 = vpop.f32.mrb[2].mxu0 }
 0x12f   : > { %v715_v1 = vadd.f32 %v709_v60, %v330_v58  ;;  %v672_v2 = vpop.f32.mrb[3].mxu0 }
 0x130   : > { %v716_v3 = vadd.f32 %v711_v63, %v331_v61 }
 0x131   : > { %717 = vst [vmem:[#allocation2] sm:$0xff] %v715_v1 }
 0x132   : > { %718 = vst [vmem:[#allocation2 + $0x8] sm:$0xff] %v716_v3 }
 0x138   : > { %v723_v10 = vld [vmem:[#allocation2] sm:$0xff] }
 0x139   : > { %v724_v11 = vld [vmem:[#allocation2 + $0x8] sm:$0xff]  ;;  %v737_v16 = vmul.f32 %v730_v12, %v723_v10 }
 0x13a   : > { %v738_v17 = vmul.f32 %v734_v13, %v724_v11 }
 0x13b   : > { %v751_v18 = vadd.f32 %v744_v14, %v737_v16 }
 0x13c   : > { %v752_v19 = vadd.f32 %v748_v15, %v738_v17 }
 0x13d   : > { %v753_v20 = vmax.f32 %v751_v18, 0.0 }
 0x13e   : > { %v754_v21 = vmax.f32 %v752_v19, 0.0 }
 0x140   : > { %v961_v22 = vpack.c.bf16 %v754_v21, %v753_v20 }
 0x142   : > { %763 = vst [vmem:[%s1220_s4] sm:$0xff] %v961_v22 }
 0x143 PF: > { %s14_s17 = sadd.s32 1, %s1085_s17   ;;  %s1221_s15 = smov %s1081_s16 }
 0x144   : > { %p11_p8 = scmp.ge.s32.totalorder %s14_s17, 5   ;;  %s1222_s16 = smov %s1224_s18 }
 0x146   :  { %13 = sbr.rel (!%p11_p8) target bundleno = 2 (0x2), region = 83 }

// kernel: resnet18_backbone.32
= control target key start
LH: loop header
LB: loop body
LE: loop exit
PB: predicated region body
PF: predicated region fallthrough
CT: control target
= control target key end

     0   :  { %v257_v1 = vmov 0   ;;  %v175_v18 = vlaneseq  ;;  %s343_s1 = inlined_call_operand.vmem [shape: bf16[128,256], index: 1, kind: input, shape index: {}]   ;;  %s344_s0 = inlined_call_operand.vmem [shape: bf16[8,128], index: 0, kind: input, shape index: {}]   ;;  %s345_s2 = inlined_call_operand.vmem [shape: f32[1,256], index: 2, kind: input, shape index: {}]   ;;  %s346_s3 = inlined_call_operand.vmem [shape: f32[1,256], index: 3, kind: input, shape index: {}]   ;;  %s347_s4 = inlined_call_operand.vmem [shape: bf16[8,256], index: 4, kind: output, shape index: {}]  }
   0x1   :  { %v233_v0 = vld [vmem:[%s343_s1 + $0x4] ss:$8 sps:$4 sm:$0xff]   ;;  %155 = vmatprep.mubr.bf16.mxu0 %v257_v1  ;;  %v235_v2 = vld [vmem:[%s343_s1] ss:$8 sps:$4 sm:$0xff]   ;;  %v236_v3 = vld [vmem:[%s343_s1 + $0x14] ss:$8 sps:$4 sm:$0xff]  }
   0x2   :  { %123 = vmatprep.subr.bf16.mxu0 %v233_v0  ;;  %v238_v4 = vld [vmem:[%s343_s1 + $0x10] ss:$8 sps:$4 sm:$0xff]   ;;  %v239_v5 = vld [vmem:[%s343_s1 + $0x24] ss:$8 sps:$4 sm:$0xff]   ;;  %v241_v6 = vld [vmem:[%s343_s1 + $0x20] ss:$8 sps:$4 sm:$0xff]  }
   0x3   :  { %124 = vmatpush1.bf16.msra.mxu0 %v235_v2  ;;  %v242_v7 = vld [vmem:[%s343_s1 + $0x34] ss:$8 sps:$4 sm:$0xff]   ;;  %v244_v8 = vld [vmem:[%s343_s1 + $0x30] ss:$8 sps:$4 sm:$0xff]   ;;  %v245_v9 = vld [vmem:[%s343_s1 + $0x44] ss:$8 sps:$4 sm:$0xff]  }
   0x4   :  { %125 = vmatprep.subr.bf16.mxu0 %v236_v3  ;;  %v247_v10 = vld [vmem:[%s343_s1 + $0x40] ss:$8 sps:$4 sm:$0xff]   ;;  %v248_v11 = vld [vmem:[%s343_s1 + $0x54] ss:$8 sps:$4 sm:$0xff]   ;;  %v250_v12 = vld [vmem:[%s343_s1 + $0x50] ss:$8 sps:$4 sm:$0xff]  }
   0x5   :  { %v251_v13 = vld [vmem:[%s343_s1 + $0x64] ss:$8 sps:$4 sm:$0xff]   ;;  %v253_v14 = vld [vmem:[%s343_s1 + $0x60] ss:$8 sps:$4 sm:$0xff]   ;;  %v254_v15 = vld [vmem:[%s343_s1 + $0x74] ss:$8 sps:$4 sm:$0xff]  }
   0x6   :  { %v256_v16 = vld [vmem:[%s343_s1 + $0x70] ss:$8 sps:$4 sm:$0xff]   ;;  %v26_v17 = vld [vmem:[%s344_s0] sm:$0xf]  ;;  %v176_v19 = vshrl.u32 %v175_v18, 7 }
   0x7   :  { %126 = vmatpush1.bf16.msra.mxu0 %v238_v4  ;;  %v173_v21 = vld [vmem:[%s345_s2] sm:$0x3] }
   0x8   :  { %127 = vmatprep.subr.bf16.mxu0 %v239_v5  ;;  %v177_v20 = vsub.s32 0, %v176_v19  ;;  %v181_v22 = vsub.s32 1, %v176_v19  ;;  %v187_v23 = vld [vmem:[%s346_s3] sm:$0x3] }
   0xa   :  { %v178_v24 = vrot.slane %v173_v21, %v177_v20  ;;  %v182_v25 = vrot.slane %v173_v21, %v181_v22  ;;  %v192_v26 = vrot.slane %v187_v23, %v177_v20  ;;  %v196_v28 = vrot.slane %v187_v23, %v181_v22 }
   0xb   :  { %128 = vmatpush1.bf16.msra.mxu0 %v241_v6 }
   0xc   :  { %129 = vmatprep.subr.bf16.mxu0 %v242_v7 }
   0xf   :  { %130 = vmatpush1.bf16.msra.mxu0 %v244_v8 }
  0x10   :  { %131 = vmatprep.subr.bf16.mxu0 %v245_v9 }
  0x13   :  { %132 = vmatpush1.bf16.msra.mxu0 %v247_v10 }
  0x14   :  { %133 = vmatprep.subr.bf16.mxu0 %v248_v11 }
  0x17   :  { %134 = vmatpush1.bf16.msra.mxu0 %v250_v12 }
  0x18   :  { %135 = vmatprep.subr.bf16.mxu0 %v251_v13 }
  0x1b   :  { %136 = vmatpush1.bf16.msra.mxu0 %v253_v14 }
  0x1c   :  { %137 = vmatprep.subr.bf16.mxu0 %v254_v15 }
  0x1f   :  { %138 = vmatpush1.bf16.msra.mxu0 %v256_v16 }
  0x22   :  { %156 = vmatmul.mubr.bf16.vlgmr.msra.gmra.mrb[0].mxu0 %v26_v17 }
  0xf5   :  { %v157_v27 = vpop.f32.mrb[0].mxu0 }
  0xf6   :  { %v185_v29 = vmul.f32 %v178_v24, %v157_v27  ;;  %v159_v30 = vpop.f32.mrb[1].mxu0 }
  0xf7   :  { %v186_v31 = vmul.f32 %v182_v25, %v159_v30  ;;  %v161_v32 = vpop.f32.mrb[2].mxu0 }
  0xf8   :  { %v199_v33 = vadd.f32 %v192_v26, %v185_v29  ;;  %v162_v34 = vpop.f32.mrb[3].mxu0 }
  0xf9   :  { %v200_v35 = vadd.f32 %v196_v28, %v186_v31 }
  0xfb   :  { %v231_v36 = vpack.c.bf16 %v200_v35, %v199_v33 }
  0xfd   :  { %209 = vst [vmem:[%s347_s4] sm:$0xff] %v231_v36 }

// kernel: resnet18_backbone.34
= control target key start
LH: loop header
LB: loop body
LE: loop exit
PB: predicated region body
PF: predicated region fallthrough
CT: control target
= control target key end

     0   :  { %s1672_s18 = smov 0   ;;  %s1674_s19 = smov 0   ;;  %s1832_s0 = inlined_call_operand.vmem [shape: bf16[8,2304], index: 0, kind: input, shape index: {}]   ;;  %s1833_s1 = inlined_call_operand.vmem [shape: bf16[2304,256], index: 1, kind: input, shape index: {}]   ;;  %s1834_s2 = inlined_call_operand.vmem [shape: f32[1,256], index: 2, kind: input, shape index: {}]   ;;  %s1835_s3 = inlined_call_operand.vmem [shape: f32[1,256], index: 3, kind: input, shape index: {}]   ;;  %s1836_s4 = inlined_call_operand.vmem [shape: bf16[8,256], index: 4, kind: input, shape index: {}]   ;;  %s1837_s5 = inlined_call_operand.vmem [shape: bf16[8,256], index: 5, kind: output, shape index: {}]  }
   0x1   :  { %s1676_s20 = smov 0  }
   0x2 LB: > { %s27_s21 = sadd.s32 1, %s1635_s19  ;;  %p1327_p0 = scmp.ge.s32.totalorder %s1639_s20, 1  ;;  %s1639_s20 = sphi %s1676_s20, %s15_s20   ;;  %s1635_s19 = sphi %s1674_s19, %s1839_s19   ;;  %s1631_s18 = sphi %s1672_s18, %s1838_s18  }
   0x3   : > { %p28_p1 = scmp.ge.s32.totalorder %s27_s21, 3  ;;  %p271_p2 = scmp.lt.s32.totalorder %s1639_s20, 4 }
   0x5   : > { %s1841_s21 = smov (%p28_p1, %s27_s21), 0  ;;  %p272_p3 = pnand %p1327_p0, %p271_p2 }
   0x6   : > { %s334_s22 = smul.u32 (!%p272_p3), 6, %s1631_s18  ;;  %p1331_p6 = scmp.ne.s32.totalorder (!%p272_p3), %s1631_s18, 0 }
   0x7   : > { %275 = sbr.rel (%p272_p3) target bundleno = 389 (0x185), region = 40 }
   0x8   : > { %s344_s23 = smul.u32 (!%p272_p3), 96, %s1631_s18  ;;  %p337_p4 = scmp.lt.s32.totalorder (!%p272_p3), %s334_s22, 17 }
   0xa   : > { %p346_p5 = scmp.lt.s32.totalorder (!%p272_p3), %s344_s23, 287 }
   0xe   : > { %s1843_s22 = smov (!%p337_p4, %s334_s22), 17  ;;  %s1845_s23 = smov (!%p346_p5, %s344_s23), 287 }
   0xf   : > { %s1328_s24 = sshll.u32 %s1843_s22, 2  ;;  %s1440_s28 = sshll.u32 %s1845_s23, 3  ;;  %v1641_v0 = vmov (!%p1331_p6), 0.0  }
  0x10   : > { %s1697_s27 = scalar_lea.vmem %s1832_s0, %s1328_s24  ;;  %s1702_s6 = scalar_lea.vmem %s1833_s1, %s1440_s28  ;;  %390 = vst [vmem:[#allocation2] sm:$0xff] (!%p1331_p6), %v1641_v0  ;;  %391 = vst [vmem:[#allocation2 + $0x8] sm:$0xff] (!%p1331_p6), %v1641_v0 }
  0x11   : > { %389 = sbr.rel (%p1331_p6) target bundleno = 24 (0x18), region = 44 }
  0x18 PF: > { %v1467_v1 = vld [vmem:[%s1702_s6 + $0x4] ss:$8 sps:$4 sm:$0xff]   ;;  %v1471_v3 = vld [vmem:[%s1702_s6] ss:$8 sps:$4 sm:$0xff]   ;;  %v1473_v5 = vld [vmem:[%s1702_s6 + $0x14] ss:$8 sps:$4 sm:$0xff]  }
  0x19   : > { %v1469_v2 = vld [vmem:[%s1702_s6 + $0x104] ss:$8 sps:$4 sm:$0xff]   ;;  %994 = vmatprep.subr.bf16.mxu0 %v1467_v1  ;;  %v1472_v4 = vld [vmem:[%s1702_s6 + $0x100] ss:$8 sps:$4 sm:$0xff]   ;;  %v1475_v6 = vld [vmem:[%s1702_s6 + $0x114] ss:$8 sps:$4 sm:$0xff]  }
  0x1a   : > { %1035 = vmatprep.subr.bf16.mxu1 %v1469_v2  ;;  %995 = vmatpush1.bf16.msra.mxu0 %v1471_v3  ;;  %v1477_v7 = vld [vmem:[%s1702_s6 + $0x10] ss:$8 sps:$4 sm:$0xff]   ;;  %v1479_v9 = vld [vmem:[%s1702_s6 + $0x24] ss:$8 sps:$4 sm:$0xff]   ;;  %v1483_v11 = vld [vmem:[%s1702_s6 + $0x20] ss:$8 sps:$4 sm:$0xff]  }
  0x1b   : > { %1036 = vmatpush1.bf16.msra.mxu1 %v1472_v4  ;;  %996 = vmatprep.subr.bf16.mxu0 %v1473_v5  ;;  %v1478_v8 = vld [vmem:[%s1702_s6 + $0x110] ss:$8 sps:$4 sm:$0xff]   ;;  %v1481_v10 = vld [vmem:[%s1702_s6 + $0x124] ss:$8 sps:$4 sm:$0xff]   ;;  %v1484_v12 = vld [vmem:[%s1702_s6 + $0x120] ss:$8 sps:$4 sm:$0xff]  }
  0x1c   : > { %1037 = vmatprep.subr.bf16.mxu1 %v1475_v6  ;;  %v1485_v13 = vld [vmem:[%s1702_s6 + $0x34] ss:$8 sps:$4 sm:$0xff]   ;;  %v1489_v15 = vld [vmem:[%s1702_s6 + $0x30] ss:$8 sps:$4 sm:$0xff]   ;;  %v1491_v17 = vld [vmem:[%s1702_s6 + $0x44] ss:$8 sps:$4 sm:$0xff]  }
  0x1d   : > { %v1487_v14 = vld [vmem:[%s1702_s6 + $0x134] ss:$8 sps:$4 sm:$0xff]   ;;  %v1490_v16 = vld [vmem:[%s1702_s6 + $0x130] ss:$8 sps:$4 sm:$0xff]   ;;  %v1493_v18 = vld [vmem:[%s1702_s6 + $0x144] ss:$8 sps:$4 sm:$0xff]  }
  0x1e   : > { %997 = vmatpush1.bf16.msra.mxu0 %v1477_v7  ;;  %v1495_v19 = vld [vmem:[%s1702_s6 + $0x40] ss:$8 sps:$4 sm:$0xff]   ;;  %v1497_v21 = vld [vmem:[%s1702_s6 + $0x54] ss:$8 sps:$4 sm:$0xff]   ;;  %v1501_v23 = vld [vmem:[%s1702_s6 + $0x50] ss:$8 sps:$4 sm:$0xff]  }
  0x1f   : > { %1038 = vmatpush1.bf16.msra.mxu1 %v1478_v8  ;;  %998 = vmatprep.subr.bf16.mxu0 %v1479_v9  ;;  %v1496_v20 = vld [vmem:[%s1702_s6 + $0x140] ss:$8 sps:$4 sm:$0xff]   ;;  %v1499_v22 = vld [vmem:[%s1702_s6 + $0x154] ss:$8 sps:$4 sm:$0xff]   ;;  %v1502_v24 = vld [vmem:[%s1702_s6 + $0x150] ss:$8 sps:$4 sm:$0xff]  }
  0x20   : > { %1039 = vmatprep.subr.bf16.mxu1 %v1481_v10  ;;  %v1503_v25 = vld [vmem:[%s1702_s6 + $0x64] ss:$8 sps:$4 sm:$0xff]   ;;  %v1507_v27 = vld [vmem:[%s1702_s6 + $0x60] ss:$8 sps:$4 sm:$0xff]   ;;  %v1509_v29 = vld [vmem:[%s1702_s6 + $0x74] ss:$8 sps:$4 sm:$0xff]  }
  0x21   : > { %v1505_v26 = vld [vmem:[%s1702_s6 + $0x164] ss:$8 sps:$4 sm:$0xff]   ;;  %v1508_v28 = vld [vmem:[%s1702_s6 + $0x160] ss:$8 sps:$4 sm:$0xff]   ;;  %v1511_v30 = vld [vmem:[%s1702_s6 + $0x174] ss:$8 sps:$4 sm:$0xff]  }
  0x22   : > { %999 = vmatpush1.bf16.msra.mxu0 %v1483_v11  ;;  %v1513_v31 = vld [vmem:[%s1702_s6 + $0x70] ss:$8 sps:$4 sm:$0xff]   ;;  %v1515_v33 = vld [vmem:[%s1702_s6 + $0x84] ss:$8 sps:$4 sm:$0xff]   ;;  %v1519_v35 = vld [vmem:[%s1702_s6 + $0x80] ss:$8 sps:$4 sm:$0xff]  }
  0x23   : > { %1040 = vmatpush1.bf16.msra.mxu1 %v1484_v12  ;;  %1000 = vmatprep.subr.bf16.mxu0 %v1485_v13  ;;  %v1514_v32 = vld [vmem:[%s1702_s6 + $0x170] ss:$8 sps:$4 sm:$0xff]   ;;  %v1517_v34 = vld [vmem:[%s1702_s6 + $0x184] ss:$8 sps:$4 sm:$0xff]   ;;  %v1520_v36 = vld [vmem:[%s1702_s6 + $0x180] ss:$8 sps:$4 sm:$0xff]  }
  0x24   : > { %1041 = vmatprep.subr.bf16.mxu1 %v1487_v14  ;;  %v1521_v37 = vld [vmem:[%s1702_s6 + $0x94] ss:$8 sps:$4 sm:$0xff]   ;;  %v1525_v39 = vld [vmem:[%s1702_s6 + $0x90] ss:$8 sps:$4 sm:$0xff]   ;;  %v1527_v41 = vld [vmem:[%s1702_s6 + $0xa4] ss:$8 sps:$4 sm:$0xff]  }
  0x25   : > { %v1523_v38 = vld [vmem:[%s1702_s6 + $0x194] ss:$8 sps:$4 sm:$0xff]   ;;  %v1526_v40 = vld [vmem:[%s1702_s6 + $0x190] ss:$8 sps:$4 sm:$0xff]   ;;  %v1529_v42 = vld [vmem:[%s1702_s6 + $0x1a4] ss:$8 sps:$4 sm:$0xff]  }
  0x26   : > { %1001 = vmatpush1.bf16.msra.mxu0 %v1489_v15  ;;  %v1531_v43 = vld [vmem:[%s1702_s6 + $0xa0] ss:$8 sps:$4 sm:$0xff]   ;;  %v1533_v45 = vld [vmem:[%s1702_s6 + $0xb4] ss:$8 sps:$4 sm:$0xff]   ;;  %v1537_v50 = vld [vmem:[%s1702_s6 + $0xb0] ss:$8 sps:$4 sm:$0xff]  }
  0x27   : > { %1042 = vmatpush1.bf16.msra.mxu1 %v1490_v16  ;;  %1002 = vmatprep.subr.bf16.mxu0 %v1491_v17  ;;  %v1532_v44 = vld [vmem:[%s1702_s6 + $0x1a0] ss:$8 sps:$4 sm:$0xff]   ;;  %v1535_v46 = vld [vmem:[%s1702_s6 + $0x1b4] ss:$8 sps:$4 sm:$0xff]   ;;  %v1538_v51 = vld [vmem:[%s1702_s6 + $0x1b0] ss:$8 sps:$4 sm:$0xff]  }
  0x28   : > { %1043 = vmatprep.subr.bf16.mxu1 %v1493_v18  ;;  %v394_v47 = vld [vmem:[%s1697_s27] sm:$0xff]  ;;  %v395_v49 = vld [vmem:[%s1697_s27 + $0x8] sm:$0xff]  ;;  %v1545_v57 = vld [vmem:[%s1702_s6 + $0xd4] ss:$8 sps:$4 sm:$0xff]   ;;  %p1434_p7 = scmp.ne.s32.totalorder %s1631_s18, 2 }
  0x29   : > { %v1333_v48 = vcombine.high %v394_v47, %v394_v47  ;;  %v1335_v52 = vcombine.high %v395_v49, %v395_v49  ;;  %v1539_v53 = vld [vmem:[%s1702_s6 + $0xc4] ss:$8 sps:$4 sm:$0xff]   ;;  %v1543_v55 = vld [vmem:[%s1702_s6 + $0xc0] ss:$8 sps:$4 sm:$0xff]   ;;  %v1547_v58 = vld [vmem:[%s1702_s6 + $0x1d4] ss:$8 sps:$4 sm:$0xff]   ;;  %v1332_v6 = vcombine.low %v394_v47, %v394_v47  ;;  %v1334_v7 = vcombine.low %v395_v49, %v395_v49 }
  0x2a   : > { %1003 = vmatpush1.bf16.msra.mxu0 %v1495_v19  ;;  %v1541_v54 = vld [vmem:[%s1702_s6 + $0x1c4] ss:$8 sps:$4 sm:$0xff]   ;;  %v1544_v56 = vld [vmem:[%s1702_s6 + $0x1c0] ss:$8 sps:$4 sm:$0xff]   ;;  %v1549_v59 = vld [vmem:[%s1702_s6 + $0xd0] ss:$8 sps:$4 sm:$0xff]  }
  0x2b   : > { %1044 = vmatpush1.bf16.msra.mxu1 %v1496_v20  ;;  %1004 = vmatprep.subr.bf16.mxu0 %v1497_v21  ;;  %v1550_v60 = vld [vmem:[%s1702_s6 + $0x1d0] ss:$8 sps:$4 sm:$0xff]   ;;  %v1551_v61 = vld [vmem:[%s1702_s6 + $0xe4] ss:$8 sps:$4 sm:$0xff]   ;;  %v1555_v63 = vld [vmem:[%s1702_s6 + $0xe0] ss:$8 sps:$4 sm:$0xff]  }
  0x2c   : > { %1045 = vmatprep.subr.bf16.mxu1 %v1499_v22  ;;  %1026 = vmatprep.mubr.bf16.mxu0 %v1333_v48  ;;  %v1553_v62 = vld [vmem:[%s1702_s6 + $0x1e4] ss:$8 sps:$4 sm:$0xff]   ;;  %v1556_v0 = vld [vmem:[%s1702_s6 + $0x1e0] ss:$8 sps:$4 sm:$0xff]   ;;  %v1557_v1 = vld [vmem:[%s1702_s6 + $0xf4] ss:$8 sps:$4 sm:$0xff]  }
  0x2d   : > { %1067 = vmatprep.mubr.bf16.mxu1 %v1335_v52  ;;  %v1559_v2 = vld [vmem:[%s1702_s6 + $0x1f4] ss:$8 sps:$4 sm:$0xff]   ;;  %v1561_v3 = vld [vmem:[%s1702_s6 + $0xf0] ss:$8 sps:$4 sm:$0xff]   ;;  %v1569_v5 = vld [vmem:[%s1702_s6 + $0x204] ss:$8 sps:$4 sm:$0xff]  }
  0x2e   : > { %1005 = vmatpush1.bf16.msra.mxu0 %v1501_v23  ;;  %v1562_v4 = vld [vmem:[%s1702_s6 + $0x1f0] ss:$8 sps:$4 sm:$0xff]   ;;  %v1567_v8 = vld [vmem:[%s1702_s6 + $0x200] ss:$8 sps:$4 sm:$0xff]   ;;  %v1572_v10 = vld [vmem:[%s1702_s6 + $0x214] ss:$8 sps:$4 sm:$0xff]  }
  0x2f   : > { %1046 = vmatpush1.bf16.msra.mxu1 %v1502_v24  ;;  %1006 = vmatprep.subr.bf16.mxu0 %v1503_v25  ;;  %v1774_v9 = vld [vmem:[%s1697_s27 + $0x10] sm:$0xff]  ;;  %v1575_v13 = vld [vmem:[%s1702_s6 + $0x224] ss:$8 sps:$4 sm:$0xff]   ;;  %v1573_v14 = vld [vmem:[%s1702_s6 + $0x220] ss:$8 sps:$4 sm:$0xff]  }
  0x30   : > { %1047 = vmatprep.subr.bf16.mxu1 %v1505_v26  ;;  %v1337_v11 = vcombine.high %v1774_v9, %v1774_v9  ;;  %v1570_v12 = vld [vmem:[%s1702_s6 + $0x210] ss:$8 sps:$4 sm:$0xff]   ;;  %v1578_v15 = vld [vmem:[%s1702_s6 + $0x234] ss:$8 sps:$4 sm:$0xff]   ;;  %v1581_v17 = vld [vmem:[%s1702_s6 + $0x244] ss:$8 sps:$4 sm:$0xff]  }
  0x31   : > { %v1576_v16 = vld [vmem:[%s1702_s6 + $0x230] ss:$8 sps:$4 sm:$0xff]   ;;  %v1579_v18 = vld [vmem:[%s1702_s6 + $0x240] ss:$8 sps:$4 sm:$0xff]   ;;  %v1584_v19 = vld [vmem:[%s1702_s6 + $0x254] ss:$8 sps:$4 sm:$0xff]  }
  0x32   : > { %1007 = vmatpush1.bf16.msra.mxu0 %v1507_v27  ;;  %v1582_v20 = vld [vmem:[%s1702_s6 + $0x250] ss:$8 sps:$4 sm:$0xff]   ;;  %v1587_v21 = vld [vmem:[%s1702_s6 + $0x264] ss:$8 sps:$4 sm:$0xff]   ;;  %v1585_v22 = vld [vmem:[%s1702_s6 + $0x260] ss:$8 sps:$4 sm:$0xff]  }
  0x33   : > { %1048 = vmatpush1.bf16.msra.mxu1 %v1508_v28  ;;  %1008 = vmatprep.subr.bf16.mxu0 %v1509_v29  ;;  %v1590_v23 = vld [vmem:[%s1702_s6 + $0x274] ss:$8 sps:$4 sm:$0xff]   ;;  %v1588_v24 = vld [vmem:[%s1702_s6 + $0x270] ss:$8 sps:$4 sm:$0xff]   ;;  %v1593_v25 = vld [vmem:[%s1702_s6 + $0x284] ss:$8 sps:$4 sm:$0xff]  }
  0x34   : > { %1049 = vmatprep.subr.bf16.mxu1 %v1511_v30  ;;  %v1591_v26 = vld [vmem:[%s1702_s6 + $0x280] ss:$8 sps:$4 sm:$0xff]   ;;  %v1596_v27 = vld [vmem:[%s1702_s6 + $0x294] ss:$8 sps:$4 sm:$0xff]   ;;  %v1594_v28 = vld [vmem:[%s1702_s6 + $0x290] ss:$8 sps:$4 sm:$0xff]  }
  0x35   : > { %v1599_v29 = vld [vmem:[%s1702_s6 + $0x2a4] ss:$8 sps:$4 sm:$0xff]   ;;  %v1597_v30 = vld [vmem:[%s1702_s6 + $0x2a0] ss:$8 sps:$4 sm:$0xff]  }
  0x36   : > { %1009 = vmatpush1.bf16.msra.mxu0 %v1513_v31  ;;  %v1602_v31 = vld [vmem:[%s1702_s6 + $0x2b4] ss:$8 sps:$4 sm:$0xff]   ;;  %v392_v52 = vld [vmem:[#allocation2] sm:$0xff] }
  0x37   : > { %1050 = vmatpush1.bf16.msra.mxu1 %v1514_v32  ;;  %1010 = vmatprep.subr.bf16.mxu0 %v1515_v33  ;;  %v1600_v32 = vld [vmem:[%s1702_s6 + $0x2b0] ss:$8 sps:$4 sm:$0xff]   ;;  %v1605_v33 = vld [vmem:[%s1702_s6 + $0x2c4] ss:$8 sps:$4 sm:$0xff]  }
  0x38   : > { %1051 = vmatprep.subr.bf16.mxu1 %v1517_v34  ;;  %v1603_v34 = vld [vmem:[%s1702_s6 + $0x2c0] ss:$8 sps:$4 sm:$0xff]  }
  0x3a   : > { %1011 = vmatpush1.bf16.msra.mxu0 %v1519_v35  ;;  %v1608_v35 = vld [vmem:[%s1702_s6 + $0x2d4] ss:$8 sps:$4 sm:$0xff]  }
  0x3b   : > { %1052 = vmatpush1.bf16.msra.mxu1 %v1520_v36  ;;  %1012 = vmatprep.subr.bf16.mxu0 %v1521_v37  ;;  %v1606_v36 = vld [vmem:[%s1702_s6 + $0x2d0] ss:$8 sps:$4 sm:$0xff]   ;;  %v1611_v37 = vld [vmem:[%s1702_s6 + $0x2e4] ss:$8 sps:$4 sm:$0xff]  }
  0x3c   : > { %1053 = vmatprep.subr.bf16.mxu1 %v1523_v38  ;;  %v1609_v38 = vld [vmem:[%s1702_s6 + $0x2e0] ss:$8 sps:$4 sm:$0xff]  }
  0x3e   : > { %1013 = vmatpush1.bf16.msra.mxu0 %v1525_v39  ;;  %v1614_v39 = vld [vmem:[%s1702_s6 + $0x2f4] ss:$8 sps:$4 sm:$0xff]  }
  0x3f   : > { %1054 = vmatpush1.bf16.msra.mxu1 %v1526_v40  ;;  %1014 = vmatprep.subr.bf16.mxu0 %v1527_v41  ;;  %v1612_v40 = vld [vmem:[%s1702_s6 + $0x2f0] ss:$8 sps:$4 sm:$0xff]   ;;  %v1336_v41 = vcombine.low %v1774_v9, %v1774_v9 }
  0x40   : > { %1055 = vmatprep.subr.bf16.mxu1 %v1529_v42 }
  0x42   : > { %1015 = vmatpush1.bf16.msra.mxu0 %v1531_v43 }
  0x43   : > { %1056 = vmatpush1.bf16.msra.mxu1 %v1532_v44  ;;  %1016 = vmatprep.subr.bf16.mxu0 %v1533_v45 }
  0x44   : > { %1057 = vmatprep.subr.bf16.mxu1 %v1535_v46 }
  0x46   : > { %1017 = vmatpush1.bf16.msra.mxu0 %v1537_v50 }
  0x47   : > { %1058 = vmatpush1.bf16.msra.mxu1 %v1538_v51  ;;  %1018 = vmatprep.subr.bf16.mxu0 %v1539_v53 }
  0x48   : > { %1059 = vmatprep.subr.bf16.mxu1 %v1541_v54 }
  0x4a   : > { %1019 = vmatpush1.bf16.msra.mxu0 %v1543_v55  ;;  %v393_v55 = vld [vmem:[#allocation2 + $0x8] sm:$0xff] }
  0x4b   : > { %1060 = vmatpush1.bf16.msra.mxu1 %v1544_v56  ;;  %1020 = vmatprep.subr.bf16.mxu0 %v1545_v57 }
  0x4c   : > { %1061 = vmatprep.subr.bf16.mxu1 %v1547_v58 }
  0x4e   : > { %1021 = vmatpush1.bf16.msra.mxu0 %v1549_v59 }
  0x4f   : > { %1062 = vmatpush1.bf16.msra.mxu1 %v1550_v60  ;;  %1022 = vmatprep.subr.bf16.mxu0 %v1551_v61 }
  0x50   : > { %1063 = vmatprep.subr.bf16.mxu1 %v1553_v62  ;;  %v1129_v62 = vlaneseq (!%p1434_p7) }
  0x52   : > { %1023 = vmatpush1.bf16.msra.mxu0 %v1555_v63  ;;  %v1130_v63 = vshrl.u32 (!%p1434_p7), %v1129_v62, 7 }
  0x53   : > { %1064 = vmatpush1.bf16.msra.mxu1 %v1556_v0  ;;  %1024 = vmatprep.subr.bf16.mxu0 %v1557_v1  ;;  %v1127_v0 = vld [vmem:[%s1834_s2] sm:$0x3] (!%p1434_p7) }
  0x54   : > { %1065 = vmatprep.subr.bf16.mxu1 %v1559_v2  ;;  %v1141_v1 = vld [vmem:[%s1835_s3] sm:$0x3] (!%p1434_p7)  ;;  %v1131_v2 = vsub.s32 (!%p1434_p7), 0, %v1130_v63 }
  0x56   : > { %1025 = vmatpush1.bf16.msra.mxu0 %v1561_v3  ;;  %v1135_v3 = vsub.s32 (!%p1434_p7), 1, %v1130_v63  ;;  %v1146_v9 = vrot.slane (!%p1434_p7), %v1141_v1, %v1131_v2 }
  0x57   : > { %1066 = vmatpush1.bf16.msra.mxu1 %v1562_v4  ;;  %1076 = vmatprep.subr.bf16.mxu0 %v1569_v5 }
  0x59   : > { %1027 = vmatmul.mubr.bf16.vlgmr.msra.gmra.mrb[0].mxu0 %v1332_v6  ;;  %v1155_v6 = vld [vmem:[%s1836_s4] sm:$0xff] (!%p1434_p7) }
  0x5a   : > { %1068 = vmatmul.mubr.bf16.vlgmr.msra.gmra.mrb[0].mxu1 %v1334_v7  ;;  %1077 = vmatpush1.bf16.msra.mxu0 %v1567_v8  ;;  %v1132_v7 = vrot.slane (!%p1434_p7), %v1127_v0, %v1131_v2  ;;  %v1136_v8 = vrot.slane (!%p1434_p7), %v1127_v0, %v1135_v3 }
  0x5b   : > { %1108 = vmatprep.mubr.bf16.mxu0 %v1337_v11  ;;  %1078 = vmatprep.subr.bf16.mxu0 %v1572_v10  ;;  %v1150_v10 = vrot.slane (!%p1434_p7), %v1141_v1, %v1135_v3 }
  0x5e   : > { %1079 = vmatpush1.bf16.msra.mxu0 %v1570_v12 }
  0x5f   : > { %1080 = vmatprep.subr.bf16.mxu0 %v1575_v13  ;;  %v1156_v13 = vunpack.c.l.bf16 (!%p1434_p7), %v1155_v6 }
  0x62   : > { %1081 = vmatpush1.bf16.msra.mxu0 %v1573_v14  ;;  %v1157_v14 = vunpack.c.h.bf16 (!%p1434_p7), %v1155_v6 }
  0x63   : > { %1082 = vmatprep.subr.bf16.mxu0 %v1578_v15 }
  0x66   : > { %1083 = vmatpush1.bf16.msra.mxu0 %v1576_v16 }
  0x67   : > { %1084 = vmatprep.subr.bf16.mxu0 %v1581_v17 }
  0x6a   : > { %1085 = vmatpush1.bf16.msra.mxu0 %v1579_v18 }
  0x6b   : > { %1086 = vmatprep.subr.bf16.mxu0 %v1584_v19 }
  0x6e   : > { %1087 = vmatpush1.bf16.msra.mxu0 %v1582_v20 }
  0x6f   : > { %1088 = vmatprep.subr.bf16.mxu0 %v1587_v21 }
  0x72   : > { %1089 = vmatpush1.bf16.msra.mxu0 %v1585_v22 }
  0x73   : > { %1090 = vmatprep.subr.bf16.mxu0 %v1590_v23 }
  0x76   : > { %1091 = vmatpush1.bf16.msra.mxu0 %v1588_v24 }
  0x77   : > { %1092 = vmatprep.subr.bf16.mxu0 %v1593_v25 }
  0x7a   : > { %1093 = vmatpush1.bf16.msra.mxu0 %v1591_v26 }
  0x7b   : > { %1094 = vmatprep.subr.bf16.mxu0 %v1596_v27 }
  0x7e   : > { %1095 = vmatpush1.bf16.msra.mxu0 %v1594_v28 }
  0x7f   : > { %1096 = vmatprep.subr.bf16.mxu0 %v1599_v29 }
  0x82   : > { %1097 = vmatpush1.bf16.msra.mxu0 %v1597_v30 }
  0x83   : > { %1098 = vmatprep.subr.bf16.mxu0 %v1602_v31 }
  0x86   : > { %1099 = vmatpush1.bf16.msra.mxu0 %v1600_v32 }
  0x87   : > { %1100 = vmatprep.subr.bf16.mxu0 %v1605_v33 }
  0x8a   : > { %1101 = vmatpush1.bf16.msra.mxu0 %v1603_v34 }
  0x8b   : > { %1102 = vmatprep.subr.bf16.mxu0 %v1608_v35 }
  0x8e   : > { %1103 = vmatpush1.bf16.msra.mxu0 %v1606_v36 }
  0x8f   : > { %1104 = vmatprep.subr.bf16.mxu0 %v1611_v37 }
  0x92   : > { %1105 = vmatpush1.bf16.msra.mxu0 %v1609_v38 }
  0x93   : > { %1106 = vmatprep.subr.bf16.mxu0 %v1614_v39 }
  0x96   : > { %1107 = vmatpush1.bf16.msra.mxu0 %v1612_v40 }
  0x99   : > { %1109 = vmatmul.mubr.bf16.vlgmr.msra.gmra.mrb[4].mxu0 %v1336_v41 }
 0x12c   : > { %v1028_v42 = vpop.f32.mrb[0].mxu0 }
 0x12d   : > { %v1069_v43 = vpop.f32.mrb[0].mxu1  ;;  %v1030_v45 = vpop.f32.mrb[1].mxu0 }
 0x12e   : > { %v1070_v44 = vadd.f32 %v1069_v43, %v1028_v42  ;;  %v1071_v46 = vpop.f32.mrb[1].mxu1  ;;  %v1032_v48 = vpop.f32.mrb[2].mxu0 }
 0x12f   : > { %v1072_v47 = vadd.f32 %v1071_v46, %v1030_v45  ;;  %v1073_v49 = vpop.f32.mrb[2].mxu1  ;;  %v1033_v50 = vpop.f32.mrb[3].mxu0 }
 0x130   : > { %v1074_v51 = vpop.f32.mrb[3].mxu1 }
 0x16c   : > { %v1110_v53 = vpop.f32.mrb[4].mxu0  ;;  %1124 = sbr.rel (%p1434_p7) target bundleno = 389 (0x185), region = 48 }
 0x16d   : > { %v1111_v54 = vadd.f32 %v1110_v53, %v1070_v44  ;;  %v1112_v56 = vpop.f32.mrb[5].mxu0 }
 0x16e   : > { %v1113_v57 = vadd.f32 %v1112_v56, %v1072_v47  ;;  %v1114_v58 = vpop.f32.mrb[6].mxu0 }
 0x16f   : > { %v1117_v59 = vadd.f32 %v1111_v54, %v392_v52  ;;  %v1115_v60 = vpop.f32.mrb[7].mxu0 }
 0x170   : > { %v1118_v61 = vadd.f32 %v1113_v57, %v393_v55 }
 0x171   : > { %1119 = vst [vmem:[#allocation2] sm:$0xff] %v1117_v59 }
 0x172   : > { %1120 = vst [vmem:[#allocation2 + $0x8] sm:$0xff] %v1118_v61 }
 0x178   : > { %v1125_v4 = vld [vmem:[#allocation2] sm:$0xff] }
 0x179   : > { %v1126_v5 = vld [vmem:[#allocation2 + $0x8] sm:$0xff]  ;;  %v1139_v11 = vmul.f32 %v1132_v7, %v1125_v4 }
 0x17a   : > { %v1140_v12 = vmul.f32 %v1136_v8, %v1126_v5 }
 0x17b   : > { %v1153_v15 = vadd.f32 %v1146_v9, %v1139_v11 }
 0x17c   : > { %v1154_v16 = vadd.f32 %v1150_v10, %v1140_v12 }
 0x17d   : > { %v1158_v17 = vadd.f32 %v1156_v13, %v1153_v15 }
 0x17e   : > { %v1159_v18 = vadd.f32 %v1157_v14, %v1154_v16 }
 0x17f   : > { %v1160_v19 = vmax.f32 %v1158_v17, 0.0 }
 0x180   : > { %v1161_v20 = vmax.f32 %v1159_v18, 0.0 }
 0x182   : > { %v1441_v21 = vpack.c.bf16 %v1161_v20, %v1160_v19 }
 0x184   : > { %1170 = vst [vmem:[%s1837_s5] sm:$0xff] %v1441_v21 }
 0x185 PF: > { %s15_s20 = sadd.s32 1, %s1639_s20   ;;  %s1838_s18 = smov %s1635_s19 }
 0x186   : > { %p12_p8 = scmp.ge.s32.totalorder %s15_s20, 5   ;;  %s1839_s19 = smov %s1841_s21 }
 0x188   :  { %14 = sbr.rel (!%p12_p8) target bundleno = 2 (0x2), region = 90 }

// kernel: resnet18_backbone.35
= control target key start
LH: loop header
LB: loop body
LE: loop exit
PB: predicated region body
PF: predicated region fallthrough
CT: control target
= control target key end

     0   :  { %s1577_s15 = smov 0   ;;  %s1579_s16 = smov 0   ;;  %s1734_s0 = inlined_call_operand.vmem [shape: bf16[8,2304], index: 0, kind: input, shape index: {}]   ;;  %s1735_s1 = inlined_call_operand.vmem [shape: bf16[2304,256], index: 1, kind: input, shape index: {}]   ;;  %s1736_s2 = inlined_call_operand.vmem [shape: f32[1,256], index: 2, kind: input, shape index: {}]   ;;  %s1737_s3 = inlined_call_operand.vmem [shape: f32[1,256], index: 3, kind: input, shape index: {}]   ;;  %s1738_s4 = inlined_call_operand.vmem [shape: bf16[8,256], index: 4, kind: output, shape index: {}]  }
   0x1   :  { %s1581_s17 = smov 0  }
   0x2 LB: > { %s26_s18 = sadd.s32 1, %s1545_s16  ;;  %p1237_p0 = scmp.ge.s32.totalorder %s1549_s17, 1  ;;  %s1549_s17 = sphi %s1581_s17, %s14_s17   ;;  %s1545_s16 = sphi %s1579_s16, %s1740_s16   ;;  %s1541_s15 = sphi %s1577_s15, %s1739_s15  }
   0x3   : > { %p27_p1 = scmp.ge.s32.totalorder %s26_s18, 3  ;;  %p229_p2 = scmp.lt.s32.totalorder %s1549_s17, 4 }
   0x5   : > { %s1742_s18 = smov (%p27_p1, %s26_s18), 0  ;;  %p230_p3 = pnand %p1237_p0, %p229_p2 }
   0x6   : > { %s281_s19 = smul.u32 (!%p230_p3), 6, %s1541_s15  ;;  %p1241_p6 = scmp.ne.s32.totalorder (!%p230_p3), %s1541_s15, 0 }
   0x7   : > { %233 = sbr.rel (%p230_p3) target bundleno = 387 (0x183), region = 36 }
   0x8   : > { %s291_s20 = smul.u32 (!%p230_p3), 96, %s1541_s15  ;;  %p284_p4 = scmp.lt.s32.totalorder (!%p230_p3), %s281_s19, 17 }
   0xa   : > { %p293_p5 = scmp.lt.s32.totalorder (!%p230_p3), %s291_s20, 287 }
   0xe   : > { %s1744_s19 = smov (!%p284_p4, %s281_s19), 17  ;;  %s1746_s20 = smov (!%p293_p5, %s291_s20), 287 }
   0xf   : > { %s1238_s21 = sshll.u32 %s1744_s19, 2  ;;  %s1350_s25 = sshll.u32 %s1746_s20, 3  ;;  %v1551_v0 = vmov (!%p1241_p6), 0.0  }
  0x10   : > { %s1602_s24 = scalar_lea.vmem %s1734_s0, %s1238_s21  ;;  %s1607_s28 = scalar_lea.vmem %s1735_s1, %s1350_s25  ;;  %327 = vst [vmem:[#allocation2] sm:$0xff] (!%p1241_p6), %v1551_v0  ;;  %328 = vst [vmem:[#allocation2 + $0x8] sm:$0xff] (!%p1241_p6), %v1551_v0 }
  0x11   : > { %326 = sbr.rel (%p1241_p6) target bundleno = 24 (0x18), region = 40 }
  0x18 PF: > { %v1377_v1 = vld [vmem:[%s1607_s28 + $0x4] ss:$8 sps:$4 sm:$0xff]   ;;  %v1381_v3 = vld [vmem:[%s1607_s28] ss:$8 sps:$4 sm:$0xff]   ;;  %v1383_v5 = vld [vmem:[%s1607_s28 + $0x14] ss:$8 sps:$4 sm:$0xff]  }
  0x19   : > { %v1379_v2 = vld [vmem:[%s1607_s28 + $0x104] ss:$8 sps:$4 sm:$0xff]   ;;  %931 = vmatprep.subr.bf16.mxu0 %v1377_v1  ;;  %v1382_v4 = vld [vmem:[%s1607_s28 + $0x100] ss:$8 sps:$4 sm:$0xff]   ;;  %v1385_v6 = vld [vmem:[%s1607_s28 + $0x114] ss:$8 sps:$4 sm:$0xff]  }
  0x1a   : > { %972 = vmatprep.subr.bf16.mxu1 %v1379_v2  ;;  %932 = vmatpush1.bf16.msra.mxu0 %v1381_v3  ;;  %v1387_v7 = vld [vmem:[%s1607_s28 + $0x10] ss:$8 sps:$4 sm:$0xff]   ;;  %v1389_v9 = vld [vmem:[%s1607_s28 + $0x24] ss:$8 sps:$4 sm:$0xff]   ;;  %v1393_v11 = vld [vmem:[%s1607_s28 + $0x20] ss:$8 sps:$4 sm:$0xff]  }
  0x1b   : > { %973 = vmatpush1.bf16.msra.mxu1 %v1382_v4  ;;  %933 = vmatprep.subr.bf16.mxu0 %v1383_v5  ;;  %v1388_v8 = vld [vmem:[%s1607_s28 + $0x110] ss:$8 sps:$4 sm:$0xff]   ;;  %v1391_v10 = vld [vmem:[%s1607_s28 + $0x124] ss:$8 sps:$4 sm:$0xff]   ;;  %v1394_v12 = vld [vmem:[%s1607_s28 + $0x120] ss:$8 sps:$4 sm:$0xff]  }
  0x1c   : > { %974 = vmatprep.subr.bf16.mxu1 %v1385_v6  ;;  %v1395_v13 = vld [vmem:[%s1607_s28 + $0x34] ss:$8 sps:$4 sm:$0xff]   ;;  %v1399_v15 = vld [vmem:[%s1607_s28 + $0x30] ss:$8 sps:$4 sm:$0xff]   ;;  %v1401_v17 = vld [vmem:[%s1607_s28 + $0x44] ss:$8 sps:$4 sm:$0xff]  }
  0x1d   : > { %v1397_v14 = vld [vmem:[%s1607_s28 + $0x134] ss:$8 sps:$4 sm:$0xff]   ;;  %v1400_v16 = vld [vmem:[%s1607_s28 + $0x130] ss:$8 sps:$4 sm:$0xff]   ;;  %v1403_v18 = vld [vmem:[%s1607_s28 + $0x144] ss:$8 sps:$4 sm:$0xff]  }
  0x1e   : > { %934 = vmatpush1.bf16.msra.mxu0 %v1387_v7  ;;  %v1405_v19 = vld [vmem:[%s1607_s28 + $0x40] ss:$8 sps:$4 sm:$0xff]   ;;  %v1407_v21 = vld [vmem:[%s1607_s28 + $0x54] ss:$8 sps:$4 sm:$0xff]   ;;  %v1411_v23 = vld [vmem:[%s1607_s28 + $0x50] ss:$8 sps:$4 sm:$0xff]  }
  0x1f   : > { %975 = vmatpush1.bf16.msra.mxu1 %v1388_v8  ;;  %935 = vmatprep.subr.bf16.mxu0 %v1389_v9  ;;  %v1406_v20 = vld [vmem:[%s1607_s28 + $0x140] ss:$8 sps:$4 sm:$0xff]   ;;  %v1409_v22 = vld [vmem:[%s1607_s28 + $0x154] ss:$8 sps:$4 sm:$0xff]   ;;  %v1412_v24 = vld [vmem:[%s1607_s28 + $0x150] ss:$8 sps:$4 sm:$0xff]  }
  0x20   : > { %976 = vmatprep.subr.bf16.mxu1 %v1391_v10  ;;  %v1413_v25 = vld [vmem:[%s1607_s28 + $0x64] ss:$8 sps:$4 sm:$0xff]   ;;  %v1417_v27 = vld [vmem:[%s1607_s28 + $0x60] ss:$8 sps:$4 sm:$0xff]   ;;  %v1419_v29 = vld [vmem:[%s1607_s28 + $0x74] ss:$8 sps:$4 sm:$0xff]  }
  0x21   : > { %v1415_v26 = vld [vmem:[%s1607_s28 + $0x164] ss:$8 sps:$4 sm:$0xff]   ;;  %v1418_v28 = vld [vmem:[%s1607_s28 + $0x160] ss:$8 sps:$4 sm:$0xff]   ;;  %v1421_v30 = vld [vmem:[%s1607_s28 + $0x174] ss:$8 sps:$4 sm:$0xff]  }
  0x22   : > { %936 = vmatpush1.bf16.msra.mxu0 %v1393_v11  ;;  %v1423_v31 = vld [vmem:[%s1607_s28 + $0x70] ss:$8 sps:$4 sm:$0xff]   ;;  %v1425_v33 = vld [vmem:[%s1607_s28 + $0x84] ss:$8 sps:$4 sm:$0xff]   ;;  %v1429_v35 = vld [vmem:[%s1607_s28 + $0x80] ss:$8 sps:$4 sm:$0xff]  }
  0x23   : > { %977 = vmatpush1.bf16.msra.mxu1 %v1394_v12  ;;  %937 = vmatprep.subr.bf16.mxu0 %v1395_v13  ;;  %v1424_v32 = vld [vmem:[%s1607_s28 + $0x170] ss:$8 sps:$4 sm:$0xff]   ;;  %v1427_v34 = vld [vmem:[%s1607_s28 + $0x184] ss:$8 sps:$4 sm:$0xff]   ;;  %v1430_v36 = vld [vmem:[%s1607_s28 + $0x180] ss:$8 sps:$4 sm:$0xff]  }
  0x24   : > { %978 = vmatprep.subr.bf16.mxu1 %v1397_v14  ;;  %v1431_v37 = vld [vmem:[%s1607_s28 + $0x94] ss:$8 sps:$4 sm:$0xff]   ;;  %v1435_v39 = vld [vmem:[%s1607_s28 + $0x90] ss:$8 sps:$4 sm:$0xff]   ;;  %v1437_v41 = vld [vmem:[%s1607_s28 + $0xa4] ss:$8 sps:$4 sm:$0xff]  }
  0x25   : > { %v1433_v38 = vld [vmem:[%s1607_s28 + $0x194] ss:$8 sps:$4 sm:$0xff]   ;;  %v1436_v40 = vld [vmem:[%s1607_s28 + $0x190] ss:$8 sps:$4 sm:$0xff]   ;;  %v1439_v42 = vld [vmem:[%s1607_s28 + $0x1a4] ss:$8 sps:$4 sm:$0xff]  }
  0x26   : > { %938 = vmatpush1.bf16.msra.mxu0 %v1399_v15  ;;  %v1441_v43 = vld [vmem:[%s1607_s28 + $0xa0] ss:$8 sps:$4 sm:$0xff]   ;;  %v1443_v45 = vld [vmem:[%s1607_s28 + $0xb4] ss:$8 sps:$4 sm:$0xff]   ;;  %v1447_v50 = vld [vmem:[%s1607_s28 + $0xb0] ss:$8 sps:$4 sm:$0xff]  }
  0x27   : > { %979 = vmatpush1.bf16.msra.mxu1 %v1400_v16  ;;  %939 = vmatprep.subr.bf16.mxu0 %v1401_v17  ;;  %v1442_v44 = vld [vmem:[%s1607_s28 + $0x1a0] ss:$8 sps:$4 sm:$0xff]   ;;  %v1445_v46 = vld [vmem:[%s1607_s28 + $0x1b4] ss:$8 sps:$4 sm:$0xff]   ;;  %v1448_v51 = vld [vmem:[%s1607_s28 + $0x1b0] ss:$8 sps:$4 sm:$0xff]  }
  0x28   : > { %980 = vmatprep.subr.bf16.mxu1 %v1403_v18  ;;  %v331_v47 = vld [vmem:[%s1602_s24] sm:$0xff]  ;;  %v332_v49 = vld [vmem:[%s1602_s24 + $0x8] sm:$0xff]  ;;  %v1455_v57 = vld [vmem:[%s1607_s28 + $0xd4] ss:$8 sps:$4 sm:$0xff]   ;;  %p1344_p7 = scmp.ne.s32.totalorder %s1541_s15, 2 }
  0x29   : > { %v1243_v48 = vcombine.high %v331_v47, %v331_v47  ;;  %v1245_v52 = vcombine.high %v332_v49, %v332_v49  ;;  %v1449_v53 = vld [vmem:[%s1607_s28 + $0xc4] ss:$8 sps:$4 sm:$0xff]   ;;  %v1453_v55 = vld [vmem:[%s1607_s28 + $0xc0] ss:$8 sps:$4 sm:$0xff]   ;;  %v1457_v58 = vld [vmem:[%s1607_s28 + $0x1d4] ss:$8 sps:$4 sm:$0xff]   ;;  %v1242_v6 = vcombine.low %v331_v47, %v331_v47  ;;  %v1244_v7 = vcombine.low %v332_v49, %v332_v49 }
  0x2a   : > { %940 = vmatpush1.bf16.msra.mxu0 %v1405_v19  ;;  %v1451_v54 = vld [vmem:[%s1607_s28 + $0x1c4] ss:$8 sps:$4 sm:$0xff]   ;;  %v1454_v56 = vld [vmem:[%s1607_s28 + $0x1c0] ss:$8 sps:$4 sm:$0xff]   ;;  %v1459_v59 = vld [vmem:[%s1607_s28 + $0xd0] ss:$8 sps:$4 sm:$0xff]  }
  0x2b   : > { %981 = vmatpush1.bf16.msra.mxu1 %v1406_v20  ;;  %941 = vmatprep.subr.bf16.mxu0 %v1407_v21  ;;  %v1460_v60 = vld [vmem:[%s1607_s28 + $0x1d0] ss:$8 sps:$4 sm:$0xff]   ;;  %v1461_v61 = vld [vmem:[%s1607_s28 + $0xe4] ss:$8 sps:$4 sm:$0xff]   ;;  %v1465_v63 = vld [vmem:[%s1607_s28 + $0xe0] ss:$8 sps:$4 sm:$0xff]  }
  0x2c   : > { %982 = vmatprep.subr.bf16.mxu1 %v1409_v22  ;;  %963 = vmatprep.mubr.bf16.mxu0 %v1243_v48  ;;  %v1463_v62 = vld [vmem:[%s1607_s28 + $0x1e4] ss:$8 sps:$4 sm:$0xff]   ;;  %v1466_v0 = vld [vmem:[%s1607_s28 + $0x1e0] ss:$8 sps:$4 sm:$0xff]   ;;  %v1467_v1 = vld [vmem:[%s1607_s28 + $0xf4] ss:$8 sps:$4 sm:$0xff]  }
  0x2d   : > { %1004 = vmatprep.mubr.bf16.mxu1 %v1245_v52  ;;  %v1469_v2 = vld [vmem:[%s1607_s28 + $0x1f4] ss:$8 sps:$4 sm:$0xff]   ;;  %v1471_v3 = vld [vmem:[%s1607_s28 + $0xf0] ss:$8 sps:$4 sm:$0xff]   ;;  %v1479_v5 = vld [vmem:[%s1607_s28 + $0x204] ss:$8 sps:$4 sm:$0xff]  }
  0x2e   : > { %942 = vmatpush1.bf16.msra.mxu0 %v1411_v23  ;;  %v1472_v4 = vld [vmem:[%s1607_s28 + $0x1f0] ss:$8 sps:$4 sm:$0xff]   ;;  %v1477_v8 = vld [vmem:[%s1607_s28 + $0x200] ss:$8 sps:$4 sm:$0xff]   ;;  %v1482_v10 = vld [vmem:[%s1607_s28 + $0x214] ss:$8 sps:$4 sm:$0xff]  }
  0x2f   : > { %983 = vmatpush1.bf16.msra.mxu1 %v1412_v24  ;;  %943 = vmatprep.subr.bf16.mxu0 %v1413_v25  ;;  %v1679_v9 = vld [vmem:[%s1602_s24 + $0x10] sm:$0xff]  ;;  %v1485_v13 = vld [vmem:[%s1607_s28 + $0x224] ss:$8 sps:$4 sm:$0xff]   ;;  %v1483_v14 = vld [vmem:[%s1607_s28 + $0x220] ss:$8 sps:$4 sm:$0xff]  }
  0x30   : > { %984 = vmatprep.subr.bf16.mxu1 %v1415_v26  ;;  %v1247_v11 = vcombine.high %v1679_v9, %v1679_v9  ;;  %v1480_v12 = vld [vmem:[%s1607_s28 + $0x210] ss:$8 sps:$4 sm:$0xff]   ;;  %v1488_v15 = vld [vmem:[%s1607_s28 + $0x234] ss:$8 sps:$4 sm:$0xff]   ;;  %v1491_v17 = vld [vmem:[%s1607_s28 + $0x244] ss:$8 sps:$4 sm:$0xff]  }
  0x31   : > { %v1486_v16 = vld [vmem:[%s1607_s28 + $0x230] ss:$8 sps:$4 sm:$0xff]   ;;  %v1489_v18 = vld [vmem:[%s1607_s28 + $0x240] ss:$8 sps:$4 sm:$0xff]   ;;  %v1494_v19 = vld [vmem:[%s1607_s28 + $0x254] ss:$8 sps:$4 sm:$0xff]  }
  0x32   : > { %944 = vmatpush1.bf16.msra.mxu0 %v1417_v27  ;;  %v1492_v20 = vld [vmem:[%s1607_s28 + $0x250] ss:$8 sps:$4 sm:$0xff]   ;;  %v1497_v21 = vld [vmem:[%s1607_s28 + $0x264] ss:$8 sps:$4 sm:$0xff]   ;;  %v1495_v22 = vld [vmem:[%s1607_s28 + $0x260] ss:$8 sps:$4 sm:$0xff]  }
  0x33   : > { %985 = vmatpush1.bf16.msra.mxu1 %v1418_v28  ;;  %945 = vmatprep.subr.bf16.mxu0 %v1419_v29  ;;  %v1500_v23 = vld [vmem:[%s1607_s28 + $0x274] ss:$8 sps:$4 sm:$0xff]   ;;  %v1498_v24 = vld [vmem:[%s1607_s28 + $0x270] ss:$8 sps:$4 sm:$0xff]   ;;  %v1503_v25 = vld [vmem:[%s1607_s28 + $0x284] ss:$8 sps:$4 sm:$0xff]  }
  0x34   : > { %986 = vmatprep.subr.bf16.mxu1 %v1421_v30  ;;  %v1501_v26 = vld [vmem:[%s1607_s28 + $0x280] ss:$8 sps:$4 sm:$0xff]   ;;  %v1506_v27 = vld [vmem:[%s1607_s28 + $0x294] ss:$8 sps:$4 sm:$0xff]   ;;  %v1504_v28 = vld [vmem:[%s1607_s28 + $0x290] ss:$8 sps:$4 sm:$0xff]  }
  0x35   : > { %v1509_v29 = vld [vmem:[%s1607_s28 + $0x2a4] ss:$8 sps:$4 sm:$0xff]   ;;  %v1507_v30 = vld [vmem:[%s1607_s28 + $0x2a0] ss:$8 sps:$4 sm:$0xff]  }
  0x36   : > { %946 = vmatpush1.bf16.msra.mxu0 %v1423_v31  ;;  %v1512_v31 = vld [vmem:[%s1607_s28 + $0x2b4] ss:$8 sps:$4 sm:$0xff]   ;;  %v329_v52 = vld [vmem:[#allocation2] sm:$0xff] }
  0x37   : > { %987 = vmatpush1.bf16.msra.mxu1 %v1424_v32  ;;  %947 = vmatprep.subr.bf16.mxu0 %v1425_v33  ;;  %v1510_v32 = vld [vmem:[%s1607_s28 + $0x2b0] ss:$8 sps:$4 sm:$0xff]   ;;  %v1515_v33 = vld [vmem:[%s1607_s28 + $0x2c4] ss:$8 sps:$4 sm:$0xff]  }
  0x38   : > { %988 = vmatprep.subr.bf16.mxu1 %v1427_v34  ;;  %v1513_v34 = vld [vmem:[%s1607_s28 + $0x2c0] ss:$8 sps:$4 sm:$0xff]  }
  0x3a   : > { %948 = vmatpush1.bf16.msra.mxu0 %v1429_v35  ;;  %v1518_v35 = vld [vmem:[%s1607_s28 + $0x2d4] ss:$8 sps:$4 sm:$0xff]  }
  0x3b   : > { %989 = vmatpush1.bf16.msra.mxu1 %v1430_v36  ;;  %949 = vmatprep.subr.bf16.mxu0 %v1431_v37  ;;  %v1516_v36 = vld [vmem:[%s1607_s28 + $0x2d0] ss:$8 sps:$4 sm:$0xff]   ;;  %v1521_v37 = vld [vmem:[%s1607_s28 + $0x2e4] ss:$8 sps:$4 sm:$0xff]  }
  0x3c   : > { %990 = vmatprep.subr.bf16.mxu1 %v1433_v38  ;;  %v1519_v38 = vld [vmem:[%s1607_s28 + $0x2e0] ss:$8 sps:$4 sm:$0xff]  }
  0x3e   : > { %950 = vmatpush1.bf16.msra.mxu0 %v1435_v39  ;;  %v1524_v39 = vld [vmem:[%s1607_s28 + $0x2f4] ss:$8 sps:$4 sm:$0xff]  }
  0x3f   : > { %991 = vmatpush1.bf16.msra.mxu1 %v1436_v40  ;;  %951 = vmatprep.subr.bf16.mxu0 %v1437_v41  ;;  %v1522_v40 = vld [vmem:[%s1607_s28 + $0x2f0] ss:$8 sps:$4 sm:$0xff]   ;;  %v1246_v41 = vcombine.low %v1679_v9, %v1679_v9 }
  0x40   : > { %992 = vmatprep.subr.bf16.mxu1 %v1439_v42 }
  0x42   : > { %952 = vmatpush1.bf16.msra.mxu0 %v1441_v43 }
  0x43   : > { %993 = vmatpush1.bf16.msra.mxu1 %v1442_v44  ;;  %953 = vmatprep.subr.bf16.mxu0 %v1443_v45 }
  0x44   : > { %994 = vmatprep.subr.bf16.mxu1 %v1445_v46 }
  0x46   : > { %954 = vmatpush1.bf16.msra.mxu0 %v1447_v50 }
  0x47   : > { %995 = vmatpush1.bf16.msra.mxu1 %v1448_v51  ;;  %955 = vmatprep.subr.bf16.mxu0 %v1449_v53 }
  0x48   : > { %996 = vmatprep.subr.bf16.mxu1 %v1451_v54 }
  0x4a   : > { %956 = vmatpush1.bf16.msra.mxu0 %v1453_v55  ;;  %v330_v55 = vld [vmem:[#allocation2 + $0x8] sm:$0xff] }
  0x4b   : > { %997 = vmatpush1.bf16.msra.mxu1 %v1454_v56  ;;  %957 = vmatprep.subr.bf16.mxu0 %v1455_v57 }
  0x4c   : > { %998 = vmatprep.subr.bf16.mxu1 %v1457_v58 }
  0x4e   : > { %958 = vmatpush1.bf16.msra.mxu0 %v1459_v59 }
  0x4f   : > { %999 = vmatpush1.bf16.msra.mxu1 %v1460_v60  ;;  %959 = vmatprep.subr.bf16.mxu0 %v1461_v61 }
  0x50   : > { %1000 = vmatprep.subr.bf16.mxu1 %v1463_v62  ;;  %v1066_v62 = vlaneseq (!%p1344_p7) }
  0x52   : > { %960 = vmatpush1.bf16.msra.mxu0 %v1465_v63  ;;  %v1067_v63 = vshrl.u32 (!%p1344_p7), %v1066_v62, 7 }
  0x53   : > { %1001 = vmatpush1.bf16.msra.mxu1 %v1466_v0  ;;  %961 = vmatprep.subr.bf16.mxu0 %v1467_v1  ;;  %v1064_v0 = vld [vmem:[%s1736_s2] sm:$0x3] (!%p1344_p7) }
  0x54   : > { %1002 = vmatprep.subr.bf16.mxu1 %v1469_v2  ;;  %v1078_v1 = vld [vmem:[%s1737_s3] sm:$0x3] (!%p1344_p7)  ;;  %v1068_v2 = vsub.s32 (!%p1344_p7), 0, %v1067_v63 }
  0x56   : > { %962 = vmatpush1.bf16.msra.mxu0 %v1471_v3  ;;  %v1072_v3 = vsub.s32 (!%p1344_p7), 1, %v1067_v63 }
  0x57   : > { %1003 = vmatpush1.bf16.msra.mxu1 %v1472_v4  ;;  %1013 = vmatprep.subr.bf16.mxu0 %v1479_v5 }
  0x58   : > { %v1087_v9 = vrot.slane (!%p1344_p7), %v1078_v1, %v1072_v3 }
  0x59   : > { %964 = vmatmul.mubr.bf16.vlgmr.msra.gmra.mrb[0].mxu0 %v1242_v6  ;;  %v1069_v6 = vrot.slane (!%p1344_p7), %v1064_v0, %v1068_v2 }
  0x5a   : > { %1005 = vmatmul.mubr.bf16.vlgmr.msra.gmra.mrb[0].mxu1 %v1244_v7  ;;  %1014 = vmatpush1.bf16.msra.mxu0 %v1477_v8  ;;  %v1073_v7 = vrot.slane (!%p1344_p7), %v1064_v0, %v1072_v3  ;;  %v1083_v8 = vrot.slane (!%p1344_p7), %v1078_v1, %v1068_v2 }
  0x5b   : > { %1045 = vmatprep.mubr.bf16.mxu0 %v1247_v11  ;;  %1015 = vmatprep.subr.bf16.mxu0 %v1482_v10 }
  0x5e   : > { %1016 = vmatpush1.bf16.msra.mxu0 %v1480_v12 }
  0x5f   : > { %1017 = vmatprep.subr.bf16.mxu0 %v1485_v13 }
  0x62   : > { %1018 = vmatpush1.bf16.msra.mxu0 %v1483_v14 }
  0x63   : > { %1019 = vmatprep.subr.bf16.mxu0 %v1488_v15 }
  0x66   : > { %1020 = vmatpush1.bf16.msra.mxu0 %v1486_v16 }
  0x67   : > { %1021 = vmatprep.subr.bf16.mxu0 %v1491_v17 }
  0x6a   : > { %1022 = vmatpush1.bf16.msra.mxu0 %v1489_v18 }
  0x6b   : > { %1023 = vmatprep.subr.bf16.mxu0 %v1494_v19 }
  0x6e   : > { %1024 = vmatpush1.bf16.msra.mxu0 %v1492_v20 }
  0x6f   : > { %1025 = vmatprep.subr.bf16.mxu0 %v1497_v21 }
  0x72   : > { %1026 = vmatpush1.bf16.msra.mxu0 %v1495_v22 }
  0x73   : > { %1027 = vmatprep.subr.bf16.mxu0 %v1500_v23 }
  0x76   : > { %1028 = vmatpush1.bf16.msra.mxu0 %v1498_v24 }
  0x77   : > { %1029 = vmatprep.subr.bf16.mxu0 %v1503_v25 }
  0x7a   : > { %1030 = vmatpush1.bf16.msra.mxu0 %v1501_v26 }
  0x7b   : > { %1031 = vmatprep.subr.bf16.mxu0 %v1506_v27 }
  0x7e   : > { %1032 = vmatpush1.bf16.msra.mxu0 %v1504_v28 }
  0x7f   : > { %1033 = vmatprep.subr.bf16.mxu0 %v1509_v29 }
  0x82   : > { %1034 = vmatpush1.bf16.msra.mxu0 %v1507_v30 }
  0x83   : > { %1035 = vmatprep.subr.bf16.mxu0 %v1512_v31 }
  0x86   : > { %1036 = vmatpush1.bf16.msra.mxu0 %v1510_v32 }
  0x87   : > { %1037 = vmatprep.subr.bf16.mxu0 %v1515_v33 }
  0x8a   : > { %1038 = vmatpush1.bf16.msra.mxu0 %v1513_v34 }
  0x8b   : > { %1039 = vmatprep.subr.bf16.mxu0 %v1518_v35 }
  0x8e   : > { %1040 = vmatpush1.bf16.msra.mxu0 %v1516_v36 }
  0x8f   : > { %1041 = vmatprep.subr.bf16.mxu0 %v1521_v37 }
  0x92   : > { %1042 = vmatpush1.bf16.msra.mxu0 %v1519_v38 }
  0x93   : > { %1043 = vmatprep.subr.bf16.mxu0 %v1524_v39 }
  0x96   : > { %1044 = vmatpush1.bf16.msra.mxu0 %v1522_v40 }
  0x99   : > { %1046 = vmatmul.mubr.bf16.vlgmr.msra.gmra.mrb[4].mxu0 %v1246_v41 }
 0x12c   : > { %v965_v42 = vpop.f32.mrb[0].mxu0 }
 0x12d   : > { %v1006_v43 = vpop.f32.mrb[0].mxu1  ;;  %v967_v45 = vpop.f32.mrb[1].mxu0 }
 0x12e   : > { %v1007_v44 = vadd.f32 %v1006_v43, %v965_v42  ;;  %v1008_v46 = vpop.f32.mrb[1].mxu1  ;;  %v969_v48 = vpop.f32.mrb[2].mxu0 }
 0x12f   : > { %v1009_v47 = vadd.f32 %v1008_v46, %v967_v45  ;;  %v1010_v49 = vpop.f32.mrb[2].mxu1  ;;  %v970_v50 = vpop.f32.mrb[3].mxu0 }
 0x130   : > { %v1011_v51 = vpop.f32.mrb[3].mxu1 }
 0x16c   : > { %v1047_v53 = vpop.f32.mrb[4].mxu0  ;;  %1061 = sbr.rel (%p1344_p7) target bundleno = 387 (0x183), region = 44 }
 0x16d   : > { %v1048_v54 = vadd.f32 %v1047_v53, %v1007_v44  ;;  %v1049_v56 = vpop.f32.mrb[5].mxu0 }
 0x16e   : > { %v1050_v57 = vadd.f32 %v1049_v56, %v1009_v47  ;;  %v1051_v58 = vpop.f32.mrb[6].mxu0 }
 0x16f   : > { %v1054_v59 = vadd.f32 %v1048_v54, %v329_v52  ;;  %v1052_v60 = vpop.f32.mrb[7].mxu0 }
 0x170   : > { %v1055_v61 = vadd.f32 %v1050_v57, %v330_v55 }
 0x171   : > { %1056 = vst [vmem:[#allocation2] sm:$0xff] %v1054_v59 }
 0x172   : > { %1057 = vst [vmem:[#allocation2 + $0x8] sm:$0xff] %v1055_v61 }
 0x178   : > { %v1062_v4 = vld [vmem:[#allocation2] sm:$0xff] }
 0x179   : > { %v1063_v5 = vld [vmem:[#allocation2 + $0x8] sm:$0xff]  ;;  %v1076_v10 = vmul.f32 %v1069_v6, %v1062_v4 }
 0x17a   : > { %v1077_v11 = vmul.f32 %v1073_v7, %v1063_v5 }
 0x17b   : > { %v1090_v12 = vadd.f32 %v1083_v8, %v1076_v10 }
 0x17c   : > { %v1091_v13 = vadd.f32 %v1087_v9, %v1077_v11 }
 0x17d   : > { %v1092_v14 = vmax.f32 %v1090_v12, 0.0 }
 0x17e   : > { %v1093_v15 = vmax.f32 %v1091_v13, 0.0 }
 0x180   : > { %v1351_v16 = vpack.c.bf16 %v1093_v15, %v1092_v14 }
 0x182   : > { %1102 = vst [vmem:[%s1738_s4] sm:$0xff] %v1351_v16 }
 0x183 PF: > { %s14_s17 = sadd.s32 1, %s1549_s17   ;;  %s1739_s15 = smov %s1545_s16 }
 0x184   : > { %p11_p8 = scmp.ge.s32.totalorder %s14_s17, 5   ;;  %s1740_s16 = smov %s1742_s18 }
 0x186   :  { %13 = sbr.rel (!%p11_p8) target bundleno = 2 (0x2), region = 83 }

// kernel: resnet18_backbone.38
= control target key start
LH: loop header
LB: loop body
LE: loop exit
PB: predicated region body
PF: predicated region fallthrough
CT: control target
= control target key end

     0   :  { %s2563_s15 = smov 0   ;;  %s2565_s16 = smov 0   ;;  %s2843_s0 = inlined_call_operand.vmem [shape: bf16[8,2304], index: 0, kind: input, shape index: {}]   ;;  %s2844_s1 = inlined_call_operand.vmem [shape: bf16[2304,512], index: 1, kind: input, shape index: {}]   ;;  %s2845_s2 = inlined_call_operand.vmem [shape: f32[1,512], index: 2, kind: input, shape index: {}]   ;;  %s2846_s3 = inlined_call_operand.vmem [shape: f32[1,512], index: 3, kind: input, shape index: {}]   ;;  %s2847_s4 = inlined_call_operand.vmem [shape: bf16[8,512], index: 4, kind: output, shape index: {}]  }
   0x1   :  { %s2567_s17 = smov 0  }
   0x2 LB: > { %s26_s18 = sadd.s32 1, %s2531_s16  ;;  %p1981_p0 = scmp.ge.s32.totalorder %s2535_s17, 1  ;;  %s2535_s17 = sphi %s2567_s17, %s14_s17   ;;  %s2531_s16 = sphi %s2565_s16, %s2849_s16   ;;  %s2527_s15 = sphi %s2563_s15, %s2848_s15  }
   0x3   : > { %p27_p1 = scmp.ge.s32.totalorder %s26_s18, 3  ;;  %p229_p2 = scmp.lt.s32.totalorder %s2535_s17, 4 }
   0x5   : > { %s2851_s18 = smov (%p27_p1, %s26_s18), 0  ;;  %p230_p3 = pnand %p1981_p0, %p229_p2 }
   0x6   : > { %s281_s19 = smul.u32 (!%p230_p3), 6, %s2527_s15  ;;  %p1985_p6 = scmp.ne.s32.totalorder (!%p230_p3), %s2527_s15, 0 }
   0x7   : > { %233 = sbr.rel (%p230_p3) target bundleno = 453 (0x1c5), region = 36 }
   0x8   : > { %s291_s20 = smul.u32 (!%p230_p3), 96, %s2527_s15  ;;  %p284_p4 = scmp.lt.s32.totalorder (!%p230_p3), %s281_s19, 17 }
   0xa   : > { %p293_p5 = scmp.lt.s32.totalorder (!%p230_p3), %s291_s20, 287 }
   0xe   : > { %s2853_s19 = smov (!%p284_p4, %s281_s19), 17  ;;  %s2855_s20 = smov (!%p293_p5, %s291_s20), 287 }
   0xf   : > { %s1982_s21 = sshll.u32 %s2853_s19, 2  ;;  %s2191_s25 = sshll.u32 %s2855_s20, 4  ;;  %v2537_v0 = vmov (!%p1985_p6), 0.0  }
  0x10   : > { %s2588_s24 = scalar_lea.vmem %s2843_s0, %s1982_s21  ;;  %s2593_s28 = scalar_lea.vmem %s2844_s1, %s2191_s25  ;;  %327 = vst [vmem:[#allocation2] sm:$0xff] (!%p1985_p6), %v2537_v0  ;;  %328 = vst [vmem:[#allocation2 + $0x8] sm:$0xff] (!%p1985_p6), %v2537_v0 }
  0x11   : > { %326 = sbr.rel (%p1985_p6) target bundleno = 24 (0x18), region = 40  ;;  %329 = vst [vmem:[#allocation2 + $0x10] sm:$0xff] (!%p1985_p6), %v2537_v0  ;;  %330 = vst [vmem:[#allocation2 + $0x18] sm:$0xff] (!%p1985_p6), %v2537_v0 }
  0x18 PF: > { %v2219_v1 = vld [vmem:[%s2593_s28 + $0x4] ss:$16 sps:$4 sm:$0xff]   ;;  %v2223_v3 = vld [vmem:[%s2593_s28] ss:$16 sps:$4 sm:$0xff]   ;;  %v336_v49 = vld [vmem:[%s2588_s24 + $0x8] sm:$0xff]  ;;  %p2184_p7 = scmp.ne.s32.totalorder %s2527_s15, 2 }
  0x19   : > { %v2221_v2 = vld [vmem:[%s2593_s28 + $0x204] ss:$16 sps:$4 sm:$0xff]   ;;  %1511 = vmatprep.subr.bf16.mxu0 %v2219_v1  ;;  %v2224_v4 = vld [vmem:[%s2593_s28 + $0x200] ss:$16 sps:$4 sm:$0xff]   ;;  %v2648_v52 = vcombine.high %v336_v49, %v336_v49 }
  0x1a   : > { %1552 = vmatprep.subr.bf16.mxu1 %v2221_v2  ;;  %v2225_v5 = vld [vmem:[%s2593_s28 + $0x24] ss:$16 sps:$4 sm:$0xff]   ;;  %1512 = vmatpush1.bf16.msra.mxu0 %v2223_v3  ;;  %v2229_v7 = vld [vmem:[%s2593_s28 + $0x20] ss:$16 sps:$4 sm:$0xff]  }
  0x1b   : > { %1553 = vmatpush1.bf16.msra.mxu1 %v2224_v4  ;;  %v2227_v6 = vld [vmem:[%s2593_s28 + $0x224] ss:$16 sps:$4 sm:$0xff]   ;;  %1513 = vmatprep.subr.bf16.mxu0 %v2225_v5  ;;  %v2230_v8 = vld [vmem:[%s2593_s28 + $0x220] ss:$16 sps:$4 sm:$0xff]  }
  0x1c   : > { %1554 = vmatprep.subr.bf16.mxu1 %v2227_v6  ;;  %v2231_v9 = vld [vmem:[%s2593_s28 + $0x44] ss:$16 sps:$4 sm:$0xff]   ;;  %v2235_v11 = vld [vmem:[%s2593_s28 + $0x40] ss:$16 sps:$4 sm:$0xff]   ;;  %1584 = vmatprep.mubr.bf16.mxu1 %v2648_v52  ;;  %v2324_v6 = vld [vmem:[%s2593_s28 + $0xc] ss:$16 sps:$4 sm:$0xff]  }
  0x1d   : > { %v2233_v10 = vld [vmem:[%s2593_s28 + $0x244] ss:$16 sps:$4 sm:$0xff]   ;;  %v2236_v12 = vld [vmem:[%s2593_s28 + $0x240] ss:$16 sps:$4 sm:$0xff]  }
  0x1e   : > { %1514 = vmatpush1.bf16.msra.mxu0 %v2229_v7  ;;  %v2237_v13 = vld [vmem:[%s2593_s28 + $0x64] ss:$16 sps:$4 sm:$0xff]   ;;  %v2241_v15 = vld [vmem:[%s2593_s28 + $0x60] ss:$16 sps:$4 sm:$0xff]  }
  0x1f   : > { %1555 = vmatpush1.bf16.msra.mxu1 %v2230_v8  ;;  %1515 = vmatprep.subr.bf16.mxu0 %v2231_v9  ;;  %v2239_v14 = vld [vmem:[%s2593_s28 + $0x264] ss:$16 sps:$4 sm:$0xff]   ;;  %v2242_v16 = vld [vmem:[%s2593_s28 + $0x260] ss:$16 sps:$4 sm:$0xff]   ;;  %v2672_v8 = vcombine.low %v336_v49, %v336_v49 }
  0x20   : > { %1556 = vmatprep.subr.bf16.mxu1 %v2233_v10  ;;  %v2243_v17 = vld [vmem:[%s2593_s28 + $0x84] ss:$16 sps:$4 sm:$0xff]   ;;  %v2247_v19 = vld [vmem:[%s2593_s28 + $0x80] ss:$16 sps:$4 sm:$0xff]   ;;  %v2322_v10 = vld [vmem:[%s2593_s28 + $0x8] ss:$16 sps:$4 sm:$0xff]  }
  0x21   : > { %v2245_v18 = vld [vmem:[%s2593_s28 + $0x284] ss:$16 sps:$4 sm:$0xff]   ;;  %v2248_v20 = vld [vmem:[%s2593_s28 + $0x280] ss:$16 sps:$4 sm:$0xff]  }
  0x22   : > { %1516 = vmatpush1.bf16.msra.mxu0 %v2235_v11  ;;  %v2249_v21 = vld [vmem:[%s2593_s28 + $0xa4] ss:$16 sps:$4 sm:$0xff]   ;;  %v2253_v23 = vld [vmem:[%s2593_s28 + $0xa0] ss:$16 sps:$4 sm:$0xff]  }
  0x23   : > { %1557 = vmatpush1.bf16.msra.mxu1 %v2236_v12  ;;  %1517 = vmatprep.subr.bf16.mxu0 %v2237_v13  ;;  %v2251_v22 = vld [vmem:[%s2593_s28 + $0x2a4] ss:$16 sps:$4 sm:$0xff]   ;;  %v2254_v24 = vld [vmem:[%s2593_s28 + $0x2a0] ss:$16 sps:$4 sm:$0xff]   ;;  %v2330_v12 = vld [vmem:[%s2593_s28 + $0x2c] ss:$16 sps:$4 sm:$0xff]  }
  0x24   : > { %1558 = vmatprep.subr.bf16.mxu1 %v2239_v14  ;;  %v2255_v25 = vld [vmem:[%s2593_s28 + $0xc4] ss:$16 sps:$4 sm:$0xff]   ;;  %v2259_v27 = vld [vmem:[%s2593_s28 + $0xc0] ss:$16 sps:$4 sm:$0xff]   ;;  %v2328_v14 = vld [vmem:[%s2593_s28 + $0x28] ss:$16 sps:$4 sm:$0xff]  }
  0x25   : > { %v2257_v26 = vld [vmem:[%s2593_s28 + $0x2c4] ss:$16 sps:$4 sm:$0xff]   ;;  %v2260_v28 = vld [vmem:[%s2593_s28 + $0x2c0] ss:$16 sps:$4 sm:$0xff]  }
  0x26   : > { %1518 = vmatpush1.bf16.msra.mxu0 %v2241_v15  ;;  %v2261_v29 = vld [vmem:[%s2593_s28 + $0xe4] ss:$16 sps:$4 sm:$0xff]   ;;  %v2265_v31 = vld [vmem:[%s2593_s28 + $0xe0] ss:$16 sps:$4 sm:$0xff]  }
  0x27   : > { %1559 = vmatpush1.bf16.msra.mxu1 %v2242_v16  ;;  %1519 = vmatprep.subr.bf16.mxu0 %v2243_v17  ;;  %v2263_v30 = vld [vmem:[%s2593_s28 + $0x2e4] ss:$16 sps:$4 sm:$0xff]   ;;  %v2266_v32 = vld [vmem:[%s2593_s28 + $0x2e0] ss:$16 sps:$4 sm:$0xff]   ;;  %v2336_v16 = vld [vmem:[%s2593_s28 + $0x4c] ss:$16 sps:$4 sm:$0xff]  }
  0x28   : > { %1560 = vmatprep.subr.bf16.mxu1 %v2245_v18  ;;  %v2267_v33 = vld [vmem:[%s2593_s28 + $0x104] ss:$16 sps:$4 sm:$0xff]   ;;  %v2271_v35 = vld [vmem:[%s2593_s28 + $0x100] ss:$16 sps:$4 sm:$0xff]   ;;  %v2334_v18 = vld [vmem:[%s2593_s28 + $0x48] ss:$16 sps:$4 sm:$0xff]  }
  0x29   : > { %v2269_v34 = vld [vmem:[%s2593_s28 + $0x304] ss:$16 sps:$4 sm:$0xff]   ;;  %v2272_v36 = vld [vmem:[%s2593_s28 + $0x300] ss:$16 sps:$4 sm:$0xff]  }
  0x2a   : > { %1520 = vmatpush1.bf16.msra.mxu0 %v2247_v19  ;;  %v2273_v37 = vld [vmem:[%s2593_s28 + $0x124] ss:$16 sps:$4 sm:$0xff]   ;;  %v2277_v39 = vld [vmem:[%s2593_s28 + $0x120] ss:$16 sps:$4 sm:$0xff]  }
  0x2b   : > { %1561 = vmatpush1.bf16.msra.mxu1 %v2248_v20  ;;  %1521 = vmatprep.subr.bf16.mxu0 %v2249_v21  ;;  %v2275_v38 = vld [vmem:[%s2593_s28 + $0x324] ss:$16 sps:$4 sm:$0xff]   ;;  %v2278_v40 = vld [vmem:[%s2593_s28 + $0x320] ss:$16 sps:$4 sm:$0xff]   ;;  %v2342_v20 = vld [vmem:[%s2593_s28 + $0x6c] ss:$16 sps:$4 sm:$0xff]  }
  0x2c   : > { %1562 = vmatprep.subr.bf16.mxu1 %v2251_v22  ;;  %v2279_v41 = vld [vmem:[%s2593_s28 + $0x144] ss:$16 sps:$4 sm:$0xff]   ;;  %v2283_v43 = vld [vmem:[%s2593_s28 + $0x140] ss:$16 sps:$4 sm:$0xff]   ;;  %v2340_v22 = vld [vmem:[%s2593_s28 + $0x68] ss:$16 sps:$4 sm:$0xff]  }
  0x2d   : > { %v2281_v42 = vld [vmem:[%s2593_s28 + $0x344] ss:$16 sps:$4 sm:$0xff]   ;;  %v2284_v44 = vld [vmem:[%s2593_s28 + $0x340] ss:$16 sps:$4 sm:$0xff]  }
  0x2e   : > { %1522 = vmatpush1.bf16.msra.mxu0 %v2253_v23  ;;  %v2285_v45 = vld [vmem:[%s2593_s28 + $0x164] ss:$16 sps:$4 sm:$0xff]   ;;  %v2289_v50 = vld [vmem:[%s2593_s28 + $0x160] ss:$16 sps:$4 sm:$0xff]  }
  0x2f   : > { %1563 = vmatpush1.bf16.msra.mxu1 %v2254_v24  ;;  %1523 = vmatprep.subr.bf16.mxu0 %v2255_v25  ;;  %v2287_v46 = vld [vmem:[%s2593_s28 + $0x364] ss:$16 sps:$4 sm:$0xff]   ;;  %v2290_v51 = vld [vmem:[%s2593_s28 + $0x360] ss:$16 sps:$4 sm:$0xff]   ;;  %v2348_v24 = vld [vmem:[%s2593_s28 + $0x8c] ss:$16 sps:$4 sm:$0xff]  }
  0x30   : > { %1564 = vmatprep.subr.bf16.mxu1 %v2257_v26  ;;  %v335_v47 = vld [vmem:[%s2588_s24] sm:$0xff]  ;;  %v2346_v26 = vld [vmem:[%s2593_s28 + $0x88] ss:$16 sps:$4 sm:$0xff]  }
  0x31   : > { %v2643_v48 = vcombine.high %v335_v47, %v335_v47  ;;  %v2291_v53 = vld [vmem:[%s2593_s28 + $0x184] ss:$16 sps:$4 sm:$0xff]   ;;  %v2295_v55 = vld [vmem:[%s2593_s28 + $0x180] ss:$16 sps:$4 sm:$0xff]   ;;  %v2670_v7 = vcombine.low %v335_v47, %v335_v47 }
  0x32   : > { %1524 = vmatpush1.bf16.msra.mxu0 %v2259_v27  ;;  %v2293_v54 = vld [vmem:[%s2593_s28 + $0x384] ss:$16 sps:$4 sm:$0xff]   ;;  %v2296_v56 = vld [vmem:[%s2593_s28 + $0x380] ss:$16 sps:$4 sm:$0xff]  }
  0x33   : > { %1565 = vmatpush1.bf16.msra.mxu1 %v2260_v28  ;;  %1525 = vmatprep.subr.bf16.mxu0 %v2261_v29  ;;  %v2297_v57 = vld [vmem:[%s2593_s28 + $0x1a4] ss:$16 sps:$4 sm:$0xff]   ;;  %v2301_v59 = vld [vmem:[%s2593_s28 + $0x1a0] ss:$16 sps:$4 sm:$0xff]   ;;  %v2354_v28 = vld [vmem:[%s2593_s28 + $0xac] ss:$16 sps:$4 sm:$0xff]  }
  0x34   : > { %1566 = vmatprep.subr.bf16.mxu1 %v2263_v30  ;;  %1543 = vmatprep.mubr.bf16.mxu0 %v2643_v48  ;;  %v2299_v58 = vld [vmem:[%s2593_s28 + $0x3a4] ss:$16 sps:$4 sm:$0xff]   ;;  %v2302_v60 = vld [vmem:[%s2593_s28 + $0x3a0] ss:$16 sps:$4 sm:$0xff]   ;;  %v2352_v30 = vld [vmem:[%s2593_s28 + $0xa8] ss:$16 sps:$4 sm:$0xff]  }
  0x35   : > { %v2303_v61 = vld [vmem:[%s2593_s28 + $0x1c4] ss:$16 sps:$4 sm:$0xff]   ;;  %v2307_v63 = vld [vmem:[%s2593_s28 + $0x1c0] ss:$16 sps:$4 sm:$0xff]  }
  0x36   : > { %1526 = vmatpush1.bf16.msra.mxu0 %v2265_v31  ;;  %v2305_v62 = vld [vmem:[%s2593_s28 + $0x3c4] ss:$16 sps:$4 sm:$0xff]   ;;  %v2308_v0 = vld [vmem:[%s2593_s28 + $0x3c0] ss:$16 sps:$4 sm:$0xff]  }
  0x37   : > { %1567 = vmatpush1.bf16.msra.mxu1 %v2266_v32  ;;  %1527 = vmatprep.subr.bf16.mxu0 %v2267_v33  ;;  %v2309_v1 = vld [vmem:[%s2593_s28 + $0x1e4] ss:$16 sps:$4 sm:$0xff]   ;;  %v2313_v3 = vld [vmem:[%s2593_s28 + $0x1e0] ss:$16 sps:$4 sm:$0xff]   ;;  %v2360_v32 = vld [vmem:[%s2593_s28 + $0xcc] ss:$16 sps:$4 sm:$0xff]  }
  0x38   : > { %1568 = vmatprep.subr.bf16.mxu1 %v2269_v34  ;;  %v2311_v2 = vld [vmem:[%s2593_s28 + $0x3e4] ss:$16 sps:$4 sm:$0xff]   ;;  %v2314_v4 = vld [vmem:[%s2593_s28 + $0x3e0] ss:$16 sps:$4 sm:$0xff]  }
  0x39   : > { %v2321_v5 = vld [vmem:[%s2593_s28 + $0x404] ss:$16 sps:$4 sm:$0xff]   ;;  %v2319_v9 = vld [vmem:[%s2593_s28 + $0x400] ss:$16 sps:$4 sm:$0xff]  }
  0x3a   : > { %1528 = vmatpush1.bf16.msra.mxu0 %v2271_v35  ;;  %v2327_v11 = vld [vmem:[%s2593_s28 + $0x424] ss:$16 sps:$4 sm:$0xff]   ;;  %v2325_v13 = vld [vmem:[%s2593_s28 + $0x420] ss:$16 sps:$4 sm:$0xff]  }
  0x3b   : > { %1569 = vmatpush1.bf16.msra.mxu1 %v2272_v36  ;;  %1529 = vmatprep.subr.bf16.mxu0 %v2273_v37  ;;  %v2333_v15 = vld [vmem:[%s2593_s28 + $0x444] ss:$16 sps:$4 sm:$0xff]   ;;  %v2331_v17 = vld [vmem:[%s2593_s28 + $0x440] ss:$16 sps:$4 sm:$0xff]   ;;  %v2358_v36 = vld [vmem:[%s2593_s28 + $0xc8] ss:$16 sps:$4 sm:$0xff]  }
  0x3c   : > { %1570 = vmatprep.subr.bf16.mxu1 %v2275_v38  ;;  %v2339_v19 = vld [vmem:[%s2593_s28 + $0x464] ss:$16 sps:$4 sm:$0xff]   ;;  %v2337_v21 = vld [vmem:[%s2593_s28 + $0x460] ss:$16 sps:$4 sm:$0xff]   ;;  %v2366_v38 = vld [vmem:[%s2593_s28 + $0xec] ss:$16 sps:$4 sm:$0xff]  }
  0x3d   : > { %v2345_v23 = vld [vmem:[%s2593_s28 + $0x484] ss:$16 sps:$4 sm:$0xff]   ;;  %v2343_v25 = vld [vmem:[%s2593_s28 + $0x480] ss:$16 sps:$4 sm:$0xff]  }
  0x3e   : > { %1530 = vmatpush1.bf16.msra.mxu0 %v2277_v39  ;;  %v2351_v27 = vld [vmem:[%s2593_s28 + $0x4a4] ss:$16 sps:$4 sm:$0xff]   ;;  %v2349_v29 = vld [vmem:[%s2593_s28 + $0x4a0] ss:$16 sps:$4 sm:$0xff]  }
  0x3f   : > { %1571 = vmatpush1.bf16.msra.mxu1 %v2278_v40  ;;  %1531 = vmatprep.subr.bf16.mxu0 %v2279_v41  ;;  %v2357_v31 = vld [vmem:[%s2593_s28 + $0x4c4] ss:$16 sps:$4 sm:$0xff]   ;;  %v2355_v34 = vld [vmem:[%s2593_s28 + $0x4c0] ss:$16 sps:$4 sm:$0xff]   ;;  %v2364_v40 = vld [vmem:[%s2593_s28 + $0xe8] ss:$16 sps:$4 sm:$0xff]  }
  0x40   : > { %1572 = vmatprep.subr.bf16.mxu1 %v2281_v42  ;;  %v2702_v33 = vld [vmem:[%s2588_s24 + $0x10] sm:$0xff]  ;;  %v2372_v42 = vld [vmem:[%s2593_s28 + $0x10c] ss:$16 sps:$4 sm:$0xff]  }
  0x41   : > { %v2707_v35 = vcombine.high %v2702_v33, %v2702_v33  ;;  %v2363_v37 = vld [vmem:[%s2593_s28 + $0x4e4] ss:$16 sps:$4 sm:$0xff]   ;;  %v2361_v39 = vld [vmem:[%s2593_s28 + $0x4e0] ss:$16 sps:$4 sm:$0xff]  }
  0x42   : > { %1532 = vmatpush1.bf16.msra.mxu0 %v2283_v43  ;;  %v2369_v41 = vld [vmem:[%s2593_s28 + $0x504] ss:$16 sps:$4 sm:$0xff]   ;;  %v2367_v43 = vld [vmem:[%s2593_s28 + $0x500] ss:$16 sps:$4 sm:$0xff]  }
  0x43   : > { %1573 = vmatpush1.bf16.msra.mxu1 %v2284_v44  ;;  %1533 = vmatprep.subr.bf16.mxu0 %v2285_v45  ;;  %v2370_v44 = vld [vmem:[%s2593_s28 + $0x108] ss:$16 sps:$4 sm:$0xff]   ;;  %v2375_v45 = vld [vmem:[%s2593_s28 + $0x524] ss:$16 sps:$4 sm:$0xff]   ;;  %v2373_v47 = vld [vmem:[%s2593_s28 + $0x520] ss:$16 sps:$4 sm:$0xff]  }
  0x44   : > { %1574 = vmatprep.subr.bf16.mxu1 %v2287_v46  ;;  %v2378_v46 = vld [vmem:[%s2593_s28 + $0x12c] ss:$16 sps:$4 sm:$0xff]   ;;  %v2381_v49 = vld [vmem:[%s2593_s28 + $0x544] ss:$16 sps:$4 sm:$0xff]  }
  0x46   : > { %1534 = vmatpush1.bf16.msra.mxu0 %v2289_v50  ;;  %v2384_v50 = vld [vmem:[%s2593_s28 + $0x14c] ss:$16 sps:$4 sm:$0xff]  }
  0x47   : > { %1575 = vmatpush1.bf16.msra.mxu1 %v2290_v51  ;;  %1535 = vmatprep.subr.bf16.mxu0 %v2291_v53  ;;  %v2379_v51 = vld [vmem:[%s2593_s28 + $0x540] ss:$16 sps:$4 sm:$0xff]   ;;  %v2382_v53 = vld [vmem:[%s2593_s28 + $0x148] ss:$16 sps:$4 sm:$0xff]  }
  0x48   : > { %1576 = vmatprep.subr.bf16.mxu1 %v2293_v54  ;;  %v2387_v54 = vld [vmem:[%s2593_s28 + $0x564] ss:$16 sps:$4 sm:$0xff]  }
  0x4a   : > { %1536 = vmatpush1.bf16.msra.mxu0 %v2295_v55  ;;  %v2390_v55 = vld [vmem:[%s2593_s28 + $0x16c] ss:$16 sps:$4 sm:$0xff]  }
  0x4b   : > { %1577 = vmatpush1.bf16.msra.mxu1 %v2296_v56  ;;  %1537 = vmatprep.subr.bf16.mxu0 %v2297_v57  ;;  %v2385_v56 = vld [vmem:[%s2593_s28 + $0x560] ss:$16 sps:$4 sm:$0xff]   ;;  %v2388_v57 = vld [vmem:[%s2593_s28 + $0x168] ss:$16 sps:$4 sm:$0xff]  }
  0x4c   : > { %1578 = vmatprep.subr.bf16.mxu1 %v2299_v58  ;;  %v2393_v58 = vld [vmem:[%s2593_s28 + $0x584] ss:$16 sps:$4 sm:$0xff]  }
  0x4e   : > { %1538 = vmatpush1.bf16.msra.mxu0 %v2301_v59  ;;  %v2396_v59 = vld [vmem:[%s2593_s28 + $0x18c] ss:$16 sps:$4 sm:$0xff]  }
  0x4f   : > { %1579 = vmatpush1.bf16.msra.mxu1 %v2302_v60  ;;  %1539 = vmatprep.subr.bf16.mxu0 %v2303_v61  ;;  %v2391_v60 = vld [vmem:[%s2593_s28 + $0x580] ss:$16 sps:$4 sm:$0xff]   ;;  %v2394_v61 = vld [vmem:[%s2593_s28 + $0x188] ss:$16 sps:$4 sm:$0xff]  }
  0x50   : > { %1580 = vmatprep.subr.bf16.mxu1 %v2305_v62  ;;  %v2399_v62 = vld [vmem:[%s2593_s28 + $0x5a4] ss:$16 sps:$4 sm:$0xff]  }
  0x52   : > { %1540 = vmatpush1.bf16.msra.mxu0 %v2307_v63  ;;  %v2402_v63 = vld [vmem:[%s2593_s28 + $0x1ac] ss:$16 sps:$4 sm:$0xff]  }
  0x53   : > { %1581 = vmatpush1.bf16.msra.mxu1 %v2308_v0  ;;  %1541 = vmatprep.subr.bf16.mxu0 %v2309_v1  ;;  %v2397_v0 = vld [vmem:[%s2593_s28 + $0x5a0] ss:$16 sps:$4 sm:$0xff]   ;;  %v2400_v1 = vld [vmem:[%s2593_s28 + $0x1a8] ss:$16 sps:$4 sm:$0xff]  }
  0x54   : > { %1582 = vmatprep.subr.bf16.mxu1 %v2311_v2  ;;  %v2405_v2 = vld [vmem:[%s2593_s28 + $0x5c4] ss:$16 sps:$4 sm:$0xff]  }
  0x56   : > { %1542 = vmatpush1.bf16.msra.mxu0 %v2313_v3  ;;  %v2408_v3 = vld [vmem:[%s2593_s28 + $0x1cc] ss:$16 sps:$4 sm:$0xff]  }
  0x57   : > { %1583 = vmatpush1.bf16.msra.mxu1 %v2314_v4  ;;  %1593 = vmatprep.subr.bf16.mxu0 %v2321_v5  ;;  %v2403_v4 = vld [vmem:[%s2593_s28 + $0x5c0] ss:$16 sps:$4 sm:$0xff]   ;;  %v2406_v5 = vld [vmem:[%s2593_s28 + $0x1c8] ss:$16 sps:$4 sm:$0xff]  }
  0x58   : > { %1634 = vmatprep.subr.bf16.mxu1 %v2324_v6  ;;  %v2411_v6 = vld [vmem:[%s2593_s28 + $0x5e4] ss:$16 sps:$4 sm:$0xff]  }
  0x59   : > { %1544 = vmatmul.mubr.bf16.vlgmr.msra.gmra.mrb[0].mxu0 %v2670_v7 }
  0x5a   : > { %1585 = vmatmul.mubr.bf16.vlgmr.msra.gmra.mrb[0].mxu1 %v2672_v8  ;;  %1594 = vmatpush1.bf16.msra.mxu0 %v2319_v9  ;;  %v2414_v9 = vld [vmem:[%s2593_s28 + $0x1ec] ss:$16 sps:$4 sm:$0xff]  }
  0x5b   : > { %1635 = vmatpush1.bf16.msra.mxu1 %v2322_v10  ;;  %1595 = vmatprep.subr.bf16.mxu0 %v2327_v11  ;;  %v2409_v10 = vld [vmem:[%s2593_s28 + $0x5e0] ss:$16 sps:$4 sm:$0xff]   ;;  %v2412_v11 = vld [vmem:[%s2593_s28 + $0x1e8] ss:$16 sps:$4 sm:$0xff]  }
  0x5c   : > { %1636 = vmatprep.subr.bf16.mxu1 %v2330_v12  ;;  %1666 = vmatprep.mubr.bf16.mxu1 %v2643_v48  ;;  %v2376_v48 = vld [vmem:[%s2593_s28 + $0x128] ss:$16 sps:$4 sm:$0xff]   ;;  %v2419_v12 = vld [vmem:[%s2593_s28 + $0x20c] ss:$16 sps:$4 sm:$0xff]  }
  0x5d   : > { %1625 = vmatprep.mubr.bf16.mxu0 %v2707_v35 }
  0x5e   : > { %1596 = vmatpush1.bf16.msra.mxu0 %v2325_v13  ;;  %v2422_v13 = vld [vmem:[%s2593_s28 + $0x40c] ss:$16 sps:$4 sm:$0xff]  }
  0x5f   : > { %1637 = vmatpush1.bf16.msra.mxu1 %v2328_v14  ;;  %1597 = vmatprep.subr.bf16.mxu0 %v2333_v15  ;;  %v2751_v14 = vcombine.low %v2702_v33, %v2702_v33  ;;  %v2417_v15 = vld [vmem:[%s2593_s28 + $0x208] ss:$16 sps:$4 sm:$0xff]  }
  0x60   : > { %1638 = vmatprep.subr.bf16.mxu1 %v2336_v16  ;;  %v2420_v16 = vld [vmem:[%s2593_s28 + $0x408] ss:$16 sps:$4 sm:$0xff]  }
  0x61   : > { %v2447_v33 = vld [vmem:[%s2593_s28 + $0x2a8] ss:$16 sps:$4 sm:$0xff]  }
  0x62   : > { %1598 = vmatpush1.bf16.msra.mxu0 %v2331_v17  ;;  %v2425_v17 = vld [vmem:[%s2593_s28 + $0x22c] ss:$16 sps:$4 sm:$0xff]  }
  0x63   : > { %1639 = vmatpush1.bf16.msra.mxu1 %v2334_v18  ;;  %1599 = vmatprep.subr.bf16.mxu0 %v2339_v19  ;;  %v2428_v18 = vld [vmem:[%s2593_s28 + $0x42c] ss:$16 sps:$4 sm:$0xff]   ;;  %v2423_v19 = vld [vmem:[%s2593_s28 + $0x228] ss:$16 sps:$4 sm:$0xff]  }
  0x64   : > { %1640 = vmatprep.subr.bf16.mxu1 %v2342_v20  ;;  %v2426_v20 = vld [vmem:[%s2593_s28 + $0x428] ss:$16 sps:$4 sm:$0xff]  }
  0x66   : > { %1600 = vmatpush1.bf16.msra.mxu0 %v2337_v21  ;;  %v2431_v21 = vld [vmem:[%s2593_s28 + $0x24c] ss:$16 sps:$4 sm:$0xff]  }
  0x67   : > { %1641 = vmatpush1.bf16.msra.mxu1 %v2340_v22  ;;  %1601 = vmatprep.subr.bf16.mxu0 %v2345_v23  ;;  %v2434_v22 = vld [vmem:[%s2593_s28 + $0x44c] ss:$16 sps:$4 sm:$0xff]   ;;  %v2432_v23 = vld [vmem:[%s2593_s28 + $0x448] ss:$16 sps:$4 sm:$0xff]  }
  0x68   : > { %1642 = vmatprep.subr.bf16.mxu1 %v2348_v24  ;;  %v2437_v24 = vld [vmem:[%s2593_s28 + $0x26c] ss:$16 sps:$4 sm:$0xff]  }
  0x6a   : > { %1602 = vmatpush1.bf16.msra.mxu0 %v2343_v25  ;;  %v2440_v25 = vld [vmem:[%s2593_s28 + $0x46c] ss:$16 sps:$4 sm:$0xff]  }
  0x6b   : > { %1643 = vmatpush1.bf16.msra.mxu1 %v2346_v26  ;;  %1603 = vmatprep.subr.bf16.mxu0 %v2351_v27  ;;  %v2435_v26 = vld [vmem:[%s2593_s28 + $0x268] ss:$16 sps:$4 sm:$0xff]   ;;  %v2443_v27 = vld [vmem:[%s2593_s28 + $0x28c] ss:$16 sps:$4 sm:$0xff]  }
  0x6c   : > { %1644 = vmatprep.subr.bf16.mxu1 %v2354_v28  ;;  %v2446_v28 = vld [vmem:[%s2593_s28 + $0x48c] ss:$16 sps:$4 sm:$0xff]  }
  0x6e   : > { %1604 = vmatpush1.bf16.msra.mxu0 %v2349_v29  ;;  %v2441_v29 = vld [vmem:[%s2593_s28 + $0x288] ss:$16 sps:$4 sm:$0xff]  }
  0x6f   : > { %1645 = vmatpush1.bf16.msra.mxu1 %v2352_v30  ;;  %1605 = vmatprep.subr.bf16.mxu0 %v2357_v31  ;;  %v2444_v30 = vld [vmem:[%s2593_s28 + $0x488] ss:$16 sps:$4 sm:$0xff]   ;;  %v2449_v31 = vld [vmem:[%s2593_s28 + $0x2ac] ss:$16 sps:$4 sm:$0xff]  }
  0x70   : > { %1646 = vmatprep.subr.bf16.mxu1 %v2360_v32  ;;  %v2452_v32 = vld [vmem:[%s2593_s28 + $0x4ac] ss:$16 sps:$4 sm:$0xff]  }
  0x72   : > { %1606 = vmatpush1.bf16.msra.mxu0 %v2355_v34  ;;  %v2450_v34 = vld [vmem:[%s2593_s28 + $0x4a8] ss:$16 sps:$4 sm:$0xff]  }
  0x73   : > { %1647 = vmatpush1.bf16.msra.mxu1 %v2358_v36  ;;  %1607 = vmatprep.subr.bf16.mxu0 %v2363_v37  ;;  %v2458_v36 = vld [vmem:[%s2593_s28 + $0x4cc] ss:$16 sps:$4 sm:$0xff]   ;;  %v2453_v37 = vld [vmem:[%s2593_s28 + $0x2c8] ss:$16 sps:$4 sm:$0xff]  }
  0x74   : > { %1648 = vmatprep.subr.bf16.mxu1 %v2366_v38  ;;  %v2456_v38 = vld [vmem:[%s2593_s28 + $0x4c8] ss:$16 sps:$4 sm:$0xff]  }
  0x76   : > { %1608 = vmatpush1.bf16.msra.mxu0 %v2361_v39  ;;  %v2461_v39 = vld [vmem:[%s2593_s28 + $0x2ec] ss:$16 sps:$4 sm:$0xff]  }
  0x77   : > { %1649 = vmatpush1.bf16.msra.mxu1 %v2364_v40  ;;  %1609 = vmatprep.subr.bf16.mxu0 %v2369_v41  ;;  %v2464_v40 = vld [vmem:[%s2593_s28 + $0x4ec] ss:$16 sps:$4 sm:$0xff]   ;;  %v2459_v41 = vld [vmem:[%s2593_s28 + $0x2e8] ss:$16 sps:$4 sm:$0xff]  }
  0x78   : > { %1650 = vmatprep.subr.bf16.mxu1 %v2372_v42  ;;  %v2462_v42 = vld [vmem:[%s2593_s28 + $0x4e8] ss:$16 sps:$4 sm:$0xff]  }
  0x7a   : > { %1610 = vmatpush1.bf16.msra.mxu0 %v2367_v43  ;;  %v2467_v43 = vld [vmem:[%s2593_s28 + $0x30c] ss:$16 sps:$4 sm:$0xff]  }
  0x7b   : > { %1651 = vmatpush1.bf16.msra.mxu1 %v2370_v44  ;;  %1611 = vmatprep.subr.bf16.mxu0 %v2375_v45  ;;  %v2470_v44 = vld [vmem:[%s2593_s28 + $0x50c] ss:$16 sps:$4 sm:$0xff]   ;;  %v2465_v45 = vld [vmem:[%s2593_s28 + $0x308] ss:$16 sps:$4 sm:$0xff]  }
  0x7c   : > { %1652 = vmatprep.subr.bf16.mxu1 %v2378_v46  ;;  %v2468_v46 = vld [vmem:[%s2593_s28 + $0x508] ss:$16 sps:$4 sm:$0xff]  }
  0x7e   : > { %1612 = vmatpush1.bf16.msra.mxu0 %v2373_v47  ;;  %v2473_v47 = vld [vmem:[%s2593_s28 + $0x32c] ss:$16 sps:$4 sm:$0xff]  }
  0x7f   : > { %1653 = vmatpush1.bf16.msra.mxu1 %v2376_v48  ;;  %1613 = vmatprep.subr.bf16.mxu0 %v2381_v49  ;;  %v2476_v48 = vld [vmem:[%s2593_s28 + $0x52c] ss:$16 sps:$4 sm:$0xff]   ;;  %v2471_v49 = vld [vmem:[%s2593_s28 + $0x328] ss:$16 sps:$4 sm:$0xff]  }
  0x80   : > { %1654 = vmatprep.subr.bf16.mxu1 %v2384_v50  ;;  %v2474_v50 = vld [vmem:[%s2593_s28 + $0x528] ss:$16 sps:$4 sm:$0xff]  }
  0x82   : > { %1614 = vmatpush1.bf16.msra.mxu0 %v2379_v51  ;;  %v2479_v51 = vld [vmem:[%s2593_s28 + $0x34c] ss:$16 sps:$4 sm:$0xff]  }
  0x83   : > { %1655 = vmatpush1.bf16.msra.mxu1 %v2382_v53  ;;  %1615 = vmatprep.subr.bf16.mxu0 %v2387_v54  ;;  %v2482_v53 = vld [vmem:[%s2593_s28 + $0x54c] ss:$16 sps:$4 sm:$0xff]   ;;  %v2477_v54 = vld [vmem:[%s2593_s28 + $0x348] ss:$16 sps:$4 sm:$0xff]  }
  0x84   : > { %1656 = vmatprep.subr.bf16.mxu1 %v2390_v55  ;;  %v2480_v55 = vld [vmem:[%s2593_s28 + $0x548] ss:$16 sps:$4 sm:$0xff]  }
  0x86   : > { %1616 = vmatpush1.bf16.msra.mxu0 %v2385_v56  ;;  %v2485_v56 = vld [vmem:[%s2593_s28 + $0x36c] ss:$16 sps:$4 sm:$0xff]  }
  0x87   : > { %1657 = vmatpush1.bf16.msra.mxu1 %v2388_v57  ;;  %1617 = vmatprep.subr.bf16.mxu0 %v2393_v58  ;;  %v2488_v57 = vld [vmem:[%s2593_s28 + $0x56c] ss:$16 sps:$4 sm:$0xff]   ;;  %v2483_v58 = vld [vmem:[%s2593_s28 + $0x368] ss:$16 sps:$4 sm:$0xff]  }
  0x88   : > { %1658 = vmatprep.subr.bf16.mxu1 %v2396_v59  ;;  %v2486_v59 = vld [vmem:[%s2593_s28 + $0x568] ss:$16 sps:$4 sm:$0xff]  }
  0x8a   : > { %1618 = vmatpush1.bf16.msra.mxu0 %v2391_v60  ;;  %v2491_v60 = vld [vmem:[%s2593_s28 + $0x38c] ss:$16 sps:$4 sm:$0xff]  }
  0x8b   : > { %1659 = vmatpush1.bf16.msra.mxu1 %v2394_v61  ;;  %1619 = vmatprep.subr.bf16.mxu0 %v2399_v62  ;;  %v2494_v61 = vld [vmem:[%s2593_s28 + $0x58c] ss:$16 sps:$4 sm:$0xff]   ;;  %v2489_v62 = vld [vmem:[%s2593_s28 + $0x388] ss:$16 sps:$4 sm:$0xff]  }
  0x8c   : > { %1660 = vmatprep.subr.bf16.mxu1 %v2402_v63  ;;  %v2492_v63 = vld [vmem:[%s2593_s28 + $0x588] ss:$16 sps:$4 sm:$0xff]  }
  0x8e   : > { %1620 = vmatpush1.bf16.msra.mxu0 %v2397_v0  ;;  %v2497_v0 = vld [vmem:[%s2593_s28 + $0x3ac] ss:$16 sps:$4 sm:$0xff]  }
  0x8f   : > { %1661 = vmatpush1.bf16.msra.mxu1 %v2400_v1  ;;  %1621 = vmatprep.subr.bf16.mxu0 %v2405_v2  ;;  %v2500_v1 = vld [vmem:[%s2593_s28 + $0x5ac] ss:$16 sps:$4 sm:$0xff]   ;;  %v2495_v2 = vld [vmem:[%s2593_s28 + $0x3a8] ss:$16 sps:$4 sm:$0xff]  }
  0x90   : > { %1662 = vmatprep.subr.bf16.mxu1 %v2408_v3  ;;  %v2498_v3 = vld [vmem:[%s2593_s28 + $0x5a8] ss:$16 sps:$4 sm:$0xff]  }
  0x92   : > { %1622 = vmatpush1.bf16.msra.mxu0 %v2403_v4  ;;  %v2503_v4 = vld [vmem:[%s2593_s28 + $0x3cc] ss:$16 sps:$4 sm:$0xff]  }
  0x93   : > { %1663 = vmatpush1.bf16.msra.mxu1 %v2406_v5  ;;  %1623 = vmatprep.subr.bf16.mxu0 %v2411_v6  ;;  %v2506_v5 = vld [vmem:[%s2593_s28 + $0x5cc] ss:$16 sps:$4 sm:$0xff]   ;;  %v2501_v6 = vld [vmem:[%s2593_s28 + $0x3c8] ss:$16 sps:$4 sm:$0xff]  }
  0x94   : > { %1664 = vmatprep.subr.bf16.mxu1 %v2414_v9  ;;  %v2504_v9 = vld [vmem:[%s2593_s28 + $0x5c8] ss:$16 sps:$4 sm:$0xff]  }
  0x96   : > { %1624 = vmatpush1.bf16.msra.mxu0 %v2409_v10  ;;  %v2509_v10 = vld [vmem:[%s2593_s28 + $0x3ec] ss:$16 sps:$4 sm:$0xff]  }
  0x97   : > { %1665 = vmatpush1.bf16.msra.mxu1 %v2412_v11  ;;  %1675 = vmatprep.subr.bf16.mxu0 %v2419_v12  ;;  %v2512_v11 = vld [vmem:[%s2593_s28 + $0x5ec] ss:$16 sps:$4 sm:$0xff]   ;;  %v2507_v12 = vld [vmem:[%s2593_s28 + $0x3e8] ss:$16 sps:$4 sm:$0xff]  }
  0x98   : > { %1716 = vmatprep.subr.bf16.mxu1 %v2422_v13  ;;  %v2510_v13 = vld [vmem:[%s2593_s28 + $0x5e8] ss:$16 sps:$4 sm:$0xff]  }
  0x99   : > { %1626 = vmatmul.mubr.bf16.vlgmr.msra.gmra.mrb[4].mxu0 %v2751_v14 }
  0x9a   : > { %1667 = vmatmul.mubr.bf16.vlgmr.msra.gmra.mrb[4].mxu1 %v2670_v7  ;;  %1676 = vmatpush1.bf16.msra.mxu0 %v2417_v15  ;;  %v2429_v7 = vld [vmem:[%s2593_s28 + $0x248] ss:$16 sps:$4 sm:$0xff]  }
  0x9b   : > { %1717 = vmatpush1.bf16.msra.mxu1 %v2420_v16  ;;  %1677 = vmatprep.subr.bf16.mxu0 %v2425_v17 }
  0x9c   : > { %1718 = vmatprep.subr.bf16.mxu1 %v2428_v18  ;;  %1707 = vmatprep.mubr.bf16.mxu0 %v2648_v52  ;;  %v2438_v52 = vld [vmem:[%s2593_s28 + $0x468] ss:$16 sps:$4 sm:$0xff]  }
  0x9d   : > { %1748 = vmatprep.mubr.bf16.mxu1 %v2707_v35  ;;  %v2455_v35 = vld [vmem:[%s2593_s28 + $0x2cc] ss:$16 sps:$4 sm:$0xff]  }
  0x9e   : > { %1678 = vmatpush1.bf16.msra.mxu0 %v2423_v19 }
  0x9f   : > { %1719 = vmatpush1.bf16.msra.mxu1 %v2426_v20  ;;  %1679 = vmatprep.subr.bf16.mxu0 %v2431_v21 }
  0xa0   : > { %1720 = vmatprep.subr.bf16.mxu1 %v2434_v22 }
  0xa2   : > { %1680 = vmatpush1.bf16.msra.mxu0 %v2429_v7 }
  0xa3   : > { %1721 = vmatpush1.bf16.msra.mxu1 %v2432_v23  ;;  %1681 = vmatprep.subr.bf16.mxu0 %v2437_v24  ;;  %v331_v24 = vld [vmem:[#allocation2] sm:$0xff] }
  0xa4   : > { %1722 = vmatprep.subr.bf16.mxu1 %v2440_v25 }
  0xa6   : > { %1682 = vmatpush1.bf16.msra.mxu0 %v2435_v26 }
  0xa7   : > { %1723 = vmatpush1.bf16.msra.mxu1 %v2438_v52  ;;  %1683 = vmatprep.subr.bf16.mxu0 %v2443_v27  ;;  %v332_v27 = vld [vmem:[#allocation2 + $0x8] sm:$0xff] }
  0xa8   : > { %1724 = vmatprep.subr.bf16.mxu1 %v2446_v28 }
  0xaa   : > { %1684 = vmatpush1.bf16.msra.mxu0 %v2441_v29 }
  0xab   : > { %1725 = vmatpush1.bf16.msra.mxu1 %v2444_v30  ;;  %1685 = vmatprep.subr.bf16.mxu0 %v2449_v31 }
  0xac   : > { %1726 = vmatprep.subr.bf16.mxu1 %v2452_v32 }
  0xae   : > { %1686 = vmatpush1.bf16.msra.mxu0 %v2447_v33 }
  0xaf   : > { %1727 = vmatpush1.bf16.msra.mxu1 %v2450_v34  ;;  %1687 = vmatprep.subr.bf16.mxu0 %v2455_v35 }
  0xb0   : > { %1728 = vmatprep.subr.bf16.mxu1 %v2458_v36 }
  0xb2   : > { %1688 = vmatpush1.bf16.msra.mxu0 %v2453_v37 }
  0xb3   : > { %1729 = vmatpush1.bf16.msra.mxu1 %v2456_v38  ;;  %1689 = vmatprep.subr.bf16.mxu0 %v2461_v39 }
  0xb4   : > { %1730 = vmatprep.subr.bf16.mxu1 %v2464_v40  ;;  %v333_v40 = vld [vmem:[#allocation2 + $0x10] sm:$0xff] }
  0xb6   : > { %1690 = vmatpush1.bf16.msra.mxu0 %v2459_v41 }
  0xb7   : > { %1731 = vmatpush1.bf16.msra.mxu1 %v2462_v42  ;;  %1691 = vmatprep.subr.bf16.mxu0 %v2467_v43 }
  0xb8   : > { %1732 = vmatprep.subr.bf16.mxu1 %v2470_v44 }
  0xba   : > { %1692 = vmatpush1.bf16.msra.mxu0 %v2465_v45  ;;  %v334_v45 = vld [vmem:[#allocation2 + $0x18] sm:$0xff] }
  0xbb   : > { %1733 = vmatpush1.bf16.msra.mxu1 %v2468_v46  ;;  %1693 = vmatprep.subr.bf16.mxu0 %v2473_v47 }
  0xbc   : > { %1734 = vmatprep.subr.bf16.mxu1 %v2476_v48 }
  0xbe   : > { %1694 = vmatpush1.bf16.msra.mxu0 %v2471_v49 }
  0xbf   : > { %1735 = vmatpush1.bf16.msra.mxu1 %v2474_v50  ;;  %1695 = vmatprep.subr.bf16.mxu0 %v2479_v51  ;;  %v1775_v51 = vlaneseq (!%p2184_p7) }
  0xc0   : > { %1736 = vmatprep.subr.bf16.mxu1 %v2482_v53 }
  0xc1   : > { %v1776_v53 = vshrl.u32 (!%p2184_p7), %v1775_v51, 7 }
  0xc2   : > { %1696 = vmatpush1.bf16.msra.mxu0 %v2477_v54  ;;  %v1773_v54 = vld [vmem:[%s2845_s2] sm:$0xf] (!%p2184_p7) }
  0xc3   : > { %1737 = vmatpush1.bf16.msra.mxu1 %v2480_v55  ;;  %1697 = vmatprep.subr.bf16.mxu0 %v2485_v56  ;;  %v1799_v55 = vld [vmem:[%s2846_s3] sm:$0xf] (!%p2184_p7)  ;;  %v1777_v56 = vsub.s32 (!%p2184_p7), 0, %v1776_v53 }
  0xc4   : > { %1738 = vmatprep.subr.bf16.mxu1 %v2488_v57  ;;  %v1781_v57 = vsub.s32 (!%p2184_p7), 1, %v1776_v53 }
  0xc6   : > { %1698 = vmatpush1.bf16.msra.mxu0 %v2483_v58  ;;  %v1785_v58 = vsub.s32 (!%p2184_p7), 2, %v1776_v53 }
  0xc7   : > { %1739 = vmatpush1.bf16.msra.mxu1 %v2486_v59  ;;  %1699 = vmatprep.subr.bf16.mxu0 %v2491_v60  ;;  %v1789_v59 = vsub.s32 (!%p2184_p7), 3, %v1776_v53 }
  0xc8   : > { %1740 = vmatprep.subr.bf16.mxu1 %v2494_v61 }
  0xca   : > { %1700 = vmatpush1.bf16.msra.mxu0 %v2489_v62  ;;  %v1778_v62 = vrot.slane (!%p2184_p7), %v1773_v54, %v1777_v56 }
  0xcb   : > { %1741 = vmatpush1.bf16.msra.mxu1 %v2492_v63  ;;  %1701 = vmatprep.subr.bf16.mxu0 %v2497_v0  ;;  %v1782_v63 = vrot.slane (!%p2184_p7), %v1773_v54, %v1781_v57  ;;  %v1804_v0 = vrot.slane (!%p2184_p7), %v1799_v55, %v1777_v56 }
  0xcc   : > { %1742 = vmatprep.subr.bf16.mxu1 %v2500_v1  ;;  %v1808_v1 = vrot.slane (!%p2184_p7), %v1799_v55, %v1781_v57 }
  0xce   : > { %1702 = vmatpush1.bf16.msra.mxu0 %v2495_v2 }
  0xcf   : > { %1743 = vmatpush1.bf16.msra.mxu1 %v2498_v3  ;;  %1703 = vmatprep.subr.bf16.mxu0 %v2503_v4  ;;  %v1786_v4 = vrot.slane (!%p2184_p7), %v1773_v54, %v1785_v58 }
  0xd0   : > { %1744 = vmatprep.subr.bf16.mxu1 %v2506_v5  ;;  %v1790_v5 = vrot.slane (!%p2184_p7), %v1773_v54, %v1789_v59 }
  0xd2   : > { %1704 = vmatpush1.bf16.msra.mxu0 %v2501_v6  ;;  %v1812_v6 = vrot.slane (!%p2184_p7), %v1799_v55, %v1785_v58 }
  0xd3   : > { %1745 = vmatpush1.bf16.msra.mxu1 %v2504_v9  ;;  %1705 = vmatprep.subr.bf16.mxu0 %v2509_v10  ;;  %v1816_v9 = vrot.slane (!%p2184_p7), %v1799_v55, %v1789_v59 }
  0xd4   : > { %1746 = vmatprep.subr.bf16.mxu1 %v2512_v11 }
  0xd6   : > { %1706 = vmatpush1.bf16.msra.mxu0 %v2507_v12 }
  0xd7   : > { %1747 = vmatpush1.bf16.msra.mxu1 %v2510_v13 }
  0xd9   : > { %1708 = vmatmul.mubr.bf16.vlgmr.msra.gmra.mrb[8].mxu0 %v2672_v8 }
  0xda   : > { %1749 = vmatmul.mubr.bf16.vlgmr.msra.gmra.mrb[8].mxu1 %v2751_v14 }
 0x12c   : > { %v1545_v15 = vpop.f32.mrb[0].mxu0 }
 0x12d   : > { %v1586_v16 = vpop.f32.mrb[0].mxu1  ;;  %v1547_v18 = vpop.f32.mrb[1].mxu0 }
 0x12e   : > { %v1587_v17 = vadd.f32 %v1586_v16, %v1545_v15  ;;  %v1588_v19 = vpop.f32.mrb[1].mxu1  ;;  %v1549_v21 = vpop.f32.mrb[2].mxu0 }
 0x12f   : > { %v1589_v20 = vadd.f32 %v1588_v19, %v1547_v18  ;;  %v1590_v22 = vpop.f32.mrb[2].mxu1  ;;  %v1550_v7 = vpop.f32.mrb[3].mxu0 }
 0x130   : > { %v1591_v23 = vpop.f32.mrb[3].mxu1 }
 0x16c   : > { %v1627_v25 = vpop.f32.mrb[4].mxu0 }
 0x16d   : > { %v1668_v26 = vpop.f32.mrb[4].mxu1  ;;  %v1628_v52 = vadd.f32 %v1627_v25, %v1587_v17  ;;  %v1629_v28 = vpop.f32.mrb[5].mxu0 }
 0x16e   : > { %v1670_v29 = vpop.f32.mrb[5].mxu1  ;;  %v1630_v8 = vadd.f32 %v1629_v28, %v1589_v20  ;;  %v1631_v30 = vpop.f32.mrb[6].mxu0 }
 0x16f   : > { %v1672_v14 = vpop.f32.mrb[6].mxu1  ;;  %v1757_v31 = vadd.f32 %v1628_v52, %v331_v24  ;;  %v1632_v32 = vpop.f32.mrb[7].mxu0 }
 0x170   : > { %v1673_v33 = vpop.f32.mrb[7].mxu1  ;;  %v1758_v34 = vadd.f32 %v1630_v8, %v332_v27 }
 0x171   : > { %1761 = vst [vmem:[#allocation2] sm:$0xff] %v1757_v31 }
 0x172   : > { %1762 = vst [vmem:[#allocation2 + $0x8] sm:$0xff] %v1758_v34 }
 0x178   : > { %v1769_v60 = vld [vmem:[#allocation2] sm:$0xff] (!%p2184_p7) }
 0x179   : > { %v1770_v61 = vld [vmem:[#allocation2 + $0x8] sm:$0xff] (!%p2184_p7)  ;;  %v1795_v10 = vmul.f32 (!%p2184_p7), %v1778_v62, %v1769_v60 }
 0x17a   : > { %v1796_v11 = vmul.f32 (!%p2184_p7), %v1782_v63, %v1770_v61 }
 0x17b   : > { %v1821_v15 = vadd.f32 (!%p2184_p7), %v1804_v0, %v1795_v10 }
 0x17c   : > { %v1822_v16 = vadd.f32 (!%p2184_p7), %v1808_v1, %v1796_v11 }
 0x17d   : > { %v1825_v19 = vmax.f32 (!%p2184_p7), %v1821_v15, 0.0 }
 0x17e   : > { %v1826_v20 = vmax.f32 (!%p2184_p7), %v1822_v16, 0.0 }
 0x180   : > { %v2192_v7 = vpack.c.bf16 (!%p2184_p7), %v1826_v20, %v1825_v19 }
 0x182   : > { %1845 = vst [vmem:[%s2847_s4] sm:$0xff] (!%p2184_p7), %v2192_v7 }
 0x1ac   : > { %v1709_v35 = vpop.f32.mrb[8].mxu0 }
 0x1ad   : > { %v1750_v36 = vpop.f32.mrb[8].mxu1  ;;  %v1710_v37 = vadd.f32 %v1709_v35, %v1668_v26  ;;  %v1711_v38 = vpop.f32.mrb[9].mxu0 }
 0x1ae   : > { %v1752_v39 = vpop.f32.mrb[9].mxu1  ;;  %v1712_v41 = vadd.f32 %v1711_v38, %v1670_v29  ;;  %v1713_v42 = vpop.f32.mrb[10].mxu0  ;;  %1768 = sbr.rel (%p2184_p7) target bundleno = 453 (0x1c5), region = 44 }
 0x1af   : > { %v1754_v43 = vpop.f32.mrb[10].mxu1  ;;  %v1751_v44 = vadd.f32 %v1750_v36, %v1710_v37  ;;  %v1714_v46 = vpop.f32.mrb[11].mxu0 }
 0x1b0   : > { %v1755_v47 = vpop.f32.mrb[11].mxu1  ;;  %v1753_v48 = vadd.f32 %v1752_v39, %v1712_v41 }
 0x1b1   : > { %v1759_v49 = vadd.f32 %v1751_v44, %v333_v40 }
 0x1b2   : > { %v1760_v50 = vadd.f32 %v1753_v48, %v334_v45 }
 0x1b3   : > { %1763 = vst [vmem:[#allocation2 + $0x10] sm:$0xff] %v1759_v49 }
 0x1b4   : > { %1764 = vst [vmem:[#allocation2 + $0x18] sm:$0xff] %v1760_v50 }
 0x1ba   : > { %v1771_v2 = vld [vmem:[#allocation2 + $0x10] sm:$0xff] }
 0x1bb   : > { %v1772_v3 = vld [vmem:[#allocation2 + $0x18] sm:$0xff]  ;;  %v1797_v12 = vmul.f32 %v1786_v4, %v1771_v2 }
 0x1bc   : > { %v1798_v13 = vmul.f32 %v1790_v5, %v1772_v3 }
 0x1bd   : > { %v1823_v17 = vadd.f32 %v1812_v6, %v1797_v12 }
 0x1be   : > { %v1824_v18 = vadd.f32 %v1816_v9, %v1798_v13 }
 0x1bf   : > { %v1827_v21 = vmax.f32 %v1823_v17, 0.0 }
 0x1c0   : > { %v1828_v22 = vmax.f32 %v1824_v18, 0.0 }
 0x1c2   : > { %v2193_v23 = vpack.c.bf16 %v1828_v22, %v1827_v21 }
 0x1c4   : > { %1846 = vst [vmem:[%s2847_s4 + $0x8] sm:$0xff] %v2193_v23 }
 0x1c5 PF: > { %s14_s17 = sadd.s32 1, %s2535_s17   ;;  %s2848_s15 = smov %s2531_s16 }
 0x1c6   : > { %p11_p8 = scmp.ge.s32.totalorder %s14_s17, 5   ;;  %s2849_s16 = smov %s2851_s18 }
 0x1c8   :  { %13 = sbr.rel (!%p11_p8) target bundleno = 2 (0x2), region = 83 }

// kernel: resnet18_backbone.37
= control target key start
LH: loop header
LB: loop body
LE: loop exit
PB: predicated region body
PF: predicated region fallthrough
CT: control target
= control target key end

     0   :  { %s992_s1 = inlined_call_operand.vmem [shape: bf16[256,512], index: 1, kind: input, shape index: {}]   ;;  %s993_s0 = inlined_call_operand.vmem [shape: bf16[8,256], index: 0, kind: input, shape index: {}]   ;;  %s994_s2 = inlined_call_operand.vmem [shape: f32[1,512], index: 2, kind: input, shape index: {}]   ;;  %s995_s3 = inlined_call_operand.vmem [shape: f32[1,512], index: 3, kind: input, shape index: {}]   ;;  %s996_s4 = inlined_call_operand.vmem [shape: bf16[8,512], index: 4, kind: output, shape index: {}]  }
   0x1   :  { %v662_v0 = vld [vmem:[%s992_s1 + $0x4] ss:$16 sps:$4 sm:$0xff]   ;;  %v664_v1 = vld [vmem:[%s992_s1 + $0xc] ss:$16 sps:$4 sm:$0xff]   ;;  %v666_v2 = vld [vmem:[%s992_s1] ss:$16 sps:$4 sm:$0xff]  }
   0x2   :  { %421 = vmatprep.subr.bf16.mxu0 %v662_v0  ;;  %v667_v3 = vld [vmem:[%s992_s1 + $0x8] ss:$16 sps:$4 sm:$0xff]   ;;  %462 = vmatprep.subr.bf16.mxu1 %v664_v1  ;;  %v668_v4 = vld [vmem:[%s992_s1 + $0x24] ss:$16 sps:$4 sm:$0xff]   ;;  %v670_v5 = vld [vmem:[%s992_s1 + $0x2c] ss:$16 sps:$4 sm:$0xff]  }
   0x3   :  { %422 = vmatpush1.bf16.msra.mxu0 %v666_v2  ;;  %463 = vmatpush1.bf16.msra.mxu1 %v667_v3  ;;  %v672_v6 = vld [vmem:[%s992_s1 + $0x20] ss:$16 sps:$4 sm:$0xff]   ;;  %v673_v7 = vld [vmem:[%s992_s1 + $0x28] ss:$16 sps:$4 sm:$0xff]   ;;  %v674_v8 = vld [vmem:[%s992_s1 + $0x44] ss:$16 sps:$4 sm:$0xff]   ;;  %v520_v3 = vlaneseq }
   0x4   :  { %423 = vmatprep.subr.bf16.mxu0 %v668_v4  ;;  %464 = vmatprep.subr.bf16.mxu1 %v670_v5  ;;  %v676_v9 = vld [vmem:[%s992_s1 + $0x4c] ss:$16 sps:$4 sm:$0xff]   ;;  %v678_v10 = vld [vmem:[%s992_s1 + $0x40] ss:$16 sps:$4 sm:$0xff]   ;;  %v679_v11 = vld [vmem:[%s992_s1 + $0x48] ss:$16 sps:$4 sm:$0xff]  }
   0x5   :  { %v680_v12 = vld [vmem:[%s992_s1 + $0x64] ss:$16 sps:$4 sm:$0xff]   ;;  %v682_v13 = vld [vmem:[%s992_s1 + $0x6c] ss:$16 sps:$4 sm:$0xff]   ;;  %v684_v14 = vld [vmem:[%s992_s1 + $0x60] ss:$16 sps:$4 sm:$0xff]  }
   0x6   :  { %v685_v15 = vld [vmem:[%s992_s1 + $0x68] ss:$16 sps:$4 sm:$0xff]   ;;  %v686_v16 = vld [vmem:[%s992_s1 + $0x84] ss:$16 sps:$4 sm:$0xff]   ;;  %v688_v17 = vld [vmem:[%s992_s1 + $0x8c] ss:$16 sps:$4 sm:$0xff]  }
   0x7   :  { %424 = vmatpush1.bf16.msra.mxu0 %v672_v6  ;;  %465 = vmatpush1.bf16.msra.mxu1 %v673_v7  ;;  %v690_v18 = vld [vmem:[%s992_s1 + $0x80] ss:$16 sps:$4 sm:$0xff]   ;;  %v691_v19 = vld [vmem:[%s992_s1 + $0x88] ss:$16 sps:$4 sm:$0xff]   ;;  %v692_v20 = vld [vmem:[%s992_s1 + $0xa4] ss:$16 sps:$4 sm:$0xff]  }
   0x8   :  { %425 = vmatprep.subr.bf16.mxu0 %v674_v8  ;;  %466 = vmatprep.subr.bf16.mxu1 %v676_v9  ;;  %v694_v21 = vld [vmem:[%s992_s1 + $0xac] ss:$16 sps:$4 sm:$0xff]   ;;  %v696_v22 = vld [vmem:[%s992_s1 + $0xa0] ss:$16 sps:$4 sm:$0xff]   ;;  %v697_v23 = vld [vmem:[%s992_s1 + $0xa8] ss:$16 sps:$4 sm:$0xff]  }
   0x9   :  { %v698_v24 = vld [vmem:[%s992_s1 + $0xc4] ss:$16 sps:$4 sm:$0xff]   ;;  %v700_v25 = vld [vmem:[%s992_s1 + $0xcc] ss:$16 sps:$4 sm:$0xff]   ;;  %v702_v26 = vld [vmem:[%s992_s1 + $0xc0] ss:$16 sps:$4 sm:$0xff]  }
   0xa   :  { %v703_v27 = vld [vmem:[%s992_s1 + $0xc8] ss:$16 sps:$4 sm:$0xff]   ;;  %v704_v28 = vld [vmem:[%s992_s1 + $0xe4] ss:$16 sps:$4 sm:$0xff]   ;;  %v706_v29 = vld [vmem:[%s992_s1 + $0xec] ss:$16 sps:$4 sm:$0xff]  }
   0xb   :  { %426 = vmatpush1.bf16.msra.mxu0 %v678_v10  ;;  %467 = vmatpush1.bf16.msra.mxu1 %v679_v11  ;;  %v708_v30 = vld [vmem:[%s992_s1 + $0xe0] ss:$16 sps:$4 sm:$0xff]   ;;  %v709_v31 = vld [vmem:[%s992_s1 + $0xe8] ss:$16 sps:$4 sm:$0xff]   ;;  %v710_v32 = vld [vmem:[%s992_s1 + $0x104] ss:$16 sps:$4 sm:$0xff]  }
   0xc   :  { %427 = vmatprep.subr.bf16.mxu0 %v680_v12  ;;  %468 = vmatprep.subr.bf16.mxu1 %v682_v13  ;;  %v712_v33 = vld [vmem:[%s992_s1 + $0x10c] ss:$16 sps:$4 sm:$0xff]   ;;  %v714_v34 = vld [vmem:[%s992_s1 + $0x100] ss:$16 sps:$4 sm:$0xff]   ;;  %v715_v35 = vld [vmem:[%s992_s1 + $0x108] ss:$16 sps:$4 sm:$0xff]  }
   0xd   :  { %v716_v36 = vld [vmem:[%s992_s1 + $0x124] ss:$16 sps:$4 sm:$0xff]   ;;  %v718_v37 = vld [vmem:[%s992_s1 + $0x12c] ss:$16 sps:$4 sm:$0xff]   ;;  %v720_v38 = vld [vmem:[%s992_s1 + $0x120] ss:$16 sps:$4 sm:$0xff]  }
   0xe   :  { %v721_v39 = vld [vmem:[%s992_s1 + $0x128] ss:$16 sps:$4 sm:$0xff]   ;;  %v722_v40 = vld [vmem:[%s992_s1 + $0x144] ss:$16 sps:$4 sm:$0xff]   ;;  %v724_v41 = vld [vmem:[%s992_s1 + $0x14c] ss:$16 sps:$4 sm:$0xff]  }
   0xf   :  { %428 = vmatpush1.bf16.msra.mxu0 %v684_v14  ;;  %469 = vmatpush1.bf16.msra.mxu1 %v685_v15  ;;  %v726_v42 = vld [vmem:[%s992_s1 + $0x140] ss:$16 sps:$4 sm:$0xff]   ;;  %v727_v43 = vld [vmem:[%s992_s1 + $0x148] ss:$16 sps:$4 sm:$0xff]   ;;  %v728_v44 = vld [vmem:[%s992_s1 + $0x164] ss:$16 sps:$4 sm:$0xff]  }
  0x10   :  { %429 = vmatprep.subr.bf16.mxu0 %v686_v16  ;;  %470 = vmatprep.subr.bf16.mxu1 %v688_v17  ;;  %v730_v45 = vld [vmem:[%s992_s1 + $0x16c] ss:$16 sps:$4 sm:$0xff]   ;;  %v29_v46 = vld [vmem:[%s993_s0] sm:$0xff]  ;;  %v733_v49 = vld [vmem:[%s992_s1 + $0x168] ss:$16 sps:$4 sm:$0xff]   ;;  %v521_v4 = vshrl.u32 %v520_v3, 7 }
  0x11   :  { %v593_v47 = vcombine.high %v29_v46, %v29_v46  ;;  %v732_v48 = vld [vmem:[%s992_s1 + $0x160] ss:$16 sps:$4 sm:$0xff]   ;;  %v734_v50 = vld [vmem:[%s992_s1 + $0x184] ss:$16 sps:$4 sm:$0xff]   ;;  %v736_v51 = vld [vmem:[%s992_s1 + $0x18c] ss:$16 sps:$4 sm:$0xff]   ;;  %v592_v2 = vcombine.low %v29_v46, %v29_v46 }
  0x12   :  { %v738_v52 = vld [vmem:[%s992_s1 + $0x180] ss:$16 sps:$4 sm:$0xff]   ;;  %v739_v53 = vld [vmem:[%s992_s1 + $0x188] ss:$16 sps:$4 sm:$0xff]   ;;  %v740_v54 = vld [vmem:[%s992_s1 + $0x1a4] ss:$16 sps:$4 sm:$0xff]  }
  0x13   :  { %430 = vmatpush1.bf16.msra.mxu0 %v690_v18  ;;  %471 = vmatpush1.bf16.msra.mxu1 %v691_v19  ;;  %v742_v55 = vld [vmem:[%s992_s1 + $0x1ac] ss:$16 sps:$4 sm:$0xff]   ;;  %v744_v56 = vld [vmem:[%s992_s1 + $0x1a0] ss:$16 sps:$4 sm:$0xff]   ;;  %v745_v57 = vld [vmem:[%s992_s1 + $0x1a8] ss:$16 sps:$4 sm:$0xff]  }
  0x14   :  { %431 = vmatprep.subr.bf16.mxu0 %v692_v20  ;;  %472 = vmatprep.subr.bf16.mxu1 %v694_v21  ;;  %v746_v58 = vld [vmem:[%s992_s1 + $0x1c4] ss:$16 sps:$4 sm:$0xff]   ;;  %v748_v59 = vld [vmem:[%s992_s1 + $0x1cc] ss:$16 sps:$4 sm:$0xff]   ;;  %v750_v60 = vld [vmem:[%s992_s1 + $0x1c0] ss:$16 sps:$4 sm:$0xff]  }
  0x15   :  { %453 = vmatprep.mubr.bf16.mxu0 %v593_v47  ;;  %494 = vmatprep.mubr.bf16.mxu1 %v593_v47  ;;  %v751_v61 = vld [vmem:[%s992_s1 + $0x1c8] ss:$16 sps:$4 sm:$0xff]   ;;  %v752_v62 = vld [vmem:[%s992_s1 + $0x1e4] ss:$16 sps:$4 sm:$0xff]   ;;  %v754_v63 = vld [vmem:[%s992_s1 + $0x1ec] ss:$16 sps:$4 sm:$0xff]  }
  0x16   :  { %v756_v0 = vld [vmem:[%s992_s1 + $0x1e0] ss:$16 sps:$4 sm:$0xff]   ;;  %v757_v1 = vld [vmem:[%s992_s1 + $0x1e8] ss:$16 sps:$4 sm:$0xff]   ;;  %v522_v5 = vsub.s32 0, %v521_v4  ;;  %v530_v6 = vsub.s32 2, %v521_v4 }
  0x17   :  { %432 = vmatpush1.bf16.msra.mxu0 %v696_v22  ;;  %473 = vmatpush1.bf16.msra.mxu1 %v697_v23  ;;  %v518_v7 = vld [vmem:[%s994_s2] sm:$0xf]  ;;  %v526_v8 = vsub.s32 1, %v521_v4  ;;  %v534_v9 = vsub.s32 3, %v521_v4 }
  0x18   :  { %433 = vmatprep.subr.bf16.mxu0 %v698_v24  ;;  %474 = vmatprep.subr.bf16.mxu1 %v700_v25  ;;  %v544_v10 = vld [vmem:[%s995_s3] sm:$0xf]  ;;  %v523_v11 = vrot.slane %v518_v7, %v522_v5  ;;  %v531_v12 = vrot.slane %v518_v7, %v530_v6 }
  0x19   :  { %v527_v13 = vrot.slane %v518_v7, %v526_v8  ;;  %v535_v14 = vrot.slane %v518_v7, %v534_v9  ;;  %v549_v15 = vrot.slane %v544_v10, %v522_v5  ;;  %v557_v16 = vrot.slane %v544_v10, %v530_v6 }
  0x1a   :  { %v553_v19 = vrot.slane %v544_v10, %v526_v8  ;;  %v561_v20 = vrot.slane %v544_v10, %v534_v9 }
  0x1b   :  { %434 = vmatpush1.bf16.msra.mxu0 %v702_v26  ;;  %475 = vmatpush1.bf16.msra.mxu1 %v703_v27 }
  0x1c   :  { %435 = vmatprep.subr.bf16.mxu0 %v704_v28  ;;  %476 = vmatprep.subr.bf16.mxu1 %v706_v29 }
  0x1f   :  { %436 = vmatpush1.bf16.msra.mxu0 %v708_v30  ;;  %477 = vmatpush1.bf16.msra.mxu1 %v709_v31 }
  0x20   :  { %437 = vmatprep.subr.bf16.mxu0 %v710_v32  ;;  %478 = vmatprep.subr.bf16.mxu1 %v712_v33 }
  0x23   :  { %438 = vmatpush1.bf16.msra.mxu0 %v714_v34  ;;  %479 = vmatpush1.bf16.msra.mxu1 %v715_v35 }
  0x24   :  { %439 = vmatprep.subr.bf16.mxu0 %v716_v36  ;;  %480 = vmatprep.subr.bf16.mxu1 %v718_v37 }
  0x27   :  { %440 = vmatpush1.bf16.msra.mxu0 %v720_v38  ;;  %481 = vmatpush1.bf16.msra.mxu1 %v721_v39 }
  0x28   :  { %441 = vmatprep.subr.bf16.mxu0 %v722_v40  ;;  %482 = vmatprep.subr.bf16.mxu1 %v724_v41 }
  0x2b   :  { %442 = vmatpush1.bf16.msra.mxu0 %v726_v42  ;;  %483 = vmatpush1.bf16.msra.mxu1 %v727_v43 }
  0x2c   :  { %443 = vmatprep.subr.bf16.mxu0 %v728_v44  ;;  %484 = vmatprep.subr.bf16.mxu1 %v730_v45 }
  0x2f   :  { %444 = vmatpush1.bf16.msra.mxu0 %v732_v48  ;;  %485 = vmatpush1.bf16.msra.mxu1 %v733_v49 }
  0x30   :  { %445 = vmatprep.subr.bf16.mxu0 %v734_v50  ;;  %486 = vmatprep.subr.bf16.mxu1 %v736_v51 }
  0x33   :  { %446 = vmatpush1.bf16.msra.mxu0 %v738_v52  ;;  %487 = vmatpush1.bf16.msra.mxu1 %v739_v53 }
  0x34   :  { %447 = vmatprep.subr.bf16.mxu0 %v740_v54  ;;  %488 = vmatprep.subr.bf16.mxu1 %v742_v55 }
  0x37   :  { %448 = vmatpush1.bf16.msra.mxu0 %v744_v56  ;;  %489 = vmatpush1.bf16.msra.mxu1 %v745_v57 }
  0x38   :  { %449 = vmatprep.subr.bf16.mxu0 %v746_v58  ;;  %490 = vmatprep.subr.bf16.mxu1 %v748_v59 }
  0x3b   :  { %450 = vmatpush1.bf16.msra.mxu0 %v750_v60  ;;  %491 = vmatpush1.bf16.msra.mxu1 %v751_v61 }
  0x3c   :  { %451 = vmatprep.subr.bf16.mxu0 %v752_v62  ;;  %492 = vmatprep.subr.bf16.mxu1 %v754_v63 }
  0x3f   :  { %452 = vmatpush1.bf16.msra.mxu0 %v756_v0  ;;  %493 = vmatpush1.bf16.msra.mxu1 %v757_v1 }
  0x42   :  { %454 = vmatmul.mubr.bf16.vlgmr.msra.gmra.mrb[0].mxu0 %v592_v2  ;;  %495 = vmatmul.mubr.bf16.vlgmr.msra.gmra.mrb[0].mxu1 %v592_v2 }
 0x115   :  { %v455_v17 = vpop.f32.mrb[0].mxu0  ;;  %v496_v18 = vpop.f32.mrb[0].mxu1 }
 0x116   :  { %v540_v21 = vmul.f32 %v523_v11, %v455_v17  ;;  %v542_v22 = vmul.f32 %v531_v12, %v496_v18  ;;  %v457_v23 = vpop.f32.mrb[1].mxu0  ;;  %v498_v24 = vpop.f32.mrb[1].mxu1 }
 0x117   :  { %v541_v25 = vmul.f32 %v527_v13, %v457_v23  ;;  %v543_v26 = vmul.f32 %v535_v14, %v498_v24  ;;  %v459_v27 = vpop.f32.mrb[2].mxu0  ;;  %v500_v28 = vpop.f32.mrb[2].mxu1 }
 0x118   :  { %v566_v29 = vadd.f32 %v549_v15, %v540_v21  ;;  %v568_v30 = vadd.f32 %v557_v16, %v542_v22  ;;  %v460_v31 = vpop.f32.mrb[3].mxu0  ;;  %v501_v32 = vpop.f32.mrb[3].mxu1 }
 0x119   :  { %v567_v33 = vadd.f32 %v553_v19, %v541_v25  ;;  %v569_v34 = vadd.f32 %v561_v20, %v543_v26 }
 0x11b   :  { %v660_v35 = vpack.c.bf16 %v567_v33, %v566_v29  ;;  %v661_v36 = vpack.c.bf16 %v569_v34, %v568_v30 }
 0x11d   :  { %586 = vst [vmem:[%s996_s4] sm:$0xff] %v660_v35  ;;  %587 = vst [vmem:[%s996_s4 + $0x8] sm:$0xff] %v661_v36 }

// kernel: resnet18_backbone.39
= control target key start
LH: loop header
LB: loop body
LE: loop exit
PB: predicated region body
PF: predicated region fallthrough
CT: control target
= control target key end

     0   :  { %s2663_s18 = smov 0   ;;  %s2665_s19 = smov 0   ;;  %s2949_s0 = inlined_call_operand.vmem [shape: bf16[8,4608], index: 0, kind: input, shape index: {}]   ;;  %s2950_s1 = inlined_call_operand.vmem [shape: bf16[4608,512], index: 1, kind: input, shape index: {}]   ;;  %s2951_s2 = inlined_call_operand.vmem [shape: f32[1,512], index: 2, kind: input, shape index: {}]   ;;  %s2952_s3 = inlined_call_operand.vmem [shape: f32[1,512], index: 3, kind: input, shape index: {}]   ;;  %s2953_s4 = inlined_call_operand.vmem [shape: bf16[8,512], index: 4, kind: input, shape index: {}]   ;;  %s2954_s5 = inlined_call_operand.vmem [shape: bf16[8,512], index: 5, kind: output, shape index: {}]  }
   0x1   :  { %s2667_s20 = smov 0  }
   0x2 LB: > { %s27_s21 = sadd.s32 1, %s2626_s19  ;;  %p2076_p0 = scmp.ge.s32.totalorder %s2630_s20, 1  ;;  %s2630_s20 = sphi %s2667_s20, %s15_s20   ;;  %s2626_s19 = sphi %s2665_s19, %s2956_s19   ;;  %s2622_s18 = sphi %s2663_s18, %s2955_s18  }
   0x3   : > { %p28_p1 = scmp.ge.s32.totalorder %s27_s21, 6  ;;  %p271_p2 = scmp.lt.s32.totalorder %s2630_s20, 7 }
   0x5   : > { %s2958_s21 = smov (%p28_p1, %s27_s21), 0  ;;  %p272_p3 = pnand %p2076_p0, %p271_p2 }
   0x6   : > { %s334_s22 = smul.u32 (!%p272_p3), 6, %s2622_s18  ;;  %p2080_p6 = scmp.ne.s32.totalorder (!%p272_p3), %s2622_s18, 0 }
   0x7   : > { %275 = sbr.rel (%p272_p3) target bundleno = 455 (0x1c7), region = 40 }
   0x8   : > { %s344_s23 = smul.u32 (!%p272_p3), 96, %s2622_s18  ;;  %p337_p4 = scmp.lt.s32.totalorder (!%p272_p3), %s334_s22, 35 }
   0xa   : > { %p346_p5 = scmp.lt.s32.totalorder (!%p272_p3), %s344_s23, 575 }
   0xe   : > { %s2960_s22 = smov (!%p337_p4, %s334_s22), 35  ;;  %s2962_s23 = smov (!%p346_p5, %s344_s23), 575 }
   0xf   : > { %s2077_s24 = sshll.u32 %s2960_s22, 2  ;;  %s2286_s28 = sshll.u32 %s2962_s23, 4  ;;  %v2632_v0 = vmov (!%p2080_p6), 0.0  }
  0x10   : > { %s2688_s27 = scalar_lea.vmem %s2949_s0, %s2077_s24  ;;  %s2693_s6 = scalar_lea.vmem %s2950_s1, %s2286_s28  ;;  %390 = vst [vmem:[#allocation2] sm:$0xff] (!%p2080_p6), %v2632_v0  ;;  %391 = vst [vmem:[#allocation2 + $0x8] sm:$0xff] (!%p2080_p6), %v2632_v0 }
  0x11   : > { %389 = sbr.rel (%p2080_p6) target bundleno = 24 (0x18), region = 44  ;;  %392 = vst [vmem:[#allocation2 + $0x10] sm:$0xff] (!%p2080_p6), %v2632_v0  ;;  %393 = vst [vmem:[#allocation2 + $0x18] sm:$0xff] (!%p2080_p6), %v2632_v0 }
  0x18 PF: > { %v2314_v1 = vld [vmem:[%s2693_s6 + $0x4] ss:$16 sps:$4 sm:$0xff]   ;;  %v2318_v3 = vld [vmem:[%s2693_s6] ss:$16 sps:$4 sm:$0xff]   ;;  %v399_v49 = vld [vmem:[%s2688_s27 + $0x8] sm:$0xff]  ;;  %p2279_p7 = scmp.ne.s32.totalorder %s2622_s18, 5 }
  0x19   : > { %v2316_v2 = vld [vmem:[%s2693_s6 + $0x204] ss:$16 sps:$4 sm:$0xff]   ;;  %1574 = vmatprep.subr.bf16.mxu0 %v2314_v1  ;;  %v2319_v4 = vld [vmem:[%s2693_s6 + $0x200] ss:$16 sps:$4 sm:$0xff]   ;;  %v2748_v52 = vcombine.high %v399_v49, %v399_v49 }
  0x1a   : > { %1615 = vmatprep.subr.bf16.mxu1 %v2316_v2  ;;  %v2320_v5 = vld [vmem:[%s2693_s6 + $0x24] ss:$16 sps:$4 sm:$0xff]   ;;  %1575 = vmatpush1.bf16.msra.mxu0 %v2318_v3  ;;  %v2324_v7 = vld [vmem:[%s2693_s6 + $0x20] ss:$16 sps:$4 sm:$0xff]  }
  0x1b   : > { %1616 = vmatpush1.bf16.msra.mxu1 %v2319_v4  ;;  %v2322_v6 = vld [vmem:[%s2693_s6 + $0x224] ss:$16 sps:$4 sm:$0xff]   ;;  %1576 = vmatprep.subr.bf16.mxu0 %v2320_v5  ;;  %v2325_v8 = vld [vmem:[%s2693_s6 + $0x220] ss:$16 sps:$4 sm:$0xff]  }
  0x1c   : > { %1617 = vmatprep.subr.bf16.mxu1 %v2322_v6  ;;  %v2326_v9 = vld [vmem:[%s2693_s6 + $0x44] ss:$16 sps:$4 sm:$0xff]   ;;  %v2330_v11 = vld [vmem:[%s2693_s6 + $0x40] ss:$16 sps:$4 sm:$0xff]   ;;  %1647 = vmatprep.mubr.bf16.mxu1 %v2748_v52  ;;  %v2419_v6 = vld [vmem:[%s2693_s6 + $0xc] ss:$16 sps:$4 sm:$0xff]  }
  0x1d   : > { %v2328_v10 = vld [vmem:[%s2693_s6 + $0x244] ss:$16 sps:$4 sm:$0xff]   ;;  %v2331_v12 = vld [vmem:[%s2693_s6 + $0x240] ss:$16 sps:$4 sm:$0xff]  }
  0x1e   : > { %1577 = vmatpush1.bf16.msra.mxu0 %v2324_v7  ;;  %v2332_v13 = vld [vmem:[%s2693_s6 + $0x64] ss:$16 sps:$4 sm:$0xff]   ;;  %v2336_v15 = vld [vmem:[%s2693_s6 + $0x60] ss:$16 sps:$4 sm:$0xff]  }
  0x1f   : > { %1618 = vmatpush1.bf16.msra.mxu1 %v2325_v8  ;;  %1578 = vmatprep.subr.bf16.mxu0 %v2326_v9  ;;  %v2334_v14 = vld [vmem:[%s2693_s6 + $0x264] ss:$16 sps:$4 sm:$0xff]   ;;  %v2337_v16 = vld [vmem:[%s2693_s6 + $0x260] ss:$16 sps:$4 sm:$0xff]   ;;  %v2772_v8 = vcombine.low %v399_v49, %v399_v49 }
  0x20   : > { %1619 = vmatprep.subr.bf16.mxu1 %v2328_v10  ;;  %v2338_v17 = vld [vmem:[%s2693_s6 + $0x84] ss:$16 sps:$4 sm:$0xff]   ;;  %v2342_v19 = vld [vmem:[%s2693_s6 + $0x80] ss:$16 sps:$4 sm:$0xff]   ;;  %v2417_v10 = vld [vmem:[%s2693_s6 + $0x8] ss:$16 sps:$4 sm:$0xff]  }
  0x21   : > { %v2340_v18 = vld [vmem:[%s2693_s6 + $0x284] ss:$16 sps:$4 sm:$0xff]   ;;  %v2343_v20 = vld [vmem:[%s2693_s6 + $0x280] ss:$16 sps:$4 sm:$0xff]  }
  0x22   : > { %1579 = vmatpush1.bf16.msra.mxu0 %v2330_v11  ;;  %v2344_v21 = vld [vmem:[%s2693_s6 + $0xa4] ss:$16 sps:$4 sm:$0xff]   ;;  %v2348_v23 = vld [vmem:[%s2693_s6 + $0xa0] ss:$16 sps:$4 sm:$0xff]  }
  0x23   : > { %1620 = vmatpush1.bf16.msra.mxu1 %v2331_v12  ;;  %1580 = vmatprep.subr.bf16.mxu0 %v2332_v13  ;;  %v2346_v22 = vld [vmem:[%s2693_s6 + $0x2a4] ss:$16 sps:$4 sm:$0xff]   ;;  %v2349_v24 = vld [vmem:[%s2693_s6 + $0x2a0] ss:$16 sps:$4 sm:$0xff]   ;;  %v2425_v12 = vld [vmem:[%s2693_s6 + $0x2c] ss:$16 sps:$4 sm:$0xff]  }
  0x24   : > { %1621 = vmatprep.subr.bf16.mxu1 %v2334_v14  ;;  %v2350_v25 = vld [vmem:[%s2693_s6 + $0xc4] ss:$16 sps:$4 sm:$0xff]   ;;  %v2354_v27 = vld [vmem:[%s2693_s6 + $0xc0] ss:$16 sps:$4 sm:$0xff]   ;;  %v2423_v14 = vld [vmem:[%s2693_s6 + $0x28] ss:$16 sps:$4 sm:$0xff]  }
  0x25   : > { %v2352_v26 = vld [vmem:[%s2693_s6 + $0x2c4] ss:$16 sps:$4 sm:$0xff]   ;;  %v2355_v28 = vld [vmem:[%s2693_s6 + $0x2c0] ss:$16 sps:$4 sm:$0xff]  }
  0x26   : > { %1581 = vmatpush1.bf16.msra.mxu0 %v2336_v15  ;;  %v2356_v29 = vld [vmem:[%s2693_s6 + $0xe4] ss:$16 sps:$4 sm:$0xff]   ;;  %v2360_v31 = vld [vmem:[%s2693_s6 + $0xe0] ss:$16 sps:$4 sm:$0xff]  }
  0x27   : > { %1622 = vmatpush1.bf16.msra.mxu1 %v2337_v16  ;;  %1582 = vmatprep.subr.bf16.mxu0 %v2338_v17  ;;  %v2358_v30 = vld [vmem:[%s2693_s6 + $0x2e4] ss:$16 sps:$4 sm:$0xff]   ;;  %v2361_v32 = vld [vmem:[%s2693_s6 + $0x2e0] ss:$16 sps:$4 sm:$0xff]   ;;  %v2431_v16 = vld [vmem:[%s2693_s6 + $0x4c] ss:$16 sps:$4 sm:$0xff]  }
  0x28   : > { %1623 = vmatprep.subr.bf16.mxu1 %v2340_v18  ;;  %v2362_v33 = vld [vmem:[%s2693_s6 + $0x104] ss:$16 sps:$4 sm:$0xff]   ;;  %v2366_v35 = vld [vmem:[%s2693_s6 + $0x100] ss:$16 sps:$4 sm:$0xff]   ;;  %v2429_v18 = vld [vmem:[%s2693_s6 + $0x48] ss:$16 sps:$4 sm:$0xff]  }
  0x29   : > { %v2364_v34 = vld [vmem:[%s2693_s6 + $0x304] ss:$16 sps:$4 sm:$0xff]   ;;  %v2367_v36 = vld [vmem:[%s2693_s6 + $0x300] ss:$16 sps:$4 sm:$0xff]  }
  0x2a   : > { %1583 = vmatpush1.bf16.msra.mxu0 %v2342_v19  ;;  %v2368_v37 = vld [vmem:[%s2693_s6 + $0x124] ss:$16 sps:$4 sm:$0xff]   ;;  %v2372_v39 = vld [vmem:[%s2693_s6 + $0x120] ss:$16 sps:$4 sm:$0xff]  }
  0x2b   : > { %1624 = vmatpush1.bf16.msra.mxu1 %v2343_v20  ;;  %1584 = vmatprep.subr.bf16.mxu0 %v2344_v21  ;;  %v2370_v38 = vld [vmem:[%s2693_s6 + $0x324] ss:$16 sps:$4 sm:$0xff]   ;;  %v2373_v40 = vld [vmem:[%s2693_s6 + $0x320] ss:$16 sps:$4 sm:$0xff]   ;;  %v2437_v20 = vld [vmem:[%s2693_s6 + $0x6c] ss:$16 sps:$4 sm:$0xff]  }
  0x2c   : > { %1625 = vmatprep.subr.bf16.mxu1 %v2346_v22  ;;  %v2374_v41 = vld [vmem:[%s2693_s6 + $0x144] ss:$16 sps:$4 sm:$0xff]   ;;  %v2378_v43 = vld [vmem:[%s2693_s6 + $0x140] ss:$16 sps:$4 sm:$0xff]   ;;  %v2435_v22 = vld [vmem:[%s2693_s6 + $0x68] ss:$16 sps:$4 sm:$0xff]  }
  0x2d   : > { %v2376_v42 = vld [vmem:[%s2693_s6 + $0x344] ss:$16 sps:$4 sm:$0xff]   ;;  %v2379_v44 = vld [vmem:[%s2693_s6 + $0x340] ss:$16 sps:$4 sm:$0xff]  }
  0x2e   : > { %1585 = vmatpush1.bf16.msra.mxu0 %v2348_v23  ;;  %v2380_v45 = vld [vmem:[%s2693_s6 + $0x164] ss:$16 sps:$4 sm:$0xff]   ;;  %v2384_v50 = vld [vmem:[%s2693_s6 + $0x160] ss:$16 sps:$4 sm:$0xff]  }
  0x2f   : > { %1626 = vmatpush1.bf16.msra.mxu1 %v2349_v24  ;;  %1586 = vmatprep.subr.bf16.mxu0 %v2350_v25  ;;  %v2382_v46 = vld [vmem:[%s2693_s6 + $0x364] ss:$16 sps:$4 sm:$0xff]   ;;  %v2385_v51 = vld [vmem:[%s2693_s6 + $0x360] ss:$16 sps:$4 sm:$0xff]   ;;  %v2443_v24 = vld [vmem:[%s2693_s6 + $0x8c] ss:$16 sps:$4 sm:$0xff]  }
  0x30   : > { %1627 = vmatprep.subr.bf16.mxu1 %v2352_v26  ;;  %v398_v47 = vld [vmem:[%s2688_s27] sm:$0xff]  ;;  %v2441_v26 = vld [vmem:[%s2693_s6 + $0x88] ss:$16 sps:$4 sm:$0xff]  }
  0x31   : > { %v2743_v48 = vcombine.high %v398_v47, %v398_v47  ;;  %v2386_v53 = vld [vmem:[%s2693_s6 + $0x184] ss:$16 sps:$4 sm:$0xff]   ;;  %v2390_v55 = vld [vmem:[%s2693_s6 + $0x180] ss:$16 sps:$4 sm:$0xff]   ;;  %v2770_v7 = vcombine.low %v398_v47, %v398_v47 }
  0x32   : > { %1587 = vmatpush1.bf16.msra.mxu0 %v2354_v27  ;;  %v2388_v54 = vld [vmem:[%s2693_s6 + $0x384] ss:$16 sps:$4 sm:$0xff]   ;;  %v2391_v56 = vld [vmem:[%s2693_s6 + $0x380] ss:$16 sps:$4 sm:$0xff]  }
  0x33   : > { %1628 = vmatpush1.bf16.msra.mxu1 %v2355_v28  ;;  %1588 = vmatprep.subr.bf16.mxu0 %v2356_v29  ;;  %v2392_v57 = vld [vmem:[%s2693_s6 + $0x1a4] ss:$16 sps:$4 sm:$0xff]   ;;  %v2396_v59 = vld [vmem:[%s2693_s6 + $0x1a0] ss:$16 sps:$4 sm:$0xff]   ;;  %v2449_v28 = vld [vmem:[%s2693_s6 + $0xac] ss:$16 sps:$4 sm:$0xff]  }
  0x34   : > { %1629 = vmatprep.subr.bf16.mxu1 %v2358_v30  ;;  %1606 = vmatprep.mubr.bf16.mxu0 %v2743_v48  ;;  %v2394_v58 = vld [vmem:[%s2693_s6 + $0x3a4] ss:$16 sps:$4 sm:$0xff]   ;;  %v2397_v60 = vld [vmem:[%s2693_s6 + $0x3a0] ss:$16 sps:$4 sm:$0xff]   ;;  %v2447_v30 = vld [vmem:[%s2693_s6 + $0xa8] ss:$16 sps:$4 sm:$0xff]  }
  0x35   : > { %v2398_v61 = vld [vmem:[%s2693_s6 + $0x1c4] ss:$16 sps:$4 sm:$0xff]   ;;  %v2402_v63 = vld [vmem:[%s2693_s6 + $0x1c0] ss:$16 sps:$4 sm:$0xff]  }
  0x36   : > { %1589 = vmatpush1.bf16.msra.mxu0 %v2360_v31  ;;  %v2400_v62 = vld [vmem:[%s2693_s6 + $0x3c4] ss:$16 sps:$4 sm:$0xff]   ;;  %v2403_v0 = vld [vmem:[%s2693_s6 + $0x3c0] ss:$16 sps:$4 sm:$0xff]  }
  0x37   : > { %1630 = vmatpush1.bf16.msra.mxu1 %v2361_v32  ;;  %1590 = vmatprep.subr.bf16.mxu0 %v2362_v33  ;;  %v2404_v1 = vld [vmem:[%s2693_s6 + $0x1e4] ss:$16 sps:$4 sm:$0xff]   ;;  %v2408_v3 = vld [vmem:[%s2693_s6 + $0x1e0] ss:$16 sps:$4 sm:$0xff]   ;;  %v2455_v32 = vld [vmem:[%s2693_s6 + $0xcc] ss:$16 sps:$4 sm:$0xff]  }
  0x38   : > { %1631 = vmatprep.subr.bf16.mxu1 %v2364_v34  ;;  %v2406_v2 = vld [vmem:[%s2693_s6 + $0x3e4] ss:$16 sps:$4 sm:$0xff]   ;;  %v2409_v4 = vld [vmem:[%s2693_s6 + $0x3e0] ss:$16 sps:$4 sm:$0xff]  }
  0x39   : > { %v2416_v5 = vld [vmem:[%s2693_s6 + $0x404] ss:$16 sps:$4 sm:$0xff]   ;;  %v2414_v9 = vld [vmem:[%s2693_s6 + $0x400] ss:$16 sps:$4 sm:$0xff]  }
  0x3a   : > { %1591 = vmatpush1.bf16.msra.mxu0 %v2366_v35  ;;  %v2422_v11 = vld [vmem:[%s2693_s6 + $0x424] ss:$16 sps:$4 sm:$0xff]   ;;  %v2420_v13 = vld [vmem:[%s2693_s6 + $0x420] ss:$16 sps:$4 sm:$0xff]  }
  0x3b   : > { %1632 = vmatpush1.bf16.msra.mxu1 %v2367_v36  ;;  %1592 = vmatprep.subr.bf16.mxu0 %v2368_v37  ;;  %v2428_v15 = vld [vmem:[%s2693_s6 + $0x444] ss:$16 sps:$4 sm:$0xff]   ;;  %v2426_v17 = vld [vmem:[%s2693_s6 + $0x440] ss:$16 sps:$4 sm:$0xff]   ;;  %v2453_v36 = vld [vmem:[%s2693_s6 + $0xc8] ss:$16 sps:$4 sm:$0xff]  }
  0x3c   : > { %1633 = vmatprep.subr.bf16.mxu1 %v2370_v38  ;;  %v2434_v19 = vld [vmem:[%s2693_s6 + $0x464] ss:$16 sps:$4 sm:$0xff]   ;;  %v2432_v21 = vld [vmem:[%s2693_s6 + $0x460] ss:$16 sps:$4 sm:$0xff]   ;;  %v2461_v38 = vld [vmem:[%s2693_s6 + $0xec] ss:$16 sps:$4 sm:$0xff]  }
  0x3d   : > { %v2440_v23 = vld [vmem:[%s2693_s6 + $0x484] ss:$16 sps:$4 sm:$0xff]   ;;  %v2438_v25 = vld [vmem:[%s2693_s6 + $0x480] ss:$16 sps:$4 sm:$0xff]  }
  0x3e   : > { %1593 = vmatpush1.bf16.msra.mxu0 %v2372_v39  ;;  %v2446_v27 = vld [vmem:[%s2693_s6 + $0x4a4] ss:$16 sps:$4 sm:$0xff]   ;;  %v2444_v29 = vld [vmem:[%s2693_s6 + $0x4a0] ss:$16 sps:$4 sm:$0xff]  }
  0x3f   : > { %1634 = vmatpush1.bf16.msra.mxu1 %v2373_v40  ;;  %1594 = vmatprep.subr.bf16.mxu0 %v2374_v41  ;;  %v2452_v31 = vld [vmem:[%s2693_s6 + $0x4c4] ss:$16 sps:$4 sm:$0xff]   ;;  %v2450_v34 = vld [vmem:[%s2693_s6 + $0x4c0] ss:$16 sps:$4 sm:$0xff]   ;;  %v2459_v40 = vld [vmem:[%s2693_s6 + $0xe8] ss:$16 sps:$4 sm:$0xff]  }
  0x40   : > { %1635 = vmatprep.subr.bf16.mxu1 %v2376_v42  ;;  %v2802_v33 = vld [vmem:[%s2688_s27 + $0x10] sm:$0xff]  ;;  %v2467_v42 = vld [vmem:[%s2693_s6 + $0x10c] ss:$16 sps:$4 sm:$0xff]  }
  0x41   : > { %v2807_v35 = vcombine.high %v2802_v33, %v2802_v33  ;;  %v2458_v37 = vld [vmem:[%s2693_s6 + $0x4e4] ss:$16 sps:$4 sm:$0xff]   ;;  %v2456_v39 = vld [vmem:[%s2693_s6 + $0x4e0] ss:$16 sps:$4 sm:$0xff]  }
  0x42   : > { %1595 = vmatpush1.bf16.msra.mxu0 %v2378_v43  ;;  %v2464_v41 = vld [vmem:[%s2693_s6 + $0x504] ss:$16 sps:$4 sm:$0xff]   ;;  %v2462_v43 = vld [vmem:[%s2693_s6 + $0x500] ss:$16 sps:$4 sm:$0xff]  }
  0x43   : > { %1636 = vmatpush1.bf16.msra.mxu1 %v2379_v44  ;;  %1596 = vmatprep.subr.bf16.mxu0 %v2380_v45  ;;  %v2465_v44 = vld [vmem:[%s2693_s6 + $0x108] ss:$16 sps:$4 sm:$0xff]   ;;  %v2470_v45 = vld [vmem:[%s2693_s6 + $0x524] ss:$16 sps:$4 sm:$0xff]   ;;  %v2468_v47 = vld [vmem:[%s2693_s6 + $0x520] ss:$16 sps:$4 sm:$0xff]  }
  0x44   : > { %1637 = vmatprep.subr.bf16.mxu1 %v2382_v46  ;;  %v2473_v46 = vld [vmem:[%s2693_s6 + $0x12c] ss:$16 sps:$4 sm:$0xff]   ;;  %v2476_v49 = vld [vmem:[%s2693_s6 + $0x544] ss:$16 sps:$4 sm:$0xff]  }
  0x46   : > { %1597 = vmatpush1.bf16.msra.mxu0 %v2384_v50  ;;  %v2479_v50 = vld [vmem:[%s2693_s6 + $0x14c] ss:$16 sps:$4 sm:$0xff]  }
  0x47   : > { %1638 = vmatpush1.bf16.msra.mxu1 %v2385_v51  ;;  %1598 = vmatprep.subr.bf16.mxu0 %v2386_v53  ;;  %v2474_v51 = vld [vmem:[%s2693_s6 + $0x540] ss:$16 sps:$4 sm:$0xff]   ;;  %v2477_v53 = vld [vmem:[%s2693_s6 + $0x148] ss:$16 sps:$4 sm:$0xff]  }
  0x48   : > { %1639 = vmatprep.subr.bf16.mxu1 %v2388_v54  ;;  %v2482_v54 = vld [vmem:[%s2693_s6 + $0x564] ss:$16 sps:$4 sm:$0xff]  }
  0x4a   : > { %1599 = vmatpush1.bf16.msra.mxu0 %v2390_v55  ;;  %v2485_v55 = vld [vmem:[%s2693_s6 + $0x16c] ss:$16 sps:$4 sm:$0xff]  }
  0x4b   : > { %1640 = vmatpush1.bf16.msra.mxu1 %v2391_v56  ;;  %1600 = vmatprep.subr.bf16.mxu0 %v2392_v57  ;;  %v2480_v56 = vld [vmem:[%s2693_s6 + $0x560] ss:$16 sps:$4 sm:$0xff]   ;;  %v2483_v57 = vld [vmem:[%s2693_s6 + $0x168] ss:$16 sps:$4 sm:$0xff]  }
  0x4c   : > { %1641 = vmatprep.subr.bf16.mxu1 %v2394_v58  ;;  %v2488_v58 = vld [vmem:[%s2693_s6 + $0x584] ss:$16 sps:$4 sm:$0xff]  }
  0x4e   : > { %1601 = vmatpush1.bf16.msra.mxu0 %v2396_v59  ;;  %v2491_v59 = vld [vmem:[%s2693_s6 + $0x18c] ss:$16 sps:$4 sm:$0xff]  }
  0x4f   : > { %1642 = vmatpush1.bf16.msra.mxu1 %v2397_v60  ;;  %1602 = vmatprep.subr.bf16.mxu0 %v2398_v61  ;;  %v2486_v60 = vld [vmem:[%s2693_s6 + $0x580] ss:$16 sps:$4 sm:$0xff]   ;;  %v2489_v61 = vld [vmem:[%s2693_s6 + $0x188] ss:$16 sps:$4 sm:$0xff]  }
  0x50   : > { %1643 = vmatprep.subr.bf16.mxu1 %v2400_v62  ;;  %v2494_v62 = vld [vmem:[%s2693_s6 + $0x5a4] ss:$16 sps:$4 sm:$0xff]  }
  0x52   : > { %1603 = vmatpush1.bf16.msra.mxu0 %v2402_v63  ;;  %v2497_v63 = vld [vmem:[%s2693_s6 + $0x1ac] ss:$16 sps:$4 sm:$0xff]  }
  0x53   : > { %1644 = vmatpush1.bf16.msra.mxu1 %v2403_v0  ;;  %1604 = vmatprep.subr.bf16.mxu0 %v2404_v1  ;;  %v2492_v0 = vld [vmem:[%s2693_s6 + $0x5a0] ss:$16 sps:$4 sm:$0xff]   ;;  %v2495_v1 = vld [vmem:[%s2693_s6 + $0x1a8] ss:$16 sps:$4 sm:$0xff]  }
  0x54   : > { %1645 = vmatprep.subr.bf16.mxu1 %v2406_v2  ;;  %v2500_v2 = vld [vmem:[%s2693_s6 + $0x5c4] ss:$16 sps:$4 sm:$0xff]  }
  0x56   : > { %1605 = vmatpush1.bf16.msra.mxu0 %v2408_v3  ;;  %v2503_v3 = vld [vmem:[%s2693_s6 + $0x1cc] ss:$16 sps:$4 sm:$0xff]  }
  0x57   : > { %1646 = vmatpush1.bf16.msra.mxu1 %v2409_v4  ;;  %1656 = vmatprep.subr.bf16.mxu0 %v2416_v5  ;;  %v2498_v4 = vld [vmem:[%s2693_s6 + $0x5c0] ss:$16 sps:$4 sm:$0xff]   ;;  %v2501_v5 = vld [vmem:[%s2693_s6 + $0x1c8] ss:$16 sps:$4 sm:$0xff]  }
  0x58   : > { %1697 = vmatprep.subr.bf16.mxu1 %v2419_v6  ;;  %v2506_v6 = vld [vmem:[%s2693_s6 + $0x5e4] ss:$16 sps:$4 sm:$0xff]  }
  0x59   : > { %1607 = vmatmul.mubr.bf16.vlgmr.msra.gmra.mrb[0].mxu0 %v2770_v7 }
  0x5a   : > { %1648 = vmatmul.mubr.bf16.vlgmr.msra.gmra.mrb[0].mxu1 %v2772_v8  ;;  %1657 = vmatpush1.bf16.msra.mxu0 %v2414_v9  ;;  %v2509_v9 = vld [vmem:[%s2693_s6 + $0x1ec] ss:$16 sps:$4 sm:$0xff]  }
  0x5b   : > { %1698 = vmatpush1.bf16.msra.mxu1 %v2417_v10  ;;  %1658 = vmatprep.subr.bf16.mxu0 %v2422_v11  ;;  %v2504_v10 = vld [vmem:[%s2693_s6 + $0x5e0] ss:$16 sps:$4 sm:$0xff]   ;;  %v2507_v11 = vld [vmem:[%s2693_s6 + $0x1e8] ss:$16 sps:$4 sm:$0xff]  }
  0x5c   : > { %1699 = vmatprep.subr.bf16.mxu1 %v2425_v12  ;;  %1729 = vmatprep.mubr.bf16.mxu1 %v2743_v48  ;;  %v2471_v48 = vld [vmem:[%s2693_s6 + $0x128] ss:$16 sps:$4 sm:$0xff]   ;;  %v2514_v12 = vld [vmem:[%s2693_s6 + $0x20c] ss:$16 sps:$4 sm:$0xff]  }
  0x5d   : > { %1688 = vmatprep.mubr.bf16.mxu0 %v2807_v35 }
  0x5e   : > { %1659 = vmatpush1.bf16.msra.mxu0 %v2420_v13  ;;  %v2517_v13 = vld [vmem:[%s2693_s6 + $0x40c] ss:$16 sps:$4 sm:$0xff]  }
  0x5f   : > { %1700 = vmatpush1.bf16.msra.mxu1 %v2423_v14  ;;  %1660 = vmatprep.subr.bf16.mxu0 %v2428_v15  ;;  %v2851_v14 = vcombine.low %v2802_v33, %v2802_v33  ;;  %v2512_v15 = vld [vmem:[%s2693_s6 + $0x208] ss:$16 sps:$4 sm:$0xff]  }
  0x60   : > { %1701 = vmatprep.subr.bf16.mxu1 %v2431_v16  ;;  %v2515_v16 = vld [vmem:[%s2693_s6 + $0x408] ss:$16 sps:$4 sm:$0xff]  }
  0x61   : > { %v2542_v33 = vld [vmem:[%s2693_s6 + $0x2a8] ss:$16 sps:$4 sm:$0xff]  }
  0x62   : > { %1661 = vmatpush1.bf16.msra.mxu0 %v2426_v17  ;;  %v2520_v17 = vld [vmem:[%s2693_s6 + $0x22c] ss:$16 sps:$4 sm:$0xff]  }
  0x63   : > { %1702 = vmatpush1.bf16.msra.mxu1 %v2429_v18  ;;  %1662 = vmatprep.subr.bf16.mxu0 %v2434_v19  ;;  %v2523_v18 = vld [vmem:[%s2693_s6 + $0x42c] ss:$16 sps:$4 sm:$0xff]   ;;  %v2518_v19 = vld [vmem:[%s2693_s6 + $0x228] ss:$16 sps:$4 sm:$0xff]  }
  0x64   : > { %1703 = vmatprep.subr.bf16.mxu1 %v2437_v20  ;;  %v2521_v20 = vld [vmem:[%s2693_s6 + $0x428] ss:$16 sps:$4 sm:$0xff]  }
  0x66   : > { %1663 = vmatpush1.bf16.msra.mxu0 %v2432_v21  ;;  %v2526_v21 = vld [vmem:[%s2693_s6 + $0x24c] ss:$16 sps:$4 sm:$0xff]  }
  0x67   : > { %1704 = vmatpush1.bf16.msra.mxu1 %v2435_v22  ;;  %1664 = vmatprep.subr.bf16.mxu0 %v2440_v23  ;;  %v2529_v22 = vld [vmem:[%s2693_s6 + $0x44c] ss:$16 sps:$4 sm:$0xff]   ;;  %v2527_v23 = vld [vmem:[%s2693_s6 + $0x448] ss:$16 sps:$4 sm:$0xff]  }
  0x68   : > { %1705 = vmatprep.subr.bf16.mxu1 %v2443_v24  ;;  %v2532_v24 = vld [vmem:[%s2693_s6 + $0x26c] ss:$16 sps:$4 sm:$0xff]  }
  0x6a   : > { %1665 = vmatpush1.bf16.msra.mxu0 %v2438_v25  ;;  %v2535_v25 = vld [vmem:[%s2693_s6 + $0x46c] ss:$16 sps:$4 sm:$0xff]  }
  0x6b   : > { %1706 = vmatpush1.bf16.msra.mxu1 %v2441_v26  ;;  %1666 = vmatprep.subr.bf16.mxu0 %v2446_v27  ;;  %v2530_v26 = vld [vmem:[%s2693_s6 + $0x268] ss:$16 sps:$4 sm:$0xff]   ;;  %v2538_v27 = vld [vmem:[%s2693_s6 + $0x28c] ss:$16 sps:$4 sm:$0xff]  }
  0x6c   : > { %1707 = vmatprep.subr.bf16.mxu1 %v2449_v28  ;;  %v2541_v28 = vld [vmem:[%s2693_s6 + $0x48c] ss:$16 sps:$4 sm:$0xff]  }
  0x6e   : > { %1667 = vmatpush1.bf16.msra.mxu0 %v2444_v29  ;;  %v2536_v29 = vld [vmem:[%s2693_s6 + $0x288] ss:$16 sps:$4 sm:$0xff]  }
  0x6f   : > { %1708 = vmatpush1.bf16.msra.mxu1 %v2447_v30  ;;  %1668 = vmatprep.subr.bf16.mxu0 %v2452_v31  ;;  %v2539_v30 = vld [vmem:[%s2693_s6 + $0x488] ss:$16 sps:$4 sm:$0xff]   ;;  %v2544_v31 = vld [vmem:[%s2693_s6 + $0x2ac] ss:$16 sps:$4 sm:$0xff]  }
  0x70   : > { %1709 = vmatprep.subr.bf16.mxu1 %v2455_v32  ;;  %v2547_v32 = vld [vmem:[%s2693_s6 + $0x4ac] ss:$16 sps:$4 sm:$0xff]  }
  0x72   : > { %1669 = vmatpush1.bf16.msra.mxu0 %v2450_v34  ;;  %v2545_v34 = vld [vmem:[%s2693_s6 + $0x4a8] ss:$16 sps:$4 sm:$0xff]  }
  0x73   : > { %1710 = vmatpush1.bf16.msra.mxu1 %v2453_v36  ;;  %1670 = vmatprep.subr.bf16.mxu0 %v2458_v37  ;;  %v2553_v36 = vld [vmem:[%s2693_s6 + $0x4cc] ss:$16 sps:$4 sm:$0xff]   ;;  %v2548_v37 = vld [vmem:[%s2693_s6 + $0x2c8] ss:$16 sps:$4 sm:$0xff]  }
  0x74   : > { %1711 = vmatprep.subr.bf16.mxu1 %v2461_v38  ;;  %v2551_v38 = vld [vmem:[%s2693_s6 + $0x4c8] ss:$16 sps:$4 sm:$0xff]  }
  0x76   : > { %1671 = vmatpush1.bf16.msra.mxu0 %v2456_v39  ;;  %v2556_v39 = vld [vmem:[%s2693_s6 + $0x2ec] ss:$16 sps:$4 sm:$0xff]  }
  0x77   : > { %1712 = vmatpush1.bf16.msra.mxu1 %v2459_v40  ;;  %1672 = vmatprep.subr.bf16.mxu0 %v2464_v41  ;;  %v2559_v40 = vld [vmem:[%s2693_s6 + $0x4ec] ss:$16 sps:$4 sm:$0xff]   ;;  %v2554_v41 = vld [vmem:[%s2693_s6 + $0x2e8] ss:$16 sps:$4 sm:$0xff]  }
  0x78   : > { %1713 = vmatprep.subr.bf16.mxu1 %v2467_v42  ;;  %v2557_v42 = vld [vmem:[%s2693_s6 + $0x4e8] ss:$16 sps:$4 sm:$0xff]  }
  0x7a   : > { %1673 = vmatpush1.bf16.msra.mxu0 %v2462_v43  ;;  %v2562_v43 = vld [vmem:[%s2693_s6 + $0x30c] ss:$16 sps:$4 sm:$0xff]  }
  0x7b   : > { %1714 = vmatpush1.bf16.msra.mxu1 %v2465_v44  ;;  %1674 = vmatprep.subr.bf16.mxu0 %v2470_v45  ;;  %v2565_v44 = vld [vmem:[%s2693_s6 + $0x50c] ss:$16 sps:$4 sm:$0xff]   ;;  %v2560_v45 = vld [vmem:[%s2693_s6 + $0x308] ss:$16 sps:$4 sm:$0xff]  }
  0x7c   : > { %1715 = vmatprep.subr.bf16.mxu1 %v2473_v46  ;;  %v2563_v46 = vld [vmem:[%s2693_s6 + $0x508] ss:$16 sps:$4 sm:$0xff]  }
  0x7e   : > { %1675 = vmatpush1.bf16.msra.mxu0 %v2468_v47  ;;  %v2568_v47 = vld [vmem:[%s2693_s6 + $0x32c] ss:$16 sps:$4 sm:$0xff]  }
  0x7f   : > { %1716 = vmatpush1.bf16.msra.mxu1 %v2471_v48  ;;  %1676 = vmatprep.subr.bf16.mxu0 %v2476_v49  ;;  %v2571_v48 = vld [vmem:[%s2693_s6 + $0x52c] ss:$16 sps:$4 sm:$0xff]   ;;  %v2566_v49 = vld [vmem:[%s2693_s6 + $0x328] ss:$16 sps:$4 sm:$0xff]  }
  0x80   : > { %1717 = vmatprep.subr.bf16.mxu1 %v2479_v50  ;;  %v2569_v50 = vld [vmem:[%s2693_s6 + $0x528] ss:$16 sps:$4 sm:$0xff]  }
  0x82   : > { %1677 = vmatpush1.bf16.msra.mxu0 %v2474_v51  ;;  %v2574_v51 = vld [vmem:[%s2693_s6 + $0x34c] ss:$16 sps:$4 sm:$0xff]  }
  0x83   : > { %1718 = vmatpush1.bf16.msra.mxu1 %v2477_v53  ;;  %1678 = vmatprep.subr.bf16.mxu0 %v2482_v54  ;;  %v2577_v53 = vld [vmem:[%s2693_s6 + $0x54c] ss:$16 sps:$4 sm:$0xff]   ;;  %v2572_v54 = vld [vmem:[%s2693_s6 + $0x348] ss:$16 sps:$4 sm:$0xff]  }
  0x84   : > { %1719 = vmatprep.subr.bf16.mxu1 %v2485_v55  ;;  %v2575_v55 = vld [vmem:[%s2693_s6 + $0x548] ss:$16 sps:$4 sm:$0xff]  }
  0x86   : > { %1679 = vmatpush1.bf16.msra.mxu0 %v2480_v56  ;;  %v2580_v56 = vld [vmem:[%s2693_s6 + $0x36c] ss:$16 sps:$4 sm:$0xff]  }
  0x87   : > { %1720 = vmatpush1.bf16.msra.mxu1 %v2483_v57  ;;  %1680 = vmatprep.subr.bf16.mxu0 %v2488_v58  ;;  %v2583_v57 = vld [vmem:[%s2693_s6 + $0x56c] ss:$16 sps:$4 sm:$0xff]   ;;  %v2578_v58 = vld [vmem:[%s2693_s6 + $0x368] ss:$16 sps:$4 sm:$0xff]  }
  0x88   : > { %1721 = vmatprep.subr.bf16.mxu1 %v2491_v59  ;;  %v2581_v59 = vld [vmem:[%s2693_s6 + $0x568] ss:$16 sps:$4 sm:$0xff]  }
  0x8a   : > { %1681 = vmatpush1.bf16.msra.mxu0 %v2486_v60  ;;  %v2586_v60 = vld [vmem:[%s2693_s6 + $0x38c] ss:$16 sps:$4 sm:$0xff]  }
  0x8b   : > { %1722 = vmatpush1.bf16.msra.mxu1 %v2489_v61  ;;  %1682 = vmatprep.subr.bf16.mxu0 %v2494_v62  ;;  %v2589_v61 = vld [vmem:[%s2693_s6 + $0x58c] ss:$16 sps:$4 sm:$0xff]   ;;  %v2584_v62 = vld [vmem:[%s2693_s6 + $0x388] ss:$16 sps:$4 sm:$0xff]  }
  0x8c   : > { %1723 = vmatprep.subr.bf16.mxu1 %v2497_v63  ;;  %v2587_v63 = vld [vmem:[%s2693_s6 + $0x588] ss:$16 sps:$4 sm:$0xff]  }
  0x8e   : > { %1683 = vmatpush1.bf16.msra.mxu0 %v2492_v0  ;;  %v2592_v0 = vld [vmem:[%s2693_s6 + $0x3ac] ss:$16 sps:$4 sm:$0xff]  }
  0x8f   : > { %1724 = vmatpush1.bf16.msra.mxu1 %v2495_v1  ;;  %1684 = vmatprep.subr.bf16.mxu0 %v2500_v2  ;;  %v2595_v1 = vld [vmem:[%s2693_s6 + $0x5ac] ss:$16 sps:$4 sm:$0xff]   ;;  %v2590_v2 = vld [vmem:[%s2693_s6 + $0x3a8] ss:$16 sps:$4 sm:$0xff]  }
  0x90   : > { %1725 = vmatprep.subr.bf16.mxu1 %v2503_v3  ;;  %v2593_v3 = vld [vmem:[%s2693_s6 + $0x5a8] ss:$16 sps:$4 sm:$0xff]  }
  0x92   : > { %1685 = vmatpush1.bf16.msra.mxu0 %v2498_v4  ;;  %v2598_v4 = vld [vmem:[%s2693_s6 + $0x3cc] ss:$16 sps:$4 sm:$0xff]  }
  0x93   : > { %1726 = vmatpush1.bf16.msra.mxu1 %v2501_v5  ;;  %1686 = vmatprep.subr.bf16.mxu0 %v2506_v6  ;;  %v2601_v5 = vld [vmem:[%s2693_s6 + $0x5cc] ss:$16 sps:$4 sm:$0xff]   ;;  %v2596_v6 = vld [vmem:[%s2693_s6 + $0x3c8] ss:$16 sps:$4 sm:$0xff]  }
  0x94   : > { %1727 = vmatprep.subr.bf16.mxu1 %v2509_v9  ;;  %v2599_v9 = vld [vmem:[%s2693_s6 + $0x5c8] ss:$16 sps:$4 sm:$0xff]  }
  0x96   : > { %1687 = vmatpush1.bf16.msra.mxu0 %v2504_v10  ;;  %v2604_v10 = vld [vmem:[%s2693_s6 + $0x3ec] ss:$16 sps:$4 sm:$0xff]  }
  0x97   : > { %1728 = vmatpush1.bf16.msra.mxu1 %v2507_v11  ;;  %1738 = vmatprep.subr.bf16.mxu0 %v2514_v12  ;;  %v2607_v11 = vld [vmem:[%s2693_s6 + $0x5ec] ss:$16 sps:$4 sm:$0xff]   ;;  %v2602_v12 = vld [vmem:[%s2693_s6 + $0x3e8] ss:$16 sps:$4 sm:$0xff]  }
  0x98   : > { %1779 = vmatprep.subr.bf16.mxu1 %v2517_v13  ;;  %v2605_v13 = vld [vmem:[%s2693_s6 + $0x5e8] ss:$16 sps:$4 sm:$0xff]  }
  0x99   : > { %1689 = vmatmul.mubr.bf16.vlgmr.msra.gmra.mrb[4].mxu0 %v2851_v14 }
  0x9a   : > { %1730 = vmatmul.mubr.bf16.vlgmr.msra.gmra.mrb[4].mxu1 %v2770_v7  ;;  %1739 = vmatpush1.bf16.msra.mxu0 %v2512_v15  ;;  %v2524_v7 = vld [vmem:[%s2693_s6 + $0x248] ss:$16 sps:$4 sm:$0xff]  }
  0x9b   : > { %1780 = vmatpush1.bf16.msra.mxu1 %v2515_v16  ;;  %1740 = vmatprep.subr.bf16.mxu0 %v2520_v17 }
  0x9c   : > { %1781 = vmatprep.subr.bf16.mxu1 %v2523_v18  ;;  %1770 = vmatprep.mubr.bf16.mxu0 %v2748_v52  ;;  %v2533_v52 = vld [vmem:[%s2693_s6 + $0x468] ss:$16 sps:$4 sm:$0xff]  }
  0x9d   : > { %1811 = vmatprep.mubr.bf16.mxu1 %v2807_v35  ;;  %v2550_v35 = vld [vmem:[%s2693_s6 + $0x2cc] ss:$16 sps:$4 sm:$0xff]  }
  0x9e   : > { %1741 = vmatpush1.bf16.msra.mxu0 %v2518_v19 }
  0x9f   : > { %1782 = vmatpush1.bf16.msra.mxu1 %v2521_v20  ;;  %1742 = vmatprep.subr.bf16.mxu0 %v2526_v21 }
  0xa0   : > { %1783 = vmatprep.subr.bf16.mxu1 %v2529_v22 }
  0xa2   : > { %1743 = vmatpush1.bf16.msra.mxu0 %v2524_v7 }
  0xa3   : > { %1784 = vmatpush1.bf16.msra.mxu1 %v2527_v23  ;;  %1744 = vmatprep.subr.bf16.mxu0 %v2532_v24  ;;  %v394_v24 = vld [vmem:[#allocation2] sm:$0xff] }
  0xa4   : > { %1785 = vmatprep.subr.bf16.mxu1 %v2535_v25 }
  0xa6   : > { %1745 = vmatpush1.bf16.msra.mxu0 %v2530_v26 }
  0xa7   : > { %1786 = vmatpush1.bf16.msra.mxu1 %v2533_v52  ;;  %1746 = vmatprep.subr.bf16.mxu0 %v2538_v27  ;;  %v395_v27 = vld [vmem:[#allocation2 + $0x8] sm:$0xff] }
  0xa8   : > { %1787 = vmatprep.subr.bf16.mxu1 %v2541_v28 }
  0xaa   : > { %1747 = vmatpush1.bf16.msra.mxu0 %v2536_v29 }
  0xab   : > { %1788 = vmatpush1.bf16.msra.mxu1 %v2539_v30  ;;  %1748 = vmatprep.subr.bf16.mxu0 %v2544_v31 }
  0xac   : > { %1789 = vmatprep.subr.bf16.mxu1 %v2547_v32 }
  0xae   : > { %1749 = vmatpush1.bf16.msra.mxu0 %v2542_v33 }
  0xaf   : > { %1790 = vmatpush1.bf16.msra.mxu1 %v2545_v34  ;;  %1750 = vmatprep.subr.bf16.mxu0 %v2550_v35 }
  0xb0   : > { %1791 = vmatprep.subr.bf16.mxu1 %v2553_v36 }
  0xb2   : > { %1751 = vmatpush1.bf16.msra.mxu0 %v2548_v37 }
  0xb3   : > { %1792 = vmatpush1.bf16.msra.mxu1 %v2551_v38  ;;  %1752 = vmatprep.subr.bf16.mxu0 %v2556_v39 }
  0xb4   : > { %1793 = vmatprep.subr.bf16.mxu1 %v2559_v40  ;;  %v396_v40 = vld [vmem:[#allocation2 + $0x10] sm:$0xff] }
  0xb6   : > { %1753 = vmatpush1.bf16.msra.mxu0 %v2554_v41 }
  0xb7   : > { %1794 = vmatpush1.bf16.msra.mxu1 %v2557_v42  ;;  %1754 = vmatprep.subr.bf16.mxu0 %v2562_v43 }
  0xb8   : > { %1795 = vmatprep.subr.bf16.mxu1 %v2565_v44 }
  0xba   : > { %1755 = vmatpush1.bf16.msra.mxu0 %v2560_v45  ;;  %v397_v45 = vld [vmem:[#allocation2 + $0x18] sm:$0xff] }
  0xbb   : > { %1796 = vmatpush1.bf16.msra.mxu1 %v2563_v46  ;;  %1756 = vmatprep.subr.bf16.mxu0 %v2568_v47 }
  0xbc   : > { %1797 = vmatprep.subr.bf16.mxu1 %v2571_v48 }
  0xbe   : > { %1757 = vmatpush1.bf16.msra.mxu0 %v2566_v49 }
  0xbf   : > { %1798 = vmatpush1.bf16.msra.mxu1 %v2569_v50  ;;  %1758 = vmatprep.subr.bf16.mxu0 %v2574_v51  ;;  %v1838_v51 = vlaneseq (!%p2279_p7) }
  0xc0   : > { %1799 = vmatprep.subr.bf16.mxu1 %v2577_v53 }
  0xc1   : > { %v1839_v53 = vshrl.u32 (!%p2279_p7), %v1838_v51, 7 }
  0xc2   : > { %1759 = vmatpush1.bf16.msra.mxu0 %v2572_v54  ;;  %v1836_v54 = vld [vmem:[%s2951_s2] sm:$0xf] (!%p2279_p7) }
  0xc3   : > { %1800 = vmatpush1.bf16.msra.mxu1 %v2575_v55  ;;  %1760 = vmatprep.subr.bf16.mxu0 %v2580_v56  ;;  %v1862_v55 = vld [vmem:[%s2952_s3] sm:$0xf] (!%p2279_p7)  ;;  %v1840_v56 = vsub.s32 (!%p2279_p7), 0, %v1839_v53 }
  0xc4   : > { %1801 = vmatprep.subr.bf16.mxu1 %v2583_v57  ;;  %v1844_v57 = vsub.s32 (!%p2279_p7), 1, %v1839_v53 }
  0xc6   : > { %1761 = vmatpush1.bf16.msra.mxu0 %v2578_v58  ;;  %v1848_v58 = vsub.s32 (!%p2279_p7), 2, %v1839_v53 }
  0xc7   : > { %1802 = vmatpush1.bf16.msra.mxu1 %v2581_v59  ;;  %1762 = vmatprep.subr.bf16.mxu0 %v2586_v60  ;;  %v1852_v59 = vsub.s32 (!%p2279_p7), 3, %v1839_v53 }
  0xc8   : > { %1803 = vmatprep.subr.bf16.mxu1 %v2589_v61 }
  0xca   : > { %1763 = vmatpush1.bf16.msra.mxu0 %v2584_v62  ;;  %v1888_v62 = vld [vmem:[%s2953_s4] sm:$0xff] (!%p2279_p7) }
  0xcb   : > { %1804 = vmatpush1.bf16.msra.mxu1 %v2587_v63  ;;  %1764 = vmatprep.subr.bf16.mxu0 %v2592_v0  ;;  %v1841_v63 = vrot.slane (!%p2279_p7), %v1836_v54, %v1840_v56  ;;  %v1845_v0 = vrot.slane (!%p2279_p7), %v1836_v54, %v1844_v57 }
  0xcc   : > { %1805 = vmatprep.subr.bf16.mxu1 %v2595_v1  ;;  %v1867_v1 = vrot.slane (!%p2279_p7), %v1862_v55, %v1840_v56 }
  0xce   : > { %1765 = vmatpush1.bf16.msra.mxu0 %v2590_v2  ;;  %v1871_v2 = vrot.slane (!%p2279_p7), %v1862_v55, %v1844_v57 }
  0xcf   : > { %1806 = vmatpush1.bf16.msra.mxu1 %v2593_v3  ;;  %1766 = vmatprep.subr.bf16.mxu0 %v2598_v4 }
  0xd0   : > { %1807 = vmatprep.subr.bf16.mxu1 %v2601_v5  ;;  %v1889_v5 = vld [vmem:[%s2953_s4 + $0x8] sm:$0xff] (!%p2279_p7) }
  0xd2   : > { %1767 = vmatpush1.bf16.msra.mxu0 %v2596_v6  ;;  %v1849_v6 = vrot.slane (!%p2279_p7), %v1836_v54, %v1848_v58 }
  0xd3   : > { %1808 = vmatpush1.bf16.msra.mxu1 %v2599_v9  ;;  %1768 = vmatprep.subr.bf16.mxu0 %v2604_v10  ;;  %v1853_v9 = vrot.slane (!%p2279_p7), %v1836_v54, %v1852_v59  ;;  %v1875_v10 = vrot.slane (!%p2279_p7), %v1862_v55, %v1848_v58 }
  0xd4   : > { %1809 = vmatprep.subr.bf16.mxu1 %v2607_v11  ;;  %v1879_v11 = vrot.slane (!%p2279_p7), %v1862_v55, %v1852_v59 }
  0xd6   : > { %1769 = vmatpush1.bf16.msra.mxu0 %v2602_v12 }
  0xd7   : > { %1810 = vmatpush1.bf16.msra.mxu1 %v2605_v13 }
  0xd9   : > { %1771 = vmatmul.mubr.bf16.vlgmr.msra.gmra.mrb[8].mxu0 %v2772_v8 }
  0xda   : > { %1812 = vmatmul.mubr.bf16.vlgmr.msra.gmra.mrb[8].mxu1 %v2851_v14 }
 0x12c   : > { %v1608_v15 = vpop.f32.mrb[0].mxu0 }
 0x12d   : > { %v1649_v16 = vpop.f32.mrb[0].mxu1  ;;  %v1610_v18 = vpop.f32.mrb[1].mxu0 }
 0x12e   : > { %v1650_v17 = vadd.f32 %v1649_v16, %v1608_v15  ;;  %v1651_v19 = vpop.f32.mrb[1].mxu1  ;;  %v1612_v21 = vpop.f32.mrb[2].mxu0  ;;  %v1890_v15 = vunpack.c.l.bf16 (!%p2279_p7), %v1888_v62  ;;  %v1891_v16 = vunpack.c.h.bf16 (!%p2279_p7), %v1888_v62 }
 0x12f   : > { %v1652_v20 = vadd.f32 %v1651_v19, %v1610_v18  ;;  %v1653_v22 = vpop.f32.mrb[2].mxu1  ;;  %v1613_v7 = vpop.f32.mrb[3].mxu0  ;;  %v1892_v19 = vunpack.c.l.bf16 (!%p2279_p7), %v1889_v5 }
 0x130   : > { %v1654_v23 = vpop.f32.mrb[3].mxu1 }
 0x16c   : > { %v1690_v25 = vpop.f32.mrb[4].mxu0 }
 0x16d   : > { %v1731_v26 = vpop.f32.mrb[4].mxu1  ;;  %v1691_v52 = vadd.f32 %v1690_v25, %v1650_v17  ;;  %v1692_v28 = vpop.f32.mrb[5].mxu0 }
 0x16e   : > { %v1733_v29 = vpop.f32.mrb[5].mxu1  ;;  %v1693_v8 = vadd.f32 %v1692_v28, %v1652_v20  ;;  %v1694_v30 = vpop.f32.mrb[6].mxu0  ;;  %v1893_v20 = vunpack.c.h.bf16 (!%p2279_p7), %v1889_v5 }
 0x16f   : > { %v1735_v14 = vpop.f32.mrb[6].mxu1  ;;  %v1820_v31 = vadd.f32 %v1691_v52, %v394_v24  ;;  %v1695_v32 = vpop.f32.mrb[7].mxu0 }
 0x170   : > { %v1736_v33 = vpop.f32.mrb[7].mxu1  ;;  %v1821_v34 = vadd.f32 %v1693_v8, %v395_v27 }
 0x171   : > { %1824 = vst [vmem:[#allocation2] sm:$0xff] %v1820_v31 }
 0x172   : > { %1825 = vst [vmem:[#allocation2 + $0x8] sm:$0xff] %v1821_v34 }
 0x178   : > { %v1832_v60 = vld [vmem:[#allocation2] sm:$0xff] (!%p2279_p7) }
 0x179   : > { %v1833_v61 = vld [vmem:[#allocation2 + $0x8] sm:$0xff] (!%p2279_p7)  ;;  %v1858_v12 = vmul.f32 (!%p2279_p7), %v1841_v63, %v1832_v60 }
 0x17a   : > { %v1859_v13 = vmul.f32 (!%p2279_p7), %v1845_v0, %v1833_v61 }
 0x17b   : > { %v1884_v21 = vadd.f32 (!%p2279_p7), %v1867_v1, %v1858_v12 }
 0x17c   : > { %v1885_v22 = vadd.f32 (!%p2279_p7), %v1871_v2, %v1859_v13 }
 0x17d   : > { %v1894_v24 = vadd.f32 (!%p2279_p7), %v1890_v15, %v1884_v21 }
 0x17e   : > { %v1895_v25 = vadd.f32 (!%p2279_p7), %v1891_v16, %v1885_v22 }
 0x17f   : > { %v1898_v27 = vmax.f32 (!%p2279_p7), %v1894_v24, 0.0 }
 0x180   : > { %v1899_v28 = vmax.f32 (!%p2279_p7), %v1895_v25, 0.0 }
 0x182   : > { %v2287_v30 = vpack.c.bf16 (!%p2279_p7), %v1899_v28, %v1898_v27 }
 0x184   : > { %1918 = vst [vmem:[%s2954_s5] sm:$0xff] (!%p2279_p7), %v2287_v30 }
 0x1ac   : > { %v1772_v35 = vpop.f32.mrb[8].mxu0 }
 0x1ad   : > { %v1813_v36 = vpop.f32.mrb[8].mxu1  ;;  %v1773_v37 = vadd.f32 %v1772_v35, %v1731_v26  ;;  %v1774_v38 = vpop.f32.mrb[9].mxu0 }
 0x1ae   : > { %v1815_v39 = vpop.f32.mrb[9].mxu1  ;;  %v1775_v41 = vadd.f32 %v1774_v38, %v1733_v29  ;;  %v1776_v42 = vpop.f32.mrb[10].mxu0  ;;  %1831 = sbr.rel (%p2279_p7) target bundleno = 455 (0x1c7), region = 48 }
 0x1af   : > { %v1817_v43 = vpop.f32.mrb[10].mxu1  ;;  %v1814_v44 = vadd.f32 %v1813_v36, %v1773_v37  ;;  %v1777_v46 = vpop.f32.mrb[11].mxu0 }
 0x1b0   : > { %v1818_v47 = vpop.f32.mrb[11].mxu1  ;;  %v1816_v48 = vadd.f32 %v1815_v39, %v1775_v41 }
 0x1b1   : > { %v1822_v49 = vadd.f32 %v1814_v44, %v396_v40 }
 0x1b2   : > { %v1823_v50 = vadd.f32 %v1816_v48, %v397_v45 }
 0x1b3   : > { %1826 = vst [vmem:[#allocation2 + $0x10] sm:$0xff] %v1822_v49 }
 0x1b4   : > { %1827 = vst [vmem:[#allocation2 + $0x18] sm:$0xff] %v1823_v50 }
 0x1ba   : > { %v1834_v3 = vld [vmem:[#allocation2 + $0x10] sm:$0xff] }
 0x1bb   : > { %v1835_v4 = vld [vmem:[#allocation2 + $0x18] sm:$0xff]  ;;  %v1860_v17 = vmul.f32 %v1849_v6, %v1834_v3 }
 0x1bc   : > { %v1861_v18 = vmul.f32 %v1853_v9, %v1835_v4 }
 0x1bd   : > { %v1886_v7 = vadd.f32 %v1875_v10, %v1860_v17 }
 0x1be   : > { %v1887_v23 = vadd.f32 %v1879_v11, %v1861_v18 }
 0x1bf   : > { %v1896_v26 = vadd.f32 %v1892_v19, %v1886_v7 }
 0x1c0   : > { %v1897_v52 = vadd.f32 %v1893_v20, %v1887_v23 }
 0x1c1   : > { %v1900_v29 = vmax.f32 %v1896_v26, 0.0 }
 0x1c2   : > { %v1901_v8 = vmax.f32 %v1897_v52, 0.0 }
 0x1c4   : > { %v2288_v14 = vpack.c.bf16 %v1901_v8, %v1900_v29 }
 0x1c6   : > { %1919 = vst [vmem:[%s2954_s5 + $0x8] sm:$0xff] %v2288_v14 }
 0x1c7 PF: > { %s15_s20 = sadd.s32 1, %s2630_s20   ;;  %s2955_s18 = smov %s2626_s19 }
 0x1c8   : > { %p12_p8 = scmp.ge.s32.totalorder %s15_s20, 8   ;;  %s2956_s19 = smov %s2958_s21 }
 0x1ca   :  { %14 = sbr.rel (!%p12_p8) target bundleno = 2 (0x2), region = 90 }

// kernel: resnet18_backbone.40
= control target key start
LH: loop header
LB: loop body
LE: loop exit
PB: predicated region body
PF: predicated region fallthrough
CT: control target
= control target key end

     0   :  { %s2563_s15 = smov 0   ;;  %s2565_s16 = smov 0   ;;  %s2843_s0 = inlined_call_operand.vmem [shape: bf16[8,4608], index: 0, kind: input, shape index: {}]   ;;  %s2844_s1 = inlined_call_operand.vmem [shape: bf16[4608,512], index: 1, kind: input, shape index: {}]   ;;  %s2845_s2 = inlined_call_operand.vmem [shape: f32[1,512], index: 2, kind: input, shape index: {}]   ;;  %s2846_s3 = inlined_call_operand.vmem [shape: f32[1,512], index: 3, kind: input, shape index: {}]   ;;  %s2847_s4 = inlined_call_operand.vmem [shape: bf16[8,512], index: 4, kind: output, shape index: {}]  }
   0x1   :  { %s2567_s17 = smov 0  }
   0x2 LB: > { %s26_s18 = sadd.s32 1, %s2531_s16  ;;  %p1981_p0 = scmp.ge.s32.totalorder %s2535_s17, 1  ;;  %s2535_s17 = sphi %s2567_s17, %s14_s17   ;;  %s2531_s16 = sphi %s2565_s16, %s2849_s16   ;;  %s2527_s15 = sphi %s2563_s15, %s2848_s15  }
   0x3   : > { %p27_p1 = scmp.ge.s32.totalorder %s26_s18, 6  ;;  %p229_p2 = scmp.lt.s32.totalorder %s2535_s17, 7 }
   0x5   : > { %s2851_s18 = smov (%p27_p1, %s26_s18), 0  ;;  %p230_p3 = pnand %p1981_p0, %p229_p2 }
   0x6   : > { %s281_s19 = smul.u32 (!%p230_p3), 6, %s2527_s15  ;;  %p1985_p6 = scmp.ne.s32.totalorder (!%p230_p3), %s2527_s15, 0 }
   0x7   : > { %233 = sbr.rel (%p230_p3) target bundleno = 453 (0x1c5), region = 36 }
   0x8   : > { %s291_s20 = smul.u32 (!%p230_p3), 96, %s2527_s15  ;;  %p284_p4 = scmp.lt.s32.totalorder (!%p230_p3), %s281_s19, 35 }
   0xa   : > { %p293_p5 = scmp.lt.s32.totalorder (!%p230_p3), %s291_s20, 575 }
   0xe   : > { %s2853_s19 = smov (!%p284_p4, %s281_s19), 35  ;;  %s2855_s20 = smov (!%p293_p5, %s291_s20), 575 }
   0xf   : > { %s1982_s21 = sshll.u32 %s2853_s19, 2  ;;  %s2191_s25 = sshll.u32 %s2855_s20, 4  ;;  %v2537_v0 = vmov (!%p1985_p6), 0.0  }
  0x10   : > { %s2588_s24 = scalar_lea.vmem %s2843_s0, %s1982_s21  ;;  %s2593_s28 = scalar_lea.vmem %s2844_s1, %s2191_s25  ;;  %327 = vst [vmem:[#allocation2] sm:$0xff] (!%p1985_p6), %v2537_v0  ;;  %328 = vst [vmem:[#allocation2 + $0x8] sm:$0xff] (!%p1985_p6), %v2537_v0 }
  0x11   : > { %326 = sbr.rel (%p1985_p6) target bundleno = 24 (0x18), region = 40  ;;  %329 = vst [vmem:[#allocation2 + $0x10] sm:$0xff] (!%p1985_p6), %v2537_v0  ;;  %330 = vst [vmem:[#allocation2 + $0x18] sm:$0xff] (!%p1985_p6), %v2537_v0 }
  0x18 PF: > { %v2219_v1 = vld [vmem:[%s2593_s28 + $0x4] ss:$16 sps:$4 sm:$0xff]   ;;  %v2223_v3 = vld [vmem:[%s2593_s28] ss:$16 sps:$4 sm:$0xff]   ;;  %v336_v49 = vld [vmem:[%s2588_s24 + $0x8] sm:$0xff]  ;;  %p2184_p7 = scmp.ne.s32.totalorder %s2527_s15, 5 }
  0x19   : > { %v2221_v2 = vld [vmem:[%s2593_s28 + $0x204] ss:$16 sps:$4 sm:$0xff]   ;;  %1511 = vmatprep.subr.bf16.mxu0 %v2219_v1  ;;  %v2224_v4 = vld [vmem:[%s2593_s28 + $0x200] ss:$16 sps:$4 sm:$0xff]   ;;  %v2648_v52 = vcombine.high %v336_v49, %v336_v49 }
  0x1a   : > { %1552 = vmatprep.subr.bf16.mxu1 %v2221_v2  ;;  %v2225_v5 = vld [vmem:[%s2593_s28 + $0x24] ss:$16 sps:$4 sm:$0xff]   ;;  %1512 = vmatpush1.bf16.msra.mxu0 %v2223_v3  ;;  %v2229_v7 = vld [vmem:[%s2593_s28 + $0x20] ss:$16 sps:$4 sm:$0xff]  }
  0x1b   : > { %1553 = vmatpush1.bf16.msra.mxu1 %v2224_v4  ;;  %v2227_v6 = vld [vmem:[%s2593_s28 + $0x224] ss:$16 sps:$4 sm:$0xff]   ;;  %1513 = vmatprep.subr.bf16.mxu0 %v2225_v5  ;;  %v2230_v8 = vld [vmem:[%s2593_s28 + $0x220] ss:$16 sps:$4 sm:$0xff]  }
  0x1c   : > { %1554 = vmatprep.subr.bf16.mxu1 %v2227_v6  ;;  %v2231_v9 = vld [vmem:[%s2593_s28 + $0x44] ss:$16 sps:$4 sm:$0xff]   ;;  %v2235_v11 = vld [vmem:[%s2593_s28 + $0x40] ss:$16 sps:$4 sm:$0xff]   ;;  %1584 = vmatprep.mubr.bf16.mxu1 %v2648_v52  ;;  %v2324_v6 = vld [vmem:[%s2593_s28 + $0xc] ss:$16 sps:$4 sm:$0xff]  }
  0x1d   : > { %v2233_v10 = vld [vmem:[%s2593_s28 + $0x244] ss:$16 sps:$4 sm:$0xff]   ;;  %v2236_v12 = vld [vmem:[%s2593_s28 + $0x240] ss:$16 sps:$4 sm:$0xff]  }
  0x1e   : > { %1514 = vmatpush1.bf16.msra.mxu0 %v2229_v7  ;;  %v2237_v13 = vld [vmem:[%s2593_s28 + $0x64] ss:$16 sps:$4 sm:$0xff]   ;;  %v2241_v15 = vld [vmem:[%s2593_s28 + $0x60] ss:$16 sps:$4 sm:$0xff]  }
  0x1f   : > { %1555 = vmatpush1.bf16.msra.mxu1 %v2230_v8  ;;  %1515 = vmatprep.subr.bf16.mxu0 %v2231_v9  ;;  %v2239_v14 = vld [vmem:[%s2593_s28 + $0x264] ss:$16 sps:$4 sm:$0xff]   ;;  %v2242_v16 = vld [vmem:[%s2593_s28 + $0x260] ss:$16 sps:$4 sm:$0xff]   ;;  %v2672_v8 = vcombine.low %v336_v49, %v336_v49 }
  0x20   : > { %1556 = vmatprep.subr.bf16.mxu1 %v2233_v10  ;;  %v2243_v17 = vld [vmem:[%s2593_s28 + $0x84] ss:$16 sps:$4 sm:$0xff]   ;;  %v2247_v19 = vld [vmem:[%s2593_s28 + $0x80] ss:$16 sps:$4 sm:$0xff]   ;;  %v2322_v10 = vld [vmem:[%s2593_s28 + $0x8] ss:$16 sps:$4 sm:$0xff]  }
  0x21   : > { %v2245_v18 = vld [vmem:[%s2593_s28 + $0x284] ss:$16 sps:$4 sm:$0xff]   ;;  %v2248_v20 = vld [vmem:[%s2593_s28 + $0x280] ss:$16 sps:$4 sm:$0xff]  }
  0x22   : > { %1516 = vmatpush1.bf16.msra.mxu0 %v2235_v11  ;;  %v2249_v21 = vld [vmem:[%s2593_s28 + $0xa4] ss:$16 sps:$4 sm:$0xff]   ;;  %v2253_v23 = vld [vmem:[%s2593_s28 + $0xa0] ss:$16 sps:$4 sm:$0xff]  }
  0x23   : > { %1557 = vmatpush1.bf16.msra.mxu1 %v2236_v12  ;;  %1517 = vmatprep.subr.bf16.mxu0 %v2237_v13  ;;  %v2251_v22 = vld [vmem:[%s2593_s28 + $0x2a4] ss:$16 sps:$4 sm:$0xff]   ;;  %v2254_v24 = vld [vmem:[%s2593_s28 + $0x2a0] ss:$16 sps:$4 sm:$0xff]   ;;  %v2330_v12 = vld [vmem:[%s2593_s28 + $0x2c] ss:$16 sps:$4 sm:$0xff]  }
  0x24   : > { %1558 = vmatprep.subr.bf16.mxu1 %v2239_v14  ;;  %v2255_v25 = vld [vmem:[%s2593_s28 + $0xc4] ss:$16 sps:$4 sm:$0xff]   ;;  %v2259_v27 = vld [vmem:[%s2593_s28 + $0xc0] ss:$16 sps:$4 sm:$0xff]   ;;  %v2328_v14 = vld [vmem:[%s2593_s28 + $0x28] ss:$16 sps:$4 sm:$0xff]  }
  0x25   : > { %v2257_v26 = vld [vmem:[%s2593_s28 + $0x2c4] ss:$16 sps:$4 sm:$0xff]   ;;  %v2260_v28 = vld [vmem:[%s2593_s28 + $0x2c0] ss:$16 sps:$4 sm:$0xff]  }
  0x26   : > { %1518 = vmatpush1.bf16.msra.mxu0 %v2241_v15  ;;  %v2261_v29 = vld [vmem:[%s2593_s28 + $0xe4] ss:$16 sps:$4 sm:$0xff]   ;;  %v2265_v31 = vld [vmem:[%s2593_s28 + $0xe0] ss:$16 sps:$4 sm:$0xff]  }
  0x27   : > { %1559 = vmatpush1.bf16.msra.mxu1 %v2242_v16  ;;  %1519 = vmatprep.subr.bf16.mxu0 %v2243_v17  ;;  %v2263_v30 = vld [vmem:[%s2593_s28 + $0x2e4] ss:$16 sps:$4 sm:$0xff]   ;;  %v2266_v32 = vld [vmem:[%s2593_s28 + $0x2e0] ss:$16 sps:$4 sm:$0xff]   ;;  %v2336_v16 = vld [vmem:[%s2593_s28 + $0x4c] ss:$16 sps:$4 sm:$0xff]  }
  0x28   : > { %1560 = vmatprep.subr.bf16.mxu1 %v2245_v18  ;;  %v2267_v33 = vld [vmem:[%s2593_s28 + $0x104] ss:$16 sps:$4 sm:$0xff]   ;;  %v2271_v35 = vld [vmem:[%s2593_s28 + $0x100] ss:$16 sps:$4 sm:$0xff]   ;;  %v2334_v18 = vld [vmem:[%s2593_s28 + $0x48] ss:$16 sps:$4 sm:$0xff]  }
  0x29   : > { %v2269_v34 = vld [vmem:[%s2593_s28 + $0x304] ss:$16 sps:$4 sm:$0xff]   ;;  %v2272_v36 = vld [vmem:[%s2593_s28 + $0x300] ss:$16 sps:$4 sm:$0xff]  }
  0x2a   : > { %1520 = vmatpush1.bf16.msra.mxu0 %v2247_v19  ;;  %v2273_v37 = vld [vmem:[%s2593_s28 + $0x124] ss:$16 sps:$4 sm:$0xff]   ;;  %v2277_v39 = vld [vmem:[%s2593_s28 + $0x120] ss:$16 sps:$4 sm:$0xff]  }
  0x2b   : > { %1561 = vmatpush1.bf16.msra.mxu1 %v2248_v20  ;;  %1521 = vmatprep.subr.bf16.mxu0 %v2249_v21  ;;  %v2275_v38 = vld [vmem:[%s2593_s28 + $0x324] ss:$16 sps:$4 sm:$0xff]   ;;  %v2278_v40 = vld [vmem:[%s2593_s28 + $0x320] ss:$16 sps:$4 sm:$0xff]   ;;  %v2342_v20 = vld [vmem:[%s2593_s28 + $0x6c] ss:$16 sps:$4 sm:$0xff]  }
  0x2c   : > { %1562 = vmatprep.subr.bf16.mxu1 %v2251_v22  ;;  %v2279_v41 = vld [vmem:[%s2593_s28 + $0x144] ss:$16 sps:$4 sm:$0xff]   ;;  %v2283_v43 = vld [vmem:[%s2593_s28 + $0x140] ss:$16 sps:$4 sm:$0xff]   ;;  %v2340_v22 = vld [vmem:[%s2593_s28 + $0x68] ss:$16 sps:$4 sm:$0xff]  }
  0x2d   : > { %v2281_v42 = vld [vmem:[%s2593_s28 + $0x344] ss:$16 sps:$4 sm:$0xff]   ;;  %v2284_v44 = vld [vmem:[%s2593_s28 + $0x340] ss:$16 sps:$4 sm:$0xff]  }
  0x2e   : > { %1522 = vmatpush1.bf16.msra.mxu0 %v2253_v23  ;;  %v2285_v45 = vld [vmem:[%s2593_s28 + $0x164] ss:$16 sps:$4 sm:$0xff]   ;;  %v2289_v50 = vld [vmem:[%s2593_s28 + $0x160] ss:$16 sps:$4 sm:$0xff]  }
  0x2f   : > { %1563 = vmatpush1.bf16.msra.mxu1 %v2254_v24  ;;  %1523 = vmatprep.subr.bf16.mxu0 %v2255_v25  ;;  %v2287_v46 = vld [vmem:[%s2593_s28 + $0x364] ss:$16 sps:$4 sm:$0xff]   ;;  %v2290_v51 = vld [vmem:[%s2593_s28 + $0x360] ss:$16 sps:$4 sm:$0xff]   ;;  %v2348_v24 = vld [vmem:[%s2593_s28 + $0x8c] ss:$16 sps:$4 sm:$0xff]  }
  0x30   : > { %1564 = vmatprep.subr.bf16.mxu1 %v2257_v26  ;;  %v335_v47 = vld [vmem:[%s2588_s24] sm:$0xff]  ;;  %v2346_v26 = vld [vmem:[%s2593_s28 + $0x88] ss:$16 sps:$4 sm:$0xff]  }
  0x31   : > { %v2643_v48 = vcombine.high %v335_v47, %v335_v47  ;;  %v2291_v53 = vld [vmem:[%s2593_s28 + $0x184] ss:$16 sps:$4 sm:$0xff]   ;;  %v2295_v55 = vld [vmem:[%s2593_s28 + $0x180] ss:$16 sps:$4 sm:$0xff]   ;;  %v2670_v7 = vcombine.low %v335_v47, %v335_v47 }
  0x32   : > { %1524 = vmatpush1.bf16.msra.mxu0 %v2259_v27  ;;  %v2293_v54 = vld [vmem:[%s2593_s28 + $0x384] ss:$16 sps:$4 sm:$0xff]   ;;  %v2296_v56 = vld [vmem:[%s2593_s28 + $0x380] ss:$16 sps:$4 sm:$0xff]  }
  0x33   : > { %1565 = vmatpush1.bf16.msra.mxu1 %v2260_v28  ;;  %1525 = vmatprep.subr.bf16.mxu0 %v2261_v29  ;;  %v2297_v57 = vld [vmem:[%s2593_s28 + $0x1a4] ss:$16 sps:$4 sm:$0xff]   ;;  %v2301_v59 = vld [vmem:[%s2593_s28 + $0x1a0] ss:$16 sps:$4 sm:$0xff]   ;;  %v2354_v28 = vld [vmem:[%s2593_s28 + $0xac] ss:$16 sps:$4 sm:$0xff]  }
  0x34   : > { %1566 = vmatprep.subr.bf16.mxu1 %v2263_v30  ;;  %1543 = vmatprep.mubr.bf16.mxu0 %v2643_v48  ;;  %v2299_v58 = vld [vmem:[%s2593_s28 + $0x3a4] ss:$16 sps:$4 sm:$0xff]   ;;  %v2302_v60 = vld [vmem:[%s2593_s28 + $0x3a0] ss:$16 sps:$4 sm:$0xff]   ;;  %v2352_v30 = vld [vmem:[%s2593_s28 + $0xa8] ss:$16 sps:$4 sm:$0xff]  }
  0x35   : > { %v2303_v61 = vld [vmem:[%s2593_s28 + $0x1c4] ss:$16 sps:$4 sm:$0xff]   ;;  %v2307_v63 = vld [vmem:[%s2593_s28 + $0x1c0] ss:$16 sps:$4 sm:$0xff]  }
  0x36   : > { %1526 = vmatpush1.bf16.msra.mxu0 %v2265_v31  ;;  %v2305_v62 = vld [vmem:[%s2593_s28 + $0x3c4] ss:$16 sps:$4 sm:$0xff]   ;;  %v2308_v0 = vld [vmem:[%s2593_s28 + $0x3c0] ss:$16 sps:$4 sm:$0xff]  }
  0x37   : > { %1567 = vmatpush1.bf16.msra.mxu1 %v2266_v32  ;;  %1527 = vmatprep.subr.bf16.mxu0 %v2267_v33  ;;  %v2309_v1 = vld [vmem:[%s2593_s28 + $0x1e4] ss:$16 sps:$4 sm:$0xff]   ;;  %v2313_v3 = vld [vmem:[%s2593_s28 + $0x1e0] ss:$16 sps:$4 sm:$0xff]   ;;  %v2360_v32 = vld [vmem:[%s2593_s28 + $0xcc] ss:$16 sps:$4 sm:$0xff]  }
  0x38   : > { %1568 = vmatprep.subr.bf16.mxu1 %v2269_v34  ;;  %v2311_v2 = vld [vmem:[%s2593_s28 + $0x3e4] ss:$16 sps:$4 sm:$0xff]   ;;  %v2314_v4 = vld [vmem:[%s2593_s28 + $0x3e0] ss:$16 sps:$4 sm:$0xff]  }
  0x39   : > { %v2321_v5 = vld [vmem:[%s2593_s28 + $0x404] ss:$16 sps:$4 sm:$0xff]   ;;  %v2319_v9 = vld [vmem:[%s2593_s28 + $0x400] ss:$16 sps:$4 sm:$0xff]  }
  0x3a   : > { %1528 = vmatpush1.bf16.msra.mxu0 %v2271_v35  ;;  %v2327_v11 = vld [vmem:[%s2593_s28 + $0x424] ss:$16 sps:$4 sm:$0xff]   ;;  %v2325_v13 = vld [vmem:[%s2593_s28 + $0x420] ss:$16 sps:$4 sm:$0xff]  }
  0x3b   : > { %1569 = vmatpush1.bf16.msra.mxu1 %v2272_v36  ;;  %1529 = vmatprep.subr.bf16.mxu0 %v2273_v37  ;;  %v2333_v15 = vld [vmem:[%s2593_s28 + $0x444] ss:$16 sps:$4 sm:$0xff]   ;;  %v2331_v17 = vld [vmem:[%s2593_s28 + $0x440] ss:$16 sps:$4 sm:$0xff]   ;;  %v2358_v36 = vld [vmem:[%s2593_s28 + $0xc8] ss:$16 sps:$4 sm:$0xff]  }
  0x3c   : > { %1570 = vmatprep.subr.bf16.mxu1 %v2275_v38  ;;  %v2339_v19 = vld [vmem:[%s2593_s28 + $0x464] ss:$16 sps:$4 sm:$0xff]   ;;  %v2337_v21 = vld [vmem:[%s2593_s28 + $0x460] ss:$16 sps:$4 sm:$0xff]   ;;  %v2366_v38 = vld [vmem:[%s2593_s28 + $0xec] ss:$16 sps:$4 sm:$0xff]  }
  0x3d   : > { %v2345_v23 = vld [vmem:[%s2593_s28 + $0x484] ss:$16 sps:$4 sm:$0xff]   ;;  %v2343_v25 = vld [vmem:[%s2593_s28 + $0x480] ss:$16 sps:$4 sm:$0xff]  }
  0x3e   : > { %1530 = vmatpush1.bf16.msra.mxu0 %v2277_v39  ;;  %v2351_v27 = vld [vmem:[%s2593_s28 + $0x4a4] ss:$16 sps:$4 sm:$0xff]   ;;  %v2349_v29 = vld [vmem:[%s2593_s28 + $0x4a0] ss:$16 sps:$4 sm:$0xff]  }
  0x3f   : > { %1571 = vmatpush1.bf16.msra.mxu1 %v2278_v40  ;;  %1531 = vmatprep.subr.bf16.mxu0 %v2279_v41  ;;  %v2357_v31 = vld [vmem:[%s2593_s28 + $0x4c4] ss:$16 sps:$4 sm:$0xff]   ;;  %v2355_v34 = vld [vmem:[%s2593_s28 + $0x4c0] ss:$16 sps:$4 sm:$0xff]   ;;  %v2364_v40 = vld [vmem:[%s2593_s28 + $0xe8] ss:$16 sps:$4 sm:$0xff]  }
  0x40   : > { %1572 = vmatprep.subr.bf16.mxu1 %v2281_v42  ;;  %v2702_v33 = vld [vmem:[%s2588_s24 + $0x10] sm:$0xff]  ;;  %v2372_v42 = vld [vmem:[%s2593_s28 + $0x10c] ss:$16 sps:$4 sm:$0xff]  }
  0x41   : > { %v2707_v35 = vcombine.high %v2702_v33, %v2702_v33  ;;  %v2363_v37 = vld [vmem:[%s2593_s28 + $0x4e4] ss:$16 sps:$4 sm:$0xff]   ;;  %v2361_v39 = vld [vmem:[%s2593_s28 + $0x4e0] ss:$16 sps:$4 sm:$0xff]  }
  0x42   : > { %1532 = vmatpush1.bf16.msra.mxu0 %v2283_v43  ;;  %v2369_v41 = vld [vmem:[%s2593_s28 + $0x504] ss:$16 sps:$4 sm:$0xff]   ;;  %v2367_v43 = vld [vmem:[%s2593_s28 + $0x500] ss:$16 sps:$4 sm:$0xff]  }
  0x43   : > { %1573 = vmatpush1.bf16.msra.mxu1 %v2284_v44  ;;  %1533 = vmatprep.subr.bf16.mxu0 %v2285_v45  ;;  %v2370_v44 = vld [vmem:[%s2593_s28 + $0x108] ss:$16 sps:$4 sm:$0xff]   ;;  %v2375_v45 = vld [vmem:[%s2593_s28 + $0x524] ss:$16 sps:$4 sm:$0xff]   ;;  %v2373_v47 = vld [vmem:[%s2593_s28 + $0x520] ss:$16 sps:$4 sm:$0xff]  }
  0x44   : > { %1574 = vmatprep.subr.bf16.mxu1 %v2287_v46  ;;  %v2378_v46 = vld [vmem:[%s2593_s28 + $0x12c] ss:$16 sps:$4 sm:$0xff]   ;;  %v2381_v49 = vld [vmem:[%s2593_s28 + $0x544] ss:$16 sps:$4 sm:$0xff]  }
  0x46   : > { %1534 = vmatpush1.bf16.msra.mxu0 %v2289_v50  ;;  %v2384_v50 = vld [vmem:[%s2593_s28 + $0x14c] ss:$16 sps:$4 sm:$0xff]  }
  0x47   : > { %1575 = vmatpush1.bf16.msra.mxu1 %v2290_v51  ;;  %1535 = vmatprep.subr.bf16.mxu0 %v2291_v53  ;;  %v2379_v51 = vld [vmem:[%s2593_s28 + $0x540] ss:$16 sps:$4 sm:$0xff]   ;;  %v2382_v53 = vld [vmem:[%s2593_s28 + $0x148] ss:$16 sps:$4 sm:$0xff]  }
  0x48   : > { %1576 = vmatprep.subr.bf16.mxu1 %v2293_v54  ;;  %v2387_v54 = vld [vmem:[%s2593_s28 + $0x564] ss:$16 sps:$4 sm:$0xff]  }
  0x4a   : > { %1536 = vmatpush1.bf16.msra.mxu0 %v2295_v55  ;;  %v2390_v55 = vld [vmem:[%s2593_s28 + $0x16c] ss:$16 sps:$4 sm:$0xff]  }
  0x4b   : > { %1577 = vmatpush1.bf16.msra.mxu1 %v2296_v56  ;;  %1537 = vmatprep.subr.bf16.mxu0 %v2297_v57  ;;  %v2385_v56 = vld [vmem:[%s2593_s28 + $0x560] ss:$16 sps:$4 sm:$0xff]   ;;  %v2388_v57 = vld [vmem:[%s2593_s28 + $0x168] ss:$16 sps:$4 sm:$0xff]  }
  0x4c   : > { %1578 = vmatprep.subr.bf16.mxu1 %v2299_v58  ;;  %v2393_v58 = vld [vmem:[%s2593_s28 + $0x584] ss:$16 sps:$4 sm:$0xff]  }
  0x4e   : > { %1538 = vmatpush1.bf16.msra.mxu0 %v2301_v59  ;;  %v2396_v59 = vld [vmem:[%s2593_s28 + $0x18c] ss:$16 sps:$4 sm:$0xff]  }
  0x4f   : > { %1579 = vmatpush1.bf16.msra.mxu1 %v2302_v60  ;;  %1539 = vmatprep.subr.bf16.mxu0 %v2303_v61  ;;  %v2391_v60 = vld [vmem:[%s2593_s28 + $0x580] ss:$16 sps:$4 sm:$0xff]   ;;  %v2394_v61 = vld [vmem:[%s2593_s28 + $0x188] ss:$16 sps:$4 sm:$0xff]  }
  0x50   : > { %1580 = vmatprep.subr.bf16.mxu1 %v2305_v62  ;;  %v2399_v62 = vld [vmem:[%s2593_s28 + $0x5a4] ss:$16 sps:$4 sm:$0xff]  }
  0x52   : > { %1540 = vmatpush1.bf16.msra.mxu0 %v2307_v63  ;;  %v2402_v63 = vld [vmem:[%s2593_s28 + $0x1ac] ss:$16 sps:$4 sm:$0xff]  }
  0x53   : > { %1581 = vmatpush1.bf16.msra.mxu1 %v2308_v0  ;;  %1541 = vmatprep.subr.bf16.mxu0 %v2309_v1  ;;  %v2397_v0 = vld [vmem:[%s2593_s28 + $0x5a0] ss:$16 sps:$4 sm:$0xff]   ;;  %v2400_v1 = vld [vmem:[%s2593_s28 + $0x1a8] ss:$16 sps:$4 sm:$0xff]  }
  0x54   : > { %1582 = vmatprep.subr.bf16.mxu1 %v2311_v2  ;;  %v2405_v2 = vld [vmem:[%s2593_s28 + $0x5c4] ss:$16 sps:$4 sm:$0xff]  }
  0x56   : > { %1542 = vmatpush1.bf16.msra.mxu0 %v2313_v3  ;;  %v2408_v3 = vld [vmem:[%s2593_s28 + $0x1cc] ss:$16 sps:$4 sm:$0xff]  }
  0x57   : > { %1583 = vmatpush1.bf16.msra.mxu1 %v2314_v4  ;;  %1593 = vmatprep.subr.bf16.mxu0 %v2321_v5  ;;  %v2403_v4 = vld [vmem:[%s2593_s28 + $0x5c0] ss:$16 sps:$4 sm:$0xff]   ;;  %v2406_v5 = vld [vmem:[%s2593_s28 + $0x1c8] ss:$16 sps:$4 sm:$0xff]  }
  0x58   : > { %1634 = vmatprep.subr.bf16.mxu1 %v2324_v6  ;;  %v2411_v6 = vld [vmem:[%s2593_s28 + $0x5e4] ss:$16 sps:$4 sm:$0xff]  }
  0x59   : > { %1544 = vmatmul.mubr.bf16.vlgmr.msra.gmra.mrb[0].mxu0 %v2670_v7 }
  0x5a   : > { %1585 = vmatmul.mubr.bf16.vlgmr.msra.gmra.mrb[0].mxu1 %v2672_v8  ;;  %1594 = vmatpush1.bf16.msra.mxu0 %v2319_v9  ;;  %v2414_v9 = vld [vmem:[%s2593_s28 + $0x1ec] ss:$16 sps:$4 sm:$0xff]  }
  0x5b   : > { %1635 = vmatpush1.bf16.msra.mxu1 %v2322_v10  ;;  %1595 = vmatprep.subr.bf16.mxu0 %v2327_v11  ;;  %v2409_v10 = vld [vmem:[%s2593_s28 + $0x5e0] ss:$16 sps:$4 sm:$0xff]   ;;  %v2412_v11 = vld [vmem:[%s2593_s28 + $0x1e8] ss:$16 sps:$4 sm:$0xff]  }
  0x5c   : > { %1636 = vmatprep.subr.bf16.mxu1 %v2330_v12  ;;  %1666 = vmatprep.mubr.bf16.mxu1 %v2643_v48  ;;  %v2376_v48 = vld [vmem:[%s2593_s28 + $0x128] ss:$16 sps:$4 sm:$0xff]   ;;  %v2419_v12 = vld [vmem:[%s2593_s28 + $0x20c] ss:$16 sps:$4 sm:$0xff]  }
  0x5d   : > { %1625 = vmatprep.mubr.bf16.mxu0 %v2707_v35 }
  0x5e   : > { %1596 = vmatpush1.bf16.msra.mxu0 %v2325_v13  ;;  %v2422_v13 = vld [vmem:[%s2593_s28 + $0x40c] ss:$16 sps:$4 sm:$0xff]  }
  0x5f   : > { %1637 = vmatpush1.bf16.msra.mxu1 %v2328_v14  ;;  %1597 = vmatprep.subr.bf16.mxu0 %v2333_v15  ;;  %v2751_v14 = vcombine.low %v2702_v33, %v2702_v33  ;;  %v2417_v15 = vld [vmem:[%s2593_s28 + $0x208] ss:$16 sps:$4 sm:$0xff]  }
  0x60   : > { %1638 = vmatprep.subr.bf16.mxu1 %v2336_v16  ;;  %v2420_v16 = vld [vmem:[%s2593_s28 + $0x408] ss:$16 sps:$4 sm:$0xff]  }
  0x61   : > { %v2447_v33 = vld [vmem:[%s2593_s28 + $0x2a8] ss:$16 sps:$4 sm:$0xff]  }
  0x62   : > { %1598 = vmatpush1.bf16.msra.mxu0 %v2331_v17  ;;  %v2425_v17 = vld [vmem:[%s2593_s28 + $0x22c] ss:$16 sps:$4 sm:$0xff]  }
  0x63   : > { %1639 = vmatpush1.bf16.msra.mxu1 %v2334_v18  ;;  %1599 = vmatprep.subr.bf16.mxu0 %v2339_v19  ;;  %v2428_v18 = vld [vmem:[%s2593_s28 + $0x42c] ss:$16 sps:$4 sm:$0xff]   ;;  %v2423_v19 = vld [vmem:[%s2593_s28 + $0x228] ss:$16 sps:$4 sm:$0xff]  }
  0x64   : > { %1640 = vmatprep.subr.bf16.mxu1 %v2342_v20  ;;  %v2426_v20 = vld [vmem:[%s2593_s28 + $0x428] ss:$16 sps:$4 sm:$0xff]  }
  0x66   : > { %1600 = vmatpush1.bf16.msra.mxu0 %v2337_v21  ;;  %v2431_v21 = vld [vmem:[%s2593_s28 + $0x24c] ss:$16 sps:$4 sm:$0xff]  }
  0x67   : > { %1641 = vmatpush1.bf16.msra.mxu1 %v2340_v22  ;;  %1601 = vmatprep.subr.bf16.mxu0 %v2345_v23  ;;  %v2434_v22 = vld [vmem:[%s2593_s28 + $0x44c] ss:$16 sps:$4 sm:$0xff]   ;;  %v2432_v23 = vld [vmem:[%s2593_s28 + $0x448] ss:$16 sps:$4 sm:$0xff]  }
  0x68   : > { %1642 = vmatprep.subr.bf16.mxu1 %v2348_v24  ;;  %v2437_v24 = vld [vmem:[%s2593_s28 + $0x26c] ss:$16 sps:$4 sm:$0xff]  }
  0x6a   : > { %1602 = vmatpush1.bf16.msra.mxu0 %v2343_v25  ;;  %v2440_v25 = vld [vmem:[%s2593_s28 + $0x46c] ss:$16 sps:$4 sm:$0xff]  }
  0x6b   : > { %1643 = vmatpush1.bf16.msra.mxu1 %v2346_v26  ;;  %1603 = vmatprep.subr.bf16.mxu0 %v2351_v27  ;;  %v2435_v26 = vld [vmem:[%s2593_s28 + $0x268] ss:$16 sps:$4 sm:$0xff]   ;;  %v2443_v27 = vld [vmem:[%s2593_s28 + $0x28c] ss:$16 sps:$4 sm:$0xff]  }
  0x6c   : > { %1644 = vmatprep.subr.bf16.mxu1 %v2354_v28  ;;  %v2446_v28 = vld [vmem:[%s2593_s28 + $0x48c] ss:$16 sps:$4 sm:$0xff]  }
  0x6e   : > { %1604 = vmatpush1.bf16.msra.mxu0 %v2349_v29  ;;  %v2441_v29 = vld [vmem:[%s2593_s28 + $0x288] ss:$16 sps:$4 sm:$0xff]  }
  0x6f   : > { %1645 = vmatpush1.bf16.msra.mxu1 %v2352_v30  ;;  %1605 = vmatprep.subr.bf16.mxu0 %v2357_v31  ;;  %v2444_v30 = vld [vmem:[%s2593_s28 + $0x488] ss:$16 sps:$4 sm:$0xff]   ;;  %v2449_v31 = vld [vmem:[%s2593_s28 + $0x2ac] ss:$16 sps:$4 sm:$0xff]  }
  0x70   : > { %1646 = vmatprep.subr.bf16.mxu1 %v2360_v32  ;;  %v2452_v32 = vld [vmem:[%s2593_s28 + $0x4ac] ss:$16 sps:$4 sm:$0xff]  }
  0x72   : > { %1606 = vmatpush1.bf16.msra.mxu0 %v2355_v34  ;;  %v2450_v34 = vld [vmem:[%s2593_s28 + $0x4a8] ss:$16 sps:$4 sm:$0xff]  }
  0x73   : > { %1647 = vmatpush1.bf16.msra.mxu1 %v2358_v36  ;;  %1607 = vmatprep.subr.bf16.mxu0 %v2363_v37  ;;  %v2458_v36 = vld [vmem:[%s2593_s28 + $0x4cc] ss:$16 sps:$4 sm:$0xff]   ;;  %v2453_v37 = vld [vmem:[%s2593_s28 + $0x2c8] ss:$16 sps:$4 sm:$0xff]  }
  0x74   : > { %1648 = vmatprep.subr.bf16.mxu1 %v2366_v38  ;;  %v2456_v38 = vld [vmem:[%s2593_s28 + $0x4c8] ss:$16 sps:$4 sm:$0xff]  }
  0x76   : > { %1608 = vmatpush1.bf16.msra.mxu0 %v2361_v39  ;;  %v2461_v39 = vld [vmem:[%s2593_s28 + $0x2ec] ss:$16 sps:$4 sm:$0xff]  }
  0x77   : > { %1649 = vmatpush1.bf16.msra.mxu1 %v2364_v40  ;;  %1609 = vmatprep.subr.bf16.mxu0 %v2369_v41  ;;  %v2464_v40 = vld [vmem:[%s2593_s28 + $0x4ec] ss:$16 sps:$4 sm:$0xff]   ;;  %v2459_v41 = vld [vmem:[%s2593_s28 + $0x2e8] ss:$16 sps:$4 sm:$0xff]  }
  0x78   : > { %1650 = vmatprep.subr.bf16.mxu1 %v2372_v42  ;;  %v2462_v42 = vld [vmem:[%s2593_s28 + $0x4e8] ss:$16 sps:$4 sm:$0xff]  }
  0x7a   : > { %1610 = vmatpush1.bf16.msra.mxu0 %v2367_v43  ;;  %v2467_v43 = vld [vmem:[%s2593_s28 + $0x30c] ss:$16 sps:$4 sm:$0xff]  }
  0x7b   : > { %1651 = vmatpush1.bf16.msra.mxu1 %v2370_v44  ;;  %1611 = vmatprep.subr.bf16.mxu0 %v2375_v45  ;;  %v2470_v44 = vld [vmem:[%s2593_s28 + $0x50c] ss:$16 sps:$4 sm:$0xff]   ;;  %v2465_v45 = vld [vmem:[%s2593_s28 + $0x308] ss:$16 sps:$4 sm:$0xff]  }
  0x7c   : > { %1652 = vmatprep.subr.bf16.mxu1 %v2378_v46  ;;  %v2468_v46 = vld [vmem:[%s2593_s28 + $0x508] ss:$16 sps:$4 sm:$0xff]  }
  0x7e   : > { %1612 = vmatpush1.bf16.msra.mxu0 %v2373_v47  ;;  %v2473_v47 = vld [vmem:[%s2593_s28 + $0x32c] ss:$16 sps:$4 sm:$0xff]  }
  0x7f   : > { %1653 = vmatpush1.bf16.msra.mxu1 %v2376_v48  ;;  %1613 = vmatprep.subr.bf16.mxu0 %v2381_v49  ;;  %v2476_v48 = vld [vmem:[%s2593_s28 + $0x52c] ss:$16 sps:$4 sm:$0xff]   ;;  %v2471_v49 = vld [vmem:[%s2593_s28 + $0x328] ss:$16 sps:$4 sm:$0xff]  }
  0x80   : > { %1654 = vmatprep.subr.bf16.mxu1 %v2384_v50  ;;  %v2474_v50 = vld [vmem:[%s2593_s28 + $0x528] ss:$16 sps:$4 sm:$0xff]  }
  0x82   : > { %1614 = vmatpush1.bf16.msra.mxu0 %v2379_v51  ;;  %v2479_v51 = vld [vmem:[%s2593_s28 + $0x34c] ss:$16 sps:$4 sm:$0xff]  }
  0x83   : > { %1655 = vmatpush1.bf16.msra.mxu1 %v2382_v53  ;;  %1615 = vmatprep.subr.bf16.mxu0 %v2387_v54  ;;  %v2482_v53 = vld [vmem:[%s2593_s28 + $0x54c] ss:$16 sps:$4 sm:$0xff]   ;;  %v2477_v54 = vld [vmem:[%s2593_s28 + $0x348] ss:$16 sps:$4 sm:$0xff]  }
  0x84   : > { %1656 = vmatprep.subr.bf16.mxu1 %v2390_v55  ;;  %v2480_v55 = vld [vmem:[%s2593_s28 + $0x548] ss:$16 sps:$4 sm:$0xff]  }
  0x86   : > { %1616 = vmatpush1.bf16.msra.mxu0 %v2385_v56  ;;  %v2485_v56 = vld [vmem:[%s2593_s28 + $0x36c] ss:$16 sps:$4 sm:$0xff]  }
  0x87   : > { %1657 = vmatpush1.bf16.msra.mxu1 %v2388_v57  ;;  %1617 = vmatprep.subr.bf16.mxu0 %v2393_v58  ;;  %v2488_v57 = vld [vmem:[%s2593_s28 + $0x56c] ss:$16 sps:$4 sm:$0xff]   ;;  %v2483_v58 = vld [vmem:[%s2593_s28 + $0x368] ss:$16 sps:$4 sm:$0xff]  }
  0x88   : > { %1658 = vmatprep.subr.bf16.mxu1 %v2396_v59  ;;  %v2486_v59 = vld [vmem:[%s2593_s28 + $0x568] ss:$16 sps:$4 sm:$0xff]  }
  0x8a   : > { %1618 = vmatpush1.bf16.msra.mxu0 %v2391_v60  ;;  %v2491_v60 = vld [vmem:[%s2593_s28 + $0x38c] ss:$16 sps:$4 sm:$0xff]  }
  0x8b   : > { %1659 = vmatpush1.bf16.msra.mxu1 %v2394_v61  ;;  %1619 = vmatprep.subr.bf16.mxu0 %v2399_v62  ;;  %v2494_v61 = vld [vmem:[%s2593_s28 + $0x58c] ss:$16 sps:$4 sm:$0xff]   ;;  %v2489_v62 = vld [vmem:[%s2593_s28 + $0x388] ss:$16 sps:$4 sm:$0xff]  }
  0x8c   : > { %1660 = vmatprep.subr.bf16.mxu1 %v2402_v63  ;;  %v2492_v63 = vld [vmem:[%s2593_s28 + $0x588] ss:$16 sps:$4 sm:$0xff]  }
  0x8e   : > { %1620 = vmatpush1.bf16.msra.mxu0 %v2397_v0  ;;  %v2497_v0 = vld [vmem:[%s2593_s28 + $0x3ac] ss:$16 sps:$4 sm:$0xff]  }
  0x8f   : > { %1661 = vmatpush1.bf16.msra.mxu1 %v2400_v1  ;;  %1621 = vmatprep.subr.bf16.mxu0 %v2405_v2  ;;  %v2500_v1 = vld [vmem:[%s2593_s28 + $0x5ac] ss:$16 sps:$4 sm:$0xff]   ;;  %v2495_v2 = vld [vmem:[%s2593_s28 + $0x3a8] ss:$16 sps:$4 sm:$0xff]  }
  0x90   : > { %1662 = vmatprep.subr.bf16.mxu1 %v2408_v3  ;;  %v2498_v3 = vld [vmem:[%s2593_s28 + $0x5a8] ss:$16 sps:$4 sm:$0xff]  }
  0x92   : > { %1622 = vmatpush1.bf16.msra.mxu0 %v2403_v4  ;;  %v2503_v4 = vld [vmem:[%s2593_s28 + $0x3cc] ss:$16 sps:$4 sm:$0xff]  }
  0x93   : > { %1663 = vmatpush1.bf16.msra.mxu1 %v2406_v5  ;;  %1623 = vmatprep.subr.bf16.mxu0 %v2411_v6  ;;  %v2506_v5 = vld [vmem:[%s2593_s28 + $0x5cc] ss:$16 sps:$4 sm:$0xff]   ;;  %v2501_v6 = vld [vmem:[%s2593_s28 + $0x3c8] ss:$16 sps:$4 sm:$0xff]  }
  0x94   : > { %1664 = vmatprep.subr.bf16.mxu1 %v2414_v9  ;;  %v2504_v9 = vld [vmem:[%s2593_s28 + $0x5c8] ss:$16 sps:$4 sm:$0xff]  }
  0x96   : > { %1624 = vmatpush1.bf16.msra.mxu0 %v2409_v10  ;;  %v2509_v10 = vld [vmem:[%s2593_s28 + $0x3ec] ss:$16 sps:$4 sm:$0xff]  }
  0x97   : > { %1665 = vmatpush1.bf16.msra.mxu1 %v2412_v11  ;;  %1675 = vmatprep.subr.bf16.mxu0 %v2419_v12  ;;  %v2512_v11 = vld [vmem:[%s2593_s28 + $0x5ec] ss:$16 sps:$4 sm:$0xff]   ;;  %v2507_v12 = vld [vmem:[%s2593_s28 + $0x3e8] ss:$16 sps:$4 sm:$0xff]  }
  0x98   : > { %1716 = vmatprep.subr.bf16.mxu1 %v2422_v13  ;;  %v2510_v13 = vld [vmem:[%s2593_s28 + $0x5e8] ss:$16 sps:$4 sm:$0xff]  }
  0x99   : > { %1626 = vmatmul.mubr.bf16.vlgmr.msra.gmra.mrb[4].mxu0 %v2751_v14 }
  0x9a   : > { %1667 = vmatmul.mubr.bf16.vlgmr.msra.gmra.mrb[4].mxu1 %v2670_v7  ;;  %1676 = vmatpush1.bf16.msra.mxu0 %v2417_v15  ;;  %v2429_v7 = vld [vmem:[%s2593_s28 + $0x248] ss:$16 sps:$4 sm:$0xff]  }
  0x9b   : > { %1717 = vmatpush1.bf16.msra.mxu1 %v2420_v16  ;;  %1677 = vmatprep.subr.bf16.mxu0 %v2425_v17 }
  0x9c   : > { %1718 = vmatprep.subr.bf16.mxu1 %v2428_v18  ;;  %1707 = vmatprep.mubr.bf16.mxu0 %v2648_v52  ;;  %v2438_v52 = vld [vmem:[%s2593_s28 + $0x468] ss:$16 sps:$4 sm:$0xff]  }
  0x9d   : > { %1748 = vmatprep.mubr.bf16.mxu1 %v2707_v35  ;;  %v2455_v35 = vld [vmem:[%s2593_s28 + $0x2cc] ss:$16 sps:$4 sm:$0xff]  }
  0x9e   : > { %1678 = vmatpush1.bf16.msra.mxu0 %v2423_v19 }
  0x9f   : > { %1719 = vmatpush1.bf16.msra.mxu1 %v2426_v20  ;;  %1679 = vmatprep.subr.bf16.mxu0 %v2431_v21 }
  0xa0   : > { %1720 = vmatprep.subr.bf16.mxu1 %v2434_v22 }
  0xa2   : > { %1680 = vmatpush1.bf16.msra.mxu0 %v2429_v7 }
  0xa3   : > { %1721 = vmatpush1.bf16.msra.mxu1 %v2432_v23  ;;  %1681 = vmatprep.subr.bf16.mxu0 %v2437_v24  ;;  %v331_v24 = vld [vmem:[#allocation2] sm:$0xff] }
  0xa4   : > { %1722 = vmatprep.subr.bf16.mxu1 %v2440_v25 }
  0xa6   : > { %1682 = vmatpush1.bf16.msra.mxu0 %v2435_v26 }
  0xa7   : > { %1723 = vmatpush1.bf16.msra.mxu1 %v2438_v52  ;;  %1683 = vmatprep.subr.bf16.mxu0 %v2443_v27  ;;  %v332_v27 = vld [vmem:[#allocation2 + $0x8] sm:$0xff] }
  0xa8   : > { %1724 = vmatprep.subr.bf16.mxu1 %v2446_v28 }
  0xaa   : > { %1684 = vmatpush1.bf16.msra.mxu0 %v2441_v29 }
  0xab   : > { %1725 = vmatpush1.bf16.msra.mxu1 %v2444_v30  ;;  %1685 = vmatprep.subr.bf16.mxu0 %v2449_v31 }
  0xac   : > { %1726 = vmatprep.subr.bf16.mxu1 %v2452_v32 }
  0xae   : > { %1686 = vmatpush1.bf16.msra.mxu0 %v2447_v33 }
  0xaf   : > { %1727 = vmatpush1.bf16.msra.mxu1 %v2450_v34  ;;  %1687 = vmatprep.subr.bf16.mxu0 %v2455_v35 }
  0xb0   : > { %1728 = vmatprep.subr.bf16.mxu1 %v2458_v36 }
  0xb2   : > { %1688 = vmatpush1.bf16.msra.mxu0 %v2453_v37 }
  0xb3   : > { %1729 = vmatpush1.bf16.msra.mxu1 %v2456_v38  ;;  %1689 = vmatprep.subr.bf16.mxu0 %v2461_v39 }
  0xb4   : > { %1730 = vmatprep.subr.bf16.mxu1 %v2464_v40  ;;  %v333_v40 = vld [vmem:[#allocation2 + $0x10] sm:$0xff] }
  0xb6   : > { %1690 = vmatpush1.bf16.msra.mxu0 %v2459_v41 }
  0xb7   : > { %1731 = vmatpush1.bf16.msra.mxu1 %v2462_v42  ;;  %1691 = vmatprep.subr.bf16.mxu0 %v2467_v43 }
  0xb8   : > { %1732 = vmatprep.subr.bf16.mxu1 %v2470_v44 }
  0xba   : > { %1692 = vmatpush1.bf16.msra.mxu0 %v2465_v45  ;;  %v334_v45 = vld [vmem:[#allocation2 + $0x18] sm:$0xff] }
  0xbb   : > { %1733 = vmatpush1.bf16.msra.mxu1 %v2468_v46  ;;  %1693 = vmatprep.subr.bf16.mxu0 %v2473_v47 }
  0xbc   : > { %1734 = vmatprep.subr.bf16.mxu1 %v2476_v48 }
  0xbe   : > { %1694 = vmatpush1.bf16.msra.mxu0 %v2471_v49 }
  0xbf   : > { %1735 = vmatpush1.bf16.msra.mxu1 %v2474_v50  ;;  %1695 = vmatprep.subr.bf16.mxu0 %v2479_v51  ;;  %v1775_v51 = vlaneseq (!%p2184_p7) }
  0xc0   : > { %1736 = vmatprep.subr.bf16.mxu1 %v2482_v53 }
  0xc1   : > { %v1776_v53 = vshrl.u32 (!%p2184_p7), %v1775_v51, 7 }
  0xc2   : > { %1696 = vmatpush1.bf16.msra.mxu0 %v2477_v54  ;;  %v1773_v54 = vld [vmem:[%s2845_s2] sm:$0xf] (!%p2184_p7) }
  0xc3   : > { %1737 = vmatpush1.bf16.msra.mxu1 %v2480_v55  ;;  %1697 = vmatprep.subr.bf16.mxu0 %v2485_v56  ;;  %v1799_v55 = vld [vmem:[%s2846_s3] sm:$0xf] (!%p2184_p7)  ;;  %v1777_v56 = vsub.s32 (!%p2184_p7), 0, %v1776_v53 }
  0xc4   : > { %1738 = vmatprep.subr.bf16.mxu1 %v2488_v57  ;;  %v1781_v57 = vsub.s32 (!%p2184_p7), 1, %v1776_v53 }
  0xc6   : > { %1698 = vmatpush1.bf16.msra.mxu0 %v2483_v58  ;;  %v1785_v58 = vsub.s32 (!%p2184_p7), 2, %v1776_v53 }
  0xc7   : > { %1739 = vmatpush1.bf16.msra.mxu1 %v2486_v59  ;;  %1699 = vmatprep.subr.bf16.mxu0 %v2491_v60  ;;  %v1789_v59 = vsub.s32 (!%p2184_p7), 3, %v1776_v53 }
  0xc8   : > { %1740 = vmatprep.subr.bf16.mxu1 %v2494_v61 }
  0xca   : > { %1700 = vmatpush1.bf16.msra.mxu0 %v2489_v62  ;;  %v1778_v62 = vrot.slane (!%p2184_p7), %v1773_v54, %v1777_v56 }
  0xcb   : > { %1741 = vmatpush1.bf16.msra.mxu1 %v2492_v63  ;;  %1701 = vmatprep.subr.bf16.mxu0 %v2497_v0  ;;  %v1782_v63 = vrot.slane (!%p2184_p7), %v1773_v54, %v1781_v57  ;;  %v1804_v0 = vrot.slane (!%p2184_p7), %v1799_v55, %v1777_v56 }
  0xcc   : > { %1742 = vmatprep.subr.bf16.mxu1 %v2500_v1  ;;  %v1808_v1 = vrot.slane (!%p2184_p7), %v1799_v55, %v1781_v57 }
  0xce   : > { %1702 = vmatpush1.bf16.msra.mxu0 %v2495_v2 }
  0xcf   : > { %1743 = vmatpush1.bf16.msra.mxu1 %v2498_v3  ;;  %1703 = vmatprep.subr.bf16.mxu0 %v2503_v4  ;;  %v1786_v4 = vrot.slane (!%p2184_p7), %v1773_v54, %v1785_v58 }
  0xd0   : > { %1744 = vmatprep.subr.bf16.mxu1 %v2506_v5  ;;  %v1790_v5 = vrot.slane (!%p2184_p7), %v1773_v54, %v1789_v59 }
  0xd2   : > { %1704 = vmatpush1.bf16.msra.mxu0 %v2501_v6  ;;  %v1812_v6 = vrot.slane (!%p2184_p7), %v1799_v55, %v1785_v58 }
  0xd3   : > { %1745 = vmatpush1.bf16.msra.mxu1 %v2504_v9  ;;  %1705 = vmatprep.subr.bf16.mxu0 %v2509_v10  ;;  %v1816_v9 = vrot.slane (!%p2184_p7), %v1799_v55, %v1789_v59 }
  0xd4   : > { %1746 = vmatprep.subr.bf16.mxu1 %v2512_v11 }
  0xd6   : > { %1706 = vmatpush1.bf16.msra.mxu0 %v2507_v12 }
  0xd7   : > { %1747 = vmatpush1.bf16.msra.mxu1 %v2510_v13 }
  0xd9   : > { %1708 = vmatmul.mubr.bf16.vlgmr.msra.gmra.mrb[8].mxu0 %v2672_v8 }
  0xda   : > { %1749 = vmatmul.mubr.bf16.vlgmr.msra.gmra.mrb[8].mxu1 %v2751_v14 }
 0x12c   : > { %v1545_v15 = vpop.f32.mrb[0].mxu0 }
 0x12d   : > { %v1586_v16 = vpop.f32.mrb[0].mxu1  ;;  %v1547_v18 = vpop.f32.mrb[1].mxu0 }
 0x12e   : > { %v1587_v17 = vadd.f32 %v1586_v16, %v1545_v15  ;;  %v1588_v19 = vpop.f32.mrb[1].mxu1  ;;  %v1549_v21 = vpop.f32.mrb[2].mxu0 }
 0x12f   : > { %v1589_v20 = vadd.f32 %v1588_v19, %v1547_v18  ;;  %v1590_v22 = vpop.f32.mrb[2].mxu1  ;;  %v1550_v7 = vpop.f32.mrb[3].mxu0 }
 0x130   : > { %v1591_v23 = vpop.f32.mrb[3].mxu1 }
 0x16c   : > { %v1627_v25 = vpop.f32.mrb[4].mxu0 }
 0x16d   : > { %v1668_v26 = vpop.f32.mrb[4].mxu1  ;;  %v1628_v52 = vadd.f32 %v1627_v25, %v1587_v17  ;;  %v1629_v28 = vpop.f32.mrb[5].mxu0 }
 0x16e   : > { %v1670_v29 = vpop.f32.mrb[5].mxu1  ;;  %v1630_v8 = vadd.f32 %v1629_v28, %v1589_v20  ;;  %v1631_v30 = vpop.f32.mrb[6].mxu0 }
 0x16f   : > { %v1672_v14 = vpop.f32.mrb[6].mxu1  ;;  %v1757_v31 = vadd.f32 %v1628_v52, %v331_v24  ;;  %v1632_v32 = vpop.f32.mrb[7].mxu0 }
 0x170   : > { %v1673_v33 = vpop.f32.mrb[7].mxu1  ;;  %v1758_v34 = vadd.f32 %v1630_v8, %v332_v27 }
 0x171   : > { %1761 = vst [vmem:[#allocation2] sm:$0xff] %v1757_v31 }
 0x172   : > { %1762 = vst [vmem:[#allocation2 + $0x8] sm:$0xff] %v1758_v34 }
 0x178   : > { %v1769_v60 = vld [vmem:[#allocation2] sm:$0xff] (!%p2184_p7) }
 0x179   : > { %v1770_v61 = vld [vmem:[#allocation2 + $0x8] sm:$0xff] (!%p2184_p7)  ;;  %v1795_v10 = vmul.f32 (!%p2184_p7), %v1778_v62, %v1769_v60 }
 0x17a   : > { %v1796_v11 = vmul.f32 (!%p2184_p7), %v1782_v63, %v1770_v61 }
 0x17b   : > { %v1821_v15 = vadd.f32 (!%p2184_p7), %v1804_v0, %v1795_v10 }
 0x17c   : > { %v1822_v16 = vadd.f32 (!%p2184_p7), %v1808_v1, %v1796_v11 }
 0x17d   : > { %v1825_v19 = vmax.f32 (!%p2184_p7), %v1821_v15, 0.0 }
 0x17e   : > { %v1826_v20 = vmax.f32 (!%p2184_p7), %v1822_v16, 0.0 }
 0x180   : > { %v2192_v7 = vpack.c.bf16 (!%p2184_p7), %v1826_v20, %v1825_v19 }
 0x182   : > { %1845 = vst [vmem:[%s2847_s4] sm:$0xff] (!%p2184_p7), %v2192_v7 }
 0x1ac   : > { %v1709_v35 = vpop.f32.mrb[8].mxu0 }
 0x1ad   : > { %v1750_v36 = vpop.f32.mrb[8].mxu1  ;;  %v1710_v37 = vadd.f32 %v1709_v35, %v1668_v26  ;;  %v1711_v38 = vpop.f32.mrb[9].mxu0 }
 0x1ae   : > { %v1752_v39 = vpop.f32.mrb[9].mxu1  ;;  %v1712_v41 = vadd.f32 %v1711_v38, %v1670_v29  ;;  %v1713_v42 = vpop.f32.mrb[10].mxu0  ;;  %1768 = sbr.rel (%p2184_p7) target bundleno = 453 (0x1c5), region = 44 }
 0x1af   : > { %v1754_v43 = vpop.f32.mrb[10].mxu1  ;;  %v1751_v44 = vadd.f32 %v1750_v36, %v1710_v37  ;;  %v1714_v46 = vpop.f32.mrb[11].mxu0 }
 0x1b0   : > { %v1755_v47 = vpop.f32.mrb[11].mxu1  ;;  %v1753_v48 = vadd.f32 %v1752_v39, %v1712_v41 }
 0x1b1   : > { %v1759_v49 = vadd.f32 %v1751_v44, %v333_v40 }
 0x1b2   : > { %v1760_v50 = vadd.f32 %v1753_v48, %v334_v45 }
 0x1b3   : > { %1763 = vst [vmem:[#allocation2 + $0x10] sm:$0xff] %v1759_v49 }
 0x1b4   : > { %1764 = vst [vmem:[#allocation2 + $0x18] sm:$0xff] %v1760_v50 }
 0x1ba   : > { %v1771_v2 = vld [vmem:[#allocation2 + $0x10] sm:$0xff] }
 0x1bb   : > { %v1772_v3 = vld [vmem:[#allocation2 + $0x18] sm:$0xff]  ;;  %v1797_v12 = vmul.f32 %v1786_v4, %v1771_v2 }
 0x1bc   : > { %v1798_v13 = vmul.f32 %v1790_v5, %v1772_v3 }
 0x1bd   : > { %v1823_v17 = vadd.f32 %v1812_v6, %v1797_v12 }
 0x1be   : > { %v1824_v18 = vadd.f32 %v1816_v9, %v1798_v13 }
 0x1bf   : > { %v1827_v21 = vmax.f32 %v1823_v17, 0.0 }
 0x1c0   : > { %v1828_v22 = vmax.f32 %v1824_v18, 0.0 }
 0x1c2   : > { %v2193_v23 = vpack.c.bf16 %v1828_v22, %v1827_v21 }
 0x1c4   : > { %1846 = vst [vmem:[%s2847_s4 + $0x8] sm:$0xff] %v2193_v23 }
 0x1c5 PF: > { %s14_s17 = sadd.s32 1, %s2535_s17   ;;  %s2848_s15 = smov %s2531_s16 }
 0x1c6   : > { %p11_p8 = scmp.ge.s32.totalorder %s14_s17, 8   ;;  %s2849_s16 = smov %s2851_s18 }
 0x1c8   :  { %13 = sbr.rel (!%p11_p8) target bundleno = 2 (0x2), region = 83 }

</bundles_post_ra>
